<compile_context>
chip_gen: v5e
topology: v5e:2x2
jax: 0.10.0
libtpu: 0.0.40
codegen_flags: <defaults>
</compile_context>

<pallas_src>
import math

import jax
import jax.numpy as jnp
from jax.experimental import pallas as pl
from jax.experimental.pallas import tpu as pltpu

# ----------------------------- config ---------------------------------------
B = 2
C_IN = 3
IMG = 16
PATCH = 4
N_PATCH = (IMG // PATCH) ** 2          # 16
SEQ = N_PATCH + 1                      # 17 (CLS + patches)
D = 32                                 # hidden_dim (scaled down from 768)
HEADS = 4                              # scaled down from 12 / 8
HEAD_DIM = D // HEADS
ENC_LAYERS = 2
ENC_MLP = 64
DEC_LAYERS = 2
DEC_FF = 64
MEL_BINS = 8
FRAMES = 16
VIT_EPS = 1e-12
DEC_EPS = 1e-5
ATTN_SCALE = 1.0 / math.sqrt(HEAD_DIM)
PD = C_IN * PATCH * PATCH              # 48 patch-row features
Z_OUT = 128                            # lane-dense padded width for the z output
GELU_C = math.sqrt(2.0 / math.pi)

# Order in which packed parameters are passed to the fused kernel.
_PARAM_ORDER = (
    "patch_w", "tok_bias",
    "enc_wq", "enc_bq", "enc_wk", "enc_bk", "enc_wv", "enc_bv", "enc_wo", "enc_bo",
    "enc_ln1_g", "enc_ln1_b", "enc_ln2_g", "enc_ln2_b",
    "enc_fc1_w", "enc_fc1_b", "enc_fc2_w", "enc_fc2_b",
    "enc_lnf_g", "enc_lnf_b",
    "p_trigger",
    "dec_sa_v_w", "dec_sa_v_b", "dec_sa_wo", "dec_sa_bo",
    "dec_ca_wq", "dec_ca_bq", "dec_ca_wk", "dec_ca_bk", "dec_ca_wv", "dec_ca_bv",
    "dec_ca_wo", "dec_ca_bo",
    "dec_ln1_g", "dec_ln1_b", "dec_ln2_g", "dec_ln2_b", "dec_ln3_g", "dec_ln3_b",
    "dec_fc1_w", "dec_fc1_b", "dec_fc2_w", "dec_fc2_b",
    "out_w", "out_b",
)


# ----------------------------- fused Pallas kernel ---------------------------


def _coordinator_kernel(*refs):
    n_params = len(_PARAM_ORDER)
    tok_ref = refs[0]                          # (1, SEQ, PD) patch rows (CLS row zero)
    prm = dict(zip(_PARAM_ORDER, refs[1:1 + n_params]))
    z_ref = refs[1 + n_params]                 # (1, 1, Z_OUT)
    mel_ref = refs[2 + n_params]               # (1, 1, MEL_BINS*FRAMES)

    f32, bf16 = jnp.float32, jnp.bfloat16

    def mm(a, w):
        # bf16 MXU matmul, f32 accumulation (weights are pre-cast bf16).
        return jnp.dot(a.astype(bf16), w, preferred_element_type=f32)

    def ln(x, g, b, eps):
        mu = jnp.mean(x, axis=-1, keepdims=True)
        d = x - mu
        var = jnp.mean(d * d, axis=-1, keepdims=True)
        return d * jax.lax.rsqrt(var + eps) * g + b

    def gelu_tanh(v):
        # TODO(synk): tanh-form GELU (documented approximation of nn.GELU's exact erf).
        return 0.5 * v * (1.0 + jnp.tanh(GELU_C * (v + 0.044715 * v * v * v)))

    def mha(xq_bf, xkv_bf, wq, bq, wk, bk, wv, bv, wo, bo, l):
        # Multi-head attention with heads on a leading (stacked-weight) axis:
        # no lane-offset slicing of packed QKV, no head concat, no VMEM scratch.
        # 1/sqrt(head_dim) is pre-folded into wq/bq.  Per-head output is projected
        # through that head's rows of Wo and summed.
        out = None
        for h in range(HEADS):
            qh = jnp.dot(xq_bf, wq[l, h], preferred_element_type=f32) + bq[l, h]
            kh = jnp.dot(xkv_bf, wk[l, h], preferred_element_type=f32) + bk[l, h]
            vh = jnp.dot(xkv_bf, wv[l, h], preferred_element_type=f32) + bv[l, h]
            s = jax.lax.dot_general(
                qh.astype(bf16), kh.astype(bf16),
                (((1,), (1,)), ((), ())), preferred_element_type=f32)   # (lq, lk)
            s = s - jnp.max(s, axis=-1, keepdims=True)
            p = jnp.exp(s)
            p = p * pl.reciprocal(jnp.sum(p, axis=-1, keepdims=True), approx=True)
            oh = jnp.dot(p.astype(bf16), vh.astype(bf16), preferred_element_type=f32)
            c = jnp.dot(oh.astype(bf16), wo[l, h], preferred_element_type=f32)
            out = c if out is None else out + c
        return out + bo[l]

    # ---------------- ViT encoder (pre-LN, GELU) ----------------
    # patch-embed + CLS token + positional embedding as one matmul + one add
    # (tok_bias folds cls/pos/patch-bias; the CLS token row is all-zero).
    x = mm(tok_ref[0], prm["patch_w"][...]) + prm["tok_bias"][...]          # (SEQ, D)

    for l in range(ENC_LAYERS):
        h1 = ln(x, prm["enc_ln1_g"][l], prm["enc_ln1_b"][l], VIT_EPS).astype(bf16)
        x = x + mha(h1, h1,
                    prm["enc_wq"], prm["enc_bq"], prm["enc_wk"], prm["enc_bk"],
                    prm["enc_wv"], prm["enc_bv"], prm["enc_wo"], prm["enc_bo"], l)
        h2 = ln(x, prm["enc_ln2_g"][l], prm["enc_ln2_b"][l], VIT_EPS)
        h2 = gelu_tanh(mm(h2, prm["enc_fc1_w"][l]) + prm["enc_fc1_b"][l])
        x = x + mm(h2, prm["enc_fc2_w"][l]) + prm["enc_fc2_b"][l]

    enc = ln(x, prm["enc_lnf_g"][...], prm["enc_lnf_b"][...], VIT_EPS)      # (SEQ, D)

    # ---------------- z = CLS token + p_trigger (lane-dense padded store) ----
    tgt = enc[0:1, :] + prm["p_trigger"][...]                               # (1, D)
    if Z_OUT > D:
        z_ref[0] = jnp.concatenate(
            [tgt, jnp.zeros((1, Z_OUT - D), f32)], axis=-1)
    else:
        z_ref[0] = tgt

    # ---------------- TransformerDecoder (post-LN, ReLU), tgt length == 1 ----
    enc_bf = enc.astype(bf16)          # hoisted: reused by every cross-attn layer
    for l in range(DEC_LAYERS):
        # self-attention degenerates exactly: softmax over a single key == 1,
        # so attn(tgt,tgt,tgt) == V(tgt); only the V and out projections remain.
        v = mm(tgt, prm["dec_sa_v_w"][l]) + prm["dec_sa_v_b"][l]
        sa = mm(v, prm["dec_sa_wo"][l]) + prm["dec_sa_bo"][l]
        tgt = ln(tgt + sa, prm["dec_ln1_g"][l], prm["dec_ln1_b"][l], DEC_EPS)
        # cross-attention over the encoder memory
        ca = mha(tgt.astype(bf16), enc_bf,
                 prm["dec_ca_wq"], prm["dec_ca_bq"], prm["dec_ca_wk"], prm["dec_ca_bk"],
                 prm["dec_ca_wv"], prm["dec_ca_bv"], prm["dec_ca_wo"], prm["dec_ca_bo"], l)
        tgt = ln(tgt + ca, prm["dec_ln2_g"][l], prm["dec_ln2_b"][l], DEC_EPS)
        # FFN (ReLU)
        ff = jnp.maximum(mm(tgt, prm["dec_fc1_w"][l]) + prm["dec_fc1_b"][l], 0.0)
        ff = mm(ff, prm["dec_fc2_w"][l]) + prm["dec_fc2_b"][l]
        tgt = ln(tgt + ff, prm["dec_ln3_g"][l], prm["dec_ln3_b"][l], DEC_EPS)

    # ---------------- mel head (lane-dense: last dim = 128) ----------------
    mel_ref[0] = mm(tgt, prm["out_w"][...]) + prm["out_b"][...]


# ----------------------------- wrapper ---------------------------------------


def _full_spec(shape):
    # Whole-array block, same block for every grid step -> loaded into VMEM once.
    nd = len(shape)

    def idx(i):
        return (0,) * nd

    return pl.BlockSpec(shape, idx)


@jax.jit
def coordinator_forward(x_nchw, params):
    b, c, hgt, wid = x_nchw.shape
    if (c, hgt, wid) != (C_IN, IMG, IMG):
        raise ValueError(f"expected input (b, {C_IN}, {IMG}, {IMG}), got {x_nchw.shape}")
    hp, wp = hgt // PATCH, wid // PATCH
    # NCHW -> patch rows (one XLA gather/transpose); everything downstream is one
    # Pallas launch.
    patches = (
        x_nchw.reshape(b, c, hp, PATCH, wp, PATCH)
        .transpose(0, 2, 4, 1, 3, 5)
        .reshape(b, hp * wp, PD)
    )
    # Zero "CLS" row per batch; its embedding (cls + pos) is injected via tok_bias.
    tokens = jnp.concatenate(
        [jnp.zeros((b, 1, PD), patches.dtype), patches], axis=1)        # (b, SEQ, PD)

    param_list = [params[k] for k in _PARAM_ORDER]
    in_specs = [pl.BlockSpec((1, SEQ, PD), lambda i: (i, 0, 0))] + [
        _full_spec(p.shape) for p in param_list
    ]
    out_specs = (
        pl.BlockSpec((1, 1, Z_OUT), lambda i: (i, 0, 0)),
        pl.BlockSpec((1, 1, MEL_BINS * FRAMES), lambda i: (i, 0, 0)),
    )

    z_pad, mel = pl.pallas_call(
        _coordinator_kernel,
        grid=(b,),
        in_specs=in_specs,
        out_specs=out_specs,
        out_shape=(
            jax.ShapeDtypeStruct((b, 1, Z_OUT), jnp.float32),
            jax.ShapeDtypeStruct((b, 1, MEL_BINS * FRAMES), jnp.float32),
        ),
        compiler_params=pltpu.CompilerParams(dimension_semantics=("parallel",)),
    )(tokens, *param_list)

    z_with_trigger = z_pad[:, 0, :D][None, :, :]           # (1, b, D), like .unsqueeze(0)
    mel_output = mel.reshape(b, 1, MEL_BINS, FRAMES)       # like .view(-1, 1, mel, frames)
    return z_with_trigger, mel_output


# ----------------------------- param init ------------------------------------


def _dense(key, fan_in, fan_out):
    w = 0.02 * jax.random.normal(key, (fan_in, fan_out), jnp.float32)
    b = jnp.zeros((fan_out,), jnp.float32)
    return w, b


def _attn_block(key):
    ks = jax.random.split(key, 4)
    wq, bq = _dense(ks[0], D, D)
    wk, bk = _dense(ks[1], D, D)
    wv, bv = _dense(ks[2], D, D)
    wo, bo = _dense(ks[3], D, D)
    return wq, bq, wk, bk, wv, bv, wo, bo


def _heads_in(w):    # (D, D) -> (HEADS, D, HEAD_DIM): column block of head h
    return w.reshape(D, HEADS, HEAD_DIM).transpose(1, 0, 2)


def _heads_bias(b):  # (D,) -> (HEADS, 1, HEAD_DIM)
    return b.reshape(HEADS, 1, HEAD_DIM)


def _heads_out(w):   # Wo (D, D) -> (HEADS, HEAD_DIM, D): row block of head h
    return w.reshape(HEADS, HEAD_DIM, D)


def init_params(key):
    # TODO(synk): pretrained `google/vit-base-patch16-224-in21k` weights replaced by
    # deterministic synthetic weights of the same structure (no checkpoint IO).
    keys = jax.random.split(key, 16)

    # encoder embeddings
    patch_w, patch_b = _dense(keys[0], PD, D)
    cls = 0.02 * jax.random.normal(keys[1], (1, D), jnp.float32)
    pos = 0.02 * jax.random.normal(keys[2], (SEQ, D), jnp.float32)
    # Fold CLS token, positional embedding and patch-embed bias into one additive
    # (SEQ, D) term (batch-independent).
    tok_bias = jnp.concatenate([cls + pos[0:1], patch_b[None, :] + pos[1:]], axis=0)

    def stack_bf(lst):
        return jnp.stack(lst).astype(jnp.bfloat16)

    def stack_f32(lst):
        return jnp.stack(lst).astype(jnp.float32)

    # encoder layers
    e = {k: [] for k in ("wq", "bq", "wk", "bk", "wv", "bv", "wo", "bo",
                         "fc1_w", "fc1_b", "fc2_w", "fc2_b")}
    for i in range(ENC_LAYERS):
        lk = jax.random.split(keys[3 + i], 3)
        wq, bq, wk, bk, wv, bv, wo, bo = _attn_block(lk[0])
        fc1_w, fc1_b = _dense(lk[1], D, ENC_MLP)
        fc2_w, fc2_b = _dense(lk[2], ENC_MLP, D)
        e["wq"].append(_heads_in(wq * ATTN_SCALE))       # fold 1/sqrt(head_dim)
        e["bq"].append(_heads_bias(bq * ATTN_SCALE))
        e["wk"].append(_heads_in(wk)); e["bk"].append(_heads_bias(bk))
        e["wv"].append(_heads_in(wv)); e["bv"].append(_heads_bias(bv))
        e["wo"].append(_heads_out(wo)); e["bo"].append(bo[None, :])
        e["fc1_w"].append(fc1_w); e["fc1_b"].append(fc1_b[None, :])
        e["fc2_w"].append(fc2_w); e["fc2_b"].append(fc2_b[None, :])

    # decoder layers
    d = {k: [] for k in ("sa_v_w", "sa_v_b", "sa_wo", "sa_bo",
                         "ca_wq", "ca_bq", "ca_wk", "ca_bk", "ca_wv", "ca_bv",
                         "ca_wo", "ca_bo", "fc1_w", "fc1_b", "fc2_w", "fc2_b")}
    for i in range(DEC_LAYERS):
        lk = jax.random.split(keys[8 + i], 4)
        wq, bq, wk, bk, wv, bv, wo, bo = _attn_block(lk[0])
        # tgt length == 1 => self-attn output == V projection; keep only Wv/Wo.
        d["sa_v_w"].append(wv); d["sa_v_b"].append(bv[None, :])
        d["sa_wo"].append(wo); d["sa_bo"].append(bo[None, :])
        wq, bq, wk, bk, wv, bv, wo, bo = _attn_block(lk[1])
        d["ca_wq"].append(_heads_in(wq * ATTN_SCALE))
        d["ca_bq"].append(_heads_bias(bq * ATTN_SCALE))
        d["ca_wk"].append(_heads_in(wk)); d["ca_bk"].append(_heads_bias(bk))
        d["ca_wv"].append(_heads_in(wv)); d["ca_bv"].append(_heads_bias(bv))
        d["ca_wo"].append(_heads_out(wo)); d["ca_bo"].append(bo[None, :])
        fc1_w, fc1_b = _dense(lk[2], D, DEC_FF)
        fc2_w, fc2_b = _dense(lk[3], DEC_FF, D)
        d["fc1_w"].append(fc1_w); d["fc1_b"].append(fc1_b[None, :])
        d["fc2_w"].append(fc2_w); d["fc2_b"].append(fc2_b[None, :])

    p_trigger = jax.random.normal(keys[12], (1, D), jnp.float32)
    out_w, out_b = _dense(keys[13], D, MEL_BINS * FRAMES)

    def ones_ln(n):
        return jnp.ones((n, 1, D), jnp.float32)

    def zeros_ln(n):
        return jnp.zeros((n, 1, D), jnp.float32)

    params = {
        "patch_w": patch_w.astype(jnp.bfloat16),
        "tok_bias": tok_bias,
        "enc_wq": stack_bf(e["wq"]), "enc_bq": stack_f32(e["bq"]),
        "enc_wk": stack_bf(e["wk"]), "enc_bk": stack_f32(e["bk"]),
        "enc_wv": stack_bf(e["wv"]), "enc_bv": stack_f32(e["bv"]),
        "enc_wo": stack_bf(e["wo"]), "enc_bo": stack_f32(e["bo"]),
        "enc_ln1_g": ones_ln(ENC_LAYERS), "enc_ln1_b": zeros_ln(ENC_LAYERS),
        "enc_ln2_g": ones_ln(ENC_LAYERS), "enc_ln2_b": zeros_ln(ENC_LAYERS),
        "enc_fc1_w": stack_bf(e["fc1_w"]), "enc_fc1_b": stack_f32(e["fc1_b"]),
        "enc_fc2_w": stack_bf(e["fc2_w"]), "enc_fc2_b": stack_f32(e["fc2_b"]),
        "enc_lnf_g": jnp.ones((1, D), jnp.float32),
        "enc_lnf_b": jnp.zeros((1, D), jnp.float32),
        "p_trigger": p_trigger,
        "dec_sa_v_w": stack_bf(d["sa_v_w"]), "dec_sa_v_b": stack_f32(d["sa_v_b"]),
        "dec_sa_wo": stack_bf(d["sa_wo"]), "dec_sa_bo": stack_f32(d["sa_bo"]),
        "dec_ca_wq": stack_bf(d["ca_wq"]), "dec_ca_bq": stack_f32(d["ca_bq"]),
        "dec_ca_wk": stack_bf(d["ca_wk"]), "dec_ca_bk": stack_f32(d["ca_bk"]),
        "dec_ca_wv": stack_bf(d["ca_wv"]), "dec_ca_bv": stack_f32(d["ca_bv"]),
        "dec_ca_wo": stack_bf(d["ca_wo"]), "dec_ca_bo": stack_f32(d["ca_bo"]),
        "dec_ln1_g": ones_ln(DEC_LAYERS), "dec_ln1_b": zeros_ln(DEC_LAYERS),
        "dec_ln2_g": ones_ln(DEC_LAYERS), "dec_ln2_b": zeros_ln(DEC_LAYERS),
        "dec_ln3_g": ones_ln(DEC_LAYERS), "dec_ln3_b": zeros_ln(DEC_LAYERS),
        "dec_fc1_w": stack_bf(d["fc1_w"]), "dec_fc1_b": stack_f32(d["fc1_b"]),
        "dec_fc2_w": stack_bf(d["fc2_w"]), "dec_fc2_b": stack_f32(d["fc2_b"]),
        "out_w": out_w.astype(jnp.bfloat16),
        "out_b": out_b[None, :],
    }
    assert set(params) == set(_PARAM_ORDER)
    return params


# ----------------------------- main -------------------------------------------

if __name__ == "__main__":
    key = jax.random.PRNGKey(0)
    k_param, k_x = jax.random.split(key)
    params = init_params(k_param)

    x = jax.random.normal(k_x, (B, C_IN, IMG, IMG), jnp.float32)   # NCHW, like PyTorch

    z_with_trigger, mel_output = coordinator_forward(x, params)
    jax.block_until_ready((z_with_trigger, mel_output))

    assert z_with_trigger.shape == (1, B, D)
    assert mel_output.shape == (B, 1, MEL_BINS, FRAMES)
    print("KERNEL_OK")
</pallas_src>

<mosaic_0001>
module attributes {stable_mosaic.version = 11 : i64} {
  func.func @_coordinator_kernel(%arg0: i32, %arg1: memref<1x17x48xf32, #tpu.memory_space<vmem>>, %arg2: memref<48x32xbf16, #tpu.memory_space<vmem>>, %arg3: memref<17x32xf32, #tpu.memory_space<vmem>>, %arg4: memref<2x4x32x8xbf16, #tpu.memory_space<vmem>>, %arg5: memref<2x4x1x8xf32, #tpu.memory_space<vmem>>, %arg6: memref<2x4x32x8xbf16, #tpu.memory_space<vmem>>, %arg7: memref<2x4x1x8xf32, #tpu.memory_space<vmem>>, %arg8: memref<2x4x32x8xbf16, #tpu.memory_space<vmem>>, %arg9: memref<2x4x1x8xf32, #tpu.memory_space<vmem>>, %arg10: memref<2x4x8x32xbf16, #tpu.memory_space<vmem>>, %arg11: memref<2x1x32xf32, #tpu.memory_space<vmem>>, %arg12: memref<2x1x32xf32, #tpu.memory_space<vmem>>, %arg13: memref<2x1x32xf32, #tpu.memory_space<vmem>>, %arg14: memref<2x1x32xf32, #tpu.memory_space<vmem>>, %arg15: memref<2x1x32xf32, #tpu.memory_space<vmem>>, %arg16: memref<2x32x64xbf16, #tpu.memory_space<vmem>>, %arg17: memref<2x1x64xf32, #tpu.memory_space<vmem>>, %arg18: memref<2x64x32xbf16, #tpu.memory_space<vmem>>, %arg19: memref<2x1x32xf32, #tpu.memory_space<vmem>>, %arg20: memref<1x32xf32, #tpu.memory_space<vmem>>, %arg21: memref<1x32xf32, #tpu.memory_space<vmem>>, %arg22: memref<1x32xf32, #tpu.memory_space<vmem>>, %arg23: memref<2x32x32xbf16, #tpu.memory_space<vmem>>, %arg24: memref<2x1x32xf32, #tpu.memory_space<vmem>>, %arg25: memref<2x32x32xbf16, #tpu.memory_space<vmem>>, %arg26: memref<2x1x32xf32, #tpu.memory_space<vmem>>, %arg27: memref<2x4x32x8xbf16, #tpu.memory_space<vmem>>, %arg28: memref<2x4x1x8xf32, #tpu.memory_space<vmem>>, %arg29: memref<2x4x32x8xbf16, #tpu.memory_space<vmem>>, %arg30: memref<2x4x1x8xf32, #tpu.memory_space<vmem>>, %arg31: memref<2x4x32x8xbf16, #tpu.memory_space<vmem>>, %arg32: memref<2x4x1x8xf32, #tpu.memory_space<vmem>>, %arg33: memref<2x4x8x32xbf16, #tpu.memory_space<vmem>>, %arg34: memref<2x1x32xf32, #tpu.memory_space<vmem>>, %arg35: memref<2x1x32xf32, #tpu.memory_space<vmem>>, %arg36: memref<2x1x32xf32, #tpu.memory_space<vmem>>, %arg37: memref<2x1x32xf32, #tpu.memory_space<vmem>>, %arg38: memref<2x1x32xf32, #tpu.memory_space<vmem>>, %arg39: memref<2x1x32xf32, #tpu.memory_space<vmem>>, %arg40: memref<2x1x32xf32, #tpu.memory_space<vmem>>, %arg41: memref<2x32x64xbf16, #tpu.memory_space<vmem>>, %arg42: memref<2x1x64xf32, #tpu.memory_space<vmem>>, %arg43: memref<2x64x32xbf16, #tpu.memory_space<vmem>>, %arg44: memref<2x1x32xf32, #tpu.memory_space<vmem>>, %arg45: memref<32x128xbf16, #tpu.memory_space<vmem>>, %arg46: memref<1x128xf32, #tpu.memory_space<vmem>>, %arg47: memref<1x1x128xf32, #tpu.memory_space<vmem>>, %arg48: memref<1x1x128xf32, #tpu.memory_space<vmem>>) attributes {dimension_semantics = [#tpu.dimension_semantics<parallel>], iteration_bounds = array<i64: 2>, scalar_prefetch = 0 : i64, scratch_operands = 0 : i64, tpu.core_type = #tpu.core_type<tc>, window_params = [{transform_indices = @transform_0, window_bounds = array<i64: 1, 17, 48>}, {pipeline_mode = #tpu.pipeline_mode<synchronous>, transform_indices = @transform_1, window_bounds = array<i64: 48, 32>}, {pipeline_mode = #tpu.pipeline_mode<synchronous>, transform_indices = @transform_2, window_bounds = array<i64: 17, 32>}, {pipeline_mode = #tpu.pipeline_mode<synchronous>, transform_indices = @transform_3, window_bounds = array<i64: 2, 4, 32, 8>}, {pipeline_mode = #tpu.pipeline_mode<synchronous>, transform_indices = @transform_4, window_bounds = array<i64: 2, 4, 1, 8>}, {pipeline_mode = #tpu.pipeline_mode<synchronous>, transform_indices = @transform_5, window_bounds = array<i64: 2, 4, 32, 8>}, {pipeline_mode = #tpu.pipeline_mode<synchronous>, transform_indices = @transform_6, window_bounds = array<i64: 2, 4, 1, 8>}, {pipeline_mode = #tpu.pipeline_mode<synchronous>, transform_indices = @transform_7, window_bounds = array<i64: 2, 4, 32, 8>}, {pipeline_mode = #tpu.pipeline_mode<synchronous>, transform_indices = @transform_8, window_bounds = array<i64: 2, 4, 1, 8>}, {pipeline_mode = #tpu.pipeline_mode<synchronous>, transform_indices = @transform_9, window_bounds = array<i64: 2, 4, 8, 32>}, {pipeline_mode = #tpu.pipeline_mode<synchronous>, transform_indices = @transform_10, window_bounds = array<i64: 2, 1, 32>}, {pipeline_mode = #tpu.pipeline_mode<synchronous>, transform_indices = @transform_11, window_bounds = array<i64: 2, 1, 32>}, {pipeline_mode = #tpu.pipeline_mode<synchronous>, transform_indices = @transform_12, window_bounds = array<i64: 2, 1, 32>}, {pipeline_mode = #tpu.pipeline_mode<synchronous>, transform_indices = @transform_13, window_bounds = array<i64: 2, 1, 32>}, {pipeline_mode = #tpu.pipeline_mode<synchronous>, transform_indices = @transform_14, window_bounds = array<i64: 2, 1, 32>}, {pipeline_mode = #tpu.pipeline_mode<synchronous>, transform_indices = @transform_15, window_bounds = array<i64: 2, 32, 64>}, {pipeline_mode = #tpu.pipeline_mode<synchronous>, transform_indices = @transform_16, window_bounds = array<i64: 2, 1, 64>}, {pipeline_mode = #tpu.pipeline_mode<synchronous>, transform_indices = @transform_17, window_bounds = array<i64: 2, 64, 32>}, {pipeline_mode = #tpu.pipeline_mode<synchronous>, transform_indices = @transform_18, window_bounds = array<i64: 2, 1, 32>}, {pipeline_mode = #tpu.pipeline_mode<synchronous>, transform_indices = @transform_19, window_bounds = array<i64: 1, 32>}, {pipeline_mode = #tpu.pipeline_mode<synchronous>, transform_indices = @transform_20, window_bounds = array<i64: 1, 32>}, {pipeline_mode = #tpu.pipeline_mode<synchronous>, transform_indices = @transform_21, window_bounds = array<i64: 1, 32>}, {pipeline_mode = #tpu.pipeline_mode<synchronous>, transform_indices = @transform_22, window_bounds = array<i64: 2, 32, 32>}, {pipeline_mode = #tpu.pipeline_mode<synchronous>, transform_indices = @transform_23, window_bounds = array<i64: 2, 1, 32>}, {pipeline_mode = #tpu.pipeline_mode<synchronous>, transform_indices = @transform_24, window_bounds = array<i64: 2, 32, 32>}, {pipeline_mode = #tpu.pipeline_mode<synchronous>, transform_indices = @transform_25, window_bounds = array<i64: 2, 1, 32>}, {pipeline_mode = #tpu.pipeline_mode<synchronous>, transform_indices = @transform_26, window_bounds = array<i64: 2, 4, 32, 8>}, {pipeline_mode = #tpu.pipeline_mode<synchronous>, transform_indices = @transform_27, window_bounds = array<i64: 2, 4, 1, 8>}, {pipeline_mode = #tpu.pipeline_mode<synchronous>, transform_indices = @transform_28, window_bounds = array<i64: 2, 4, 32, 8>}, {pipeline_mode = #tpu.pipeline_mode<synchronous>, transform_indices = @transform_29, window_bounds = array<i64: 2, 4, 1, 8>}, {pipeline_mode = #tpu.pipeline_mode<synchronous>, transform_indices = @transform_30, window_bounds = array<i64: 2, 4, 32, 8>}, {pipeline_mode = #tpu.pipeline_mode<synchronous>, transform_indices = @transform_31, window_bounds = array<i64: 2, 4, 1, 8>}, {pipeline_mode = #tpu.pipeline_mode<synchronous>, transform_indices = @transform_32, window_bounds = array<i64: 2, 4, 8, 32>}, {pipeline_mode = #tpu.pipeline_mode<synchronous>, transform_indices = @transform_33, window_bounds = array<i64: 2, 1, 32>}, {pipeline_mode = #tpu.pipeline_mode<synchronous>, transform_indices = @transform_34, window_bounds = array<i64: 2, 1, 32>}, {pipeline_mode = #tpu.pipeline_mode<synchronous>, transform_indices = @transform_35, window_bounds = array<i64: 2, 1, 32>}, {pipeline_mode = #tpu.pipeline_mode<synchronous>, transform_indices = @transform_36, window_bounds = array<i64: 2, 1, 32>}, {pipeline_mode = #tpu.pipeline_mode<synchronous>, transform_indices = @transform_37, window_bounds = array<i64: 2, 1, 32>}, {pipeline_mode = #tpu.pipeline_mode<synchronous>, transform_indices = @transform_38, window_bounds = array<i64: 2, 1, 32>}, {pipeline_mode = #tpu.pipeline_mode<synchronous>, transform_indices = @transform_39, window_bounds = array<i64: 2, 1, 32>}, {pipeline_mode = #tpu.pipeline_mode<synchronous>, transform_indices = @transform_40, window_bounds = array<i64: 2, 32, 64>}, {pipeline_mode = #tpu.pipeline_mode<synchronous>, transform_indices = @transform_41, window_bounds = array<i64: 2, 1, 64>}, {pipeline_mode = #tpu.pipeline_mode<synchronous>, transform_indices = @transform_42, window_bounds = array<i64: 2, 64, 32>}, {pipeline_mode = #tpu.pipeline_mode<synchronous>, transform_indices = @transform_43, window_bounds = array<i64: 2, 1, 32>}, {pipeline_mode = #tpu.pipeline_mode<synchronous>, transform_indices = @transform_44, window_bounds = array<i64: 32, 128>}, {pipeline_mode = #tpu.pipeline_mode<synchronous>, transform_indices = @transform_45, window_bounds = array<i64: 1, 128>}, {transform_indices = @transform_46, window_bounds = array<i64: 1, 1, 128>}, {transform_indices = @transform_47, window_bounds = array<i64: 1, 1, 128>}]} {
    %c0 = arith.constant 0 : index
    %c0_0 = arith.constant 0 : index
    %c0_1 = arith.constant 0 : index
    %0 = vector.load %arg1[%c0, %c0_0, %c0_1] : memref<1x17x48xf32, #tpu.memory_space<vmem>>, vector<1x17x48xf32>
    %1 = vector.shape_cast %0 : vector<1x17x48xf32> to vector<17x48xf32>
    %c0_2 = arith.constant 0 : index
    %c0_3 = arith.constant 0 : index
    %2 = vector.load %arg2[%c0_2, %c0_3] : memref<48x32xbf16, #tpu.memory_space<vmem>>, vector<48x32xbf16>
    %3 = arith.truncf %1 : vector<17x48xf32> to vector<17x48xbf16>
    %cst = arith.constant dense<0.000000e+00> : vector<17x32xf32>
    %4 = tpu.matmul %3, %2, %cst {dimension_numbers = #tpu.dot_dimension_numbers<[1], [0], [0], [1], [0, 0, 1, 1], [], []>} : vector<17x48xbf16>, vector<48x32xbf16>, vector<17x32xf32> -> vector<17x32xf32>
    %c0_4 = arith.constant 0 : index
    %c0_5 = arith.constant 0 : index
    %5 = vector.load %arg3[%c0_4, %c0_5] : memref<17x32xf32, #tpu.memory_space<vmem>>, vector<17x32xf32>
    %6 = arith.addf %4, %5 : vector<17x32xf32>
    %c0_6 = arith.constant 0 : index
    %c0_7 = arith.constant 0 : index
    %c0_8 = arith.constant 0 : index
    %7 = vector.load %arg12[%c0_6, %c0_7, %c0_8] : memref<2x1x32xf32, #tpu.memory_space<vmem>>, vector<1x1x32xf32>
    %8 = vector.shape_cast %7 : vector<1x1x32xf32> to vector<1x32xf32>
    %c0_9 = arith.constant 0 : index
    %c0_10 = arith.constant 0 : index
    %c0_11 = arith.constant 0 : index
    %9 = vector.load %arg13[%c0_9, %c0_10, %c0_11] : memref<2x1x32xf32, #tpu.memory_space<vmem>>, vector<1x1x32xf32>
    %10 = vector.shape_cast %9 : vector<1x1x32xf32> to vector<1x32xf32>
    %cst_12 = arith.constant dense<0.000000e+00> : vector<17xf32>
    %11 = vector.multi_reduction <add>, %6, %cst_12 [1] : vector<17x32xf32> to vector<17xf32>
    %12 = vector.shape_cast %11 : vector<17xf32> to vector<17x1xf32>
    %cst_13 = arith.constant 3.200000e+01 : f32
    %13 = vector.broadcast %cst_13 : f32 to vector<17x1xf32>
    %14 = arith.divf %12, %13 : vector<17x1xf32>
    %15 = vector.broadcast %14 : vector<17x1xf32> to vector<17x32xf32>
    %16 = arith.subf %6, %15 : vector<17x32xf32>
    %17 = arith.mulf %16, %16 : vector<17x32xf32>
    %cst_14 = arith.constant dense<0.000000e+00> : vector<17xf32>
    %18 = vector.multi_reduction <add>, %17, %cst_14 [1] : vector<17x32xf32> to vector<17xf32>
    %19 = vector.shape_cast %18 : vector<17xf32> to vector<17x1xf32>
    %cst_15 = arith.constant 3.200000e+01 : f32
    %20 = vector.broadcast %cst_15 : f32 to vector<17x1xf32>
    %21 = arith.divf %19, %20 : vector<17x1xf32>
    %cst_16 = arith.constant 9.99999996E-13 : f32
    %22 = vector.broadcast %cst_16 : f32 to vector<17x1xf32>
    %23 = arith.addf %21, %22 : vector<17x1xf32>
    %24 = math.rsqrt %23 : vector<17x1xf32>
    %25 = vector.broadcast %24 : vector<17x1xf32> to vector<17x32xf32>
    %26 = arith.mulf %16, %25 : vector<17x32xf32>
    %27 = vector.broadcast %8 : vector<1x32xf32> to vector<17x32xf32>
    %28 = arith.mulf %26, %27 : vector<17x32xf32>
    %29 = vector.broadcast %10 : vector<1x32xf32> to vector<17x32xf32>
    %30 = arith.addf %28, %29 : vector<17x32xf32>
    %31 = arith.truncf %30 : vector<17x32xf32> to vector<17x32xbf16>
    %c0_17 = arith.constant 0 : index
    %c0_18 = arith.constant 0 : index
    %c0_19 = arith.constant 0 : index
    %c0_20 = arith.constant 0 : index
    %32 = vector.load %arg4[%c0_17, %c0_18, %c0_19, %c0_20] : memref<2x4x32x8xbf16, #tpu.memory_space<vmem>>, vector<1x1x32x8xbf16>
    %33 = vector.shape_cast %32 : vector<1x1x32x8xbf16> to vector<32x8xbf16>
    %cst_21 = arith.constant dense<0.000000e+00> : vector<17x8xf32>
    %34 = tpu.matmul %31, %33, %cst_21 {dimension_numbers = #tpu.dot_dimension_numbers<[1], [0], [0], [1], [0, 0, 1, 1], [], []>} : vector<17x32xbf16>, vector<32x8xbf16>, vector<17x8xf32> -> vector<17x8xf32>
    %c0_22 = arith.constant 0 : index
    %c0_23 = arith.constant 0 : index
    %c0_24 = arith.constant 0 : index
    %c0_25 = arith.constant 0 : index
    %35 = vector.load %arg5[%c0_22, %c0_23, %c0_24, %c0_25] : memref<2x4x1x8xf32, #tpu.memory_space<vmem>>, vector<1x1x1x8xf32>
    %36 = vector.shape_cast %35 : vector<1x1x1x8xf32> to vector<1x8xf32>
    %37 = vector.broadcast %36 : vector<1x8xf32> to vector<17x8xf32>
    %38 = arith.addf %34, %37 : vector<17x8xf32>
    %c0_26 = arith.constant 0 : index
    %c0_27 = arith.constant 0 : index
    %c0_28 = arith.constant 0 : index
    %c0_29 = arith.constant 0 : index
    %39 = vector.load %arg6[%c0_26, %c0_27, %c0_28, %c0_29] : memref<2x4x32x8xbf16, #tpu.memory_space<vmem>>, vector<1x1x32x8xbf16>
    %40 = vector.shape_cast %39 : vector<1x1x32x8xbf16> to vector<32x8xbf16>
    %cst_30 = arith.constant dense<0.000000e+00> : vector<17x8xf32>
    %41 = tpu.matmul %31, %40, %cst_30 {dimension_numbers = #tpu.dot_dimension_numbers<[1], [0], [0], [1], [0, 0, 1, 1], [], []>} : vector<17x32xbf16>, vector<32x8xbf16>, vector<17x8xf32> -> vector<17x8xf32>
    %c0_31 = arith.constant 0 : index
    %c0_32 = arith.constant 0 : index
    %c0_33 = arith.constant 0 : index
    %c0_34 = arith.constant 0 : index
    %42 = vector.load %arg7[%c0_31, %c0_32, %c0_33, %c0_34] : memref<2x4x1x8xf32, #tpu.memory_space<vmem>>, vector<1x1x1x8xf32>
    %43 = vector.shape_cast %42 : vector<1x1x1x8xf32> to vector<1x8xf32>
    %44 = vector.broadcast %43 : vector<1x8xf32> to vector<17x8xf32>
    %45 = arith.addf %41, %44 : vector<17x8xf32>
    %c0_35 = arith.constant 0 : index
    %c0_36 = arith.constant 0 : index
    %c0_37 = arith.constant 0 : index
    %c0_38 = arith.constant 0 : index
    %46 = vector.load %arg8[%c0_35, %c0_36, %c0_37, %c0_38] : memref<2x4x32x8xbf16, #tpu.memory_space<vmem>>, vector<1x1x32x8xbf16>
    %47 = vector.shape_cast %46 : vector<1x1x32x8xbf16> to vector<32x8xbf16>
    %cst_39 = arith.constant dense<0.000000e+00> : vector<17x8xf32>
    %48 = tpu.matmul %31, %47, %cst_39 {dimension_numbers = #tpu.dot_dimension_numbers<[1], [0], [0], [1], [0, 0, 1, 1], [], []>} : vector<17x32xbf16>, vector<32x8xbf16>, vector<17x8xf32> -> vector<17x8xf32>
    %c0_40 = arith.constant 0 : index
    %c0_41 = arith.constant 0 : index
    %c0_42 = arith.constant 0 : index
    %c0_43 = arith.constant 0 : index
    %49 = vector.load %arg9[%c0_40, %c0_41, %c0_42, %c0_43] : memref<2x4x1x8xf32, #tpu.memory_space<vmem>>, vector<1x1x1x8xf32>
    %50 = vector.shape_cast %49 : vector<1x1x1x8xf32> to vector<1x8xf32>
    %51 = vector.broadcast %50 : vector<1x8xf32> to vector<17x8xf32>
    %52 = arith.addf %48, %51 : vector<17x8xf32>
    %53 = arith.truncf %38 : vector<17x8xf32> to vector<17x8xbf16>
    %54 = arith.truncf %45 : vector<17x8xf32> to vector<17x8xbf16>
    %cst_44 = arith.constant dense<0.000000e+00> : vector<17x17xf32>
    %55 = tpu.matmul %53, %54, %cst_44 {dimension_numbers = #tpu.dot_dimension_numbers<[1], [1], [0], [0], [0, 0, 1, 0], [], []>} : vector<17x8xbf16>, vector<17x8xbf16>, vector<17x17xf32> -> vector<17x17xf32>
    %cst_45 = arith.constant dense<0xFF800000> : vector<17xf32>
    %56 = vector.multi_reduction <maximumf>, %55, %cst_45 [1] : vector<17x17xf32> to vector<17xf32>
    %57 = vector.shape_cast %56 : vector<17xf32> to vector<17x1xf32>
    %58 = vector.broadcast %57 : vector<17x1xf32> to vector<17x17xf32>
    %59 = arith.subf %55, %58 : vector<17x17xf32>
    %60 = math.exp %59 : vector<17x17xf32>
    %cst_46 = arith.constant dense<0.000000e+00> : vector<17xf32>
    %61 = vector.multi_reduction <add>, %60, %cst_46 [1] : vector<17x17xf32> to vector<17xf32>
    %62 = vector.shape_cast %61 : vector<17xf32> to vector<17x1xf32>
    %63 = tpu.reciprocal %62 {approx = true} : vector<17x1xf32> -> vector<17x1xf32>
    %64 = vector.broadcast %63 : vector<17x1xf32> to vector<17x17xf32>
    %65 = arith.mulf %60, %64 : vector<17x17xf32>
    %66 = arith.truncf %65 : vector<17x17xf32> to vector<17x17xbf16>
    %67 = arith.truncf %52 : vector<17x8xf32> to vector<17x8xbf16>
    %cst_47 = arith.constant dense<0.000000e+00> : vector<17x8xf32>
    %68 = tpu.matmul %66, %67, %cst_47 {dimension_numbers = #tpu.dot_dimension_numbers<[1], [0], [0], [1], [0, 0, 1, 1], [], []>} : vector<17x17xbf16>, vector<17x8xbf16>, vector<17x8xf32> -> vector<17x8xf32>
    %69 = arith.truncf %68 : vector<17x8xf32> to vector<17x8xbf16>
    %c0_48 = arith.constant 0 : index
    %c0_49 = arith.constant 0 : index
    %c0_50 = arith.constant 0 : index
    %c0_51 = arith.constant 0 : index
    %70 = vector.load %arg10[%c0_48, %c0_49, %c0_50, %c0_51] : memref<2x4x8x32xbf16, #tpu.memory_space<vmem>>, vector<1x1x8x32xbf16>
    %71 = vector.shape_cast %70 : vector<1x1x8x32xbf16> to vector<8x32xbf16>
    %cst_52 = arith.constant dense<0.000000e+00> : vector<17x32xf32>
    %72 = tpu.matmul %69, %71, %cst_52 {dimension_numbers = #tpu.dot_dimension_numbers<[1], [0], [0], [1], [0, 0, 1, 1], [], []>} : vector<17x8xbf16>, vector<8x32xbf16>, vector<17x32xf32> -> vector<17x32xf32>
    %c0_53 = arith.constant 0 : index
    %c1 = arith.constant 1 : index
    %c0_54 = arith.constant 0 : index
    %c0_55 = arith.constant 0 : index
    %73 = vector.load %arg4[%c0_53, %c1, %c0_54, %c0_55] : memref<2x4x32x8xbf16, #tpu.memory_space<vmem>>, vector<1x1x32x8xbf16>
    %74 = vector.shape_cast %73 : vector<1x1x32x8xbf16> to vector<32x8xbf16>
    %cst_56 = arith.constant dense<0.000000e+00> : vector<17x8xf32>
    %75 = tpu.matmul %31, %74, %cst_56 {dimension_numbers = #tpu.dot_dimension_numbers<[1], [0], [0], [1], [0, 0, 1, 1], [], []>} : vector<17x32xbf16>, vector<32x8xbf16>, vector<17x8xf32> -> vector<17x8xf32>
    %c0_57 = arith.constant 0 : index
    %c1_58 = arith.constant 1 : index
    %c0_59 = arith.constant 0 : index
    %c0_60 = arith.constant 0 : index
    %76 = vector.load %arg5[%c0_57, %c1_58, %c0_59, %c0_60] : memref<2x4x1x8xf32, #tpu.memory_space<vmem>>, vector<1x1x1x8xf32>
    %77 = vector.shape_cast %76 : vector<1x1x1x8xf32> to vector<1x8xf32>
    %78 = vector.broadcast %77 : vector<1x8xf32> to vector<17x8xf32>
    %79 = arith.addf %75, %78 : vector<17x8xf32>
    %c0_61 = arith.constant 0 : index
    %c1_62 = arith.constant 1 : index
    %c0_63 = arith.constant 0 : index
    %c0_64 = arith.constant 0 : index
    %80 = vector.load %arg6[%c0_61, %c1_62, %c0_63, %c0_64] : memref<2x4x32x8xbf16, #tpu.memory_space<vmem>>, vector<1x1x32x8xbf16>
    %81 = vector.shape_cast %80 : vector<1x1x32x8xbf16> to vector<32x8xbf16>
    %cst_65 = arith.constant dense<0.000000e+00> : vector<17x8xf32>
    %82 = tpu.matmul %31, %81, %cst_65 {dimension_numbers = #tpu.dot_dimension_numbers<[1], [0], [0], [1], [0, 0, 1, 1], [], []>} : vector<17x32xbf16>, vector<32x8xbf16>, vector<17x8xf32> -> vector<17x8xf32>
    %c0_66 = arith.constant 0 : index
    %c1_67 = arith.constant 1 : index
    %c0_68 = arith.constant 0 : index
    %c0_69 = arith.constant 0 : index
    %83 = vector.load %arg7[%c0_66, %c1_67, %c0_68, %c0_69] : memref<2x4x1x8xf32, #tpu.memory_space<vmem>>, vector<1x1x1x8xf32>
    %84 = vector.shape_cast %83 : vector<1x1x1x8xf32> to vector<1x8xf32>
    %85 = vector.broadcast %84 : vector<1x8xf32> to vector<17x8xf32>
    %86 = arith.addf %82, %85 : vector<17x8xf32>
    %c0_70 = arith.constant 0 : index
    %c1_71 = arith.constant 1 : index
    %c0_72 = arith.constant 0 : index
    %c0_73 = arith.constant 0 : index
    %87 = vector.load %arg8[%c0_70, %c1_71, %c0_72, %c0_73] : memref<2x4x32x8xbf16, #tpu.memory_space<vmem>>, vector<1x1x32x8xbf16>
    %88 = vector.shape_cast %87 : vector<1x1x32x8xbf16> to vector<32x8xbf16>
    %cst_74 = arith.constant dense<0.000000e+00> : vector<17x8xf32>
    %89 = tpu.matmul %31, %88, %cst_74 {dimension_numbers = #tpu.dot_dimension_numbers<[1], [0], [0], [1], [0, 0, 1, 1], [], []>} : vector<17x32xbf16>, vector<32x8xbf16>, vector<17x8xf32> -> vector<17x8xf32>
    %c0_75 = arith.constant 0 : index
    %c1_76 = arith.constant 1 : index
    %c0_77 = arith.constant 0 : index
    %c0_78 = arith.constant 0 : index
    %90 = vector.load %arg9[%c0_75, %c1_76, %c0_77, %c0_78] : memref<2x4x1x8xf32, #tpu.memory_space<vmem>>, vector<1x1x1x8xf32>
    %91 = vector.shape_cast %90 : vector<1x1x1x8xf32> to vector<1x8xf32>
    %92 = vector.broadcast %91 : vector<1x8xf32> to vector<17x8xf32>
    %93 = arith.addf %89, %92 : vector<17x8xf32>
    %94 = arith.truncf %79 : vector<17x8xf32> to vector<17x8xbf16>
    %95 = arith.truncf %86 : vector<17x8xf32> to vector<17x8xbf16>
    %cst_79 = arith.constant dense<0.000000e+00> : vector<17x17xf32>
    %96 = tpu.matmul %94, %95, %cst_79 {dimension_numbers = #tpu.dot_dimension_numbers<[1], [1], [0], [0], [0, 0, 1, 0], [], []>} : vector<17x8xbf16>, vector<17x8xbf16>, vector<17x17xf32> -> vector<17x17xf32>
    %cst_80 = arith.constant dense<0xFF800000> : vector<17xf32>
    %97 = vector.multi_reduction <maximumf>, %96, %cst_80 [1] : vector<17x17xf32> to vector<17xf32>
    %98 = vector.shape_cast %97 : vector<17xf32> to vector<17x1xf32>
    %99 = vector.broadcast %98 : vector<17x1xf32> to vector<17x17xf32>
    %100 = arith.subf %96, %99 : vector<17x17xf32>
    %101 = math.exp %100 : vector<17x17xf32>
    %cst_81 = arith.constant dense<0.000000e+00> : vector<17xf32>
    %102 = vector.multi_reduction <add>, %101, %cst_81 [1] : vector<17x17xf32> to vector<17xf32>
    %103 = vector.shape_cast %102 : vector<17xf32> to vector<17x1xf32>
    %104 = tpu.reciprocal %103 {approx = true} : vector<17x1xf32> -> vector<17x1xf32>
    %105 = vector.broadcast %104 : vector<17x1xf32> to vector<17x17xf32>
    %106 = arith.mulf %101, %105 : vector<17x17xf32>
    %107 = arith.truncf %106 : vector<17x17xf32> to vector<17x17xbf16>
    %108 = arith.truncf %93 : vector<17x8xf32> to vector<17x8xbf16>
    %cst_82 = arith.constant dense<0.000000e+00> : vector<17x8xf32>
    %109 = tpu.matmul %107, %108, %cst_82 {dimension_numbers = #tpu.dot_dimension_numbers<[1], [0], [0], [1], [0, 0, 1, 1], [], []>} : vector<17x17xbf16>, vector<17x8xbf16>, vector<17x8xf32> -> vector<17x8xf32>
    %110 = arith.truncf %109 : vector<17x8xf32> to vector<17x8xbf16>
    %c0_83 = arith.constant 0 : index
    %c1_84 = arith.constant 1 : index
    %c0_85 = arith.constant 0 : index
    %c0_86 = arith.constant 0 : index
    %111 = vector.load %arg10[%c0_83, %c1_84, %c0_85, %c0_86] : memref<2x4x8x32xbf16, #tpu.memory_space<vmem>>, vector<1x1x8x32xbf16>
    %112 = vector.shape_cast %111 : vector<1x1x8x32xbf16> to vector<8x32xbf16>
    %cst_87 = arith.constant dense<0.000000e+00> : vector<17x32xf32>
    %113 = tpu.matmul %110, %112, %cst_87 {dimension_numbers = #tpu.dot_dimension_numbers<[1], [0], [0], [1], [0, 0, 1, 1], [], []>} : vector<17x8xbf16>, vector<8x32xbf16>, vector<17x32xf32> -> vector<17x32xf32>
    %114 = arith.addf %72, %113 : vector<17x32xf32>
    %c0_88 = arith.constant 0 : index
    %c2 = arith.constant 2 : index
    %c0_89 = arith.constant 0 : index
    %c0_90 = arith.constant 0 : index
    %115 = vector.load %arg4[%c0_88, %c2, %c0_89, %c0_90] : memref<2x4x32x8xbf16, #tpu.memory_space<vmem>>, vector<1x1x32x8xbf16>
    %116 = vector.shape_cast %115 : vector<1x1x32x8xbf16> to vector<32x8xbf16>
    %cst_91 = arith.constant dense<0.000000e+00> : vector<17x8xf32>
    %117 = tpu.matmul %31, %116, %cst_91 {dimension_numbers = #tpu.dot_dimension_numbers<[1], [0], [0], [1], [0, 0, 1, 1], [], []>} : vector<17x32xbf16>, vector<32x8xbf16>, vector<17x8xf32> -> vector<17x8xf32>
    %c0_92 = arith.constant 0 : index
    %c2_93 = arith.constant 2 : index
    %c0_94 = arith.constant 0 : index
    %c0_95 = arith.constant 0 : index
    %118 = vector.load %arg5[%c0_92, %c2_93, %c0_94, %c0_95] : memref<2x4x1x8xf32, #tpu.memory_space<vmem>>, vector<1x1x1x8xf32>
    %119 = vector.shape_cast %118 : vector<1x1x1x8xf32> to vector<1x8xf32>
    %120 = vector.broadcast %119 : vector<1x8xf32> to vector<17x8xf32>
    %121 = arith.addf %117, %120 : vector<17x8xf32>
    %c0_96 = arith.constant 0 : index
    %c2_97 = arith.constant 2 : index
    %c0_98 = arith.constant 0 : index
    %c0_99 = arith.constant 0 : index
    %122 = vector.load %arg6[%c0_96, %c2_97, %c0_98, %c0_99] : memref<2x4x32x8xbf16, #tpu.memory_space<vmem>>, vector<1x1x32x8xbf16>
    %123 = vector.shape_cast %122 : vector<1x1x32x8xbf16> to vector<32x8xbf16>
    %cst_100 = arith.constant dense<0.000000e+00> : vector<17x8xf32>
    %124 = tpu.matmul %31, %123, %cst_100 {dimension_numbers = #tpu.dot_dimension_numbers<[1], [0], [0], [1], [0, 0, 1, 1], [], []>} : vector<17x32xbf16>, vector<32x8xbf16>, vector<17x8xf32> -> vector<17x8xf32>
    %c0_101 = arith.constant 0 : index
    %c2_102 = arith.constant 2 : index
    %c0_103 = arith.constant 0 : index
    %c0_104 = arith.constant 0 : index
    %125 = vector.load %arg7[%c0_101, %c2_102, %c0_103, %c0_104] : memref<2x4x1x8xf32, #tpu.memory_space<vmem>>, vector<1x1x1x8xf32>
    %126 = vector.shape_cast %125 : vector<1x1x1x8xf32> to vector<1x8xf32>
    %127 = vector.broadcast %126 : vector<1x8xf32> to vector<17x8xf32>
    %128 = arith.addf %124, %127 : vector<17x8xf32>
    %c0_105 = arith.constant 0 : index
    %c2_106 = arith.constant 2 : index
    %c0_107 = arith.constant 0 : index
    %c0_108 = arith.constant 0 : index
    %129 = vector.load %arg8[%c0_105, %c2_106, %c0_107, %c0_108] : memref<2x4x32x8xbf16, #tpu.memory_space<vmem>>, vector<1x1x32x8xbf16>
    %130 = vector.shape_cast %129 : vector<1x1x32x8xbf16> to vector<32x8xbf16>
    %cst_109 = arith.constant dense<0.000000e+00> : vector<17x8xf32>
    %131 = tpu.matmul %31, %130, %cst_109 {dimension_numbers = #tpu.dot_dimension_numbers<[1], [0], [0], [1], [0, 0, 1, 1], [], []>} : vector<17x32xbf16>, vector<32x8xbf16>, vector<17x8xf32> -> vector<17x8xf32>
    %c0_110 = arith.constant 0 : index
    %c2_111 = arith.constant 2 : index
    %c0_112 = arith.constant 0 : index
    %c0_113 = arith.constant 0 : index
    %132 = vector.load %arg9[%c0_110, %c2_111, %c0_112, %c0_113] : memref<2x4x1x8xf32, #tpu.memory_space<vmem>>, vector<1x1x1x8xf32>
    %133 = vector.shape_cast %132 : vector<1x1x1x8xf32> to vector<1x8xf32>
    %134 = vector.broadcast %133 : vector<1x8xf32> to vector<17x8xf32>
    %135 = arith.addf %131, %134 : vector<17x8xf32>
    %136 = arith.truncf %121 : vector<17x8xf32> to vector<17x8xbf16>
    %137 = arith.truncf %128 : vector<17x8xf32> to vector<17x8xbf16>
    %cst_114 = arith.constant dense<0.000000e+00> : vector<17x17xf32>
    %138 = tpu.matmul %136, %137, %cst_114 {dimension_numbers = #tpu.dot_dimension_numbers<[1], [1], [0], [0], [0, 0, 1, 0], [], []>} : vector<17x8xbf16>, vector<17x8xbf16>, vector<17x17xf32> -> vector<17x17xf32>
    %cst_115 = arith.constant dense<0xFF800000> : vector<17xf32>
    %139 = vector.multi_reduction <maximumf>, %138, %cst_115 [1] : vector<17x17xf32> to vector<17xf32>
    %140 = vector.shape_cast %139 : vector<17xf32> to vector<17x1xf32>
    %141 = vector.broadcast %140 : vector<17x1xf32> to vector<17x17xf32>
    %142 = arith.subf %138, %141 : vector<17x17xf32>
    %143 = math.exp %142 : vector<17x17xf32>
    %cst_116 = arith.constant dense<0.000000e+00> : vector<17xf32>
    %144 = vector.multi_reduction <add>, %143, %cst_116 [1] : vector<17x17xf32> to vector<17xf32>
    %145 = vector.shape_cast %144 : vector<17xf32> to vector<17x1xf32>
    %146 = tpu.reciprocal %145 {approx = true} : vector<17x1xf32> -> vector<17x1xf32>
    %147 = vector.broadcast %146 : vector<17x1xf32> to vector<17x17xf32>
    %148 = arith.mulf %143, %147 : vector<17x17xf32>
    %149 = arith.truncf %148 : vector<17x17xf32> to vector<17x17xbf16>
    %150 = arith.truncf %135 : vector<17x8xf32> to vector<17x8xbf16>
    %cst_117 = arith.constant dense<0.000000e+00> : vector<17x8xf32>
    %151 = tpu.matmul %149, %150, %cst_117 {dimension_numbers = #tpu.dot_dimension_numbers<[1], [0], [0], [1], [0, 0, 1, 1], [], []>} : vector<17x17xbf16>, vector<17x8xbf16>, vector<17x8xf32> -> vector<17x8xf32>
    %152 = arith.truncf %151 : vector<17x8xf32> to vector<17x8xbf16>
    %c0_118 = arith.constant 0 : index
    %c2_119 = arith.constant 2 : index
    %c0_120 = arith.constant 0 : index
    %c0_121 = arith.constant 0 : index
    %153 = vector.load %arg10[%c0_118, %c2_119, %c0_120, %c0_121] : memref<2x4x8x32xbf16, #tpu.memory_space<vmem>>, vector<1x1x8x32xbf16>
    %154 = vector.shape_cast %153 : vector<1x1x8x32xbf16> to vector<8x32xbf16>
    %cst_122 = arith.constant dense<0.000000e+00> : vector<17x32xf32>
    %155 = tpu.matmul %152, %154, %cst_122 {dimension_numbers = #tpu.dot_dimension_numbers<[1], [0], [0], [1], [0, 0, 1, 1], [], []>} : vector<17x8xbf16>, vector<8x32xbf16>, vector<17x32xf32> -> vector<17x32xf32>
    %156 = arith.addf %114, %155 : vector<17x32xf32>
    %c0_123 = arith.constant 0 : index
    %c3 = arith.constant 3 : index
    %c0_124 = arith.constant 0 : index
    %c0_125 = arith.constant 0 : index
    %157 = vector.load %arg4[%c0_123, %c3, %c0_124, %c0_125] : memref<2x4x32x8xbf16, #tpu.memory_space<vmem>>, vector<1x1x32x8xbf16>
    %158 = vector.shape_cast %157 : vector<1x1x32x8xbf16> to vector<32x8xbf16>
    %cst_126 = arith.constant dense<0.000000e+00> : vector<17x8xf32>
    %159 = tpu.matmul %31, %158, %cst_126 {dimension_numbers = #tpu.dot_dimension_numbers<[1], [0], [0], [1], [0, 0, 1, 1], [], []>} : vector<17x32xbf16>, vector<32x8xbf16>, vector<17x8xf32> -> vector<17x8xf32>
    %c0_127 = arith.constant 0 : index
    %c3_128 = arith.constant 3 : index
    %c0_129 = arith.constant 0 : index
    %c0_130 = arith.constant 0 : index
    %160 = vector.load %arg5[%c0_127, %c3_128, %c0_129, %c0_130] : memref<2x4x1x8xf32, #tpu.memory_space<vmem>>, vector<1x1x1x8xf32>
    %161 = vector.shape_cast %160 : vector<1x1x1x8xf32> to vector<1x8xf32>
    %162 = vector.broadcast %161 : vector<1x8xf32> to vector<17x8xf32>
    %163 = arith.addf %159, %162 : vector<17x8xf32>
    %c0_131 = arith.constant 0 : index
    %c3_132 = arith.constant 3 : index
    %c0_133 = arith.constant 0 : index
    %c0_134 = arith.constant 0 : index
    %164 = vector.load %arg6[%c0_131, %c3_132, %c0_133, %c0_134] : memref<2x4x32x8xbf16, #tpu.memory_space<vmem>>, vector<1x1x32x8xbf16>
    %165 = vector.shape_cast %164 : vector<1x1x32x8xbf16> to vector<32x8xbf16>
    %cst_135 = arith.constant dense<0.000000e+00> : vector<17x8xf32>
    %166 = tpu.matmul %31, %165, %cst_135 {dimension_numbers = #tpu.dot_dimension_numbers<[1], [0], [0], [1], [0, 0, 1, 1], [], []>} : vector<17x32xbf16>, vector<32x8xbf16>, vector<17x8xf32> -> vector<17x8xf32>
    %c0_136 = arith.constant 0 : index
    %c3_137 = arith.constant 3 : index
    %c0_138 = arith.constant 0 : index
    %c0_139 = arith.constant 0 : index
    %167 = vector.load %arg7[%c0_136, %c3_137, %c0_138, %c0_139] : memref<2x4x1x8xf32, #tpu.memory_space<vmem>>, vector<1x1x1x8xf32>
    %168 = vector.shape_cast %167 : vector<1x1x1x8xf32> to vector<1x8xf32>
    %169 = vector.broadcast %168 : vector<1x8xf32> to vector<17x8xf32>
    %170 = arith.addf %166, %169 : vector<17x8xf32>
    %c0_140 = arith.constant 0 : index
    %c3_141 = arith.constant 3 : index
    %c0_142 = arith.constant 0 : index
    %c0_143 = arith.constant 0 : index
    %171 = vector.load %arg8[%c0_140, %c3_141, %c0_142, %c0_143] : memref<2x4x32x8xbf16, #tpu.memory_space<vmem>>, vector<1x1x32x8xbf16>
    %172 = vector.shape_cast %171 : vector<1x1x32x8xbf16> to vector<32x8xbf16>
    %cst_144 = arith.constant dense<0.000000e+00> : vector<17x8xf32>
    %173 = tpu.matmul %31, %172, %cst_144 {dimension_numbers = #tpu.dot_dimension_numbers<[1], [0], [0], [1], [0, 0, 1, 1], [], []>} : vector<17x32xbf16>, vector<32x8xbf16>, vector<17x8xf32> -> vector<17x8xf32>
    %c0_145 = arith.constant 0 : index
    %c3_146 = arith.constant 3 : index
    %c0_147 = arith.constant 0 : index
    %c0_148 = arith.constant 0 : index
    %174 = vector.load %arg9[%c0_145, %c3_146, %c0_147, %c0_148] : memref<2x4x1x8xf32, #tpu.memory_space<vmem>>, vector<1x1x1x8xf32>
    %175 = vector.shape_cast %174 : vector<1x1x1x8xf32> to vector<1x8xf32>
    %176 = vector.broadcast %175 : vector<1x8xf32> to vector<17x8xf32>
    %177 = arith.addf %173, %176 : vector<17x8xf32>
    %178 = arith.truncf %163 : vector<17x8xf32> to vector<17x8xbf16>
    %179 = arith.truncf %170 : vector<17x8xf32> to vector<17x8xbf16>
    %cst_149 = arith.constant dense<0.000000e+00> : vector<17x17xf32>
    %180 = tpu.matmul %178, %179, %cst_149 {dimension_numbers = #tpu.dot_dimension_numbers<[1], [1], [0], [0], [0, 0, 1, 0], [], []>} : vector<17x8xbf16>, vector<17x8xbf16>, vector<17x17xf32> -> vector<17x17xf32>
    %cst_150 = arith.constant dense<0xFF800000> : vector<17xf32>
    %181 = vector.multi_reduction <maximumf>, %180, %cst_150 [1] : vector<17x17xf32> to vector<17xf32>
    %182 = vector.shape_cast %181 : vector<17xf32> to vector<17x1xf32>
    %183 = vector.broadcast %182 : vector<17x1xf32> to vector<17x17xf32>
    %184 = arith.subf %180, %183 : vector<17x17xf32>
    %185 = math.exp %184 : vector<17x17xf32>
    %cst_151 = arith.constant dense<0.000000e+00> : vector<17xf32>
    %186 = vector.multi_reduction <add>, %185, %cst_151 [1] : vector<17x17xf32> to vector<17xf32>
    %187 = vector.shape_cast %186 : vector<17xf32> to vector<17x1xf32>
    %188 = tpu.reciprocal %187 {approx = true} : vector<17x1xf32> -> vector<17x1xf32>
    %189 = vector.broadcast %188 : vector<17x1xf32> to vector<17x17xf32>
    %190 = arith.mulf %185, %189 : vector<17x17xf32>
    %191 = arith.truncf %190 : vector<17x17xf32> to vector<17x17xbf16>
    %192 = arith.truncf %177 : vector<17x8xf32> to vector<17x8xbf16>
    %cst_152 = arith.constant dense<0.000000e+00> : vector<17x8xf32>
    %193 = tpu.matmul %191, %192, %cst_152 {dimension_numbers = #tpu.dot_dimension_numbers<[1], [0], [0], [1], [0, 0, 1, 1], [], []>} : vector<17x17xbf16>, vector<17x8xbf16>, vector<17x8xf32> -> vector<17x8xf32>
    %194 = arith.truncf %193 : vector<17x8xf32> to vector<17x8xbf16>
    %c0_153 = arith.constant 0 : index
    %c3_154 = arith.constant 3 : index
    %c0_155 = arith.constant 0 : index
    %c0_156 = arith.constant 0 : index
    %195 = vector.load %arg10[%c0_153, %c3_154, %c0_155, %c0_156] : memref<2x4x8x32xbf16, #tpu.memory_space<vmem>>, vector<1x1x8x32xbf16>
    %196 = vector.shape_cast %195 : vector<1x1x8x32xbf16> to vector<8x32xbf16>
    %cst_157 = arith.constant dense<0.000000e+00> : vector<17x32xf32>
    %197 = tpu.matmul %194, %196, %cst_157 {dimension_numbers = #tpu.dot_dimension_numbers<[1], [0], [0], [1], [0, 0, 1, 1], [], []>} : vector<17x8xbf16>, vector<8x32xbf16>, vector<17x32xf32> -> vector<17x32xf32>
    %198 = arith.addf %156, %197 : vector<17x32xf32>
    %c0_158 = arith.constant 0 : index
    %c0_159 = arith.constant 0 : index
    %c0_160 = arith.constant 0 : index
    %199 = vector.load %arg11[%c0_158, %c0_159, %c0_160] : memref<2x1x32xf32, #tpu.memory_space<vmem>>, vector<1x1x32xf32>
    %200 = vector.shape_cast %199 : vector<1x1x32xf32> to vector<1x32xf32>
    %201 = vector.broadcast %200 : vector<1x32xf32> to vector<17x32xf32>
    %202 = arith.addf %198, %201 : vector<17x32xf32>
    %203 = arith.addf %6, %202 : vector<17x32xf32>
    %c0_161 = arith.constant 0 : index
    %c0_162 = arith.constant 0 : index
    %c0_163 = arith.constant 0 : index
    %204 = vector.load %arg14[%c0_161, %c0_162, %c0_163] : memref<2x1x32xf32, #tpu.memory_space<vmem>>, vector<1x1x32xf32>
    %205 = vector.shape_cast %204 : vector<1x1x32xf32> to vector<1x32xf32>
    %c0_164 = arith.constant 0 : index
    %c0_165 = arith.constant 0 : index
    %c0_166 = arith.constant 0 : index
    %206 = vector.load %arg15[%c0_164, %c0_165, %c0_166] : memref<2x1x32xf32, #tpu.memory_space<vmem>>, vector<1x1x32xf32>
    %207 = vector.shape_cast %206 : vector<1x1x32xf32> to vector<1x32xf32>
    %cst_167 = arith.constant dense<0.000000e+00> : vector<17xf32>
    %208 = vector.multi_reduction <add>, %203, %cst_167 [1] : vector<17x32xf32> to vector<17xf32>
    %209 = vector.shape_cast %208 : vector<17xf32> to vector<17x1xf32>
    %cst_168 = arith.constant 3.200000e+01 : f32
    %210 = vector.broadcast %cst_168 : f32 to vector<17x1xf32>
    %211 = arith.divf %209, %210 : vector<17x1xf32>
    %212 = vector.broadcast %211 : vector<17x1xf32> to vector<17x32xf32>
    %213 = arith.subf %203, %212 : vector<17x32xf32>
    %214 = arith.mulf %213, %213 : vector<17x32xf32>
    %cst_169 = arith.constant dense<0.000000e+00> : vector<17xf32>
    %215 = vector.multi_reduction <add>, %214, %cst_169 [1] : vector<17x32xf32> to vector<17xf32>
    %216 = vector.shape_cast %215 : vector<17xf32> to vector<17x1xf32>
    %cst_170 = arith.constant 3.200000e+01 : f32
    %217 = vector.broadcast %cst_170 : f32 to vector<17x1xf32>
    %218 = arith.divf %216, %217 : vector<17x1xf32>
    %cst_171 = arith.constant 9.99999996E-13 : f32
    %219 = vector.broadcast %cst_171 : f32 to vector<17x1xf32>
    %220 = arith.addf %218, %219 : vector<17x1xf32>
    %221 = math.rsqrt %220 : vector<17x1xf32>
    %222 = vector.broadcast %221 : vector<17x1xf32> to vector<17x32xf32>
    %223 = arith.mulf %213, %222 : vector<17x32xf32>
    %224 = vector.broadcast %205 : vector<1x32xf32> to vector<17x32xf32>
    %225 = arith.mulf %223, %224 : vector<17x32xf32>
    %226 = vector.broadcast %207 : vector<1x32xf32> to vector<17x32xf32>
    %227 = arith.addf %225, %226 : vector<17x32xf32>
    %c0_172 = arith.constant 0 : index
    %c0_173 = arith.constant 0 : index
    %c0_174 = arith.constant 0 : index
    %228 = vector.load %arg16[%c0_172, %c0_173, %c0_174] : memref<2x32x64xbf16, #tpu.memory_space<vmem>>, vector<1x32x64xbf16>
    %229 = vector.shape_cast %228 : vector<1x32x64xbf16> to vector<32x64xbf16>
    %230 = arith.truncf %227 : vector<17x32xf32> to vector<17x32xbf16>
    %cst_175 = arith.constant dense<0.000000e+00> : vector<17x64xf32>
    %231 = tpu.matmul %230, %229, %cst_175 {dimension_numbers = #tpu.dot_dimension_numbers<[1], [0], [0], [1], [0, 0, 1, 1], [], []>} : vector<17x32xbf16>, vector<32x64xbf16>, vector<17x64xf32> -> vector<17x64xf32>
    %c0_176 = arith.constant 0 : index
    %c0_177 = arith.constant 0 : index
    %c0_178 = arith.constant 0 : index
    %232 = vector.load %arg17[%c0_176, %c0_177, %c0_178] : memref<2x1x64xf32, #tpu.memory_space<vmem>>, vector<1x1x64xf32>
    %233 = vector.shape_cast %232 : vector<1x1x64xf32> to vector<1x64xf32>
    %234 = vector.broadcast %233 : vector<1x64xf32> to vector<17x64xf32>
    %235 = arith.addf %231, %234 : vector<17x64xf32>
    %cst_179 = arith.constant 5.000000e-01 : f32
    %236 = vector.broadcast %cst_179 : f32 to vector<17x64xf32>
    %237 = arith.mulf %236, %235 : vector<17x64xf32>
    %cst_180 = arith.constant 4.471500e-02 : f32
    %238 = vector.broadcast %cst_180 : f32 to vector<17x64xf32>
    %239 = arith.mulf %238, %235 : vector<17x64xf32>
    %240 = arith.mulf %239, %235 : vector<17x64xf32>
    %241 = arith.mulf %240, %235 : vector<17x64xf32>
    %242 = arith.addf %235, %241 : vector<17x64xf32>
    %cst_181 = arith.constant 0.797884583 : f32
    %243 = vector.broadcast %cst_181 : f32 to vector<17x64xf32>
    %244 = arith.mulf %243, %242 : vector<17x64xf32>
    %245 = math.tanh %244 : vector<17x64xf32>
    %cst_182 = arith.constant 1.000000e+00 : f32
    %246 = vector.broadcast %cst_182 : f32 to vector<17x64xf32>
    %247 = arith.addf %246, %245 : vector<17x64xf32>
    %248 = arith.mulf %237, %247 : vector<17x64xf32>
    %c0_183 = arith.constant 0 : index
    %c0_184 = arith.constant 0 : index
    %c0_185 = arith.constant 0 : index
    %249 = vector.load %arg18[%c0_183, %c0_184, %c0_185] : memref<2x64x32xbf16, #tpu.memory_space<vmem>>, vector<1x64x32xbf16>
    %250 = vector.shape_cast %249 : vector<1x64x32xbf16> to vector<64x32xbf16>
    %251 = arith.truncf %248 : vector<17x64xf32> to vector<17x64xbf16>
    %cst_186 = arith.constant dense<0.000000e+00> : vector<17x32xf32>
    %252 = tpu.matmul %251, %250, %cst_186 {dimension_numbers = #tpu.dot_dimension_numbers<[1], [0], [0], [1], [0, 0, 1, 1], [], []>} : vector<17x64xbf16>, vector<64x32xbf16>, vector<17x32xf32> -> vector<17x32xf32>
    %253 = arith.addf %203, %252 : vector<17x32xf32>
    %c0_187 = arith.constant 0 : index
    %c0_188 = arith.constant 0 : index
    %c0_189 = arith.constant 0 : index
    %254 = vector.load %arg19[%c0_187, %c0_188, %c0_189] : memref<2x1x32xf32, #tpu.memory_space<vmem>>, vector<1x1x32xf32>
    %255 = vector.shape_cast %254 : vector<1x1x32xf32> to vector<1x32xf32>
    %256 = vector.broadcast %255 : vector<1x32xf32> to vector<17x32xf32>
    %257 = arith.addf %253, %256 : vector<17x32xf32>
    %c1_190 = arith.constant 1 : index
    %c0_191 = arith.constant 0 : index
    %c0_192 = arith.constant 0 : index
    %258 = vector.load %arg12[%c1_190, %c0_191, %c0_192] : memref<2x1x32xf32, #tpu.memory_space<vmem>>, vector<1x1x32xf32>
    %259 = vector.shape_cast %258 : vector<1x1x32xf32> to vector<1x32xf32>
    %c1_193 = arith.constant 1 : index
    %c0_194 = arith.constant 0 : index
    %c0_195 = arith.constant 0 : index
    %260 = vector.load %arg13[%c1_193, %c0_194, %c0_195] : memref<2x1x32xf32, #tpu.memory_space<vmem>>, vector<1x1x32xf32>
    %261 = vector.shape_cast %260 : vector<1x1x32xf32> to vector<1x32xf32>
    %cst_196 = arith.constant dense<0.000000e+00> : vector<17xf32>
    %262 = vector.multi_reduction <add>, %257, %cst_196 [1] : vector<17x32xf32> to vector<17xf32>
    %263 = vector.shape_cast %262 : vector<17xf32> to vector<17x1xf32>
    %cst_197 = arith.constant 3.200000e+01 : f32
    %264 = vector.broadcast %cst_197 : f32 to vector<17x1xf32>
    %265 = arith.divf %263, %264 : vector<17x1xf32>
    %266 = vector.broadcast %265 : vector<17x1xf32> to vector<17x32xf32>
    %267 = arith.subf %257, %266 : vector<17x32xf32>
    %268 = arith.mulf %267, %267 : vector<17x32xf32>
    %cst_198 = arith.constant dense<0.000000e+00> : vector<17xf32>
    %269 = vector.multi_reduction <add>, %268, %cst_198 [1] : vector<17x32xf32> to vector<17xf32>
    %270 = vector.shape_cast %269 : vector<17xf32> to vector<17x1xf32>
    %cst_199 = arith.constant 3.200000e+01 : f32
    %271 = vector.broadcast %cst_199 : f32 to vector<17x1xf32>
    %272 = arith.divf %270, %271 : vector<17x1xf32>
    %cst_200 = arith.constant 9.99999996E-13 : f32
    %273 = vector.broadcast %cst_200 : f32 to vector<17x1xf32>
    %274 = arith.addf %272, %273 : vector<17x1xf32>
    %275 = math.rsqrt %274 : vector<17x1xf32>
    %276 = vector.broadcast %275 : vector<17x1xf32> to vector<17x32xf32>
    %277 = arith.mulf %267, %276 : vector<17x32xf32>
    %278 = vector.broadcast %259 : vector<1x32xf32> to vector<17x32xf32>
    %279 = arith.mulf %277, %278 : vector<17x32xf32>
    %280 = vector.broadcast %261 : vector<1x32xf32> to vector<17x32xf32>
    %281 = arith.addf %279, %280 : vector<17x32xf32>
    %282 = arith.truncf %281 : vector<17x32xf32> to vector<17x32xbf16>
    %c1_201 = arith.constant 1 : index
    %c0_202 = arith.constant 0 : index
    %c0_203 = arith.constant 0 : index
    %c0_204 = arith.constant 0 : index
    %283 = vector.load %arg4[%c1_201, %c0_202, %c0_203, %c0_204] : memref<2x4x32x8xbf16, #tpu.memory_space<vmem>>, vector<1x1x32x8xbf16>
    %284 = vector.shape_cast %283 : vector<1x1x32x8xbf16> to vector<32x8xbf16>
    %cst_205 = arith.constant dense<0.000000e+00> : vector<17x8xf32>
    %285 = tpu.matmul %282, %284, %cst_205 {dimension_numbers = #tpu.dot_dimension_numbers<[1], [0], [0], [1], [0, 0, 1, 1], [], []>} : vector<17x32xbf16>, vector<32x8xbf16>, vector<17x8xf32> -> vector<17x8xf32>
    %c1_206 = arith.constant 1 : index
    %c0_207 = arith.constant 0 : index
    %c0_208 = arith.constant 0 : index
    %c0_209 = arith.constant 0 : index
    %286 = vector.load %arg5[%c1_206, %c0_207, %c0_208, %c0_209] : memref<2x4x1x8xf32, #tpu.memory_space<vmem>>, vector<1x1x1x8xf32>
    %287 = vector.shape_cast %286 : vector<1x1x1x8xf32> to vector<1x8xf32>
    %288 = vector.broadcast %287 : vector<1x8xf32> to vector<17x8xf32>
    %289 = arith.addf %285, %288 : vector<17x8xf32>
    %c1_210 = arith.constant 1 : index
    %c0_211 = arith.constant 0 : index
    %c0_212 = arith.constant 0 : index
    %c0_213 = arith.constant 0 : index
    %290 = vector.load %arg6[%c1_210, %c0_211, %c0_212, %c0_213] : memref<2x4x32x8xbf16, #tpu.memory_space<vmem>>, vector<1x1x32x8xbf16>
    %291 = vector.shape_cast %290 : vector<1x1x32x8xbf16> to vector<32x8xbf16>
    %cst_214 = arith.constant dense<0.000000e+00> : vector<17x8xf32>
    %292 = tpu.matmul %282, %291, %cst_214 {dimension_numbers = #tpu.dot_dimension_numbers<[1], [0], [0], [1], [0, 0, 1, 1], [], []>} : vector<17x32xbf16>, vector<32x8xbf16>, vector<17x8xf32> -> vector<17x8xf32>
    %c1_215 = arith.constant 1 : index
    %c0_216 = arith.constant 0 : index
    %c0_217 = arith.constant 0 : index
    %c0_218 = arith.constant 0 : index
    %293 = vector.load %arg7[%c1_215, %c0_216, %c0_217, %c0_218] : memref<2x4x1x8xf32, #tpu.memory_space<vmem>>, vector<1x1x1x8xf32>
    %294 = vector.shape_cast %293 : vector<1x1x1x8xf32> to vector<1x8xf32>
    %295 = vector.broadcast %294 : vector<1x8xf32> to vector<17x8xf32>
    %296 = arith.addf %292, %295 : vector<17x8xf32>
    %c1_219 = arith.constant 1 : index
    %c0_220 = arith.constant 0 : index
    %c0_221 = arith.constant 0 : index
    %c0_222 = arith.constant 0 : index
    %297 = vector.load %arg8[%c1_219, %c0_220, %c0_221, %c0_222] : memref<2x4x32x8xbf16, #tpu.memory_space<vmem>>, vector<1x1x32x8xbf16>
    %298 = vector.shape_cast %297 : vector<1x1x32x8xbf16> to vector<32x8xbf16>
    %cst_223 = arith.constant dense<0.000000e+00> : vector<17x8xf32>
    %299 = tpu.matmul %282, %298, %cst_223 {dimension_numbers = #tpu.dot_dimension_numbers<[1], [0], [0], [1], [0, 0, 1, 1], [], []>} : vector<17x32xbf16>, vector<32x8xbf16>, vector<17x8xf32> -> vector<17x8xf32>
    %c1_224 = arith.constant 1 : index
    %c0_225 = arith.constant 0 : index
    %c0_226 = arith.constant 0 : index
    %c0_227 = arith.constant 0 : index
    %300 = vector.load %arg9[%c1_224, %c0_225, %c0_226, %c0_227] : memref<2x4x1x8xf32, #tpu.memory_space<vmem>>, vector<1x1x1x8xf32>
    %301 = vector.shape_cast %300 : vector<1x1x1x8xf32> to vector<1x8xf32>
    %302 = vector.broadcast %301 : vector<1x8xf32> to vector<17x8xf32>
    %303 = arith.addf %299, %302 : vector<17x8xf32>
    %304 = arith.truncf %289 : vector<17x8xf32> to vector<17x8xbf16>
    %305 = arith.truncf %296 : vector<17x8xf32> to vector<17x8xbf16>
    %cst_228 = arith.constant dense<0.000000e+00> : vector<17x17xf32>
    %306 = tpu.matmul %304, %305, %cst_228 {dimension_numbers = #tpu.dot_dimension_numbers<[1], [1], [0], [0], [0, 0, 1, 0], [], []>} : vector<17x8xbf16>, vector<17x8xbf16>, vector<17x17xf32> -> vector<17x17xf32>
    %cst_229 = arith.constant dense<0xFF800000> : vector<17xf32>
    %307 = vector.multi_reduction <maximumf>, %306, %cst_229 [1] : vector<17x17xf32> to vector<17xf32>
    %308 = vector.shape_cast %307 : vector<17xf32> to vector<17x1xf32>
    %309 = vector.broadcast %308 : vector<17x1xf32> to vector<17x17xf32>
    %310 = arith.subf %306, %309 : vector<17x17xf32>
    %311 = math.exp %310 : vector<17x17xf32>
    %cst_230 = arith.constant dense<0.000000e+00> : vector<17xf32>
    %312 = vector.multi_reduction <add>, %311, %cst_230 [1] : vector<17x17xf32> to vector<17xf32>
    %313 = vector.shape_cast %312 : vector<17xf32> to vector<17x1xf32>
    %314 = tpu.reciprocal %313 {approx = true} : vector<17x1xf32> -> vector<17x1xf32>
    %315 = vector.broadcast %314 : vector<17x1xf32> to vector<17x17xf32>
    %316 = arith.mulf %311, %315 : vector<17x17xf32>
    %317 = arith.truncf %316 : vector<17x17xf32> to vector<17x17xbf16>
    %318 = arith.truncf %303 : vector<17x8xf32> to vector<17x8xbf16>
    %cst_231 = arith.constant dense<0.000000e+00> : vector<17x8xf32>
    %319 = tpu.matmul %317, %318, %cst_231 {dimension_numbers = #tpu.dot_dimension_numbers<[1], [0], [0], [1], [0, 0, 1, 1], [], []>} : vector<17x17xbf16>, vector<17x8xbf16>, vector<17x8xf32> -> vector<17x8xf32>
    %320 = arith.truncf %319 : vector<17x8xf32> to vector<17x8xbf16>
    %c1_232 = arith.constant 1 : index
    %c0_233 = arith.constant 0 : index
    %c0_234 = arith.constant 0 : index
    %c0_235 = arith.constant 0 : index
    %321 = vector.load %arg10[%c1_232, %c0_233, %c0_234, %c0_235] : memref<2x4x8x32xbf16, #tpu.memory_space<vmem>>, vector<1x1x8x32xbf16>
    %322 = vector.shape_cast %321 : vector<1x1x8x32xbf16> to vector<8x32xbf16>
    %cst_236 = arith.constant dense<0.000000e+00> : vector<17x32xf32>
    %323 = tpu.matmul %320, %322, %cst_236 {dimension_numbers = #tpu.dot_dimension_numbers<[1], [0], [0], [1], [0, 0, 1, 1], [], []>} : vector<17x8xbf16>, vector<8x32xbf16>, vector<17x32xf32> -> vector<17x32xf32>
    %c1_237 = arith.constant 1 : index
    %c1_238 = arith.constant 1 : index
    %c0_239 = arith.constant 0 : index
    %c0_240 = arith.constant 0 : index
    %324 = vector.load %arg4[%c1_237, %c1_238, %c0_239, %c0_240] : memref<2x4x32x8xbf16, #tpu.memory_space<vmem>>, vector<1x1x32x8xbf16>
    %325 = vector.shape_cast %324 : vector<1x1x32x8xbf16> to vector<32x8xbf16>
    %cst_241 = arith.constant dense<0.000000e+00> : vector<17x8xf32>
    %326 = tpu.matmul %282, %325, %cst_241 {dimension_numbers = #tpu.dot_dimension_numbers<[1], [0], [0], [1], [0, 0, 1, 1], [], []>} : vector<17x32xbf16>, vector<32x8xbf16>, vector<17x8xf32> -> vector<17x8xf32>
    %c1_242 = arith.constant 1 : index
    %c1_243 = arith.constant 1 : index
    %c0_244 = arith.constant 0 : index
    %c0_245 = arith.constant 0 : index
    %327 = vector.load %arg5[%c1_242, %c1_243, %c0_244, %c0_245] : memref<2x4x1x8xf32, #tpu.memory_space<vmem>>, vector<1x1x1x8xf32>
    %328 = vector.shape_cast %327 : vector<1x1x1x8xf32> to vector<1x8xf32>
    %329 = vector.broadcast %328 : vector<1x8xf32> to vector<17x8xf32>
    %330 = arith.addf %326, %329 : vector<17x8xf32>
    %c1_246 = arith.constant 1 : index
    %c1_247 = arith.constant 1 : index
    %c0_248 = arith.constant 0 : index
    %c0_249 = arith.constant 0 : index
    %331 = vector.load %arg6[%c1_246, %c1_247, %c0_248, %c0_249] : memref<2x4x32x8xbf16, #tpu.memory_space<vmem>>, vector<1x1x32x8xbf16>
    %332 = vector.shape_cast %331 : vector<1x1x32x8xbf16> to vector<32x8xbf16>
    %cst_250 = arith.constant dense<0.000000e+00> : vector<17x8xf32>
    %333 = tpu.matmul %282, %332, %cst_250 {dimension_numbers = #tpu.dot_dimension_numbers<[1], [0], [0], [1], [0, 0, 1, 1], [], []>} : vector<17x32xbf16>, vector<32x8xbf16>, vector<17x8xf32> -> vector<17x8xf32>
    %c1_251 = arith.constant 1 : index
    %c1_252 = arith.constant 1 : index
    %c0_253 = arith.constant 0 : index
    %c0_254 = arith.constant 0 : index
    %334 = vector.load %arg7[%c1_251, %c1_252, %c0_253, %c0_254] : memref<2x4x1x8xf32, #tpu.memory_space<vmem>>, vector<1x1x1x8xf32>
    %335 = vector.shape_cast %334 : vector<1x1x1x8xf32> to vector<1x8xf32>
    %336 = vector.broadcast %335 : vector<1x8xf32> to vector<17x8xf32>
    %337 = arith.addf %333, %336 : vector<17x8xf32>
    %c1_255 = arith.constant 1 : index
    %c1_256 = arith.constant 1 : index
    %c0_257 = arith.constant 0 : index
    %c0_258 = arith.constant 0 : index
    %338 = vector.load %arg8[%c1_255, %c1_256, %c0_257, %c0_258] : memref<2x4x32x8xbf16, #tpu.memory_space<vmem>>, vector<1x1x32x8xbf16>
    %339 = vector.shape_cast %338 : vector<1x1x32x8xbf16> to vector<32x8xbf16>
    %cst_259 = arith.constant dense<0.000000e+00> : vector<17x8xf32>
    %340 = tpu.matmul %282, %339, %cst_259 {dimension_numbers = #tpu.dot_dimension_numbers<[1], [0], [0], [1], [0, 0, 1, 1], [], []>} : vector<17x32xbf16>, vector<32x8xbf16>, vector<17x8xf32> -> vector<17x8xf32>
    %c1_260 = arith.constant 1 : index
    %c1_261 = arith.constant 1 : index
    %c0_262 = arith.constant 0 : index
    %c0_263 = arith.constant 0 : index
    %341 = vector.load %arg9[%c1_260, %c1_261, %c0_262, %c0_263] : memref<2x4x1x8xf32, #tpu.memory_space<vmem>>, vector<1x1x1x8xf32>
    %342 = vector.shape_cast %341 : vector<1x1x1x8xf32> to vector<1x8xf32>
    %343 = vector.broadcast %342 : vector<1x8xf32> to vector<17x8xf32>
    %344 = arith.addf %340, %343 : vector<17x8xf32>
    %345 = arith.truncf %330 : vector<17x8xf32> to vector<17x8xbf16>
    %346 = arith.truncf %337 : vector<17x8xf32> to vector<17x8xbf16>
    %cst_264 = arith.constant dense<0.000000e+00> : vector<17x17xf32>
    %347 = tpu.matmul %345, %346, %cst_264 {dimension_numbers = #tpu.dot_dimension_numbers<[1], [1], [0], [0], [0, 0, 1, 0], [], []>} : vector<17x8xbf16>, vector<17x8xbf16>, vector<17x17xf32> -> vector<17x17xf32>
    %cst_265 = arith.constant dense<0xFF800000> : vector<17xf32>
    %348 = vector.multi_reduction <maximumf>, %347, %cst_265 [1] : vector<17x17xf32> to vector<17xf32>
    %349 = vector.shape_cast %348 : vector<17xf32> to vector<17x1xf32>
    %350 = vector.broadcast %349 : vector<17x1xf32> to vector<17x17xf32>
    %351 = arith.subf %347, %350 : vector<17x17xf32>
    %352 = math.exp %351 : vector<17x17xf32>
    %cst_266 = arith.constant dense<0.000000e+00> : vector<17xf32>
    %353 = vector.multi_reduction <add>, %352, %cst_266 [1] : vector<17x17xf32> to vector<17xf32>
    %354 = vector.shape_cast %353 : vector<17xf32> to vector<17x1xf32>
    %355 = tpu.reciprocal %354 {approx = true} : vector<17x1xf32> -> vector<17x1xf32>
    %356 = vector.broadcast %355 : vector<17x1xf32> to vector<17x17xf32>
    %357 = arith.mulf %352, %356 : vector<17x17xf32>
    %358 = arith.truncf %357 : vector<17x17xf32> to vector<17x17xbf16>
    %359 = arith.truncf %344 : vector<17x8xf32> to vector<17x8xbf16>
    %cst_267 = arith.constant dense<0.000000e+00> : vector<17x8xf32>
    %360 = tpu.matmul %358, %359, %cst_267 {dimension_numbers = #tpu.dot_dimension_numbers<[1], [0], [0], [1], [0, 0, 1, 1], [], []>} : vector<17x17xbf16>, vector<17x8xbf16>, vector<17x8xf32> -> vector<17x8xf32>
    %361 = arith.truncf %360 : vector<17x8xf32> to vector<17x8xbf16>
    %c1_268 = arith.constant 1 : index
    %c1_269 = arith.constant 1 : index
    %c0_270 = arith.constant 0 : index
    %c0_271 = arith.constant 0 : index
    %362 = vector.load %arg10[%c1_268, %c1_269, %c0_270, %c0_271] : memref<2x4x8x32xbf16, #tpu.memory_space<vmem>>, vector<1x1x8x32xbf16>
    %363 = vector.shape_cast %362 : vector<1x1x8x32xbf16> to vector<8x32xbf16>
    %cst_272 = arith.constant dense<0.000000e+00> : vector<17x32xf32>
    %364 = tpu.matmul %361, %363, %cst_272 {dimension_numbers = #tpu.dot_dimension_numbers<[1], [0], [0], [1], [0, 0, 1, 1], [], []>} : vector<17x8xbf16>, vector<8x32xbf16>, vector<17x32xf32> -> vector<17x32xf32>
    %365 = arith.addf %323, %364 : vector<17x32xf32>
    %c1_273 = arith.constant 1 : index
    %c2_274 = arith.constant 2 : index
    %c0_275 = arith.constant 0 : index
    %c0_276 = arith.constant 0 : index
    %366 = vector.load %arg4[%c1_273, %c2_274, %c0_275, %c0_276] : memref<2x4x32x8xbf16, #tpu.memory_space<vmem>>, vector<1x1x32x8xbf16>
    %367 = vector.shape_cast %366 : vector<1x1x32x8xbf16> to vector<32x8xbf16>
    %cst_277 = arith.constant dense<0.000000e+00> : vector<17x8xf32>
    %368 = tpu.matmul %282, %367, %cst_277 {dimension_numbers = #tpu.dot_dimension_numbers<[1], [0], [0], [1], [0, 0, 1, 1], [], []>} : vector<17x32xbf16>, vector<32x8xbf16>, vector<17x8xf32> -> vector<17x8xf32>
    %c1_278 = arith.constant 1 : index
    %c2_279 = arith.constant 2 : index
    %c0_280 = arith.constant 0 : index
    %c0_281 = arith.constant 0 : index
    %369 = vector.load %arg5[%c1_278, %c2_279, %c0_280, %c0_281] : memref<2x4x1x8xf32, #tpu.memory_space<vmem>>, vector<1x1x1x8xf32>
    %370 = vector.shape_cast %369 : vector<1x1x1x8xf32> to vector<1x8xf32>
    %371 = vector.broadcast %370 : vector<1x8xf32> to vector<17x8xf32>
    %372 = arith.addf %368, %371 : vector<17x8xf32>
    %c1_282 = arith.constant 1 : index
    %c2_283 = arith.constant 2 : index
    %c0_284 = arith.constant 0 : index
    %c0_285 = arith.constant 0 : index
    %373 = vector.load %arg6[%c1_282, %c2_283, %c0_284, %c0_285] : memref<2x4x32x8xbf16, #tpu.memory_space<vmem>>, vector<1x1x32x8xbf16>
    %374 = vector.shape_cast %373 : vector<1x1x32x8xbf16> to vector<32x8xbf16>
    %cst_286 = arith.constant dense<0.000000e+00> : vector<17x8xf32>
    %375 = tpu.matmul %282, %374, %cst_286 {dimension_numbers = #tpu.dot_dimension_numbers<[1], [0], [0], [1], [0, 0, 1, 1], [], []>} : vector<17x32xbf16>, vector<32x8xbf16>, vector<17x8xf32> -> vector<17x8xf32>
    %c1_287 = arith.constant 1 : index
    %c2_288 = arith.constant 2 : index
    %c0_289 = arith.constant 0 : index
    %c0_290 = arith.constant 0 : index
    %376 = vector.load %arg7[%c1_287, %c2_288, %c0_289, %c0_290] : memref<2x4x1x8xf32, #tpu.memory_space<vmem>>, vector<1x1x1x8xf32>
    %377 = vector.shape_cast %376 : vector<1x1x1x8xf32> to vector<1x8xf32>
    %378 = vector.broadcast %377 : vector<1x8xf32> to vector<17x8xf32>
    %379 = arith.addf %375, %378 : vector<17x8xf32>
    %c1_291 = arith.constant 1 : index
    %c2_292 = arith.constant 2 : index
    %c0_293 = arith.constant 0 : index
    %c0_294 = arith.constant 0 : index
    %380 = vector.load %arg8[%c1_291, %c2_292, %c0_293, %c0_294] : memref<2x4x32x8xbf16, #tpu.memory_space<vmem>>, vector<1x1x32x8xbf16>
    %381 = vector.shape_cast %380 : vector<1x1x32x8xbf16> to vector<32x8xbf16>
    %cst_295 = arith.constant dense<0.000000e+00> : vector<17x8xf32>
    %382 = tpu.matmul %282, %381, %cst_295 {dimension_numbers = #tpu.dot_dimension_numbers<[1], [0], [0], [1], [0, 0, 1, 1], [], []>} : vector<17x32xbf16>, vector<32x8xbf16>, vector<17x8xf32> -> vector<17x8xf32>
    %c1_296 = arith.constant 1 : index
    %c2_297 = arith.constant 2 : index
    %c0_298 = arith.constant 0 : index
    %c0_299 = arith.constant 0 : index
    %383 = vector.load %arg9[%c1_296, %c2_297, %c0_298, %c0_299] : memref<2x4x1x8xf32, #tpu.memory_space<vmem>>, vector<1x1x1x8xf32>
    %384 = vector.shape_cast %383 : vector<1x1x1x8xf32> to vector<1x8xf32>
    %385 = vector.broadcast %384 : vector<1x8xf32> to vector<17x8xf32>
    %386 = arith.addf %382, %385 : vector<17x8xf32>
    %387 = arith.truncf %372 : vector<17x8xf32> to vector<17x8xbf16>
    %388 = arith.truncf %379 : vector<17x8xf32> to vector<17x8xbf16>
    %cst_300 = arith.constant dense<0.000000e+00> : vector<17x17xf32>
    %389 = tpu.matmul %387, %388, %cst_300 {dimension_numbers = #tpu.dot_dimension_numbers<[1], [1], [0], [0], [0, 0, 1, 0], [], []>} : vector<17x8xbf16>, vector<17x8xbf16>, vector<17x17xf32> -> vector<17x17xf32>
    %cst_301 = arith.constant dense<0xFF800000> : vector<17xf32>
    %390 = vector.multi_reduction <maximumf>, %389, %cst_301 [1] : vector<17x17xf32> to vector<17xf32>
    %391 = vector.shape_cast %390 : vector<17xf32> to vector<17x1xf32>
    %392 = vector.broadcast %391 : vector<17x1xf32> to vector<17x17xf32>
    %393 = arith.subf %389, %392 : vector<17x17xf32>
    %394 = math.exp %393 : vector<17x17xf32>
    %cst_302 = arith.constant dense<0.000000e+00> : vector<17xf32>
    %395 = vector.multi_reduction <add>, %394, %cst_302 [1] : vector<17x17xf32> to vector<17xf32>
    %396 = vector.shape_cast %395 : vector<17xf32> to vector<17x1xf32>
    %397 = tpu.reciprocal %396 {approx = true} : vector<17x1xf32> -> vector<17x1xf32>
    %398 = vector.broadcast %397 : vector<17x1xf32> to vector<17x17xf32>
    %399 = arith.mulf %394, %398 : vector<17x17xf32>
    %400 = arith.truncf %399 : vector<17x17xf32> to vector<17x17xbf16>
    %401 = arith.truncf %386 : vector<17x8xf32> to vector<17x8xbf16>
    %cst_303 = arith.constant dense<0.000000e+00> : vector<17x8xf32>
    %402 = tpu.matmul %400, %401, %cst_303 {dimension_numbers = #tpu.dot_dimension_numbers<[1], [0], [0], [1], [0, 0, 1, 1], [], []>} : vector<17x17xbf16>, vector<17x8xbf16>, vector<17x8xf32> -> vector<17x8xf32>
    %403 = arith.truncf %402 : vector<17x8xf32> to vector<17x8xbf16>
    %c1_304 = arith.constant 1 : index
    %c2_305 = arith.constant 2 : index
    %c0_306 = arith.constant 0 : index
    %c0_307 = arith.constant 0 : index
    %404 = vector.load %arg10[%c1_304, %c2_305, %c0_306, %c0_307] : memref<2x4x8x32xbf16, #tpu.memory_space<vmem>>, vector<1x1x8x32xbf16>
    %405 = vector.shape_cast %404 : vector<1x1x8x32xbf16> to vector<8x32xbf16>
    %cst_308 = arith.constant dense<0.000000e+00> : vector<17x32xf32>
    %406 = tpu.matmul %403, %405, %cst_308 {dimension_numbers = #tpu.dot_dimension_numbers<[1], [0], [0], [1], [0, 0, 1, 1], [], []>} : vector<17x8xbf16>, vector<8x32xbf16>, vector<17x32xf32> -> vector<17x32xf32>
    %407 = arith.addf %365, %406 : vector<17x32xf32>
    %c1_309 = arith.constant 1 : index
    %c3_310 = arith.constant 3 : index
    %c0_311 = arith.constant 0 : index
    %c0_312 = arith.constant 0 : index
    %408 = vector.load %arg4[%c1_309, %c3_310, %c0_311, %c0_312] : memref<2x4x32x8xbf16, #tpu.memory_space<vmem>>, vector<1x1x32x8xbf16>
    %409 = vector.shape_cast %408 : vector<1x1x32x8xbf16> to vector<32x8xbf16>
    %cst_313 = arith.constant dense<0.000000e+00> : vector<17x8xf32>
    %410 = tpu.matmul %282, %409, %cst_313 {dimension_numbers = #tpu.dot_dimension_numbers<[1], [0], [0], [1], [0, 0, 1, 1], [], []>} : vector<17x32xbf16>, vector<32x8xbf16>, vector<17x8xf32> -> vector<17x8xf32>
    %c1_314 = arith.constant 1 : index
    %c3_315 = arith.constant 3 : index
    %c0_316 = arith.constant 0 : index
    %c0_317 = arith.constant 0 : index
    %411 = vector.load %arg5[%c1_314, %c3_315, %c0_316, %c0_317] : memref<2x4x1x8xf32, #tpu.memory_space<vmem>>, vector<1x1x1x8xf32>
    %412 = vector.shape_cast %411 : vector<1x1x1x8xf32> to vector<1x8xf32>
    %413 = vector.broadcast %412 : vector<1x8xf32> to vector<17x8xf32>
    %414 = arith.addf %410, %413 : vector<17x8xf32>
    %c1_318 = arith.constant 1 : index
    %c3_319 = arith.constant 3 : index
    %c0_320 = arith.constant 0 : index
    %c0_321 = arith.constant 0 : index
    %415 = vector.load %arg6[%c1_318, %c3_319, %c0_320, %c0_321] : memref<2x4x32x8xbf16, #tpu.memory_space<vmem>>, vector<1x1x32x8xbf16>
    %416 = vector.shape_cast %415 : vector<1x1x32x8xbf16> to vector<32x8xbf16>
    %cst_322 = arith.constant dense<0.000000e+00> : vector<17x8xf32>
    %417 = tpu.matmul %282, %416, %cst_322 {dimension_numbers = #tpu.dot_dimension_numbers<[1], [0], [0], [1], [0, 0, 1, 1], [], []>} : vector<17x32xbf16>, vector<32x8xbf16>, vector<17x8xf32> -> vector<17x8xf32>
    %c1_323 = arith.constant 1 : index
    %c3_324 = arith.constant 3 : index
    %c0_325 = arith.constant 0 : index
    %c0_326 = arith.constant 0 : index
    %418 = vector.load %arg7[%c1_323, %c3_324, %c0_325, %c0_326] : memref<2x4x1x8xf32, #tpu.memory_space<vmem>>, vector<1x1x1x8xf32>
    %419 = vector.shape_cast %418 : vector<1x1x1x8xf32> to vector<1x8xf32>
    %420 = vector.broadcast %419 : vector<1x8xf32> to vector<17x8xf32>
    %421 = arith.addf %417, %420 : vector<17x8xf32>
    %c1_327 = arith.constant 1 : index
    %c3_328 = arith.constant 3 : index
    %c0_329 = arith.constant 0 : index
    %c0_330 = arith.constant 0 : index
    %422 = vector.load %arg8[%c1_327, %c3_328, %c0_329, %c0_330] : memref<2x4x32x8xbf16, #tpu.memory_space<vmem>>, vector<1x1x32x8xbf16>
    %423 = vector.shape_cast %422 : vector<1x1x32x8xbf16> to vector<32x8xbf16>
    %cst_331 = arith.constant dense<0.000000e+00> : vector<17x8xf32>
    %424 = tpu.matmul %282, %423, %cst_331 {dimension_numbers = #tpu.dot_dimension_numbers<[1], [0], [0], [1], [0, 0, 1, 1], [], []>} : vector<17x32xbf16>, vector<32x8xbf16>, vector<17x8xf32> -> vector<17x8xf32>
    %c1_332 = arith.constant 1 : index
    %c3_333 = arith.constant 3 : index
    %c0_334 = arith.constant 0 : index
    %c0_335 = arith.constant 0 : index
    %425 = vector.load %arg9[%c1_332, %c3_333, %c0_334, %c0_335] : memref<2x4x1x8xf32, #tpu.memory_space<vmem>>, vector<1x1x1x8xf32>
    %426 = vector.shape_cast %425 : vector<1x1x1x8xf32> to vector<1x8xf32>
    %427 = vector.broadcast %426 : vector<1x8xf32> to vector<17x8xf32>
    %428 = arith.addf %424, %427 : vector<17x8xf32>
    %429 = arith.truncf %414 : vector<17x8xf32> to vector<17x8xbf16>
    %430 = arith.truncf %421 : vector<17x8xf32> to vector<17x8xbf16>
    %cst_336 = arith.constant dense<0.000000e+00> : vector<17x17xf32>
    %431 = tpu.matmul %429, %430, %cst_336 {dimension_numbers = #tpu.dot_dimension_numbers<[1], [1], [0], [0], [0, 0, 1, 0], [], []>} : vector<17x8xbf16>, vector<17x8xbf16>, vector<17x17xf32> -> vector<17x17xf32>
    %cst_337 = arith.constant dense<0xFF800000> : vector<17xf32>
    %432 = vector.multi_reduction <maximumf>, %431, %cst_337 [1] : vector<17x17xf32> to vector<17xf32>
    %433 = vector.shape_cast %432 : vector<17xf32> to vector<17x1xf32>
    %434 = vector.broadcast %433 : vector<17x1xf32> to vector<17x17xf32>
    %435 = arith.subf %431, %434 : vector<17x17xf32>
    %436 = math.exp %435 : vector<17x17xf32>
    %cst_338 = arith.constant dense<0.000000e+00> : vector<17xf32>
    %437 = vector.multi_reduction <add>, %436, %cst_338 [1] : vector<17x17xf32> to vector<17xf32>
    %438 = vector.shape_cast %437 : vector<17xf32> to vector<17x1xf32>
    %439 = tpu.reciprocal %438 {approx = true} : vector<17x1xf32> -> vector<17x1xf32>
    %440 = vector.broadcast %439 : vector<17x1xf32> to vector<17x17xf32>
    %441 = arith.mulf %436, %440 : vector<17x17xf32>
    %442 = arith.truncf %441 : vector<17x17xf32> to vector<17x17xbf16>
    %443 = arith.truncf %428 : vector<17x8xf32> to vector<17x8xbf16>
    %cst_339 = arith.constant dense<0.000000e+00> : vector<17x8xf32>
    %444 = tpu.matmul %442, %443, %cst_339 {dimension_numbers = #tpu.dot_dimension_numbers<[1], [0], [0], [1], [0, 0, 1, 1], [], []>} : vector<17x17xbf16>, vector<17x8xbf16>, vector<17x8xf32> -> vector<17x8xf32>
    %445 = arith.truncf %444 : vector<17x8xf32> to vector<17x8xbf16>
    %c1_340 = arith.constant 1 : index
    %c3_341 = arith.constant 3 : index
    %c0_342 = arith.constant 0 : index
    %c0_343 = arith.constant 0 : index
    %446 = vector.load %arg10[%c1_340, %c3_341, %c0_342, %c0_343] : memref<2x4x8x32xbf16, #tpu.memory_space<vmem>>, vector<1x1x8x32xbf16>
    %447 = vector.shape_cast %446 : vector<1x1x8x32xbf16> to vector<8x32xbf16>
    %cst_344 = arith.constant dense<0.000000e+00> : vector<17x32xf32>
    %448 = tpu.matmul %445, %447, %cst_344 {dimension_numbers = #tpu.dot_dimension_numbers<[1], [0], [0], [1], [0, 0, 1, 1], [], []>} : vector<17x8xbf16>, vector<8x32xbf16>, vector<17x32xf32> -> vector<17x32xf32>
    %449 = arith.addf %407, %448 : vector<17x32xf32>
    %c1_345 = arith.constant 1 : index
    %c0_346 = arith.constant 0 : index
    %c0_347 = arith.constant 0 : index
    %450 = vector.load %arg11[%c1_345, %c0_346, %c0_347] : memref<2x1x32xf32, #tpu.memory_space<vmem>>, vector<1x1x32xf32>
    %451 = vector.shape_cast %450 : vector<1x1x32xf32> to vector<1x32xf32>
    %452 = vector.broadcast %451 : vector<1x32xf32> to vector<17x32xf32>
    %453 = arith.addf %449, %452 : vector<17x32xf32>
    %454 = arith.addf %257, %453 : vector<17x32xf32>
    %c1_348 = arith.constant 1 : index
    %c0_349 = arith.constant 0 : index
    %c0_350 = arith.constant 0 : index
    %455 = vector.load %arg14[%c1_348, %c0_349, %c0_350] : memref<2x1x32xf32, #tpu.memory_space<vmem>>, vector<1x1x32xf32>
    %456 = vector.shape_cast %455 : vector<1x1x32xf32> to vector<1x32xf32>
    %c1_351 = arith.constant 1 : index
    %c0_352 = arith.constant 0 : index
    %c0_353 = arith.constant 0 : index
    %457 = vector.load %arg15[%c1_351, %c0_352, %c0_353] : memref<2x1x32xf32, #tpu.memory_space<vmem>>, vector<1x1x32xf32>
    %458 = vector.shape_cast %457 : vector<1x1x32xf32> to vector<1x32xf32>
    %cst_354 = arith.constant dense<0.000000e+00> : vector<17xf32>
    %459 = vector.multi_reduction <add>, %454, %cst_354 [1] : vector<17x32xf32> to vector<17xf32>
    %460 = vector.shape_cast %459 : vector<17xf32> to vector<17x1xf32>
    %cst_355 = arith.constant 3.200000e+01 : f32
    %461 = vector.broadcast %cst_355 : f32 to vector<17x1xf32>
    %462 = arith.divf %460, %461 : vector<17x1xf32>
    %463 = vector.broadcast %462 : vector<17x1xf32> to vector<17x32xf32>
    %464 = arith.subf %454, %463 : vector<17x32xf32>
    %465 = arith.mulf %464, %464 : vector<17x32xf32>
    %cst_356 = arith.constant dense<0.000000e+00> : vector<17xf32>
    %466 = vector.multi_reduction <add>, %465, %cst_356 [1] : vector<17x32xf32> to vector<17xf32>
    %467 = vector.shape_cast %466 : vector<17xf32> to vector<17x1xf32>
    %cst_357 = arith.constant 3.200000e+01 : f32
    %468 = vector.broadcast %cst_357 : f32 to vector<17x1xf32>
    %469 = arith.divf %467, %468 : vector<17x1xf32>
    %cst_358 = arith.constant 9.99999996E-13 : f32
    %470 = vector.broadcast %cst_358 : f32 to vector<17x1xf32>
    %471 = arith.addf %469, %470 : vector<17x1xf32>
    %472 = math.rsqrt %471 : vector<17x1xf32>
    %473 = vector.broadcast %472 : vector<17x1xf32> to vector<17x32xf32>
    %474 = arith.mulf %464, %473 : vector<17x32xf32>
    %475 = vector.broadcast %456 : vector<1x32xf32> to vector<17x32xf32>
    %476 = arith.mulf %474, %475 : vector<17x32xf32>
    %477 = vector.broadcast %458 : vector<1x32xf32> to vector<17x32xf32>
    %478 = arith.addf %476, %477 : vector<17x32xf32>
    %c1_359 = arith.constant 1 : index
    %c0_360 = arith.constant 0 : index
    %c0_361 = arith.constant 0 : index
    %479 = vector.load %arg16[%c1_359, %c0_360, %c0_361] : memref<2x32x64xbf16, #tpu.memory_space<vmem>>, vector<1x32x64xbf16>
    %480 = vector.shape_cast %479 : vector<1x32x64xbf16> to vector<32x64xbf16>
    %481 = arith.truncf %478 : vector<17x32xf32> to vector<17x32xbf16>
    %cst_362 = arith.constant dense<0.000000e+00> : vector<17x64xf32>
    %482 = tpu.matmul %481, %480, %cst_362 {dimension_numbers = #tpu.dot_dimension_numbers<[1], [0], [0], [1], [0, 0, 1, 1], [], []>} : vector<17x32xbf16>, vector<32x64xbf16>, vector<17x64xf32> -> vector<17x64xf32>
    %c1_363 = arith.constant 1 : index
    %c0_364 = arith.constant 0 : index
    %c0_365 = arith.constant 0 : index
    %483 = vector.load %arg17[%c1_363, %c0_364, %c0_365] : memref<2x1x64xf32, #tpu.memory_space<vmem>>, vector<1x1x64xf32>
    %484 = vector.shape_cast %483 : vector<1x1x64xf32> to vector<1x64xf32>
    %485 = vector.broadcast %484 : vector<1x64xf32> to vector<17x64xf32>
    %486 = arith.addf %482, %485 : vector<17x64xf32>
    %cst_366 = arith.constant 5.000000e-01 : f32
    %487 = vector.broadcast %cst_366 : f32 to vector<17x64xf32>
    %488 = arith.mulf %487, %486 : vector<17x64xf32>
    %cst_367 = arith.constant 4.471500e-02 : f32
    %489 = vector.broadcast %cst_367 : f32 to vector<17x64xf32>
    %490 = arith.mulf %489, %486 : vector<17x64xf32>
    %491 = arith.mulf %490, %486 : vector<17x64xf32>
    %492 = arith.mulf %491, %486 : vector<17x64xf32>
    %493 = arith.addf %486, %492 : vector<17x64xf32>
    %cst_368 = arith.constant 0.797884583 : f32
    %494 = vector.broadcast %cst_368 : f32 to vector<17x64xf32>
    %495 = arith.mulf %494, %493 : vector<17x64xf32>
    %496 = math.tanh %495 : vector<17x64xf32>
    %cst_369 = arith.constant 1.000000e+00 : f32
    %497 = vector.broadcast %cst_369 : f32 to vector<17x64xf32>
    %498 = arith.addf %497, %496 : vector<17x64xf32>
    %499 = arith.mulf %488, %498 : vector<17x64xf32>
    %c1_370 = arith.constant 1 : index
    %c0_371 = arith.constant 0 : index
    %c0_372 = arith.constant 0 : index
    %500 = vector.load %arg18[%c1_370, %c0_371, %c0_372] : memref<2x64x32xbf16, #tpu.memory_space<vmem>>, vector<1x64x32xbf16>
    %501 = vector.shape_cast %500 : vector<1x64x32xbf16> to vector<64x32xbf16>
    %502 = arith.truncf %499 : vector<17x64xf32> to vector<17x64xbf16>
    %cst_373 = arith.constant dense<0.000000e+00> : vector<17x32xf32>
    %503 = tpu.matmul %502, %501, %cst_373 {dimension_numbers = #tpu.dot_dimension_numbers<[1], [0], [0], [1], [0, 0, 1, 1], [], []>} : vector<17x64xbf16>, vector<64x32xbf16>, vector<17x32xf32> -> vector<17x32xf32>
    %504 = arith.addf %454, %503 : vector<17x32xf32>
    %c1_374 = arith.constant 1 : index
    %c0_375 = arith.constant 0 : index
    %c0_376 = arith.constant 0 : index
    %505 = vector.load %arg19[%c1_374, %c0_375, %c0_376] : memref<2x1x32xf32, #tpu.memory_space<vmem>>, vector<1x1x32xf32>
    %506 = vector.shape_cast %505 : vector<1x1x32xf32> to vector<1x32xf32>
    %507 = vector.broadcast %506 : vector<1x32xf32> to vector<17x32xf32>
    %508 = arith.addf %504, %507 : vector<17x32xf32>
    %c0_377 = arith.constant 0 : index
    %c0_378 = arith.constant 0 : index
    %509 = vector.load %arg20[%c0_377, %c0_378] : memref<1x32xf32, #tpu.memory_space<vmem>>, vector<1x32xf32>
    %c0_379 = arith.constant 0 : index
    %c0_380 = arith.constant 0 : index
    %510 = vector.load %arg21[%c0_379, %c0_380] : memref<1x32xf32, #tpu.memory_space<vmem>>, vector<1x32xf32>
    %cst_381 = arith.constant dense<0.000000e+00> : vector<17xf32>
    %511 = vector.multi_reduction <add>, %508, %cst_381 [1] : vector<17x32xf32> to vector<17xf32>
    %512 = vector.shape_cast %511 : vector<17xf32> to vector<17x1xf32>
    %cst_382 = arith.constant 3.200000e+01 : f32
    %513 = vector.broadcast %cst_382 : f32 to vector<17x1xf32>
    %514 = arith.divf %512, %513 : vector<17x1xf32>
    %515 = vector.broadcast %514 : vector<17x1xf32> to vector<17x32xf32>
    %516 = arith.subf %508, %515 : vector<17x32xf32>
    %517 = arith.mulf %516, %516 : vector<17x32xf32>
    %cst_383 = arith.constant dense<0.000000e+00> : vector<17xf32>
    %518 = vector.multi_reduction <add>, %517, %cst_383 [1] : vector<17x32xf32> to vector<17xf32>
    %519 = vector.shape_cast %518 : vector<17xf32> to vector<17x1xf32>
    %cst_384 = arith.constant 3.200000e+01 : f32
    %520 = vector.broadcast %cst_384 : f32 to vector<17x1xf32>
    %521 = arith.divf %519, %520 : vector<17x1xf32>
    %cst_385 = arith.constant 9.99999996E-13 : f32
    %522 = vector.broadcast %cst_385 : f32 to vector<17x1xf32>
    %523 = arith.addf %521, %522 : vector<17x1xf32>
    %524 = math.rsqrt %523 : vector<17x1xf32>
    %525 = vector.broadcast %524 : vector<17x1xf32> to vector<17x32xf32>
    %526 = arith.mulf %516, %525 : vector<17x32xf32>
    %527 = vector.broadcast %509 : vector<1x32xf32> to vector<17x32xf32>
    %528 = arith.mulf %526, %527 : vector<17x32xf32>
    %529 = vector.broadcast %510 : vector<1x32xf32> to vector<17x32xf32>
    %530 = arith.addf %528, %529 : vector<17x32xf32>
    %531 = vector.extract_strided_slice %530 {offsets = [0, 0], sizes = [1, 32], strides = [1, 1]} : vector<17x32xf32> to vector<1x32xf32>
    %c0_386 = arith.constant 0 : index
    %c0_387 = arith.constant 0 : index
    %532 = vector.load %arg22[%c0_386, %c0_387] : memref<1x32xf32, #tpu.memory_space<vmem>>, vector<1x32xf32>
    %533 = arith.addf %531, %532 : vector<1x32xf32>
    %cst_388 = arith.constant 0.000000e+00 : f32
    %534 = vector.broadcast %cst_388 : f32 to vector<1x96xf32>
    %535 = tpu.concatenate %533, %534 in 1 : vector<1x32xf32>, vector<1x96xf32> -> vector<1x128xf32>
    %c0_389 = arith.constant 0 : index
    %c0_390 = arith.constant 0 : index
    %c0_391 = arith.constant 0 : index
    %536 = vector.load %arg47[%c0_389, %c0_390, %c0_391] : memref<1x1x128xf32, #tpu.memory_space<vmem>>, vector<1x1x128xf32>
    %537 = vector.shape_cast %536 : vector<1x1x128xf32> to vector<1x128xf32>
    %538 = vector.shape_cast %535 : vector<1x128xf32> to vector<1x1x128xf32>
    tpu.vector_store %arg47[%c0_389, %c0_390, %c0_391], %538 {strides = array<i32>} : memref<1x1x128xf32, #tpu.memory_space<vmem>>, vector<1x1x128xf32>,
    %539 = arith.truncf %530 : vector<17x32xf32> to vector<17x32xbf16>
    %c0_392 = arith.constant 0 : index
    %c0_393 = arith.constant 0 : index
    %c0_394 = arith.constant 0 : index
    %540 = vector.load %arg23[%c0_392, %c0_393, %c0_394] : memref<2x32x32xbf16, #tpu.memory_space<vmem>>, vector<1x32x32xbf16>
    %541 = vector.shape_cast %540 : vector<1x32x32xbf16> to vector<32x32xbf16>
    %542 = arith.truncf %533 : vector<1x32xf32> to vector<1x32xbf16>
    %cst_395 = arith.constant dense<0.000000e+00> : vector<1x32xf32>
    %543 = tpu.matmul %542, %541, %cst_395 {dimension_numbers = #tpu.dot_dimension_numbers<[1], [0], [0], [1], [0, 0, 1, 1], [], []>} : vector<1x32xbf16>, vector<32x32xbf16>, vector<1x32xf32> -> vector<1x32xf32>
    %c0_396 = arith.constant 0 : index
    %c0_397 = arith.constant 0 : index
    %c0_398 = arith.constant 0 : index
    %544 = vector.load %arg24[%c0_396, %c0_397, %c0_398] : memref<2x1x32xf32, #tpu.memory_space<vmem>>, vector<1x1x32xf32>
    %545 = vector.shape_cast %544 : vector<1x1x32xf32> to vector<1x32xf32>
    %546 = arith.addf %543, %545 : vector<1x32xf32>
    %c0_399 = arith.constant 0 : index
    %c0_400 = arith.constant 0 : index
    %c0_401 = arith.constant 0 : index
    %547 = vector.load %arg25[%c0_399, %c0_400, %c0_401] : memref<2x32x32xbf16, #tpu.memory_space<vmem>>, vector<1x32x32xbf16>
    %548 = vector.shape_cast %547 : vector<1x32x32xbf16> to vector<32x32xbf16>
    %549 = arith.truncf %546 : vector<1x32xf32> to vector<1x32xbf16>
    %cst_402 = arith.constant dense<0.000000e+00> : vector<1x32xf32>
    %550 = tpu.matmul %549, %548, %cst_402 {dimension_numbers = #tpu.dot_dimension_numbers<[1], [0], [0], [1], [0, 0, 1, 1], [], []>} : vector<1x32xbf16>, vector<32x32xbf16>, vector<1x32xf32> -> vector<1x32xf32>
    %c0_403 = arith.constant 0 : index
    %c0_404 = arith.constant 0 : index
    %c0_405 = arith.constant 0 : index
    %551 = vector.load %arg26[%c0_403, %c0_404, %c0_405] : memref<2x1x32xf32, #tpu.memory_space<vmem>>, vector<1x1x32xf32>
    %552 = vector.shape_cast %551 : vector<1x1x32xf32> to vector<1x32xf32>
    %553 = arith.addf %550, %552 : vector<1x32xf32>
    %554 = arith.addf %533, %553 : vector<1x32xf32>
    %c0_406 = arith.constant 0 : index
    %c0_407 = arith.constant 0 : index
    %c0_408 = arith.constant 0 : index
    %555 = vector.load %arg35[%c0_406, %c0_407, %c0_408] : memref<2x1x32xf32, #tpu.memory_space<vmem>>, vector<1x1x32xf32>
    %556 = vector.shape_cast %555 : vector<1x1x32xf32> to vector<1x32xf32>
    %c0_409 = arith.constant 0 : index
    %c0_410 = arith.constant 0 : index
    %c0_411 = arith.constant 0 : index
    %557 = vector.load %arg36[%c0_409, %c0_410, %c0_411] : memref<2x1x32xf32, #tpu.memory_space<vmem>>, vector<1x1x32xf32>
    %558 = vector.shape_cast %557 : vector<1x1x32xf32> to vector<1x32xf32>
    %cst_412 = arith.constant dense<0.000000e+00> : vector<1xf32>
    %559 = vector.multi_reduction <add>, %554, %cst_412 [1] : vector<1x32xf32> to vector<1xf32>
    %560 = vector.shape_cast %559 : vector<1xf32> to vector<1x1xf32>
    %cst_413 = arith.constant 3.200000e+01 : f32
    %561 = vector.broadcast %cst_413 : f32 to vector<1x1xf32>
    %562 = arith.divf %560, %561 : vector<1x1xf32>
    %563 = vector.broadcast %562 : vector<1x1xf32> to vector<1x32xf32>
    %564 = arith.subf %554, %563 : vector<1x32xf32>
    %565 = arith.mulf %564, %564 : vector<1x32xf32>
    %cst_414 = arith.constant dense<0.000000e+00> : vector<1xf32>
    %566 = vector.multi_reduction <add>, %565, %cst_414 [1] : vector<1x32xf32> to vector<1xf32>
    %567 = vector.shape_cast %566 : vector<1xf32> to vector<1x1xf32>
    %cst_415 = arith.constant 3.200000e+01 : f32
    %568 = vector.broadcast %cst_415 : f32 to vector<1x1xf32>
    %569 = arith.divf %567, %568 : vector<1x1xf32>
    %cst_416 = arith.constant 9.99999974E-6 : f32
    %570 = vector.broadcast %cst_416 : f32 to vector<1x1xf32>
    %571 = arith.addf %569, %570 : vector<1x1xf32>
    %572 = math.rsqrt %571 : vector<1x1xf32>
    %573 = vector.broadcast %572 : vector<1x1xf32> to vector<1x32xf32>
    %574 = arith.mulf %564, %573 : vector<1x32xf32>
    %575 = arith.mulf %574, %556 : vector<1x32xf32>
    %576 = arith.addf %575, %558 : vector<1x32xf32>
    %577 = arith.truncf %576 : vector<1x32xf32> to vector<1x32xbf16>
    %c0_417 = arith.constant 0 : index
    %c0_418 = arith.constant 0 : index
    %c0_419 = arith.constant 0 : index
    %c0_420 = arith.constant 0 : index
    %578 = vector.load %arg27[%c0_417, %c0_418, %c0_419, %c0_420] : memref<2x4x32x8xbf16, #tpu.memory_space<vmem>>, vector<1x1x32x8xbf16>
    %579 = vector.shape_cast %578 : vector<1x1x32x8xbf16> to vector<32x8xbf16>
    %cst_421 = arith.constant dense<0.000000e+00> : vector<1x8xf32>
    %580 = tpu.matmul %577, %579, %cst_421 {dimension_numbers = #tpu.dot_dimension_numbers<[1], [0], [0], [1], [0, 0, 1, 1], [], []>} : vector<1x32xbf16>, vector<32x8xbf16>, vector<1x8xf32> -> vector<1x8xf32>
    %c0_422 = arith.constant 0 : index
    %c0_423 = arith.constant 0 : index
    %c0_424 = arith.constant 0 : index
    %c0_425 = arith.constant 0 : index
    %581 = vector.load %arg28[%c0_422, %c0_423, %c0_424, %c0_425] : memref<2x4x1x8xf32, #tpu.memory_space<vmem>>, vector<1x1x1x8xf32>
    %582 = vector.shape_cast %581 : vector<1x1x1x8xf32> to vector<1x8xf32>
    %583 = arith.addf %580, %582 : vector<1x8xf32>
    %c0_426 = arith.constant 0 : index
    %c0_427 = arith.constant 0 : index
    %c0_428 = arith.constant 0 : index
    %c0_429 = arith.constant 0 : index
    %584 = vector.load %arg29[%c0_426, %c0_427, %c0_428, %c0_429] : memref<2x4x32x8xbf16, #tpu.memory_space<vmem>>, vector<1x1x32x8xbf16>
    %585 = vector.shape_cast %584 : vector<1x1x32x8xbf16> to vector<32x8xbf16>
    %cst_430 = arith.constant dense<0.000000e+00> : vector<17x8xf32>
    %586 = tpu.matmul %539, %585, %cst_430 {dimension_numbers = #tpu.dot_dimension_numbers<[1], [0], [0], [1], [0, 0, 1, 1], [], []>} : vector<17x32xbf16>, vector<32x8xbf16>, vector<17x8xf32> -> vector<17x8xf32>
    %c0_431 = arith.constant 0 : index
    %c0_432 = arith.constant 0 : index
    %c0_433 = arith.constant 0 : index
    %c0_434 = arith.constant 0 : index
    %587 = vector.load %arg30[%c0_431, %c0_432, %c0_433, %c0_434] : memref<2x4x1x8xf32, #tpu.memory_space<vmem>>, vector<1x1x1x8xf32>
    %588 = vector.shape_cast %587 : vector<1x1x1x8xf32> to vector<1x8xf32>
    %589 = vector.broadcast %588 : vector<1x8xf32> to vector<17x8xf32>
    %590 = arith.addf %586, %589 : vector<17x8xf32>
    %c0_435 = arith.constant 0 : index
    %c0_436 = arith.constant 0 : index
    %c0_437 = arith.constant 0 : index
    %c0_438 = arith.constant 0 : index
    %591 = vector.load %arg31[%c0_435, %c0_436, %c0_437, %c0_438] : memref<2x4x32x8xbf16, #tpu.memory_space<vmem>>, vector<1x1x32x8xbf16>
    %592 = vector.shape_cast %591 : vector<1x1x32x8xbf16> to vector<32x8xbf16>
    %cst_439 = arith.constant dense<0.000000e+00> : vector<17x8xf32>
    %593 = tpu.matmul %539, %592, %cst_439 {dimension_numbers = #tpu.dot_dimension_numbers<[1], [0], [0], [1], [0, 0, 1, 1], [], []>} : vector<17x32xbf16>, vector<32x8xbf16>, vector<17x8xf32> -> vector<17x8xf32>
    %c0_440 = arith.constant 0 : index
    %c0_441 = arith.constant 0 : index
    %c0_442 = arith.constant 0 : index
    %c0_443 = arith.constant 0 : index
    %594 = vector.load %arg32[%c0_440, %c0_441, %c0_442, %c0_443] : memref<2x4x1x8xf32, #tpu.memory_space<vmem>>, vector<1x1x1x8xf32>
    %595 = vector.shape_cast %594 : vector<1x1x1x8xf32> to vector<1x8xf32>
    %596 = vector.broadcast %595 : vector<1x8xf32> to vector<17x8xf32>
    %597 = arith.addf %593, %596 : vector<17x8xf32>
    %598 = arith.truncf %583 : vector<1x8xf32> to vector<1x8xbf16>
    %599 = arith.truncf %590 : vector<17x8xf32> to vector<17x8xbf16>
    %cst_444 = arith.constant dense<0.000000e+00> : vector<1x17xf32>
    %600 = tpu.matmul %598, %599, %cst_444 {dimension_numbers = #tpu.dot_dimension_numbers<[1], [1], [0], [0], [0, 0, 1, 0], [], []>} : vector<1x8xbf16>, vector<17x8xbf16>, vector<1x17xf32> -> vector<1x17xf32>
    %cst_445 = arith.constant dense<0xFF800000> : vector<1xf32>
    %601 = vector.multi_reduction <maximumf>, %600, %cst_445 [1] : vector<1x17xf32> to vector<1xf32>
    %602 = vector.shape_cast %601 : vector<1xf32> to vector<1x1xf32>
    %603 = vector.broadcast %602 : vector<1x1xf32> to vector<1x17xf32>
    %604 = arith.subf %600, %603 : vector<1x17xf32>
    %605 = math.exp %604 : vector<1x17xf32>
    %cst_446 = arith.constant dense<0.000000e+00> : vector<1xf32>
    %606 = vector.multi_reduction <add>, %605, %cst_446 [1] : vector<1x17xf32> to vector<1xf32>
    %607 = vector.shape_cast %606 : vector<1xf32> to vector<1x1xf32>
    %608 = tpu.reciprocal %607 {approx = true} : vector<1x1xf32> -> vector<1x1xf32>
    %609 = vector.broadcast %608 : vector<1x1xf32> to vector<1x17xf32>
    %610 = arith.mulf %605, %609 : vector<1x17xf32>
    %611 = arith.truncf %610 : vector<1x17xf32> to vector<1x17xbf16>
    %612 = arith.truncf %597 : vector<17x8xf32> to vector<17x8xbf16>
    %cst_447 = arith.constant dense<0.000000e+00> : vector<1x8xf32>
    %613 = tpu.matmul %611, %612, %cst_447 {dimension_numbers = #tpu.dot_dimension_numbers<[1], [0], [0], [1], [0, 0, 1, 1], [], []>} : vector<1x17xbf16>, vector<17x8xbf16>, vector<1x8xf32> -> vector<1x8xf32>
    %614 = arith.truncf %613 : vector<1x8xf32> to vector<1x8xbf16>
    %c0_448 = arith.constant 0 : index
    %c0_449 = arith.constant 0 : index
    %c0_450 = arith.constant 0 : index
    %c0_451 = arith.constant 0 : index
    %615 = vector.load %arg33[%c0_448, %c0_449, %c0_450, %c0_451] : memref<2x4x8x32xbf16, #tpu.memory_space<vmem>>, vector<1x1x8x32xbf16>
    %616 = vector.shape_cast %615 : vector<1x1x8x32xbf16> to vector<8x32xbf16>
    %cst_452 = arith.constant dense<0.000000e+00> : vector<1x32xf32>
    %617 = tpu.matmul %614, %616, %cst_452 {dimension_numbers = #tpu.dot_dimension_numbers<[1], [0], [0], [1], [0, 0, 1, 1], [], []>} : vector<1x8xbf16>, vector<8x32xbf16>, vector<1x32xf32> -> vector<1x32xf32>
    %c0_453 = arith.constant 0 : index
    %c1_454 = arith.constant 1 : index
    %c0_455 = arith.constant 0 : index
    %c0_456 = arith.constant 0 : index
    %618 = vector.load %arg27[%c0_453, %c1_454, %c0_455, %c0_456] : memref<2x4x32x8xbf16, #tpu.memory_space<vmem>>, vector<1x1x32x8xbf16>
    %619 = vector.shape_cast %618 : vector<1x1x32x8xbf16> to vector<32x8xbf16>
    %cst_457 = arith.constant dense<0.000000e+00> : vector<1x8xf32>
    %620 = tpu.matmul %577, %619, %cst_457 {dimension_numbers = #tpu.dot_dimension_numbers<[1], [0], [0], [1], [0, 0, 1, 1], [], []>} : vector<1x32xbf16>, vector<32x8xbf16>, vector<1x8xf32> -> vector<1x8xf32>
    %c0_458 = arith.constant 0 : index
    %c1_459 = arith.constant 1 : index
    %c0_460 = arith.constant 0 : index
    %c0_461 = arith.constant 0 : index
    %621 = vector.load %arg28[%c0_458, %c1_459, %c0_460, %c0_461] : memref<2x4x1x8xf32, #tpu.memory_space<vmem>>, vector<1x1x1x8xf32>
    %622 = vector.shape_cast %621 : vector<1x1x1x8xf32> to vector<1x8xf32>
    %623 = arith.addf %620, %622 : vector<1x8xf32>
    %c0_462 = arith.constant 0 : index
    %c1_463 = arith.constant 1 : index
    %c0_464 = arith.constant 0 : index
    %c0_465 = arith.constant 0 : index
    %624 = vector.load %arg29[%c0_462, %c1_463, %c0_464, %c0_465] : memref<2x4x32x8xbf16, #tpu.memory_space<vmem>>, vector<1x1x32x8xbf16>
    %625 = vector.shape_cast %624 : vector<1x1x32x8xbf16> to vector<32x8xbf16>
    %cst_466 = arith.constant dense<0.000000e+00> : vector<17x8xf32>
    %626 = tpu.matmul %539, %625, %cst_466 {dimension_numbers = #tpu.dot_dimension_numbers<[1], [0], [0], [1], [0, 0, 1, 1], [], []>} : vector<17x32xbf16>, vector<32x8xbf16>, vector<17x8xf32> -> vector<17x8xf32>
    %c0_467 = arith.constant 0 : index
    %c1_468 = arith.constant 1 : index
    %c0_469 = arith.constant 0 : index
    %c0_470 = arith.constant 0 : index
    %627 = vector.load %arg30[%c0_467, %c1_468, %c0_469, %c0_470] : memref<2x4x1x8xf32, #tpu.memory_space<vmem>>, vector<1x1x1x8xf32>
    %628 = vector.shape_cast %627 : vector<1x1x1x8xf32> to vector<1x8xf32>
    %629 = vector.broadcast %628 : vector<1x8xf32> to vector<17x8xf32>
    %630 = arith.addf %626, %629 : vector<17x8xf32>
    %c0_471 = arith.constant 0 : index
    %c1_472 = arith.constant 1 : index
    %c0_473 = arith.constant 0 : index
    %c0_474 = arith.constant 0 : index
    %631 = vector.load %arg31[%c0_471, %c1_472, %c0_473, %c0_474] : memref<2x4x32x8xbf16, #tpu.memory_space<vmem>>, vector<1x1x32x8xbf16>
    %632 = vector.shape_cast %631 : vector<1x1x32x8xbf16> to vector<32x8xbf16>
    %cst_475 = arith.constant dense<0.000000e+00> : vector<17x8xf32>
    %633 = tpu.matmul %539, %632, %cst_475 {dimension_numbers = #tpu.dot_dimension_numbers<[1], [0], [0], [1], [0, 0, 1, 1], [], []>} : vector<17x32xbf16>, vector<32x8xbf16>, vector<17x8xf32> -> vector<17x8xf32>
    %c0_476 = arith.constant 0 : index
    %c1_477 = arith.constant 1 : index
    %c0_478 = arith.constant 0 : index
    %c0_479 = arith.constant 0 : index
    %634 = vector.load %arg32[%c0_476, %c1_477, %c0_478, %c0_479] : memref<2x4x1x8xf32, #tpu.memory_space<vmem>>, vector<1x1x1x8xf32>
    %635 = vector.shape_cast %634 : vector<1x1x1x8xf32> to vector<1x8xf32>
    %636 = vector.broadcast %635 : vector<1x8xf32> to vector<17x8xf32>
    %637 = arith.addf %633, %636 : vector<17x8xf32>
    %638 = arith.truncf %623 : vector<1x8xf32> to vector<1x8xbf16>
    %639 = arith.truncf %630 : vector<17x8xf32> to vector<17x8xbf16>
    %cst_480 = arith.constant dense<0.000000e+00> : vector<1x17xf32>
    %640 = tpu.matmul %638, %639, %cst_480 {dimension_numbers = #tpu.dot_dimension_numbers<[1], [1], [0], [0], [0, 0, 1, 0], [], []>} : vector<1x8xbf16>, vector<17x8xbf16>, vector<1x17xf32> -> vector<1x17xf32>
    %cst_481 = arith.constant dense<0xFF800000> : vector<1xf32>
    %641 = vector.multi_reduction <maximumf>, %640, %cst_481 [1] : vector<1x17xf32> to vector<1xf32>
    %642 = vector.shape_cast %641 : vector<1xf32> to vector<1x1xf32>
    %643 = vector.broadcast %642 : vector<1x1xf32> to vector<1x17xf32>
    %644 = arith.subf %640, %643 : vector<1x17xf32>
    %645 = math.exp %644 : vector<1x17xf32>
    %cst_482 = arith.constant dense<0.000000e+00> : vector<1xf32>
    %646 = vector.multi_reduction <add>, %645, %cst_482 [1] : vector<1x17xf32> to vector<1xf32>
    %647 = vector.shape_cast %646 : vector<1xf32> to vector<1x1xf32>
    %648 = tpu.reciprocal %647 {approx = true} : vector<1x1xf32> -> vector<1x1xf32>
    %649 = vector.broadcast %648 : vector<1x1xf32> to vector<1x17xf32>
    %650 = arith.mulf %645, %649 : vector<1x17xf32>
    %651 = arith.truncf %650 : vector<1x17xf32> to vector<1x17xbf16>
    %652 = arith.truncf %637 : vector<17x8xf32> to vector<17x8xbf16>
    %cst_483 = arith.constant dense<0.000000e+00> : vector<1x8xf32>
    %653 = tpu.matmul %651, %652, %cst_483 {dimension_numbers = #tpu.dot_dimension_numbers<[1], [0], [0], [1], [0, 0, 1, 1], [], []>} : vector<1x17xbf16>, vector<17x8xbf16>, vector<1x8xf32> -> vector<1x8xf32>
    %654 = arith.truncf %653 : vector<1x8xf32> to vector<1x8xbf16>
    %c0_484 = arith.constant 0 : index
    %c1_485 = arith.constant 1 : index
    %c0_486 = arith.constant 0 : index
    %c0_487 = arith.constant 0 : index
    %655 = vector.load %arg33[%c0_484, %c1_485, %c0_486, %c0_487] : memref<2x4x8x32xbf16, #tpu.memory_space<vmem>>, vector<1x1x8x32xbf16>
    %656 = vector.shape_cast %655 : vector<1x1x8x32xbf16> to vector<8x32xbf16>
    %cst_488 = arith.constant dense<0.000000e+00> : vector<1x32xf32>
    %657 = tpu.matmul %654, %656, %cst_488 {dimension_numbers = #tpu.dot_dimension_numbers<[1], [0], [0], [1], [0, 0, 1, 1], [], []>} : vector<1x8xbf16>, vector<8x32xbf16>, vector<1x32xf32> -> vector<1x32xf32>
    %658 = arith.addf %617, %657 : vector<1x32xf32>
    %c0_489 = arith.constant 0 : index
    %c2_490 = arith.constant 2 : index
    %c0_491 = arith.constant 0 : index
    %c0_492 = arith.constant 0 : index
    %659 = vector.load %arg27[%c0_489, %c2_490, %c0_491, %c0_492] : memref<2x4x32x8xbf16, #tpu.memory_space<vmem>>, vector<1x1x32x8xbf16>
    %660 = vector.shape_cast %659 : vector<1x1x32x8xbf16> to vector<32x8xbf16>
    %cst_493 = arith.constant dense<0.000000e+00> : vector<1x8xf32>
    %661 = tpu.matmul %577, %660, %cst_493 {dimension_numbers = #tpu.dot_dimension_numbers<[1], [0], [0], [1], [0, 0, 1, 1], [], []>} : vector<1x32xbf16>, vector<32x8xbf16>, vector<1x8xf32> -> vector<1x8xf32>
    %c0_494 = arith.constant 0 : index
    %c2_495 = arith.constant 2 : index
    %c0_496 = arith.constant 0 : index
    %c0_497 = arith.constant 0 : index
    %662 = vector.load %arg28[%c0_494, %c2_495, %c0_496, %c0_497] : memref<2x4x1x8xf32, #tpu.memory_space<vmem>>, vector<1x1x1x8xf32>
    %663 = vector.shape_cast %662 : vector<1x1x1x8xf32> to vector<1x8xf32>
    %664 = arith.addf %661, %663 : vector<1x8xf32>
    %c0_498 = arith.constant 0 : index
    %c2_499 = arith.constant 2 : index
    %c0_500 = arith.constant 0 : index
    %c0_501 = arith.constant 0 : index
    %665 = vector.load %arg29[%c0_498, %c2_499, %c0_500, %c0_501] : memref<2x4x32x8xbf16, #tpu.memory_space<vmem>>, vector<1x1x32x8xbf16>
    %666 = vector.shape_cast %665 : vector<1x1x32x8xbf16> to vector<32x8xbf16>
    %cst_502 = arith.constant dense<0.000000e+00> : vector<17x8xf32>
    %667 = tpu.matmul %539, %666, %cst_502 {dimension_numbers = #tpu.dot_dimension_numbers<[1], [0], [0], [1], [0, 0, 1, 1], [], []>} : vector<17x32xbf16>, vector<32x8xbf16>, vector<17x8xf32> -> vector<17x8xf32>
    %c0_503 = arith.constant 0 : index
    %c2_504 = arith.constant 2 : index
    %c0_505 = arith.constant 0 : index
    %c0_506 = arith.constant 0 : index
    %668 = vector.load %arg30[%c0_503, %c2_504, %c0_505, %c0_506] : memref<2x4x1x8xf32, #tpu.memory_space<vmem>>, vector<1x1x1x8xf32>
    %669 = vector.shape_cast %668 : vector<1x1x1x8xf32> to vector<1x8xf32>
    %670 = vector.broadcast %669 : vector<1x8xf32> to vector<17x8xf32>
    %671 = arith.addf %667, %670 : vector<17x8xf32>
    %c0_507 = arith.constant 0 : index
    %c2_508 = arith.constant 2 : index
    %c0_509 = arith.constant 0 : index
    %c0_510 = arith.constant 0 : index
    %672 = vector.load %arg31[%c0_507, %c2_508, %c0_509, %c0_510] : memref<2x4x32x8xbf16, #tpu.memory_space<vmem>>, vector<1x1x32x8xbf16>
    %673 = vector.shape_cast %672 : vector<1x1x32x8xbf16> to vector<32x8xbf16>
    %cst_511 = arith.constant dense<0.000000e+00> : vector<17x8xf32>
    %674 = tpu.matmul %539, %673, %cst_511 {dimension_numbers = #tpu.dot_dimension_numbers<[1], [0], [0], [1], [0, 0, 1, 1], [], []>} : vector<17x32xbf16>, vector<32x8xbf16>, vector<17x8xf32> -> vector<17x8xf32>
    %c0_512 = arith.constant 0 : index
    %c2_513 = arith.constant 2 : index
    %c0_514 = arith.constant 0 : index
    %c0_515 = arith.constant 0 : index
    %675 = vector.load %arg32[%c0_512, %c2_513, %c0_514, %c0_515] : memref<2x4x1x8xf32, #tpu.memory_space<vmem>>, vector<1x1x1x8xf32>
    %676 = vector.shape_cast %675 : vector<1x1x1x8xf32> to vector<1x8xf32>
    %677 = vector.broadcast %676 : vector<1x8xf32> to vector<17x8xf32>
    %678 = arith.addf %674, %677 : vector<17x8xf32>
    %679 = arith.truncf %664 : vector<1x8xf32> to vector<1x8xbf16>
    %680 = arith.truncf %671 : vector<17x8xf32> to vector<17x8xbf16>
    %cst_516 = arith.constant dense<0.000000e+00> : vector<1x17xf32>
    %681 = tpu.matmul %679, %680, %cst_516 {dimension_numbers = #tpu.dot_dimension_numbers<[1], [1], [0], [0], [0, 0, 1, 0], [], []>} : vector<1x8xbf16>, vector<17x8xbf16>, vector<1x17xf32> -> vector<1x17xf32>
    %cst_517 = arith.constant dense<0xFF800000> : vector<1xf32>
    %682 = vector.multi_reduction <maximumf>, %681, %cst_517 [1] : vector<1x17xf32> to vector<1xf32>
    %683 = vector.shape_cast %682 : vector<1xf32> to vector<1x1xf32>
    %684 = vector.broadcast %683 : vector<1x1xf32> to vector<1x17xf32>
    %685 = arith.subf %681, %684 : vector<1x17xf32>
    %686 = math.exp %685 : vector<1x17xf32>
    %cst_518 = arith.constant dense<0.000000e+00> : vector<1xf32>
    %687 = vector.multi_reduction <add>, %686, %cst_518 [1] : vector<1x17xf32> to vector<1xf32>
    %688 = vector.shape_cast %687 : vector<1xf32> to vector<1x1xf32>
    %689 = tpu.reciprocal %688 {approx = true} : vector<1x1xf32> -> vector<1x1xf32>
    %690 = vector.broadcast %689 : vector<1x1xf32> to vector<1x17xf32>
    %691 = arith.mulf %686, %690 : vector<1x17xf32>
    %692 = arith.truncf %691 : vector<1x17xf32> to vector<1x17xbf16>
    %693 = arith.truncf %678 : vector<17x8xf32> to vector<17x8xbf16>
    %cst_519 = arith.constant dense<0.000000e+00> : vector<1x8xf32>
    %694 = tpu.matmul %692, %693, %cst_519 {dimension_numbers = #tpu.dot_dimension_numbers<[1], [0], [0], [1], [0, 0, 1, 1], [], []>} : vector<1x17xbf16>, vector<17x8xbf16>, vector<1x8xf32> -> vector<1x8xf32>
    %695 = arith.truncf %694 : vector<1x8xf32> to vector<1x8xbf16>
    %c0_520 = arith.constant 0 : index
    %c2_521 = arith.constant 2 : index
    %c0_522 = arith.constant 0 : index
    %c0_523 = arith.constant 0 : index
    %696 = vector.load %arg33[%c0_520, %c2_521, %c0_522, %c0_523] : memref<2x4x8x32xbf16, #tpu.memory_space<vmem>>, vector<1x1x8x32xbf16>
    %697 = vector.shape_cast %696 : vector<1x1x8x32xbf16> to vector<8x32xbf16>
    %cst_524 = arith.constant dense<0.000000e+00> : vector<1x32xf32>
    %698 = tpu.matmul %695, %697, %cst_524 {dimension_numbers = #tpu.dot_dimension_numbers<[1], [0], [0], [1], [0, 0, 1, 1], [], []>} : vector<1x8xbf16>, vector<8x32xbf16>, vector<1x32xf32> -> vector<1x32xf32>
    %699 = arith.addf %658, %698 : vector<1x32xf32>
    %c0_525 = arith.constant 0 : index
    %c3_526 = arith.constant 3 : index
    %c0_527 = arith.constant 0 : index
    %c0_528 = arith.constant 0 : index
    %700 = vector.load %arg27[%c0_525, %c3_526, %c0_527, %c0_528] : memref<2x4x32x8xbf16, #tpu.memory_space<vmem>>, vector<1x1x32x8xbf16>
    %701 = vector.shape_cast %700 : vector<1x1x32x8xbf16> to vector<32x8xbf16>
    %cst_529 = arith.constant dense<0.000000e+00> : vector<1x8xf32>
    %702 = tpu.matmul %577, %701, %cst_529 {dimension_numbers = #tpu.dot_dimension_numbers<[1], [0], [0], [1], [0, 0, 1, 1], [], []>} : vector<1x32xbf16>, vector<32x8xbf16>, vector<1x8xf32> -> vector<1x8xf32>
    %c0_530 = arith.constant 0 : index
    %c3_531 = arith.constant 3 : index
    %c0_532 = arith.constant 0 : index
    %c0_533 = arith.constant 0 : index
    %703 = vector.load %arg28[%c0_530, %c3_531, %c0_532, %c0_533] : memref<2x4x1x8xf32, #tpu.memory_space<vmem>>, vector<1x1x1x8xf32>
    %704 = vector.shape_cast %703 : vector<1x1x1x8xf32> to vector<1x8xf32>
    %705 = arith.addf %702, %704 : vector<1x8xf32>
    %c0_534 = arith.constant 0 : index
    %c3_535 = arith.constant 3 : index
    %c0_536 = arith.constant 0 : index
    %c0_537 = arith.constant 0 : index
    %706 = vector.load %arg29[%c0_534, %c3_535, %c0_536, %c0_537] : memref<2x4x32x8xbf16, #tpu.memory_space<vmem>>, vector<1x1x32x8xbf16>
    %707 = vector.shape_cast %706 : vector<1x1x32x8xbf16> to vector<32x8xbf16>
    %cst_538 = arith.constant dense<0.000000e+00> : vector<17x8xf32>
    %708 = tpu.matmul %539, %707, %cst_538 {dimension_numbers = #tpu.dot_dimension_numbers<[1], [0], [0], [1], [0, 0, 1, 1], [], []>} : vector<17x32xbf16>, vector<32x8xbf16>, vector<17x8xf32> -> vector<17x8xf32>
    %c0_539 = arith.constant 0 : index
    %c3_540 = arith.constant 3 : index
    %c0_541 = arith.constant 0 : index
    %c0_542 = arith.constant 0 : index
    %709 = vector.load %arg30[%c0_539, %c3_540, %c0_541, %c0_542] : memref<2x4x1x8xf32, #tpu.memory_space<vmem>>, vector<1x1x1x8xf32>
    %710 = vector.shape_cast %709 : vector<1x1x1x8xf32> to vector<1x8xf32>
    %711 = vector.broadcast %710 : vector<1x8xf32> to vector<17x8xf32>
    %712 = arith.addf %708, %711 : vector<17x8xf32>
    %c0_543 = arith.constant 0 : index
    %c3_544 = arith.constant 3 : index
    %c0_545 = arith.constant 0 : index
    %c0_546 = arith.constant 0 : index
    %713 = vector.load %arg31[%c0_543, %c3_544, %c0_545, %c0_546] : memref<2x4x32x8xbf16, #tpu.memory_space<vmem>>, vector<1x1x32x8xbf16>
    %714 = vector.shape_cast %713 : vector<1x1x32x8xbf16> to vector<32x8xbf16>
    %cst_547 = arith.constant dense<0.000000e+00> : vector<17x8xf32>
    %715 = tpu.matmul %539, %714, %cst_547 {dimension_numbers = #tpu.dot_dimension_numbers<[1], [0], [0], [1], [0, 0, 1, 1], [], []>} : vector<17x32xbf16>, vector<32x8xbf16>, vector<17x8xf32> -> vector<17x8xf32>
    %c0_548 = arith.constant 0 : index
    %c3_549 = arith.constant 3 : index
    %c0_550 = arith.constant 0 : index
    %c0_551 = arith.constant 0 : index
    %716 = vector.load %arg32[%c0_548, %c3_549, %c0_550, %c0_551] : memref<2x4x1x8xf32, #tpu.memory_space<vmem>>, vector<1x1x1x8xf32>
    %717 = vector.shape_cast %716 : vector<1x1x1x8xf32> to vector<1x8xf32>
    %718 = vector.broadcast %717 : vector<1x8xf32> to vector<17x8xf32>
    %719 = arith.addf %715, %718 : vector<17x8xf32>
    %720 = arith.truncf %705 : vector<1x8xf32> to vector<1x8xbf16>
    %721 = arith.truncf %712 : vector<17x8xf32> to vector<17x8xbf16>
    %cst_552 = arith.constant dense<0.000000e+00> : vector<1x17xf32>
    %722 = tpu.matmul %720, %721, %cst_552 {dimension_numbers = #tpu.dot_dimension_numbers<[1], [1], [0], [0], [0, 0, 1, 0], [], []>} : vector<1x8xbf16>, vector<17x8xbf16>, vector<1x17xf32> -> vector<1x17xf32>
    %cst_553 = arith.constant dense<0xFF800000> : vector<1xf32>
    %723 = vector.multi_reduction <maximumf>, %722, %cst_553 [1] : vector<1x17xf32> to vector<1xf32>
    %724 = vector.shape_cast %723 : vector<1xf32> to vector<1x1xf32>
    %725 = vector.broadcast %724 : vector<1x1xf32> to vector<1x17xf32>
    %726 = arith.subf %722, %725 : vector<1x17xf32>
    %727 = math.exp %726 : vector<1x17xf32>
    %cst_554 = arith.constant dense<0.000000e+00> : vector<1xf32>
    %728 = vector.multi_reduction <add>, %727, %cst_554 [1] : vector<1x17xf32> to vector<1xf32>
    %729 = vector.shape_cast %728 : vector<1xf32> to vector<1x1xf32>
    %730 = tpu.reciprocal %729 {approx = true} : vector<1x1xf32> -> vector<1x1xf32>
    %731 = vector.broadcast %730 : vector<1x1xf32> to vector<1x17xf32>
    %732 = arith.mulf %727, %731 : vector<1x17xf32>
    %733 = arith.truncf %732 : vector<1x17xf32> to vector<1x17xbf16>
    %734 = arith.truncf %719 : vector<17x8xf32> to vector<17x8xbf16>
    %cst_555 = arith.constant dense<0.000000e+00> : vector<1x8xf32>
    %735 = tpu.matmul %733, %734, %cst_555 {dimension_numbers = #tpu.dot_dimension_numbers<[1], [0], [0], [1], [0, 0, 1, 1], [], []>} : vector<1x17xbf16>, vector<17x8xbf16>, vector<1x8xf32> -> vector<1x8xf32>
    %736 = arith.truncf %735 : vector<1x8xf32> to vector<1x8xbf16>
    %c0_556 = arith.constant 0 : index
    %c3_557 = arith.constant 3 : index
    %c0_558 = arith.constant 0 : index
    %c0_559 = arith.constant 0 : index
    %737 = vector.load %arg33[%c0_556, %c3_557, %c0_558, %c0_559] : memref<2x4x8x32xbf16, #tpu.memory_space<vmem>>, vector<1x1x8x32xbf16>
    %738 = vector.shape_cast %737 : vector<1x1x8x32xbf16> to vector<8x32xbf16>
    %cst_560 = arith.constant dense<0.000000e+00> : vector<1x32xf32>
    %739 = tpu.matmul %736, %738, %cst_560 {dimension_numbers = #tpu.dot_dimension_numbers<[1], [0], [0], [1], [0, 0, 1, 1], [], []>} : vector<1x8xbf16>, vector<8x32xbf16>, vector<1x32xf32> -> vector<1x32xf32>
    %740 = arith.addf %699, %739 : vector<1x32xf32>
    %c0_561 = arith.constant 0 : index
    %c0_562 = arith.constant 0 : index
    %c0_563 = arith.constant 0 : index
    %741 = vector.load %arg34[%c0_561, %c0_562, %c0_563] : memref<2x1x32xf32, #tpu.memory_space<vmem>>, vector<1x1x32xf32>
    %742 = vector.shape_cast %741 : vector<1x1x32xf32> to vector<1x32xf32>
    %743 = arith.addf %740, %742 : vector<1x32xf32>
    %744 = arith.addf %576, %743 : vector<1x32xf32>
    %c0_564 = arith.constant 0 : index
    %c0_565 = arith.constant 0 : index
    %c0_566 = arith.constant 0 : index
    %745 = vector.load %arg37[%c0_564, %c0_565, %c0_566] : memref<2x1x32xf32, #tpu.memory_space<vmem>>, vector<1x1x32xf32>
    %746 = vector.shape_cast %745 : vector<1x1x32xf32> to vector<1x32xf32>
    %c0_567 = arith.constant 0 : index
    %c0_568 = arith.constant 0 : index
    %c0_569 = arith.constant 0 : index
    %747 = vector.load %arg38[%c0_567, %c0_568, %c0_569] : memref<2x1x32xf32, #tpu.memory_space<vmem>>, vector<1x1x32xf32>
    %748 = vector.shape_cast %747 : vector<1x1x32xf32> to vector<1x32xf32>
    %cst_570 = arith.constant dense<0.000000e+00> : vector<1xf32>
    %749 = vector.multi_reduction <add>, %744, %cst_570 [1] : vector<1x32xf32> to vector<1xf32>
    %750 = vector.shape_cast %749 : vector<1xf32> to vector<1x1xf32>
    %cst_571 = arith.constant 3.200000e+01 : f32
    %751 = vector.broadcast %cst_571 : f32 to vector<1x1xf32>
    %752 = arith.divf %750, %751 : vector<1x1xf32>
    %753 = vector.broadcast %752 : vector<1x1xf32> to vector<1x32xf32>
    %754 = arith.subf %744, %753 : vector<1x32xf32>
    %755 = arith.mulf %754, %754 : vector<1x32xf32>
    %cst_572 = arith.constant dense<0.000000e+00> : vector<1xf32>
    %756 = vector.multi_reduction <add>, %755, %cst_572 [1] : vector<1x32xf32> to vector<1xf32>
    %757 = vector.shape_cast %756 : vector<1xf32> to vector<1x1xf32>
    %cst_573 = arith.constant 3.200000e+01 : f32
    %758 = vector.broadcast %cst_573 : f32 to vector<1x1xf32>
    %759 = arith.divf %757, %758 : vector<1x1xf32>
    %cst_574 = arith.constant 9.99999974E-6 : f32
    %760 = vector.broadcast %cst_574 : f32 to vector<1x1xf32>
    %761 = arith.addf %759, %760 : vector<1x1xf32>
    %762 = math.rsqrt %761 : vector<1x1xf32>
    %763 = vector.broadcast %762 : vector<1x1xf32> to vector<1x32xf32>
    %764 = arith.mulf %754, %763 : vector<1x32xf32>
    %765 = arith.mulf %764, %746 : vector<1x32xf32>
    %766 = arith.addf %765, %748 : vector<1x32xf32>
    %c0_575 = arith.constant 0 : index
    %c0_576 = arith.constant 0 : index
    %c0_577 = arith.constant 0 : index
    %767 = vector.load %arg41[%c0_575, %c0_576, %c0_577] : memref<2x32x64xbf16, #tpu.memory_space<vmem>>, vector<1x32x64xbf16>
    %768 = vector.shape_cast %767 : vector<1x32x64xbf16> to vector<32x64xbf16>
    %769 = arith.truncf %766 : vector<1x32xf32> to vector<1x32xbf16>
    %cst_578 = arith.constant dense<0.000000e+00> : vector<1x64xf32>
    %770 = tpu.matmul %769, %768, %cst_578 {dimension_numbers = #tpu.dot_dimension_numbers<[1], [0], [0], [1], [0, 0, 1, 1], [], []>} : vector<1x32xbf16>, vector<32x64xbf16>, vector<1x64xf32> -> vector<1x64xf32>
    %c0_579 = arith.constant 0 : index
    %c0_580 = arith.constant 0 : index
    %c0_581 = arith.constant 0 : index
    %771 = vector.load %arg42[%c0_579, %c0_580, %c0_581] : memref<2x1x64xf32, #tpu.memory_space<vmem>>, vector<1x1x64xf32>
    %772 = vector.shape_cast %771 : vector<1x1x64xf32> to vector<1x64xf32>
    %773 = arith.addf %770, %772 : vector<1x64xf32>
    %cst_582 = arith.constant 0.000000e+00 : f32
    %774 = vector.broadcast %cst_582 : f32 to vector<1x64xf32>
    %775 = arith.maximumf %773, %774 : vector<1x64xf32>
    %c0_583 = arith.constant 0 : index
    %c0_584 = arith.constant 0 : index
    %c0_585 = arith.constant 0 : index
    %776 = vector.load %arg43[%c0_583, %c0_584, %c0_585] : memref<2x64x32xbf16, #tpu.memory_space<vmem>>, vector<1x64x32xbf16>
    %777 = vector.shape_cast %776 : vector<1x64x32xbf16> to vector<64x32xbf16>
    %778 = arith.truncf %775 : vector<1x64xf32> to vector<1x64xbf16>
    %cst_586 = arith.constant dense<0.000000e+00> : vector<1x32xf32>
    %779 = tpu.matmul %778, %777, %cst_586 {dimension_numbers = #tpu.dot_dimension_numbers<[1], [0], [0], [1], [0, 0, 1, 1], [], []>} : vector<1x64xbf16>, vector<64x32xbf16>, vector<1x32xf32> -> vector<1x32xf32>
    %c0_587 = arith.constant 0 : index
    %c0_588 = arith.constant 0 : index
    %c0_589 = arith.constant 0 : index
    %780 = vector.load %arg44[%c0_587, %c0_588, %c0_589] : memref<2x1x32xf32, #tpu.memory_space<vmem>>, vector<1x1x32xf32>
    %781 = vector.shape_cast %780 : vector<1x1x32xf32> to vector<1x32xf32>
    %782 = arith.addf %779, %781 : vector<1x32xf32>
    %783 = arith.addf %766, %782 : vector<1x32xf32>
    %c0_590 = arith.constant 0 : index
    %c0_591 = arith.constant 0 : index
    %c0_592 = arith.constant 0 : index
    %784 = vector.load %arg39[%c0_590, %c0_591, %c0_592] : memref<2x1x32xf32, #tpu.memory_space<vmem>>, vector<1x1x32xf32>
    %785 = vector.shape_cast %784 : vector<1x1x32xf32> to vector<1x32xf32>
    %c0_593 = arith.constant 0 : index
    %c0_594 = arith.constant 0 : index
    %c0_595 = arith.constant 0 : index
    %786 = vector.load %arg40[%c0_593, %c0_594, %c0_595] : memref<2x1x32xf32, #tpu.memory_space<vmem>>, vector<1x1x32xf32>
    %787 = vector.shape_cast %786 : vector<1x1x32xf32> to vector<1x32xf32>
    %cst_596 = arith.constant dense<0.000000e+00> : vector<1xf32>
    %788 = vector.multi_reduction <add>, %783, %cst_596 [1] : vector<1x32xf32> to vector<1xf32>
    %789 = vector.shape_cast %788 : vector<1xf32> to vector<1x1xf32>
    %cst_597 = arith.constant 3.200000e+01 : f32
    %790 = vector.broadcast %cst_597 : f32 to vector<1x1xf32>
    %791 = arith.divf %789, %790 : vector<1x1xf32>
    %792 = vector.broadcast %791 : vector<1x1xf32> to vector<1x32xf32>
    %793 = arith.subf %783, %792 : vector<1x32xf32>
    %794 = arith.mulf %793, %793 : vector<1x32xf32>
    %cst_598 = arith.constant dense<0.000000e+00> : vector<1xf32>
    %795 = vector.multi_reduction <add>, %794, %cst_598 [1] : vector<1x32xf32> to vector<1xf32>
    %796 = vector.shape_cast %795 : vector<1xf32> to vector<1x1xf32>
    %cst_599 = arith.constant 3.200000e+01 : f32
    %797 = vector.broadcast %cst_599 : f32 to vector<1x1xf32>
    %798 = arith.divf %796, %797 : vector<1x1xf32>
    %cst_600 = arith.constant 9.99999974E-6 : f32
    %799 = vector.broadcast %cst_600 : f32 to vector<1x1xf32>
    %800 = arith.addf %798, %799 : vector<1x1xf32>
    %801 = math.rsqrt %800 : vector<1x1xf32>
    %802 = vector.broadcast %801 : vector<1x1xf32> to vector<1x32xf32>
    %803 = arith.mulf %793, %802 : vector<1x32xf32>
    %804 = arith.mulf %803, %785 : vector<1x32xf32>
    %805 = arith.addf %804, %787 : vector<1x32xf32>
    %c1_601 = arith.constant 1 : index
    %c0_602 = arith.constant 0 : index
    %c0_603 = arith.constant 0 : index
    %806 = vector.load %arg23[%c1_601, %c0_602, %c0_603] : memref<2x32x32xbf16, #tpu.memory_space<vmem>>, vector<1x32x32xbf16>
    %807 = vector.shape_cast %806 : vector<1x32x32xbf16> to vector<32x32xbf16>
    %808 = arith.truncf %805 : vector<1x32xf32> to vector<1x32xbf16>
    %cst_604 = arith.constant dense<0.000000e+00> : vector<1x32xf32>
    %809 = tpu.matmul %808, %807, %cst_604 {dimension_numbers = #tpu.dot_dimension_numbers<[1], [0], [0], [1], [0, 0, 1, 1], [], []>} : vector<1x32xbf16>, vector<32x32xbf16>, vector<1x32xf32> -> vector<1x32xf32>
    %c1_605 = arith.constant 1 : index
    %c0_606 = arith.constant 0 : index
    %c0_607 = arith.constant 0 : index
    %810 = vector.load %arg24[%c1_605, %c0_606, %c0_607] : memref<2x1x32xf32, #tpu.memory_space<vmem>>, vector<1x1x32xf32>
    %811 = vector.shape_cast %810 : vector<1x1x32xf32> to vector<1x32xf32>
    %812 = arith.addf %809, %811 : vector<1x32xf32>
    %c1_608 = arith.constant 1 : index
    %c0_609 = arith.constant 0 : index
    %c0_610 = arith.constant 0 : index
    %813 = vector.load %arg25[%c1_608, %c0_609, %c0_610] : memref<2x32x32xbf16, #tpu.memory_space<vmem>>, vector<1x32x32xbf16>
    %814 = vector.shape_cast %813 : vector<1x32x32xbf16> to vector<32x32xbf16>
    %815 = arith.truncf %812 : vector<1x32xf32> to vector<1x32xbf16>
    %cst_611 = arith.constant dense<0.000000e+00> : vector<1x32xf32>
    %816 = tpu.matmul %815, %814, %cst_611 {dimension_numbers = #tpu.dot_dimension_numbers<[1], [0], [0], [1], [0, 0, 1, 1], [], []>} : vector<1x32xbf16>, vector<32x32xbf16>, vector<1x32xf32> -> vector<1x32xf32>
    %c1_612 = arith.constant 1 : index
    %c0_613 = arith.constant 0 : index
    %c0_614 = arith.constant 0 : index
    %817 = vector.load %arg26[%c1_612, %c0_613, %c0_614] : memref<2x1x32xf32, #tpu.memory_space<vmem>>, vector<1x1x32xf32>
    %818 = vector.shape_cast %817 : vector<1x1x32xf32> to vector<1x32xf32>
    %819 = arith.addf %816, %818 : vector<1x32xf32>
    %820 = arith.addf %805, %819 : vector<1x32xf32>
    %c1_615 = arith.constant 1 : index
    %c0_616 = arith.constant 0 : index
    %c0_617 = arith.constant 0 : index
    %821 = vector.load %arg35[%c1_615, %c0_616, %c0_617] : memref<2x1x32xf32, #tpu.memory_space<vmem>>, vector<1x1x32xf32>
    %822 = vector.shape_cast %821 : vector<1x1x32xf32> to vector<1x32xf32>
    %c1_618 = arith.constant 1 : index
    %c0_619 = arith.constant 0 : index
    %c0_620 = arith.constant 0 : index
    %823 = vector.load %arg36[%c1_618, %c0_619, %c0_620] : memref<2x1x32xf32, #tpu.memory_space<vmem>>, vector<1x1x32xf32>
    %824 = vector.shape_cast %823 : vector<1x1x32xf32> to vector<1x32xf32>
    %cst_621 = arith.constant dense<0.000000e+00> : vector<1xf32>
    %825 = vector.multi_reduction <add>, %820, %cst_621 [1] : vector<1x32xf32> to vector<1xf32>
    %826 = vector.shape_cast %825 : vector<1xf32> to vector<1x1xf32>
    %cst_622 = arith.constant 3.200000e+01 : f32
    %827 = vector.broadcast %cst_622 : f32 to vector<1x1xf32>
    %828 = arith.divf %826, %827 : vector<1x1xf32>
    %829 = vector.broadcast %828 : vector<1x1xf32> to vector<1x32xf32>
    %830 = arith.subf %820, %829 : vector<1x32xf32>
    %831 = arith.mulf %830, %830 : vector<1x32xf32>
    %cst_623 = arith.constant dense<0.000000e+00> : vector<1xf32>
    %832 = vector.multi_reduction <add>, %831, %cst_623 [1] : vector<1x32xf32> to vector<1xf32>
    %833 = vector.shape_cast %832 : vector<1xf32> to vector<1x1xf32>
    %cst_624 = arith.constant 3.200000e+01 : f32
    %834 = vector.broadcast %cst_624 : f32 to vector<1x1xf32>
    %835 = arith.divf %833, %834 : vector<1x1xf32>
    %cst_625 = arith.constant 9.99999974E-6 : f32
    %836 = vector.broadcast %cst_625 : f32 to vector<1x1xf32>
    %837 = arith.addf %835, %836 : vector<1x1xf32>
    %838 = math.rsqrt %837 : vector<1x1xf32>
    %839 = vector.broadcast %838 : vector<1x1xf32> to vector<1x32xf32>
    %840 = arith.mulf %830, %839 : vector<1x32xf32>
    %841 = arith.mulf %840, %822 : vector<1x32xf32>
    %842 = arith.addf %841, %824 : vector<1x32xf32>
    %843 = arith.truncf %842 : vector<1x32xf32> to vector<1x32xbf16>
    %c1_626 = arith.constant 1 : index
    %c0_627 = arith.constant 0 : index
    %c0_628 = arith.constant 0 : index
    %c0_629 = arith.constant 0 : index
    %844 = vector.load %arg27[%c1_626, %c0_627, %c0_628, %c0_629] : memref<2x4x32x8xbf16, #tpu.memory_space<vmem>>, vector<1x1x32x8xbf16>
    %845 = vector.shape_cast %844 : vector<1x1x32x8xbf16> to vector<32x8xbf16>
    %cst_630 = arith.constant dense<0.000000e+00> : vector<1x8xf32>
    %846 = tpu.matmul %843, %845, %cst_630 {dimension_numbers = #tpu.dot_dimension_numbers<[1], [0], [0], [1], [0, 0, 1, 1], [], []>} : vector<1x32xbf16>, vector<32x8xbf16>, vector<1x8xf32> -> vector<1x8xf32>
    %c1_631 = arith.constant 1 : index
    %c0_632 = arith.constant 0 : index
    %c0_633 = arith.constant 0 : index
    %c0_634 = arith.constant 0 : index
    %847 = vector.load %arg28[%c1_631, %c0_632, %c0_633, %c0_634] : memref<2x4x1x8xf32, #tpu.memory_space<vmem>>, vector<1x1x1x8xf32>
    %848 = vector.shape_cast %847 : vector<1x1x1x8xf32> to vector<1x8xf32>
    %849 = arith.addf %846, %848 : vector<1x8xf32>
    %c1_635 = arith.constant 1 : index
    %c0_636 = arith.constant 0 : index
    %c0_637 = arith.constant 0 : index
    %c0_638 = arith.constant 0 : index
    %850 = vector.load %arg29[%c1_635, %c0_636, %c0_637, %c0_638] : memref<2x4x32x8xbf16, #tpu.memory_space<vmem>>, vector<1x1x32x8xbf16>
    %851 = vector.shape_cast %850 : vector<1x1x32x8xbf16> to vector<32x8xbf16>
    %cst_639 = arith.constant dense<0.000000e+00> : vector<17x8xf32>
    %852 = tpu.matmul %539, %851, %cst_639 {dimension_numbers = #tpu.dot_dimension_numbers<[1], [0], [0], [1], [0, 0, 1, 1], [], []>} : vector<17x32xbf16>, vector<32x8xbf16>, vector<17x8xf32> -> vector<17x8xf32>
    %c1_640 = arith.constant 1 : index
    %c0_641 = arith.constant 0 : index
    %c0_642 = arith.constant 0 : index
    %c0_643 = arith.constant 0 : index
    %853 = vector.load %arg30[%c1_640, %c0_641, %c0_642, %c0_643] : memref<2x4x1x8xf32, #tpu.memory_space<vmem>>, vector<1x1x1x8xf32>
    %854 = vector.shape_cast %853 : vector<1x1x1x8xf32> to vector<1x8xf32>
    %855 = vector.broadcast %854 : vector<1x8xf32> to vector<17x8xf32>
    %856 = arith.addf %852, %855 : vector<17x8xf32>
    %c1_644 = arith.constant 1 : index
    %c0_645 = arith.constant 0 : index
    %c0_646 = arith.constant 0 : index
    %c0_647 = arith.constant 0 : index
    %857 = vector.load %arg31[%c1_644, %c0_645, %c0_646, %c0_647] : memref<2x4x32x8xbf16, #tpu.memory_space<vmem>>, vector<1x1x32x8xbf16>
    %858 = vector.shape_cast %857 : vector<1x1x32x8xbf16> to vector<32x8xbf16>
    %cst_648 = arith.constant dense<0.000000e+00> : vector<17x8xf32>
    %859 = tpu.matmul %539, %858, %cst_648 {dimension_numbers = #tpu.dot_dimension_numbers<[1], [0], [0], [1], [0, 0, 1, 1], [], []>} : vector<17x32xbf16>, vector<32x8xbf16>, vector<17x8xf32> -> vector<17x8xf32>
    %c1_649 = arith.constant 1 : index
    %c0_650 = arith.constant 0 : index
    %c0_651 = arith.constant 0 : index
    %c0_652 = arith.constant 0 : index
    %860 = vector.load %arg32[%c1_649, %c0_650, %c0_651, %c0_652] : memref<2x4x1x8xf32, #tpu.memory_space<vmem>>, vector<1x1x1x8xf32>
    %861 = vector.shape_cast %860 : vector<1x1x1x8xf32> to vector<1x8xf32>
    %862 = vector.broadcast %861 : vector<1x8xf32> to vector<17x8xf32>
    %863 = arith.addf %859, %862 : vector<17x8xf32>
    %864 = arith.truncf %849 : vector<1x8xf32> to vector<1x8xbf16>
    %865 = arith.truncf %856 : vector<17x8xf32> to vector<17x8xbf16>
    %cst_653 = arith.constant dense<0.000000e+00> : vector<1x17xf32>
    %866 = tpu.matmul %864, %865, %cst_653 {dimension_numbers = #tpu.dot_dimension_numbers<[1], [1], [0], [0], [0, 0, 1, 0], [], []>} : vector<1x8xbf16>, vector<17x8xbf16>, vector<1x17xf32> -> vector<1x17xf32>
    %cst_654 = arith.constant dense<0xFF800000> : vector<1xf32>
    %867 = vector.multi_reduction <maximumf>, %866, %cst_654 [1] : vector<1x17xf32> to vector<1xf32>
    %868 = vector.shape_cast %867 : vector<1xf32> to vector<1x1xf32>
    %869 = vector.broadcast %868 : vector<1x1xf32> to vector<1x17xf32>
    %870 = arith.subf %866, %869 : vector<1x17xf32>
    %871 = math.exp %870 : vector<1x17xf32>
    %cst_655 = arith.constant dense<0.000000e+00> : vector<1xf32>
    %872 = vector.multi_reduction <add>, %871, %cst_655 [1] : vector<1x17xf32> to vector<1xf32>
    %873 = vector.shape_cast %872 : vector<1xf32> to vector<1x1xf32>
    %874 = tpu.reciprocal %873 {approx = true} : vector<1x1xf32> -> vector<1x1xf32>
    %875 = vector.broadcast %874 : vector<1x1xf32> to vector<1x17xf32>
    %876 = arith.mulf %871, %875 : vector<1x17xf32>
    %877 = arith.truncf %876 : vector<1x17xf32> to vector<1x17xbf16>
    %878 = arith.truncf %863 : vector<17x8xf32> to vector<17x8xbf16>
    %cst_656 = arith.constant dense<0.000000e+00> : vector<1x8xf32>
    %879 = tpu.matmul %877, %878, %cst_656 {dimension_numbers = #tpu.dot_dimension_numbers<[1], [0], [0], [1], [0, 0, 1, 1], [], []>} : vector<1x17xbf16>, vector<17x8xbf16>, vector<1x8xf32> -> vector<1x8xf32>
    %880 = arith.truncf %879 : vector<1x8xf32> to vector<1x8xbf16>
    %c1_657 = arith.constant 1 : index
    %c0_658 = arith.constant 0 : index
    %c0_659 = arith.constant 0 : index
    %c0_660 = arith.constant 0 : index
    %881 = vector.load %arg33[%c1_657, %c0_658, %c0_659, %c0_660] : memref<2x4x8x32xbf16, #tpu.memory_space<vmem>>, vector<1x1x8x32xbf16>
    %882 = vector.shape_cast %881 : vector<1x1x8x32xbf16> to vector<8x32xbf16>
    %cst_661 = arith.constant dense<0.000000e+00> : vector<1x32xf32>
    %883 = tpu.matmul %880, %882, %cst_661 {dimension_numbers = #tpu.dot_dimension_numbers<[1], [0], [0], [1], [0, 0, 1, 1], [], []>} : vector<1x8xbf16>, vector<8x32xbf16>, vector<1x32xf32> -> vector<1x32xf32>
    %c1_662 = arith.constant 1 : index
    %c1_663 = arith.constant 1 : index
    %c0_664 = arith.constant 0 : index
    %c0_665 = arith.constant 0 : index
    %884 = vector.load %arg27[%c1_662, %c1_663, %c0_664, %c0_665] : memref<2x4x32x8xbf16, #tpu.memory_space<vmem>>, vector<1x1x32x8xbf16>
    %885 = vector.shape_cast %884 : vector<1x1x32x8xbf16> to vector<32x8xbf16>
    %cst_666 = arith.constant dense<0.000000e+00> : vector<1x8xf32>
    %886 = tpu.matmul %843, %885, %cst_666 {dimension_numbers = #tpu.dot_dimension_numbers<[1], [0], [0], [1], [0, 0, 1, 1], [], []>} : vector<1x32xbf16>, vector<32x8xbf16>, vector<1x8xf32> -> vector<1x8xf32>
    %c1_667 = arith.constant 1 : index
    %c1_668 = arith.constant 1 : index
    %c0_669 = arith.constant 0 : index
    %c0_670 = arith.constant 0 : index
    %887 = vector.load %arg28[%c1_667, %c1_668, %c0_669, %c0_670] : memref<2x4x1x8xf32, #tpu.memory_space<vmem>>, vector<1x1x1x8xf32>
    %888 = vector.shape_cast %887 : vector<1x1x1x8xf32> to vector<1x8xf32>
    %889 = arith.addf %886, %888 : vector<1x8xf32>
    %c1_671 = arith.constant 1 : index
    %c1_672 = arith.constant 1 : index
    %c0_673 = arith.constant 0 : index
    %c0_674 = arith.constant 0 : index
    %890 = vector.load %arg29[%c1_671, %c1_672, %c0_673, %c0_674] : memref<2x4x32x8xbf16, #tpu.memory_space<vmem>>, vector<1x1x32x8xbf16>
    %891 = vector.shape_cast %890 : vector<1x1x32x8xbf16> to vector<32x8xbf16>
    %cst_675 = arith.constant dense<0.000000e+00> : vector<17x8xf32>
    %892 = tpu.matmul %539, %891, %cst_675 {dimension_numbers = #tpu.dot_dimension_numbers<[1], [0], [0], [1], [0, 0, 1, 1], [], []>} : vector<17x32xbf16>, vector<32x8xbf16>, vector<17x8xf32> -> vector<17x8xf32>
    %c1_676 = arith.constant 1 : index
    %c1_677 = arith.constant 1 : index
    %c0_678 = arith.constant 0 : index
    %c0_679 = arith.constant 0 : index
    %893 = vector.load %arg30[%c1_676, %c1_677, %c0_678, %c0_679] : memref<2x4x1x8xf32, #tpu.memory_space<vmem>>, vector<1x1x1x8xf32>
    %894 = vector.shape_cast %893 : vector<1x1x1x8xf32> to vector<1x8xf32>
    %895 = vector.broadcast %894 : vector<1x8xf32> to vector<17x8xf32>
    %896 = arith.addf %892, %895 : vector<17x8xf32>
    %c1_680 = arith.constant 1 : index
    %c1_681 = arith.constant 1 : index
    %c0_682 = arith.constant 0 : index
    %c0_683 = arith.constant 0 : index
    %897 = vector.load %arg31[%c1_680, %c1_681, %c0_682, %c0_683] : memref<2x4x32x8xbf16, #tpu.memory_space<vmem>>, vector<1x1x32x8xbf16>
    %898 = vector.shape_cast %897 : vector<1x1x32x8xbf16> to vector<32x8xbf16>
    %cst_684 = arith.constant dense<0.000000e+00> : vector<17x8xf32>
    %899 = tpu.matmul %539, %898, %cst_684 {dimension_numbers = #tpu.dot_dimension_numbers<[1], [0], [0], [1], [0, 0, 1, 1], [], []>} : vector<17x32xbf16>, vector<32x8xbf16>, vector<17x8xf32> -> vector<17x8xf32>
    %c1_685 = arith.constant 1 : index
    %c1_686 = arith.constant 1 : index
    %c0_687 = arith.constant 0 : index
    %c0_688 = arith.constant 0 : index
    %900 = vector.load %arg32[%c1_685, %c1_686, %c0_687, %c0_688] : memref<2x4x1x8xf32, #tpu.memory_space<vmem>>, vector<1x1x1x8xf32>
    %901 = vector.shape_cast %900 : vector<1x1x1x8xf32> to vector<1x8xf32>
    %902 = vector.broadcast %901 : vector<1x8xf32> to vector<17x8xf32>
    %903 = arith.addf %899, %902 : vector<17x8xf32>
    %904 = arith.truncf %889 : vector<1x8xf32> to vector<1x8xbf16>
    %905 = arith.truncf %896 : vector<17x8xf32> to vector<17x8xbf16>
    %cst_689 = arith.constant dense<0.000000e+00> : vector<1x17xf32>
    %906 = tpu.matmul %904, %905, %cst_689 {dimension_numbers = #tpu.dot_dimension_numbers<[1], [1], [0], [0], [0, 0, 1, 0], [], []>} : vector<1x8xbf16>, vector<17x8xbf16>, vector<1x17xf32> -> vector<1x17xf32>
    %cst_690 = arith.constant dense<0xFF800000> : vector<1xf32>
    %907 = vector.multi_reduction <maximumf>, %906, %cst_690 [1] : vector<1x17xf32> to vector<1xf32>
    %908 = vector.shape_cast %907 : vector<1xf32> to vector<1x1xf32>
    %909 = vector.broadcast %908 : vector<1x1xf32> to vector<1x17xf32>
    %910 = arith.subf %906, %909 : vector<1x17xf32>
    %911 = math.exp %910 : vector<1x17xf32>
    %cst_691 = arith.constant dense<0.000000e+00> : vector<1xf32>
    %912 = vector.multi_reduction <add>, %911, %cst_691 [1] : vector<1x17xf32> to vector<1xf32>
    %913 = vector.shape_cast %912 : vector<1xf32> to vector<1x1xf32>
    %914 = tpu.reciprocal %913 {approx = true} : vector<1x1xf32> -> vector<1x1xf32>
    %915 = vector.broadcast %914 : vector<1x1xf32> to vector<1x17xf32>
    %916 = arith.mulf %911, %915 : vector<1x17xf32>
    %917 = arith.truncf %916 : vector<1x17xf32> to vector<1x17xbf16>
    %918 = arith.truncf %903 : vector<17x8xf32> to vector<17x8xbf16>
    %cst_692 = arith.constant dense<0.000000e+00> : vector<1x8xf32>
    %919 = tpu.matmul %917, %918, %cst_692 {dimension_numbers = #tpu.dot_dimension_numbers<[1], [0], [0], [1], [0, 0, 1, 1], [], []>} : vector<1x17xbf16>, vector<17x8xbf16>, vector<1x8xf32> -> vector<1x8xf32>
    %920 = arith.truncf %919 : vector<1x8xf32> to vector<1x8xbf16>
    %c1_693 = arith.constant 1 : index
    %c1_694 = arith.constant 1 : index
    %c0_695 = arith.constant 0 : index
    %c0_696 = arith.constant 0 : index
    %921 = vector.load %arg33[%c1_693, %c1_694, %c0_695, %c0_696] : memref<2x4x8x32xbf16, #tpu.memory_space<vmem>>, vector<1x1x8x32xbf16>
    %922 = vector.shape_cast %921 : vector<1x1x8x32xbf16> to vector<8x32xbf16>
    %cst_697 = arith.constant dense<0.000000e+00> : vector<1x32xf32>
    %923 = tpu.matmul %920, %922, %cst_697 {dimension_numbers = #tpu.dot_dimension_numbers<[1], [0], [0], [1], [0, 0, 1, 1], [], []>} : vector<1x8xbf16>, vector<8x32xbf16>, vector<1x32xf32> -> vector<1x32xf32>
    %924 = arith.addf %883, %923 : vector<1x32xf32>
    %c1_698 = arith.constant 1 : index
    %c2_699 = arith.constant 2 : index
    %c0_700 = arith.constant 0 : index
    %c0_701 = arith.constant 0 : index
    %925 = vector.load %arg27[%c1_698, %c2_699, %c0_700, %c0_701] : memref<2x4x32x8xbf16, #tpu.memory_space<vmem>>, vector<1x1x32x8xbf16>
    %926 = vector.shape_cast %925 : vector<1x1x32x8xbf16> to vector<32x8xbf16>
    %cst_702 = arith.constant dense<0.000000e+00> : vector<1x8xf32>
    %927 = tpu.matmul %843, %926, %cst_702 {dimension_numbers = #tpu.dot_dimension_numbers<[1], [0], [0], [1], [0, 0, 1, 1], [], []>} : vector<1x32xbf16>, vector<32x8xbf16>, vector<1x8xf32> -> vector<1x8xf32>
    %c1_703 = arith.constant 1 : index
    %c2_704 = arith.constant 2 : index
    %c0_705 = arith.constant 0 : index
    %c0_706 = arith.constant 0 : index
    %928 = vector.load %arg28[%c1_703, %c2_704, %c0_705, %c0_706] : memref<2x4x1x8xf32, #tpu.memory_space<vmem>>, vector<1x1x1x8xf32>
    %929 = vector.shape_cast %928 : vector<1x1x1x8xf32> to vector<1x8xf32>
    %930 = arith.addf %927, %929 : vector<1x8xf32>
    %c1_707 = arith.constant 1 : index
    %c2_708 = arith.constant 2 : index
    %c0_709 = arith.constant 0 : index
    %c0_710 = arith.constant 0 : index
    %931 = vector.load %arg29[%c1_707, %c2_708, %c0_709, %c0_710] : memref<2x4x32x8xbf16, #tpu.memory_space<vmem>>, vector<1x1x32x8xbf16>
    %932 = vector.shape_cast %931 : vector<1x1x32x8xbf16> to vector<32x8xbf16>
    %cst_711 = arith.constant dense<0.000000e+00> : vector<17x8xf32>
    %933 = tpu.matmul %539, %932, %cst_711 {dimension_numbers = #tpu.dot_dimension_numbers<[1], [0], [0], [1], [0, 0, 1, 1], [], []>} : vector<17x32xbf16>, vector<32x8xbf16>, vector<17x8xf32> -> vector<17x8xf32>
    %c1_712 = arith.constant 1 : index
    %c2_713 = arith.constant 2 : index
    %c0_714 = arith.constant 0 : index
    %c0_715 = arith.constant 0 : index
    %934 = vector.load %arg30[%c1_712, %c2_713, %c0_714, %c0_715] : memref<2x4x1x8xf32, #tpu.memory_space<vmem>>, vector<1x1x1x8xf32>
    %935 = vector.shape_cast %934 : vector<1x1x1x8xf32> to vector<1x8xf32>
    %936 = vector.broadcast %935 : vector<1x8xf32> to vector<17x8xf32>
    %937 = arith.addf %933, %936 : vector<17x8xf32>
    %c1_716 = arith.constant 1 : index
    %c2_717 = arith.constant 2 : index
    %c0_718 = arith.constant 0 : index
    %c0_719 = arith.constant 0 : index
    %938 = vector.load %arg31[%c1_716, %c2_717, %c0_718, %c0_719] : memref<2x4x32x8xbf16, #tpu.memory_space<vmem>>, vector<1x1x32x8xbf16>
    %939 = vector.shape_cast %938 : vector<1x1x32x8xbf16> to vector<32x8xbf16>
    %cst_720 = arith.constant dense<0.000000e+00> : vector<17x8xf32>
    %940 = tpu.matmul %539, %939, %cst_720 {dimension_numbers = #tpu.dot_dimension_numbers<[1], [0], [0], [1], [0, 0, 1, 1], [], []>} : vector<17x32xbf16>, vector<32x8xbf16>, vector<17x8xf32> -> vector<17x8xf32>
    %c1_721 = arith.constant 1 : index
    %c2_722 = arith.constant 2 : index
    %c0_723 = arith.constant 0 : index
    %c0_724 = arith.constant 0 : index
    %941 = vector.load %arg32[%c1_721, %c2_722, %c0_723, %c0_724] : memref<2x4x1x8xf32, #tpu.memory_space<vmem>>, vector<1x1x1x8xf32>
    %942 = vector.shape_cast %941 : vector<1x1x1x8xf32> to vector<1x8xf32>
    %943 = vector.broadcast %942 : vector<1x8xf32> to vector<17x8xf32>
    %944 = arith.addf %940, %943 : vector<17x8xf32>
    %945 = arith.truncf %930 : vector<1x8xf32> to vector<1x8xbf16>
    %946 = arith.truncf %937 : vector<17x8xf32> to vector<17x8xbf16>
    %cst_725 = arith.constant dense<0.000000e+00> : vector<1x17xf32>
    %947 = tpu.matmul %945, %946, %cst_725 {dimension_numbers = #tpu.dot_dimension_numbers<[1], [1], [0], [0], [0, 0, 1, 0], [], []>} : vector<1x8xbf16>, vector<17x8xbf16>, vector<1x17xf32> -> vector<1x17xf32>
    %cst_726 = arith.constant dense<0xFF800000> : vector<1xf32>
    %948 = vector.multi_reduction <maximumf>, %947, %cst_726 [1] : vector<1x17xf32> to vector<1xf32>
    %949 = vector.shape_cast %948 : vector<1xf32> to vector<1x1xf32>
    %950 = vector.broadcast %949 : vector<1x1xf32> to vector<1x17xf32>
    %951 = arith.subf %947, %950 : vector<1x17xf32>
    %952 = math.exp %951 : vector<1x17xf32>
    %cst_727 = arith.constant dense<0.000000e+00> : vector<1xf32>
    %953 = vector.multi_reduction <add>, %952, %cst_727 [1] : vector<1x17xf32> to vector<1xf32>
    %954 = vector.shape_cast %953 : vector<1xf32> to vector<1x1xf32>
    %955 = tpu.reciprocal %954 {approx = true} : vector<1x1xf32> -> vector<1x1xf32>
    %956 = vector.broadcast %955 : vector<1x1xf32> to vector<1x17xf32>
    %957 = arith.mulf %952, %956 : vector<1x17xf32>
    %958 = arith.truncf %957 : vector<1x17xf32> to vector<1x17xbf16>
    %959 = arith.truncf %944 : vector<17x8xf32> to vector<17x8xbf16>
    %cst_728 = arith.constant dense<0.000000e+00> : vector<1x8xf32>
    %960 = tpu.matmul %958, %959, %cst_728 {dimension_numbers = #tpu.dot_dimension_numbers<[1], [0], [0], [1], [0, 0, 1, 1], [], []>} : vector<1x17xbf16>, vector<17x8xbf16>, vector<1x8xf32> -> vector<1x8xf32>
    %961 = arith.truncf %960 : vector<1x8xf32> to vector<1x8xbf16>
    %c1_729 = arith.constant 1 : index
    %c2_730 = arith.constant 2 : index
    %c0_731 = arith.constant 0 : index
    %c0_732 = arith.constant 0 : index
    %962 = vector.load %arg33[%c1_729, %c2_730, %c0_731, %c0_732] : memref<2x4x8x32xbf16, #tpu.memory_space<vmem>>, vector<1x1x8x32xbf16>
    %963 = vector.shape_cast %962 : vector<1x1x8x32xbf16> to vector<8x32xbf16>
    %cst_733 = arith.constant dense<0.000000e+00> : vector<1x32xf32>
    %964 = tpu.matmul %961, %963, %cst_733 {dimension_numbers = #tpu.dot_dimension_numbers<[1], [0], [0], [1], [0, 0, 1, 1], [], []>} : vector<1x8xbf16>, vector<8x32xbf16>, vector<1x32xf32> -> vector<1x32xf32>
    %965 = arith.addf %924, %964 : vector<1x32xf32>
    %c1_734 = arith.constant 1 : index
    %c3_735 = arith.constant 3 : index
    %c0_736 = arith.constant 0 : index
    %c0_737 = arith.constant 0 : index
    %966 = vector.load %arg27[%c1_734, %c3_735, %c0_736, %c0_737] : memref<2x4x32x8xbf16, #tpu.memory_space<vmem>>, vector<1x1x32x8xbf16>
    %967 = vector.shape_cast %966 : vector<1x1x32x8xbf16> to vector<32x8xbf16>
    %cst_738 = arith.constant dense<0.000000e+00> : vector<1x8xf32>
    %968 = tpu.matmul %843, %967, %cst_738 {dimension_numbers = #tpu.dot_dimension_numbers<[1], [0], [0], [1], [0, 0, 1, 1], [], []>} : vector<1x32xbf16>, vector<32x8xbf16>, vector<1x8xf32> -> vector<1x8xf32>
    %c1_739 = arith.constant 1 : index
    %c3_740 = arith.constant 3 : index
    %c0_741 = arith.constant 0 : index
    %c0_742 = arith.constant 0 : index
    %969 = vector.load %arg28[%c1_739, %c3_740, %c0_741, %c0_742] : memref<2x4x1x8xf32, #tpu.memory_space<vmem>>, vector<1x1x1x8xf32>
    %970 = vector.shape_cast %969 : vector<1x1x1x8xf32> to vector<1x8xf32>
    %971 = arith.addf %968, %970 : vector<1x8xf32>
    %c1_743 = arith.constant 1 : index
    %c3_744 = arith.constant 3 : index
    %c0_745 = arith.constant 0 : index
    %c0_746 = arith.constant 0 : index
    %972 = vector.load %arg29[%c1_743, %c3_744, %c0_745, %c0_746] : memref<2x4x32x8xbf16, #tpu.memory_space<vmem>>, vector<1x1x32x8xbf16>
    %973 = vector.shape_cast %972 : vector<1x1x32x8xbf16> to vector<32x8xbf16>
    %cst_747 = arith.constant dense<0.000000e+00> : vector<17x8xf32>
    %974 = tpu.matmul %539, %973, %cst_747 {dimension_numbers = #tpu.dot_dimension_numbers<[1], [0], [0], [1], [0, 0, 1, 1], [], []>} : vector<17x32xbf16>, vector<32x8xbf16>, vector<17x8xf32> -> vector<17x8xf32>
    %c1_748 = arith.constant 1 : index
    %c3_749 = arith.constant 3 : index
    %c0_750 = arith.constant 0 : index
    %c0_751 = arith.constant 0 : index
    %975 = vector.load %arg30[%c1_748, %c3_749, %c0_750, %c0_751] : memref<2x4x1x8xf32, #tpu.memory_space<vmem>>, vector<1x1x1x8xf32>
    %976 = vector.shape_cast %975 : vector<1x1x1x8xf32> to vector<1x8xf32>
    %977 = vector.broadcast %976 : vector<1x8xf32> to vector<17x8xf32>
    %978 = arith.addf %974, %977 : vector<17x8xf32>
    %c1_752 = arith.constant 1 : index
    %c3_753 = arith.constant 3 : index
    %c0_754 = arith.constant 0 : index
    %c0_755 = arith.constant 0 : index
    %979 = vector.load %arg31[%c1_752, %c3_753, %c0_754, %c0_755] : memref<2x4x32x8xbf16, #tpu.memory_space<vmem>>, vector<1x1x32x8xbf16>
    %980 = vector.shape_cast %979 : vector<1x1x32x8xbf16> to vector<32x8xbf16>
    %cst_756 = arith.constant dense<0.000000e+00> : vector<17x8xf32>
    %981 = tpu.matmul %539, %980, %cst_756 {dimension_numbers = #tpu.dot_dimension_numbers<[1], [0], [0], [1], [0, 0, 1, 1], [], []>} : vector<17x32xbf16>, vector<32x8xbf16>, vector<17x8xf32> -> vector<17x8xf32>
    %c1_757 = arith.constant 1 : index
    %c3_758 = arith.constant 3 : index
    %c0_759 = arith.constant 0 : index
    %c0_760 = arith.constant 0 : index
    %982 = vector.load %arg32[%c1_757, %c3_758, %c0_759, %c0_760] : memref<2x4x1x8xf32, #tpu.memory_space<vmem>>, vector<1x1x1x8xf32>
    %983 = vector.shape_cast %982 : vector<1x1x1x8xf32> to vector<1x8xf32>
    %984 = vector.broadcast %983 : vector<1x8xf32> to vector<17x8xf32>
    %985 = arith.addf %981, %984 : vector<17x8xf32>
    %986 = arith.truncf %971 : vector<1x8xf32> to vector<1x8xbf16>
    %987 = arith.truncf %978 : vector<17x8xf32> to vector<17x8xbf16>
    %cst_761 = arith.constant dense<0.000000e+00> : vector<1x17xf32>
    %988 = tpu.matmul %986, %987, %cst_761 {dimension_numbers = #tpu.dot_dimension_numbers<[1], [1], [0], [0], [0, 0, 1, 0], [], []>} : vector<1x8xbf16>, vector<17x8xbf16>, vector<1x17xf32> -> vector<1x17xf32>
    %cst_762 = arith.constant dense<0xFF800000> : vector<1xf32>
    %989 = vector.multi_reduction <maximumf>, %988, %cst_762 [1] : vector<1x17xf32> to vector<1xf32>
    %990 = vector.shape_cast %989 : vector<1xf32> to vector<1x1xf32>
    %991 = vector.broadcast %990 : vector<1x1xf32> to vector<1x17xf32>
    %992 = arith.subf %988, %991 : vector<1x17xf32>
    %993 = math.exp %992 : vector<1x17xf32>
    %cst_763 = arith.constant dense<0.000000e+00> : vector<1xf32>
    %994 = vector.multi_reduction <add>, %993, %cst_763 [1] : vector<1x17xf32> to vector<1xf32>
    %995 = vector.shape_cast %994 : vector<1xf32> to vector<1x1xf32>
    %996 = tpu.reciprocal %995 {approx = true} : vector<1x1xf32> -> vector<1x1xf32>
    %997 = vector.broadcast %996 : vector<1x1xf32> to vector<1x17xf32>
    %998 = arith.mulf %993, %997 : vector<1x17xf32>
    %999 = arith.truncf %998 : vector<1x17xf32> to vector<1x17xbf16>
    %1000 = arith.truncf %985 : vector<17x8xf32> to vector<17x8xbf16>
    %cst_764 = arith.constant dense<0.000000e+00> : vector<1x8xf32>
    %1001 = tpu.matmul %999, %1000, %cst_764 {dimension_numbers = #tpu.dot_dimension_numbers<[1], [0], [0], [1], [0, 0, 1, 1], [], []>} : vector<1x17xbf16>, vector<17x8xbf16>, vector<1x8xf32> -> vector<1x8xf32>
    %1002 = arith.truncf %1001 : vector<1x8xf32> to vector<1x8xbf16>
    %c1_765 = arith.constant 1 : index
    %c3_766 = arith.constant 3 : index
    %c0_767 = arith.constant 0 : index
    %c0_768 = arith.constant 0 : index
    %1003 = vector.load %arg33[%c1_765, %c3_766, %c0_767, %c0_768] : memref<2x4x8x32xbf16, #tpu.memory_space<vmem>>, vector<1x1x8x32xbf16>
    %1004 = vector.shape_cast %1003 : vector<1x1x8x32xbf16> to vector<8x32xbf16>
    %cst_769 = arith.constant dense<0.000000e+00> : vector<1x32xf32>
    %1005 = tpu.matmul %1002, %1004, %cst_769 {dimension_numbers = #tpu.dot_dimension_numbers<[1], [0], [0], [1], [0, 0, 1, 1], [], []>} : vector<1x8xbf16>, vector<8x32xbf16>, vector<1x32xf32> -> vector<1x32xf32>
    %1006 = arith.addf %965, %1005 : vector<1x32xf32>
    %c1_770 = arith.constant 1 : index
    %c0_771 = arith.constant 0 : index
    %c0_772 = arith.constant 0 : index
    %1007 = vector.load %arg34[%c1_770, %c0_771, %c0_772] : memref<2x1x32xf32, #tpu.memory_space<vmem>>, vector<1x1x32xf32>
    %1008 = vector.shape_cast %1007 : vector<1x1x32xf32> to vector<1x32xf32>
    %1009 = arith.addf %1006, %1008 : vector<1x32xf32>
    %1010 = arith.addf %842, %1009 : vector<1x32xf32>
    %c1_773 = arith.constant 1 : index
    %c0_774 = arith.constant 0 : index
    %c0_775 = arith.constant 0 : index
    %1011 = vector.load %arg37[%c1_773, %c0_774, %c0_775] : memref<2x1x32xf32, #tpu.memory_space<vmem>>, vector<1x1x32xf32>
    %1012 = vector.shape_cast %1011 : vector<1x1x32xf32> to vector<1x32xf32>
    %c1_776 = arith.constant 1 : index
    %c0_777 = arith.constant 0 : index
    %c0_778 = arith.constant 0 : index
    %1013 = vector.load %arg38[%c1_776, %c0_777, %c0_778] : memref<2x1x32xf32, #tpu.memory_space<vmem>>, vector<1x1x32xf32>
    %1014 = vector.shape_cast %1013 : vector<1x1x32xf32> to vector<1x32xf32>
    %cst_779 = arith.constant dense<0.000000e+00> : vector<1xf32>
    %1015 = vector.multi_reduction <add>, %1010, %cst_779 [1] : vector<1x32xf32> to vector<1xf32>
    %1016 = vector.shape_cast %1015 : vector<1xf32> to vector<1x1xf32>
    %cst_780 = arith.constant 3.200000e+01 : f32
    %1017 = vector.broadcast %cst_780 : f32 to vector<1x1xf32>
    %1018 = arith.divf %1016, %1017 : vector<1x1xf32>
    %1019 = vector.broadcast %1018 : vector<1x1xf32> to vector<1x32xf32>
    %1020 = arith.subf %1010, %1019 : vector<1x32xf32>
    %1021 = arith.mulf %1020, %1020 : vector<1x32xf32>
    %cst_781 = arith.constant dense<0.000000e+00> : vector<1xf32>
    %1022 = vector.multi_reduction <add>, %1021, %cst_781 [1] : vector<1x32xf32> to vector<1xf32>
    %1023 = vector.shape_cast %1022 : vector<1xf32> to vector<1x1xf32>
    %cst_782 = arith.constant 3.200000e+01 : f32
    %1024 = vector.broadcast %cst_782 : f32 to vector<1x1xf32>
    %1025 = arith.divf %1023, %1024 : vector<1x1xf32>
    %cst_783 = arith.constant 9.99999974E-6 : f32
    %1026 = vector.broadcast %cst_783 : f32 to vector<1x1xf32>
    %1027 = arith.addf %1025, %1026 : vector<1x1xf32>
    %1028 = math.rsqrt %1027 : vector<1x1xf32>
    %1029 = vector.broadcast %1028 : vector<1x1xf32> to vector<1x32xf32>
    %1030 = arith.mulf %1020, %1029 : vector<1x32xf32>
    %1031 = arith.mulf %1030, %1012 : vector<1x32xf32>
    %1032 = arith.addf %1031, %1014 : vector<1x32xf32>
    %c1_784 = arith.constant 1 : index
    %c0_785 = arith.constant 0 : index
    %c0_786 = arith.constant 0 : index
    %1033 = vector.load %arg41[%c1_784, %c0_785, %c0_786] : memref<2x32x64xbf16, #tpu.memory_space<vmem>>, vector<1x32x64xbf16>
    %1034 = vector.shape_cast %1033 : vector<1x32x64xbf16> to vector<32x64xbf16>
    %1035 = arith.truncf %1032 : vector<1x32xf32> to vector<1x32xbf16>
    %cst_787 = arith.constant dense<0.000000e+00> : vector<1x64xf32>
    %1036 = tpu.matmul %1035, %1034, %cst_787 {dimension_numbers = #tpu.dot_dimension_numbers<[1], [0], [0], [1], [0, 0, 1, 1], [], []>} : vector<1x32xbf16>, vector<32x64xbf16>, vector<1x64xf32> -> vector<1x64xf32>
    %c1_788 = arith.constant 1 : index
    %c0_789 = arith.constant 0 : index
    %c0_790 = arith.constant 0 : index
    %1037 = vector.load %arg42[%c1_788, %c0_789, %c0_790] : memref<2x1x64xf32, #tpu.memory_space<vmem>>, vector<1x1x64xf32>
    %1038 = vector.shape_cast %1037 : vector<1x1x64xf32> to vector<1x64xf32>
    %1039 = arith.addf %1036, %1038 : vector<1x64xf32>
    %cst_791 = arith.constant 0.000000e+00 : f32
    %1040 = vector.broadcast %cst_791 : f32 to vector<1x64xf32>
    %1041 = arith.maximumf %1039, %1040 : vector<1x64xf32>
    %c1_792 = arith.constant 1 : index
    %c0_793 = arith.constant 0 : index
    %c0_794 = arith.constant 0 : index
    %1042 = vector.load %arg43[%c1_792, %c0_793, %c0_794] : memref<2x64x32xbf16, #tpu.memory_space<vmem>>, vector<1x64x32xbf16>
    %1043 = vector.shape_cast %1042 : vector<1x64x32xbf16> to vector<64x32xbf16>
    %1044 = arith.truncf %1041 : vector<1x64xf32> to vector<1x64xbf16>
    %cst_795 = arith.constant dense<0.000000e+00> : vector<1x32xf32>
    %1045 = tpu.matmul %1044, %1043, %cst_795 {dimension_numbers = #tpu.dot_dimension_numbers<[1], [0], [0], [1], [0, 0, 1, 1], [], []>} : vector<1x64xbf16>, vector<64x32xbf16>, vector<1x32xf32> -> vector<1x32xf32>
    %c1_796 = arith.constant 1 : index
    %c0_797 = arith.constant 0 : index
    %c0_798 = arith.constant 0 : index
    %1046 = vector.load %arg44[%c1_796, %c0_797, %c0_798] : memref<2x1x32xf32, #tpu.memory_space<vmem>>, vector<1x1x32xf32>
    %1047 = vector.shape_cast %1046 : vector<1x1x32xf32> to vector<1x32xf32>
    %1048 = arith.addf %1045, %1047 : vector<1x32xf32>
    %1049 = arith.addf %1032, %1048 : vector<1x32xf32>
    %c1_799 = arith.constant 1 : index
    %c0_800 = arith.constant 0 : index
    %c0_801 = arith.constant 0 : index
    %1050 = vector.load %arg39[%c1_799, %c0_800, %c0_801] : memref<2x1x32xf32, #tpu.memory_space<vmem>>, vector<1x1x32xf32>
    %1051 = vector.shape_cast %1050 : vector<1x1x32xf32> to vector<1x32xf32>
    %c1_802 = arith.constant 1 : index
    %c0_803 = arith.constant 0 : index
    %c0_804 = arith.constant 0 : index
    %1052 = vector.load %arg40[%c1_802, %c0_803, %c0_804] : memref<2x1x32xf32, #tpu.memory_space<vmem>>, vector<1x1x32xf32>
    %1053 = vector.shape_cast %1052 : vector<1x1x32xf32> to vector<1x32xf32>
    %cst_805 = arith.constant dense<0.000000e+00> : vector<1xf32>
    %1054 = vector.multi_reduction <add>, %1049, %cst_805 [1] : vector<1x32xf32> to vector<1xf32>
    %1055 = vector.shape_cast %1054 : vector<1xf32> to vector<1x1xf32>
    %cst_806 = arith.constant 3.200000e+01 : f32
    %1056 = vector.broadcast %cst_806 : f32 to vector<1x1xf32>
    %1057 = arith.divf %1055, %1056 : vector<1x1xf32>
    %1058 = vector.broadcast %1057 : vector<1x1xf32> to vector<1x32xf32>
    %1059 = arith.subf %1049, %1058 : vector<1x32xf32>
    %1060 = arith.mulf %1059, %1059 : vector<1x32xf32>
    %cst_807 = arith.constant dense<0.000000e+00> : vector<1xf32>
    %1061 = vector.multi_reduction <add>, %1060, %cst_807 [1] : vector<1x32xf32> to vector<1xf32>
    %1062 = vector.shape_cast %1061 : vector<1xf32> to vector<1x1xf32>
    %cst_808 = arith.constant 3.200000e+01 : f32
    %1063 = vector.broadcast %cst_808 : f32 to vector<1x1xf32>
    %1064 = arith.divf %1062, %1063 : vector<1x1xf32>
    %cst_809 = arith.constant 9.99999974E-6 : f32
    %1065 = vector.broadcast %cst_809 : f32 to vector<1x1xf32>
    %1066 = arith.addf %1064, %1065 : vector<1x1xf32>
    %1067 = math.rsqrt %1066 : vector<1x1xf32>
    %1068 = vector.broadcast %1067 : vector<1x1xf32> to vector<1x32xf32>
    %1069 = arith.mulf %1059, %1068 : vector<1x32xf32>
    %1070 = arith.mulf %1069, %1051 : vector<1x32xf32>
    %1071 = arith.addf %1070, %1053 : vector<1x32xf32>
    %c0_810 = arith.constant 0 : index
    %c0_811 = arith.constant 0 : index
    %1072 = vector.load %arg45[%c0_810, %c0_811] : memref<32x128xbf16, #tpu.memory_space<vmem>>, vector<32x128xbf16>
    %1073 = arith.truncf %1071 : vector<1x32xf32> to vector<1x32xbf16>
    %cst_812 = arith.constant dense<0.000000e+00> : vector<1x128xf32>
    %1074 = tpu.matmul %1073, %1072, %cst_812 {dimension_numbers = #tpu.dot_dimension_numbers<[1], [0], [0], [1], [0, 0, 1, 1], [], []>} : vector<1x32xbf16>, vector<32x128xbf16>, vector<1x128xf32> -> vector<1x128xf32>
    %c0_813 = arith.constant 0 : index
    %c0_814 = arith.constant 0 : index
    %1075 = vector.load %arg46[%c0_813, %c0_814] : memref<1x128xf32, #tpu.memory_space<vmem>>, vector<1x128xf32>
    %1076 = arith.addf %1074, %1075 : vector<1x128xf32>
    %c0_815 = arith.constant 0 : index
    %c0_816 = arith.constant 0 : index
    %c0_817 = arith.constant 0 : index
    %1077 = vector.load %arg48[%c0_815, %c0_816, %c0_817] : memref<1x1x128xf32, #tpu.memory_space<vmem>>, vector<1x1x128xf32>
    %1078 = vector.shape_cast %1077 : vector<1x1x128xf32> to vector<1x128xf32>
    %1079 = vector.shape_cast %1076 : vector<1x128xf32> to vector<1x1x128xf32>
    tpu.vector_store %arg48[%c0_815, %c0_816, %c0_817], %1079 {strides = array<i32>} : memref<1x1x128xf32, #tpu.memory_space<vmem>>, vector<1x1x128xf32>,
    return
  }
  func.func @transform_0(%arg0: i32) -> (i32, i32, i32) {
    %c0_i32 = arith.constant 0 : i32
    %c0_i32_0 = arith.constant 0 : i32
    %c0_i32_1 = arith.constant 0 : i32
    return %arg0, %c0_i32, %c0_i32_0 : i32, i32, i32
  }
  func.func @transform_1(%arg0: i32) -> (i32, i32) {
    %c0_i32 = arith.constant 0 : i32
    %c0_i32_0 = arith.constant 0 : i32
    %c0_i32_1 = arith.constant 0 : i32
    return %c0_i32, %c0_i32_0 : i32, i32
  }
  func.func @transform_2(%arg0: i32) -> (i32, i32) {
    %c0_i32 = arith.constant 0 : i32
    %c0_i32_0 = arith.constant 0 : i32
    %c0_i32_1 = arith.constant 0 : i32
    return %c0_i32, %c0_i32_0 : i32, i32
  }
  func.func @transform_3(%arg0: i32) -> (i32, i32, i32, i32) {
    %c0_i32 = arith.constant 0 : i32
    %c0_i32_0 = arith.constant 0 : i32
    %c0_i32_1 = arith.constant 0 : i32
    %c0_i32_2 = arith.constant 0 : i32
    %c0_i32_3 = arith.constant 0 : i32
    return %c0_i32, %c0_i32_0, %c0_i32_1, %c0_i32_2 : i32, i32, i32, i32
  }
  func.func @transform_4(%arg0: i32) -> (i32, i32, i32, i32) {
    %c0_i32 = arith.constant 0 : i32
    %c0_i32_0 = arith.constant 0 : i32
    %c0_i32_1 = arith.constant 0 : i32
    %c0_i32_2 = arith.constant 0 : i32
    %c0_i32_3 = arith.constant 0 : i32
    return %c0_i32, %c0_i32_0, %c0_i32_1, %c0_i32_2 : i32, i32, i32, i32
  }
  func.func @transform_5(%arg0: i32) -> (i32, i32, i32, i32) {
    %c0_i32 = arith.constant 0 : i32
    %c0_i32_0 = arith.constant 0 : i32
    %c0_i32_1 = arith.constant 0 : i32
    %c0_i32_2 = arith.constant 0 : i32
    %c0_i32_3 = arith.constant 0 : i32
    return %c0_i32, %c0_i32_0, %c0_i32_1, %c0_i32_2 : i32, i32, i32, i32
  }
  func.func @transform_6(%arg0: i32) -> (i32, i32, i32, i32) {
    %c0_i32 = arith.constant 0 : i32
    %c0_i32_0 = arith.constant 0 : i32
    %c0_i32_1 = arith.constant 0 : i32
    %c0_i32_2 = arith.constant 0 : i32
    %c0_i32_3 = arith.constant 0 : i32
    return %c0_i32, %c0_i32_0, %c0_i32_1, %c0_i32_2 : i32, i32, i32, i32
  }
  func.func @transform_7(%arg0: i32) -> (i32, i32, i32, i32) {
    %c0_i32 = arith.constant 0 : i32
    %c0_i32_0 = arith.constant 0 : i32
    %c0_i32_1 = arith.constant 0 : i32
    %c0_i32_2 = arith.constant 0 : i32
    %c0_i32_3 = arith.constant 0 : i32
    return %c0_i32, %c0_i32_0, %c0_i32_1, %c0_i32_2 : i32, i32, i32, i32
  }
  func.func @transform_8(%arg0: i32) -> (i32, i32, i32, i32) {
    %c0_i32 = arith.constant 0 : i32
    %c0_i32_0 = arith.constant 0 : i32
    %c0_i32_1 = arith.constant 0 : i32
    %c0_i32_2 = arith.constant 0 : i32
    %c0_i32_3 = arith.constant 0 : i32
    return %c0_i32, %c0_i32_0, %c0_i32_1, %c0_i32_2 : i32, i32, i32, i32
  }
  func.func @transform_9(%arg0: i32) -> (i32, i32, i32, i32) {
    %c0_i32 = arith.constant 0 : i32
    %c0_i32_0 = arith.constant 0 : i32
    %c0_i32_1 = arith.constant 0 : i32
    %c0_i32_2 = arith.constant 0 : i32
    %c0_i32_3 = arith.constant 0 : i32
    return %c0_i32, %c0_i32_0, %c0_i32_1, %c0_i32_2 : i32, i32, i32, i32
  }
  func.func @transform_10(%arg0: i32) -> (i32, i32, i32) {
    %c0_i32 = arith.constant 0 : i32
    %c0_i32_0 = arith.constant 0 : i32
    %c0_i32_1 = arith.constant 0 : i32
    %c0_i32_2 = arith.constant 0 : i32
    return %c0_i32, %c0_i32_0, %c0_i32_1 : i32, i32, i32
  }
  func.func @transform_11(%arg0: i32) -> (i32, i32, i32) {
    %c0_i32 = arith.constant 0 : i32
    %c0_i32_0 = arith.constant 0 : i32
    %c0_i32_1 = arith.constant 0 : i32
    %c0_i32_2 = arith.constant 0 : i32
    return %c0_i32, %c0_i32_0, %c0_i32_1 : i32, i32, i32
  }
  func.func @transform_12(%arg0: i32) -> (i32, i32, i32) {
    %c0_i32 = arith.constant 0 : i32
    %c0_i32_0 = arith.constant 0 : i32
    %c0_i32_1 = arith.constant 0 : i32
    %c0_i32_2 = arith.constant 0 : i32
    return %c0_i32, %c0_i32_0, %c0_i32_1 : i32, i32, i32
  }
  func.func @transform_13(%arg0: i32) -> (i32, i32, i32) {
    %c0_i32 = arith.constant 0 : i32
    %c0_i32_0 = arith.constant 0 : i32
    %c0_i32_1 = arith.constant 0 : i32
    %c0_i32_2 = arith.constant 0 : i32
    return %c0_i32, %c0_i32_0, %c0_i32_1 : i32, i32, i32
  }
  func.func @transform_14(%arg0: i32) -> (i32, i32, i32) {
    %c0_i32 = arith.constant 0 : i32
    %c0_i32_0 = arith.constant 0 : i32
    %c0_i32_1 = arith.constant 0 : i32
    %c0_i32_2 = arith.constant 0 : i32
    return %c0_i32, %c0_i32_0, %c0_i32_1 : i32, i32, i32
  }
  func.func @transform_15(%arg0: i32) -> (i32, i32, i32) {
    %c0_i32 = arith.constant 0 : i32
    %c0_i32_0 = arith.constant 0 : i32
    %c0_i32_1 = arith.constant 0 : i32
    %c0_i32_2 = arith.constant 0 : i32
    return %c0_i32, %c0_i32_0, %c0_i32_1 : i32, i32, i32
  }
  func.func @transform_16(%arg0: i32) -> (i32, i32, i32) {
    %c0_i32 = arith.constant 0 : i32
    %c0_i32_0 = arith.constant 0 : i32
    %c0_i32_1 = arith.constant 0 : i32
    %c0_i32_2 = arith.constant 0 : i32
    return %c0_i32, %c0_i32_0, %c0_i32_1 : i32, i32, i32
  }
  func.func @transform_17(%arg0: i32) -> (i32, i32, i32) {
    %c0_i32 = arith.constant 0 : i32
    %c0_i32_0 = arith.constant 0 : i32
    %c0_i32_1 = arith.constant 0 : i32
    %c0_i32_2 = arith.constant 0 : i32
    return %c0_i32, %c0_i32_0, %c0_i32_1 : i32, i32, i32
  }
  func.func @transform_18(%arg0: i32) -> (i32, i32, i32) {
    %c0_i32 = arith.constant 0 : i32
    %c0_i32_0 = arith.constant 0 : i32
    %c0_i32_1 = arith.constant 0 : i32
    %c0_i32_2 = arith.constant 0 : i32
    return %c0_i32, %c0_i32_0, %c0_i32_1 : i32, i32, i32
  }
  func.func @transform_19(%arg0: i32) -> (i32, i32) {
    %c0_i32 = arith.constant 0 : i32
    %c0_i32_0 = arith.constant 0 : i32
    %c0_i32_1 = arith.constant 0 : i32
    return %c0_i32, %c0_i32_0 : i32, i32
  }
  func.func @transform_20(%arg0: i32) -> (i32, i32) {
    %c0_i32 = arith.constant 0 : i32
    %c0_i32_0 = arith.constant 0 : i32
    %c0_i32_1 = arith.constant 0 : i32
    return %c0_i32, %c0_i32_0 : i32, i32
  }
  func.func @transform_21(%arg0: i32) -> (i32, i32) {
    %c0_i32 = arith.constant 0 : i32
    %c0_i32_0 = arith.constant 0 : i32
    %c0_i32_1 = arith.constant 0 : i32
    return %c0_i32, %c0_i32_0 : i32, i32
  }
  func.func @transform_22(%arg0: i32) -> (i32, i32, i32) {
    %c0_i32 = arith.constant 0 : i32
    %c0_i32_0 = arith.constant 0 : i32
    %c0_i32_1 = arith.constant 0 : i32
    %c0_i32_2 = arith.constant 0 : i32
    return %c0_i32, %c0_i32_0, %c0_i32_1 : i32, i32, i32
  }
  func.func @transform_23(%arg0: i32) -> (i32, i32, i32) {
    %c0_i32 = arith.constant 0 : i32
    %c0_i32_0 = arith.constant 0 : i32
    %c0_i32_1 = arith.constant 0 : i32
    %c0_i32_2 = arith.constant 0 : i32
    return %c0_i32, %c0_i32_0, %c0_i32_1 : i32, i32, i32
  }
  func.func @transform_24(%arg0: i32) -> (i32, i32, i32) {
    %c0_i32 = arith.constant 0 : i32
    %c0_i32_0 = arith.constant 0 : i32
    %c0_i32_1 = arith.constant 0 : i32
    %c0_i32_2 = arith.constant 0 : i32
    return %c0_i32, %c0_i32_0, %c0_i32_1 : i32, i32, i32
  }
  func.func @transform_25(%arg0: i32) -> (i32, i32, i32) {
    %c0_i32 = arith.constant 0 : i32
    %c0_i32_0 = arith.constant 0 : i32
    %c0_i32_1 = arith.constant 0 : i32
    %c0_i32_2 = arith.constant 0 : i32
    return %c0_i32, %c0_i32_0, %c0_i32_1 : i32, i32, i32
  }
  func.func @transform_26(%arg0: i32) -> (i32, i32, i32, i32) {
    %c0_i32 = arith.constant 0 : i32
    %c0_i32_0 = arith.constant 0 : i32
    %c0_i32_1 = arith.constant 0 : i32
    %c0_i32_2 = arith.constant 0 : i32
    %c0_i32_3 = arith.constant 0 : i32
    return %c0_i32, %c0_i32_0, %c0_i32_1, %c0_i32_2 : i32, i32, i32, i32
  }
  func.func @transform_27(%arg0: i32) -> (i32, i32, i32, i32) {
    %c0_i32 = arith.constant 0 : i32
    %c0_i32_0 = arith.constant 0 : i32
    %c0_i32_1 = arith.constant 0 : i32
    %c0_i32_2 = arith.constant 0 : i32
    %c0_i32_3 = arith.constant 0 : i32
    return %c0_i32, %c0_i32_0, %c0_i32_1, %c0_i32_2 : i32, i32, i32, i32
  }
  func.func @transform_28(%arg0: i32) -> (i32, i32, i32, i32) {
    %c0_i32 = arith.constant 0 : i32
    %c0_i32_0 = arith.constant 0 : i32
    %c0_i32_1 = arith.constant 0 : i32
    %c0_i32_2 = arith.constant 0 : i32
    %c0_i32_3 = arith.constant 0 : i32
    return %c0_i32, %c0_i32_0, %c0_i32_1, %c0_i32_2 : i32, i32, i32, i32
  }
  func.func @transform_29(%arg0: i32) -> (i32, i32, i32, i32) {
    %c0_i32 = arith.constant 0 : i32
    %c0_i32_0 = arith.constant 0 : i32
    %c0_i32_1 = arith.constant 0 : i32
    %c0_i32_2 = arith.constant 0 : i32
    %c0_i32_3 = arith.constant 0 : i32
    return %c0_i32, %c0_i32_0, %c0_i32_1, %c0_i32_2 : i32, i32, i32, i32
  }
  func.func @transform_30(%arg0: i32) -> (i32, i32, i32, i32) {
    %c0_i32 = arith.constant 0 : i32
    %c0_i32_0 = arith.constant 0 : i32
    %c0_i32_1 = arith.constant 0 : i32
    %c0_i32_2 = arith.constant 0 : i32
    %c0_i32_3 = arith.constant 0 : i32
    return %c0_i32, %c0_i32_0, %c0_i32_1, %c0_i32_2 : i32, i32, i32, i32
  }
  func.func @transform_31(%arg0: i32) -> (i32, i32, i32, i32) {
    %c0_i32 = arith.constant 0 : i32
    %c0_i32_0 = arith.constant 0 : i32
    %c0_i32_1 = arith.constant 0 : i32
    %c0_i32_2 = arith.constant 0 : i32
    %c0_i32_3 = arith.constant 0 : i32
    return %c0_i32, %c0_i32_0, %c0_i32_1, %c0_i32_2 : i32, i32, i32, i32
  }
  func.func @transform_32(%arg0: i32) -> (i32, i32, i32, i32) {
    %c0_i32 = arith.constant 0 : i32
    %c0_i32_0 = arith.constant 0 : i32
    %c0_i32_1 = arith.constant 0 : i32
    %c0_i32_2 = arith.constant 0 : i32
    %c0_i32_3 = arith.constant 0 : i32
    return %c0_i32, %c0_i32_0, %c0_i32_1, %c0_i32_2 : i32, i32, i32, i32
  }
  func.func @transform_33(%arg0: i32) -> (i32, i32, i32) {
    %c0_i32 = arith.constant 0 : i32
    %c0_i32_0 = arith.constant 0 : i32
    %c0_i32_1 = arith.constant 0 : i32
    %c0_i32_2 = arith.constant 0 : i32
    return %c0_i32, %c0_i32_0, %c0_i32_1 : i32, i32, i32
  }
  func.func @transform_34(%arg0: i32) -> (i32, i32, i32) {
    %c0_i32 = arith.constant 0 : i32
    %c0_i32_0 = arith.constant 0 : i32
    %c0_i32_1 = arith.constant 0 : i32
    %c0_i32_2 = arith.constant 0 : i32
    return %c0_i32, %c0_i32_0, %c0_i32_1 : i32, i32, i32
  }
  func.func @transform_35(%arg0: i32) -> (i32, i32, i32) {
    %c0_i32 = arith.constant 0 : i32
    %c0_i32_0 = arith.constant 0 : i32
    %c0_i32_1 = arith.constant 0 : i32
    %c0_i32_2 = arith.constant 0 : i32
    return %c0_i32, %c0_i32_0, %c0_i32_1 : i32, i32, i32
  }
  func.func @transform_36(%arg0: i32) -> (i32, i32, i32) {
    %c0_i32 = arith.constant 0 : i32
    %c0_i32_0 = arith.constant 0 : i32
    %c0_i32_1 = arith.constant 0 : i32
    %c0_i32_2 = arith.constant 0 : i32
    return %c0_i32, %c0_i32_0, %c0_i32_1 : i32, i32, i32
  }
  func.func @transform_37(%arg0: i32) -> (i32, i32, i32) {
    %c0_i32 = arith.constant 0 : i32
    %c0_i32_0 = arith.constant 0 : i32
    %c0_i32_1 = arith.constant 0 : i32
    %c0_i32_2 = arith.constant 0 : i32
    return %c0_i32, %c0_i32_0, %c0_i32_1 : i32, i32, i32
  }
  func.func @transform_38(%arg0: i32) -> (i32, i32, i32) {
    %c0_i32 = arith.constant 0 : i32
    %c0_i32_0 = arith.constant 0 : i32
    %c0_i32_1 = arith.constant 0 : i32
    %c0_i32_2 = arith.constant 0 : i32
    return %c0_i32, %c0_i32_0, %c0_i32_1 : i32, i32, i32
  }
  func.func @transform_39(%arg0: i32) -> (i32, i32, i32) {
    %c0_i32 = arith.constant 0 : i32
    %c0_i32_0 = arith.constant 0 : i32
    %c0_i32_1 = arith.constant 0 : i32
    %c0_i32_2 = arith.constant 0 : i32
    return %c0_i32, %c0_i32_0, %c0_i32_1 : i32, i32, i32
  }
  func.func @transform_40(%arg0: i32) -> (i32, i32, i32) {
    %c0_i32 = arith.constant 0 : i32
    %c0_i32_0 = arith.constant 0 : i32
    %c0_i32_1 = arith.constant 0 : i32
    %c0_i32_2 = arith.constant 0 : i32
    return %c0_i32, %c0_i32_0, %c0_i32_1 : i32, i32, i32
  }
  func.func @transform_41(%arg0: i32) -> (i32, i32, i32) {
    %c0_i32 = arith.constant 0 : i32
    %c0_i32_0 = arith.constant 0 : i32
    %c0_i32_1 = arith.constant 0 : i32
    %c0_i32_2 = arith.constant 0 : i32
    return %c0_i32, %c0_i32_0, %c0_i32_1 : i32, i32, i32
  }
  func.func @transform_42(%arg0: i32) -> (i32, i32, i32) {
    %c0_i32 = arith.constant 0 : i32
    %c0_i32_0 = arith.constant 0 : i32
    %c0_i32_1 = arith.constant 0 : i32
    %c0_i32_2 = arith.constant 0 : i32
    return %c0_i32, %c0_i32_0, %c0_i32_1 : i32, i32, i32
  }
  func.func @transform_43(%arg0: i32) -> (i32, i32, i32) {
    %c0_i32 = arith.constant 0 : i32
    %c0_i32_0 = arith.constant 0 : i32
    %c0_i32_1 = arith.constant 0 : i32
    %c0_i32_2 = arith.constant 0 : i32
    return %c0_i32, %c0_i32_0, %c0_i32_1 : i32, i32, i32
  }
  func.func @transform_44(%arg0: i32) -> (i32, i32) {
    %c0_i32 = arith.constant 0 : i32
    %c0_i32_0 = arith.constant 0 : i32
    %c0_i32_1 = arith.constant 0 : i32
    return %c0_i32, %c0_i32_0 : i32, i32
  }
  func.func @transform_45(%arg0: i32) -> (i32, i32) {
    %c0_i32 = arith.constant 0 : i32
    %c0_i32_0 = arith.constant 0 : i32
    %c0_i32_1 = arith.constant 0 : i32
    return %c0_i32, %c0_i32_0 : i32, i32
  }
  func.func @transform_46(%arg0: i32) -> (i32, i32, i32) {
    %c0_i32 = arith.constant 0 : i32
    %c0_i32_0 = arith.constant 0 : i32
    %c0_i32_1 = arith.constant 0 : i32
    return %arg0, %c0_i32, %c0_i32_0 : i32, i32, i32
  }
  func.func @transform_47(%arg0: i32) -> (i32, i32, i32) {
    %c0_i32 = arith.constant 0 : i32
    %c0_i32_0 = arith.constant 0 : i32
    %c0_i32_1 = arith.constant 0 : i32
    return %arg0, %c0_i32, %c0_i32_0 : i32, i32, i32
  }
}

</mosaic_0001>

<bundles_post_ra>
// kernel: coordinator_forward.1
= control target key start
LH: loop header
LB: loop body
LE: loop exit
PB: predicated region body
PF: predicated region fallthrough
CT: control target
= control target key end

     0   :  { %s8090_s6 = smov 1   ;;  %s8091_s10 = smov 2   ;;  %s9568_s0 = inlined_call_operand.smem [shape: u32[48], index: -1, kind: input, shape index: {}] }
   0x1   :  { %s8149_s5 = sld [smem:[%s9568_s0]]   ;;  %s8092_s14 = smov 3  }
   0x2   :  { %s8154_s9 = sld [smem:[%s9568_s0 + %s8090_s6]]   ;;  %s8093_s18 = smov 4  }
   0x3   :  { %s8159_s13 = sld [smem:[%s9568_s0 + %s8091_s10]]   ;;  %s8094_s22 = smov 5  }
   0x4   :  { %s8164_s17 = sld [smem:[%s9568_s0 + %s8092_s14]]   ;;  %s8095_s26 = smov 6  }
   0x5   :  { %s8169_s21 = sld [smem:[%s9568_s0 + %s8093_s18]]   ;;  %s8096_s30 = smov 7  }
   0x6   :  { %s8174_s25 = sld [smem:[%s9568_s0 + %s8094_s22]]   ;;  %s8097_s4 = smov 8  }
   0x7   :  { %9631 = sst [smem:[#allocation11_spill]] %s8149_s5  ;;  %s8098_s10 = smov 9  }
   0x8   :  { %9632 = sst [smem:[#allocation12_spill]] %s8154_s9  ;;  %s8099_s15 = smov 10  }
   0x9   :  { %9633 = sst [smem:[#allocation13_spill]] %s8159_s13  ;;  %s8100_s20 = smov 11  }
   0xa   :  { %9634 = sst [smem:[#allocation14_spill]] %s8164_s17  ;;  %s8102_s1 = smov 13  }
   0xb   :  { %9635 = sst [smem:[#allocation15_spill]] %s8169_s21  ;;  %s8103_s7 = smov 14  }
   0xc   :  { %9636 = sst [smem:[#allocation16_spill]] %s8174_s25  ;;  %s8105_s22 = smov 16  }
   0xd   :  { %s8179_s29 = sld [smem:[%s9568_s0 + %s8095_s26]]   ;;  %s8101_s26 = smov 12  }
   0xe   :  { %s8184_s3 = sld [smem:[%s9568_s0 + %s8096_s30]]   ;;  %s8106_s28 = smov 17  }
   0xf   :  { %s8189_s8 = sld [smem:[%s9568_s0 + %s8097_s4]]  }
  0x10   :  { %s8194_s14 = sld [smem:[%s9568_s0 + %s8098_s10]]  }
  0x11   :  { %s8199_s19 = sld [smem:[%s9568_s0 + %s8099_s15]]   ;;  %s8104_s15 = smov 15  }
  0x12   :  { %s8204_s24 = sld [smem:[%s9568_s0 + %s8100_s20]]  }
  0x13   :  { %s8209_s30 = sld [smem:[%s9568_s0 + %s8101_s26]]  }
  0x14   :  { %9637 = sst [smem:[#allocation17_spill]] %s8184_s3 }
  0x15   :  { %9638 = sst [smem:[#allocation18_spill]] %s8189_s8 }
  0x16   :  { %9639 = sst [smem:[#allocation19_spill]] %s8194_s14 }
  0x17   :  { %9640 = sst [smem:[#allocation20_spill]] %s8199_s19 }
  0x18   :  { %9641 = sst [smem:[#allocation21_spill]] %s8204_s24 }
  0x19   :  { %s8214_s6 = sld [smem:[%s9568_s0 + %s8102_s1]]  }
  0x1a   :  { %s8219_s12 = sld [smem:[%s9568_s0 + %s8103_s7]]   ;;  %s8107_s7 = smov 18  }
  0x1b   :  { %s8224_s20 = sld [smem:[%s9568_s0 + %s8104_s15]]   ;;  %s8108_s15 = smov 19  }
  0x1c   :  { %s8229_s27 = sld [smem:[%s9568_s0 + %s8105_s22]]   ;;  %s8109_s22 = smov 20  }
  0x1d   :  { %s8234_s4 = sld [smem:[%s9568_s0 + %s8106_s28]]   ;;  %s8110_s28 = smov 21  }
  0x1f   :  { %9642 = sst [smem:[#allocation22_spill]] %s8214_s6 }
  0x20   :  { %9643 = sst [smem:[#allocation23_spill]] %s8219_s12 }
  0x21   :  { %9644 = sst [smem:[#allocation24_spill]] %s8224_s20 }
  0x22   :  { %9645 = sst [smem:[#allocation25_spill]] %s8229_s27 }
  0x23   :  { %9646 = sst [smem:[#allocation26_spill]] %s8234_s4 }
  0x24   :  { %s8239_s12 = sld [smem:[%s9568_s0 + %s8107_s7]]   ;;  %s8111_s7 = smov 22  }
  0x25   :  { %s8244_s6 = sld [smem:[%s9568_s0 + %s8108_s15]]   ;;  %s8112_s15 = smov 23  }
  0x26   :  { %s8249_s27 = sld [smem:[%s9568_s0 + %s8109_s22]]   ;;  %s8113_s22 = smov 24  }
  0x27   :  { %s8254_s4 = sld [smem:[%s9568_s0 + %s8110_s28]]   ;;  %s8114_s28 = smov 25  }
  0x28   :  { %s8274_s20 = sld [smem:[%s9568_s0 + %s8114_s28]]   ;;  %s8118_s28 = smov 29  }
  0x2a   :  { %9647 = sst [smem:[#allocation27_spill]] %s8239_s12 }
  0x2b   :  { %9648 = sst [smem:[#allocation28_spill]] %s8244_s6 }
  0x2c   :  { %9649 = sst [smem:[#allocation29_spill]] %s8249_s27 }
  0x2d   :  { %9650 = sst [smem:[#allocation30_spill]] %s8254_s4 }
  0x2e   :  { %s8259_s12 = sld [smem:[%s9568_s0 + %s8111_s7]]   ;;  %s8115_s7 = smov 26  }
  0x2f   :  { %s8264_s6 = sld [smem:[%s9568_s0 + %s8112_s15]]   ;;  %s8116_s15 = smov 27  }
  0x30   :  { %s8269_s27 = sld [smem:[%s9568_s0 + %s8113_s22]]   ;;  %s8117_s22 = smov 28  }
  0x31   :  { %9654 = sst [smem:[#allocation34_spill]] %s8274_s20 }
  0x32   :  { %s8294_s20 = sld [smem:[%s9568_s0 + %s8118_s28]]   ;;  %s8122_s28 = smov 33  }
  0x34   :  { %9651 = sst [smem:[#allocation31_spill]] %s8259_s12 }
  0x35   :  { %9652 = sst [smem:[#allocation32_spill]] %s8264_s6 }
  0x36   :  { %9653 = sst [smem:[#allocation33_spill]] %s8269_s27 }
  0x37   :  { %s8279_s12 = sld [smem:[%s9568_s0 + %s8115_s7]]   ;;  %s8119_s7 = smov 30  }
  0x38   :  { %s8284_s6 = sld [smem:[%s9568_s0 + %s8116_s15]]   ;;  %s8120_s15 = smov 31  }
  0x39   :  { %s8289_s27 = sld [smem:[%s9568_s0 + %s8117_s22]]   ;;  %s8121_s22 = smov 32  }
  0x3a   :  { %9658 = sst [smem:[#allocation38_spill]] %s8294_s20 }
  0x3b   :  { %s8314_s20 = sld [smem:[%s9568_s0 + %s8122_s28]]   ;;  %s8126_s28 = smov 37  }
  0x3d   :  { %9655 = sst [smem:[#allocation35_spill]] %s8279_s12 }
  0x3e   :  { %9656 = sst [smem:[#allocation36_spill]] %s8284_s6 }
  0x3f   :  { %9657 = sst [smem:[#allocation37_spill]] %s8289_s27 }
  0x40   :  { %s8299_s12 = sld [smem:[%s9568_s0 + %s8119_s7]]   ;;  %s8123_s7 = smov 34  }
  0x41   :  { %s8304_s6 = sld [smem:[%s9568_s0 + %s8120_s15]]   ;;  %s8124_s15 = smov 35  }
  0x42   :  { %s8309_s27 = sld [smem:[%s9568_s0 + %s8121_s22]]   ;;  %s8125_s22 = smov 36  }
  0x43   :  { %9662 = sst [smem:[#allocation42_spill]] %s8314_s20 }
  0x44   :  { %s8334_s20 = sld [smem:[%s9568_s0 + %s8126_s28]]   ;;  %s8130_s28 = smov 41  }
  0x46   :  { %9659 = sst [smem:[#allocation39_spill]] %s8299_s12 }
  0x47   :  { %9660 = sst [smem:[#allocation40_spill]] %s8304_s6 }
  0x48   :  { %9661 = sst [smem:[#allocation41_spill]] %s8309_s27 }
  0x49   :  { %s8319_s12 = sld [smem:[%s9568_s0 + %s8123_s7]]   ;;  %s8127_s7 = smov 38  }
  0x4a   :  { %s8324_s6 = sld [smem:[%s9568_s0 + %s8124_s15]]   ;;  %s8128_s15 = smov 39  }
  0x4b   :  { %s8329_s27 = sld [smem:[%s9568_s0 + %s8125_s22]]   ;;  %s8129_s22 = smov 40  }
  0x4c   :  { %9666 = sst [smem:[#allocation46_spill]] %s8334_s20 }
  0x4d   :  { %s8354_s20 = sld [smem:[%s9568_s0 + %s8130_s28]]   ;;  %s8134_s28 = smov 45  }
  0x4f   :  { %9663 = sst [smem:[#allocation43_spill]] %s8319_s12 }
  0x50   :  { %9664 = sst [smem:[#allocation44_spill]] %s8324_s6 }
  0x51   :  { %9665 = sst [smem:[#allocation45_spill]] %s8329_s27 }
  0x52   :  { %s8339_s12 = sld [smem:[%s9568_s0 + %s8127_s7]]   ;;  %s8131_s7 = smov 42  }
  0x53   :  { %s8344_s6 = sld [smem:[%s9568_s0 + %s8128_s15]]   ;;  %s8132_s15 = smov 43  }
  0x54   :  { %s8349_s27 = sld [smem:[%s9568_s0 + %s8129_s22]]   ;;  %s8133_s22 = smov 44  }
  0x55   :  { %9670 = sst [smem:[#allocation50_spill]] %s8354_s20 }
  0x56   :  { %s8374_s20 = sld [smem:[%s9568_s0 + %s8134_s28]]  }
  0x58   :  { %9667 = sst [smem:[#allocation47_spill]] %s8339_s12 }
  0x59   :  { %9668 = sst [smem:[#allocation48_spill]] %s8344_s6 }
  0x5a   :  { %9669 = sst [smem:[#allocation49_spill]] %s8349_s27 }
  0x5b   :  { %s8359_s12 = sld [smem:[%s9568_s0 + %s8131_s7]]   ;;  %s8135_s7 = smov 46  }
  0x5c   :  { %s8364_s6 = sld [smem:[%s9568_s0 + %s8132_s15]]   ;;  %s8136_s15 = smov 47  }
  0x5d   :  { %s8369_s27 = sld [smem:[%s9568_s0 + %s8133_s22]]  }
  0x5e   :  { %9673 = sst [smem:[#allocation53_spill]] %s8374_s20 }
  0x61   :  { %9671 = sst [smem:[#allocation51_spill]] %s8359_s12 }
  0x62   :  { %9672 = sst [smem:[#allocation52_spill]] %s8364_s6 }
  0x63   :  { %s8379_s12 = sld [smem:[%s9568_s0 + %s8135_s7]]  }
  0x64   :  { %s8384_s6 = sld [smem:[%s9568_s0 + %s8136_s15]]  }
  0x6a   :  { %9674 = sst [smem:[#allocation54_spill]] %s8384_s6 }
  0x6b   :  { %101 = vsyncpa [#allocation3], 0 }
  0x6c   :  { %102 = vsyncpa [#allocation6], 0 }
  0x6d   :  { %103 = vsyncpa [#allocation4], 0 }
  0x6e   :  { %105 = vsyncpa [#allocation4 + $0x1], 0  ;;  %s8386_s22 = smov 0   ;;  %s8388_s23 = smov 0  }
  0x6f   :  { %9675 = sst [smem:[#allocation55_spill]] %s8386_s22  ;;  %s8390_s26 = smov 0  }
  0x70   :  { %s8392_s28 = smov 0  }
  0x71 LB: > { %s9677_s25 = sld [smem:[#allocation16_spill]]  ;;  %s8407_s0 = sadd.s32 4294967295, %s8088_s28   ;;  %s8088_s28 = sphi %s8392_s28, %s9745_s28   ;;  %s8084_s26 = sphi %s8390_s26, %s9747_s26   ;;  %s8080_s23 = sphi %s8388_s23, %s9749_s23  }
  0x72   : > { %s9678_s24 = sld [smem:[#allocation21_spill]]  ;;  %s6479_s1 = sadd.s32 4294967294, %s8088_s28  }
  0x73   : > { %s9679_s21 = sld [smem:[#allocation15_spill]]  ;;  %s8411_s2 = sadd.s32 1, %s8088_s28  }
  0x74   : > { %s9680_s20 = sld [smem:[#allocation53_spill]]  ;;  %s1089_s7 = sadd.s32 1, %s8084_s26 }
  0x75   : > { %s9681_s19 = sld [smem:[#allocation20_spill]]  ;;  %s1086_s10 = ssub.s32 %s8088_s28, %s8411_s2 }
  0x76   : > { %s9682_s17 = sld [smem:[#allocation14_spill]]  ;;  %p1099_p0 = scmp.ne.s32.totalorder %s8084_s26, %s8080_s23 }
  0x77   : > { %s9683_s14 = sld [smem:[#allocation19_spill]]  ;;  %p1087_p1 = scmp.eq.s32.totalorder %s1086_s10, 0 }
  0x78   : > { %s9684_s13 = sld [smem:[#allocation13_spill]]  ;;  %p1100_p2 = scmp.eq.s32.totalorder %s8407_s0, 1 }
  0x79   : > { %s9685_s9 = sld [smem:[#allocation12_spill]]  ;;  %p1106_p4 = scmp.eq.s32.totalorder %s6479_s1, 1 }
  0x7a   : > { %s9686_s8 = sld [smem:[#allocation18_spill]]  ;;  %p8424_p5 = por %p1100_p2, %p1099_p0 }
  0x7b   : > { %s9687_s4 = sld [smem:[#allocation30_spill]]  ;;  %p6480_p7 = scmp.ge.s32.totalorder %s8088_s28, 1 }
  0x7c   : > { %s9688_s3 = sld [smem:[#allocation17_spill]]  ;;  %p1139_p8 = scmp.lt.s32.totalorder %s8088_s28, 3 }
  0x7d   : > { %s9689_s22 = sld [smem:[#allocation55_spill]]  ;;  %p7630_p9 = scmp.eq.s32.totalorder %s8407_s0, 0 }
  0x7e   : > { %9691 = sst [smem:[#allocation56_spill]] %s8084_s26  ;;  %p8435_p10 = pnand %p6480_p7, %p1139_p8 }
  0x7f   : > { %9692 = sst [smem:[#allocation57_spill]] %s8088_s28  ;;  %s8137_s1 = smov [#allocation2]  }
  0x80   : > { %9693 = sst [smem:[#allocation58_spill]] %s8411_s2  ;;  %p7619_p11 = pneg %p8435_p10 }
  0x81   : > { %s8422_s11 = scalar_select %p1087_p1, %s8084_s26, %s1089_s7  }
  0x82   : > { %s1211_s10 = sshll.u32 %s9687_s4, 4  ;;  %s1213_s7 = sshll.u32 %s8137_s1, 4  ;;  %s1212_s10 = int_to_ptr.hbm [resolvable:$true] %s1211_s10  ;;  %s1214_s7 = int_to_ptr.vmem [resolvable:$true] %s1213_s7 }
  0x83   : > { %9690 = sst [smem:[#allocation55_spill]] %s9689_s22  ;;  %p1105_p3 = scmp.ne.s32.totalorder %s8080_s23, %s9689_s22 }
  0x84   : > { %9694 = sst [smem:[#allocation59_spill]] %s8422_s11  ;;  %s1292_s11 = sshll.u32 %s9680_s20, 4  ;;  %s8449_s11 = int_to_ptr.hbm [resolvable:$true] %s1292_s11 }
  0x85   : > { %p8428_p6 = por %p1106_p4, %p1105_p3  ;;  %p8445_p12 = pnand %p7630_p9, %p7619_p11 }
  0x86   : > { %s8138_s2 = smov [#allocation5]   ;;  %s7958_s22 = sshra.s32 %s1212_s10, 4  ;;  %s7959_s22 = int_to_ptr.hbm [resolvable:$true] %s7958_s22 }
  0x87   : > { %s9696_s16 = scalar_select %p8428_p6, 1, 0 }
  0x88   : > { %s7960_s28 = scalar_lea.hbm %s7959_s22, 1  ;;  %p7962_p0 = pneg %p8445_p12 }
  0x89   : > { %9697 = sst [smem:[#allocation60_spill]] %s9696_s16  ;;  %s8451_s16 = sshll.u32 %s8138_s2, 4  ;;  %s1295_s16 = int_to_ptr.vmem [resolvable:$true] %s8451_s16 }
  0x8a   : > { %p7961_p13 = scmp.ne.s32.totalorder %s7959_s22, %s7960_s28  ;;  %s7965_s1 = scalar_lea.hbm %s9687_s4, 1 }
  0x8b   : > { %p7966_p3 = scmp.lt.s32.totalorder %s7959_s22, %s9687_s4  ;;  %p7967_p4 = scmp.lt.s32.totalorder %s7965_s1, %s7960_s28 }
  0x8c   : > { %p7963_p1 = pnand %p7962_p0, %p7961_p13 }
  0x8d   : > { %p7968_p7 = por %p7967_p4, %p7966_p3 }
  0x8e   : > { %p7964_p2 = pneg %p7963_p1 }
  0x90   : > { %p7969_p8 = pnand %p7968_p7, %p7964_p2 }
  0x92   : > { %7972 = shalt.err (!%p7969_p8)
}
  0x93   : > { %7622 = dma.hbm_to_vmem [thread:$0]  (!%p8445_p12), %s1212_s10, 16, %s1214_s7, [#allocation3]  }
  0x94   : > { %s7988_s2 = sshra.s32 %s8449_s11, 4  ;;  %s7995_s22 = scalar_lea.hbm %s9680_s20, 1  ;;  %s7989_s2 = int_to_ptr.hbm [resolvable:$true] %s7988_s2 }
  0x95   : > { %s7990_s6 = scalar_lea.hbm %s7989_s2, 1  ;;  %p7996_p2 = scmp.lt.s32.totalorder %s7989_s2, %s9680_s20 }
  0x96   : > { %p7991_p11 = scmp.ne.s32.totalorder %s7989_s2, %s7990_s6  ;;  %p7997_p3 = scmp.lt.s32.totalorder %s7995_s22, %s7990_s6 }
  0x98   : > { %p7993_p13 = pnand %p7991_p11, %p7962_p0  ;;  %p7998_p4 = por %p7997_p3, %p7996_p2 }
  0x9a   : > { %p7994_p1 = pneg %p7993_p13 }
  0x9c   : > { %p7999_p7 = pnand %p7998_p4, %p7994_p1 }
  0x9e   : > { %8002 = shalt.err (!%p7999_p7)
}
  0x9f   : > { %7625 = dma.hbm_to_vmem [thread:$0]  (!%p8445_p12), %s8449_s11, 16, %s1295_s16, [#allocation6]  }
  0xa0   : > { %1315 = sbr.rel (%p8435_p10) target bundleno = 14498 (0x38a2), region = 204 }
  0xa5   : > { %8063 = dma.done.wait (%p7630_p9), [#allocation3], 16  }
  0xa6   : > { %8065 = vsyncadd (%p7630_p9), [#allocation3], 4294967280 }
  0xa7   : > { %8067 = dma.done.wait (%p7630_p9), [#allocation6], 16  }
  0xa8   : > { %8069 = vsyncadd (%p7630_p9), [#allocation6], 4294967280  ;;  %s9700_s5 = sld [smem:[#allocation11_spill]]  ;;  %p1435_p12 = scmp.lt.s32.totalorder %s8407_s0, 1  ;;  %v7477_v0 = vld [vmem:[%s9685_s9 + $0x10] sm:$0xff]  ;;  %v7476_v1 = vld [vmem:[%s9685_s9 + $0x8] sm:$0xff] }
  0xa9   : > { %1488 = vmatpush.bf16.msra.mxu0 %v7477_v0  ;;  %vm1476_vm0 = vcmask 392192   ;;  %v7475_v2 = vld [vmem:[%s9685_s9] sm:$0xff]  ;;  %vm1503_vm1 = vcmask 261120   ;;  %v1456_v12 = vld [vmem:[%s9684_s13 + $0x8] sm:$0xff]  ;;  %v1457_v16 = vld [vmem:[%s9684_s13 + $0x10] sm:$0x1] }
  0xaa   : > { %s8484_s6 = scalar_select %p1435_p12, %s8407_s0, 1  ;;  %v1455_v8 = vld [vmem:[%s9684_s13] sm:$0xff]  ;;  %vm1510_vm2 = vcmask 253952   ;;  %v8139_v21 = vmov 32.0   ;;  %v7479_v43 = vld [vmem:[%s9682_s17 + $0x8] sm:$0xff]  ;;  %v7487_v46 = vld [vmem:[%s9677_s25 + $0x18] sm:$0xff] }
  0xab   : > { %7774 = vrcp.f32 %v8139_v21  ;;  %v7481_v44 = vld [vmem:[%s9677_s25 + $0x8] sm:$0xff]  ;;  %1624 = vmatpush.bf16.msra.mxu1 %v7479_v43  ;;  %v7478_v49 = vld [vmem:[%s9682_s17] sm:$0xff]  ;;  %v7486_v53 = vld [vmem:[%s9677_s25 + $0x10] sm:$0xff]  ;;  %vm1792_vm13 = vcmask 1040384   ;;  %vm1716_vm14 = vcmask 64512   ;;  %vm1747_vm15 = vcmask 138240  }
  0xac   : > { %s7608_s26 = smul.u32 24, %s8484_s6  ;;  %v7483_v45 = vld [vmem:[%s9688_s3 + $0x8] sm:$0xff]  ;;  %1662 = vmatpush.bf16.msra.mxu2 %v7481_v44  ;;  %v7480_v50 = vld [vmem:[%s9677_s25] sm:$0xff]  ;;  %s9701_s11 = sld [smem:[#allocation24_spill]] }
  0xad   : > { %1489 = vmatpush.bf16.msra.mxu0 %v7476_v1  ;;  %1700 = vmatpush.bf16.msra.mxu3 %v7483_v45  ;;  %v7482_v51 = vld [vmem:[%s9688_s3] sm:$0xff]  ;;  %s9702_s16 = sld [smem:[#allocation22_spill]] }
  0xae   : > { %s1439_s28 = scalar_lea.vmem %s9700_s5, %s7608_s26  ;;  %s9703_s18 = sld [smem:[#allocation23_spill]] }
  0xaf   : > { %v1444_v3 = vld [vmem:[%s1439_s28] sm:$0xff]  ;;  %v1445_v4 = vld [vmem:[%s1439_s28 + $0x8] sm:$0xff]  ;;  %v1446_v6 = vld [vmem:[%s1439_s28 + $0x10] sm:$0x1]  ;;  %1625 = vmatpush.bf16.msra.mxu1 %v7478_v49  ;;  %s9704_s10 = sld [smem:[#allocation26_spill]] }
  0xb0   : > { %v1453_v5 = vpack.c.bf16 %v1445_v4, %v1444_v3  ;;  %v1454_v7 = vpack.c.bf16 %v1446_v6, %v1446_v6  ;;  %1663 = vmatpush.bf16.msra.mxu2 %v7480_v50  ;;  %s9705_s7 = sld [smem:[#allocation25_spill]] }
  0xb1   : > { %1490 = vmatpush.bf16.msra.mxu0 %v7475_v2  ;;  %v7775_v22 = vpop.eup %7774  ;;  %1701 = vmatpush.bf16.msra.mxu3 %v7482_v51  ;;  %v7721_v51 = vld [vmem:[%s8179_s29 + $0x1] ss:$0 sm:$0xff]  ;;  %s9706_s1 = sld [smem:[#allocation27_spill]] }
  0xb2   : > { %v1515_v23 = vmul.f32 32.0, %v7775_v22  ;;  %vm1519_vm3 = vweird.f32 %v7775_v22  ;;  %s9707_s2 = sld [smem:[#allocation31_spill]] }
  0xb3   : > { %s9708_s22 = sld [smem:[#allocation37_spill]] }
  0xb4   : > { %6500 = vmatmul.msk.bf16.vlgmr.msra.gmra.mxu0 %vm1476_vm0, %v1453_v5  ;;  %v1516_v24 = vsub.f32 1.0, %v1515_v23  ;;  %s9710_s26 = sld [smem:[#allocation28_spill]] }
  0xb5   : > { %1887 = vmatpush.bf16.msrb.mxu0 %v7487_v46  ;;  %v7722_v46 = vld [vmem:[%s8179_s29] ss:$0 sm:$0xff]  ;;  %s9711_s28 = sld [smem:[#allocation29_spill]] }
  0xb6   : > { %v1517_v25 = vmul.f32 %v7775_v22, %v1516_v24  ;;  %s9713_s4 = sld [smem:[#allocation39_spill]] }
  0xb7   : > { %s9716_s5 = sld [smem:[#allocation35_spill]] }
  0xb8   : > { %v1518_v26 = vadd.f32 %v7775_v22, %v1517_v25  ;;  %s9720_s9 = sld [smem:[#allocation40_spill]] }
  0xb9   : > { %1888 = vmatpush.bf16.msrb.mxu0 %v7486_v53  ;;  %s9724_s13 = sld [smem:[#allocation36_spill]] }
  0xba   : > { %v8506_v27 = vsel %vm1519_vm3, %v7775_v22, %v1518_v26  ;;  %vm2047_vm3 = vcmask 1043456   ;;  %s9733_s20 = sld [smem:[#allocation46_spill]] }
  0xc4   : > { %6501 = vmatmul.msk.bf16.gmra.mxu0 %vm1476_vm0, %v1454_v7  ;;  %v7485_v7 = vld [vmem:[%s9682_s17 + $0x18] sm:$0xff]  ;;  %vm1754_vm0 = vcmask 131072  }
  0xc5   : > { %1847 = vmatpush.bf16.msrb.mxu3 %v7485_v7  ;;  %v7489_v7 = vld [vmem:[%s9688_s3 + $0x18] sm:$0xff] }
 0x131   : > { %v1492_v9 = vpop.f32.mrf.mxu0 }
 0x132   : > { %v8492_v10 = vadd.f32 %v1492_v9, %v1455_v8  ;;  %v7484_v9 = vld [vmem:[%s9682_s17 + $0x10] sm:$0xff] }
 0x133   : > { %1848 = vmatpush.bf16.msrb.mxu3 %v7484_v9 }
 0x134   : > { %v1504_v11 = vsel %vm1503_vm1, %v8492_v10, 0.0 }
 0x135   : > { %1505 = vadd.xlane.f32.xlu0 %v1504_v11 }
 0x139   : > { %v1494_v13 = vpop.f32.mrf.mxu0 }
 0x13a   : > { %v8497_v14 = vadd.f32 %v1494_v13, %v1456_v12  ;;  %v7718_v12 = vld [vmem:[%s9678_s24] ss:$0 sm:$0xff] }
 0x13c   : > { %v1507_v15 = vsel %vm1503_vm1, %v8497_v14, 0.0 }
 0x13d   : > { %1508 = vadd.xlane.f32.xlu0 %v1507_v15 }
 0x141   : > { %v1497_v17 = vpop.f32.mrf.mxu0 }
 0x142   : > { %v8502_v18 = vadd.f32 %v1497_v17, %v1457_v16 }
 0x144   : > { %v1511_v19 = vsel %vm1510_vm2, %v8502_v18, 0.0 }
 0x145   : > { %1512 = vadd.xlane.f32.xlu1 %v1511_v19 }
 0x149   : > { %v1499_v20 = vpop.f32.mrf.mxu0 }
 0x14a   : > { %v7719_v20 = vld [vmem:[%s8209_s30] ss:$0 sm:$0xff] }
 0x1a8   : > { %v1506_v28 = vpop.xlane.xlu0 %1505 }
 0x1a9   : > { %v1521_v29 = vmul.f32 %v8506_v27, %v1506_v28 }
 0x1ab   : > { %v8510_v30 = vsub.f32 %v8492_v10, %v1521_v29 }
 0x1ad   : > { %v1527_v31 = vmul.f32 %v8510_v30, %v8510_v30 }
 0x1af   : > { %v1530_v32 = vsel %vm1503_vm1, %v1527_v31, 0.0 }
 0x1b0   : > { %1531 = vadd.xlane.f32.xlu1 %v1530_v32  ;;  %v1509_v33 = vpop.xlane.xlu0 %1508 }
 0x1b1   : > { %v1522_v34 = vmul.f32 %v8506_v27, %v1509_v33 }
 0x1b3   : > { %v8517_v35 = vsub.f32 %v8497_v14, %v1522_v34 }
 0x1b5   : > { %v1528_v36 = vmul.f32 %v8517_v35, %v8517_v35 }
 0x1b7   : > { %v1533_v37 = vsel %vm1503_vm1, %v1528_v36, 0.0 }
 0x1b8   : > { %v1513_v38 = vpop.xlane.xlu1 %1512  ;;  %1534 = vadd.xlane.f32.xlu2 %v1533_v37 }
 0x1b9   : > { %v1523_v39 = vmul.f32 %v8506_v27, %v1513_v38 }
 0x1bb   : > { %v8524_v40 = vsub.f32 %v8502_v18, %v1523_v39 }
 0x1bd   : > { %v1529_v41 = vmul.f32 %v8524_v40, %v8524_v40 }
 0x1bf   : > { %v1536_v42 = vsel %vm1510_vm2, %v1529_v41, 0.0 }
 0x1c0   : > { %1537 = vadd.xlane.f32.xlu2 %v1536_v42 }
 0x223   : > { %v1532_v47 = vpop.xlane.xlu1 %1531 }
 0x224   : > { %v1539_v48 = vmul.f32 %v1532_v47, %v8506_v27  ;;  %v7723_v47 = vld [vmem:[%s9686_s8] ss:$0 sm:$0xff] }
 0x226   : > { %v1542_v52 = vadd.f32 1e-12, %v1539_v48 }
 0x228   : > { %7776 = vrsqrt.f32 %v1542_v52  ;;  %vm1551_vm5 = vweird.f32 %v1542_v52 }
 0x22b   : > { %v1535_v54 = vpop.xlane.xlu2 %1534 }
 0x22c   : > { %v1540_v55 = vmul.f32 %v1535_v54, %v8506_v27 }
 0x22e   : > { %v7777_v56 = vpop.eup %7776  ;;  %v1543_v57 = vadd.f32 1e-12, %v1540_v55 }
 0x22f   : > { %v1546_v58 = vmul.f32 %v7777_v56, %v1542_v52  ;;  %vm1552_vm4 = vweird.f32 %v7777_v56 }
 0x230   : > { %7778 = vrsqrt.f32 %v1543_v57  ;;  %vm1553_vm6 = vmor %vm1551_vm5, %vm1552_vm4  ;;  %vm1561_vm8 = vweird.f32 %v1543_v57 }
 0x231   : > { %v1547_v59 = vmul.f32 %v7777_v56, %v1546_v58 }
 0x233   : > { %v1548_v60 = vmul.f32 0.5, %v1547_v59  ;;  %v1538_v61 = vpop.xlane.xlu2 %1537 }
 0x234   : > { %v1541_v62 = vmul.f32 %v1538_v61, %v8506_v27 }
 0x235   : > { %v1549_v63 = vsub.f32 1.5, %v1548_v60 }
 0x236   : > { %v7779_v0 = vpop.eup %7778  ;;  %v1544_v1 = vadd.f32 1e-12, %v1541_v62 }
 0x237   : > { %v1550_v2 = vmul.f32 %v7777_v56, %v1549_v63  ;;  %v1556_v3 = vmul.f32 %v7779_v0, %v1543_v57  ;;  %vm1562_vm7 = vweird.f32 %v7779_v0 }
 0x238   : > { %7780 = vrsqrt.f32 %v1544_v1  ;;  %vm1563_vm9 = vmor %vm1561_vm8, %vm1562_vm7  ;;  %vm1571_vm11 = vweird.f32 %v1544_v1 }
 0x239   : > { %v1557_v4 = vmul.f32 %v7779_v0, %v1556_v3  ;;  %v1554_v5 = vsel %vm1553_vm6, %v7777_v56, %v1550_v2  ;;  %v8140_v56 = vmov 0  }
 0x23a   : > { %v1575_v13 = vmul.f32 %v1554_v5, %v8510_v30  ;;  %v8574_v57 = vsel %vm1792_vm13, 65535, %v8140_v56  ;;  %vm2797_vm13 = vcmask 523264  }
 0x23b   : > { %v1558_v6 = vmul.f32 0.5, %v1557_v4 }
 0x23c   : > { %v1581_v21 = vmul.f32 %v7718_v12, %v1575_v13 }
 0x23d   : > { %v1559_v8 = vsub.f32 1.5, %v1558_v6 }
 0x23e   : > { %v7781_v11 = vpop.eup %7780  ;;  %v1587_v26 = vadd.f32 %v7719_v20, %v1581_v21 }
 0x23f   : > { %v1560_v15 = vmul.f32 %v7779_v0, %v1559_v8  ;;  %v1566_v16 = vmul.f32 %v7781_v11, %v1544_v1  ;;  %vm1572_vm10 = vweird.f32 %v7781_v11 }
 0x240   : > { %vm1573_vm12 = vmor %vm1571_vm11, %vm1572_vm10 }
 0x241   : > { %v1564_v17 = vsel %vm1563_vm9, %v7779_v0, %v1560_v15  ;;  %v1567_v19 = vmul.f32 %v7781_v11, %v1566_v16  ;;  %v7488_v16 = vld [vmem:[%s9688_s3 + $0x10] sm:$0xff] }
 0x242   : > { %v1576_v22 = vmul.f32 %v1564_v17, %v8517_v35 }
 0x243   : > { %v1568_v23 = vmul.f32 0.5, %v1567_v19 }
 0x244   : > { %v1582_v24 = vmul.f32 %v7718_v12, %v1576_v22 }
 0x245   : > { %v1569_v25 = vsub.f32 1.5, %v1568_v23 }
 0x246   : > { %v1588_v28 = vadd.f32 %v7719_v20, %v1582_v24 }
 0x247   : > { %v1570_v29 = vmul.f32 %v7781_v11, %v1569_v25 }
 0x248   : > { %v8546_v30 = vpack.c.bf16 %v1588_v28, %v1587_v26 }
 0x249   : > { %v1574_v31 = vsel %vm1573_vm12, %v7781_v11, %v1570_v29  ;;  %v7720_v11 = vld [vmem:[%s9679_s21] ss:$0 sm:$0xff] }
 0x24a   : > { %6510 = vmatmul.msk.bf16.vlgmr.msra.gmra.mxu1 %vm1503_vm1, %v8546_v30  ;;  %6520 = vmatmul.msk.bf16.vlgmr.msra.gmra.mxu2 %vm1503_vm1, %v8546_v30  ;;  %v1577_v32 = vmul.f32 %v1574_v31, %v8524_v40 }
 0x24b   : > { %6530 = vmatmul.msk.bf16.vlgmr.msra.gmra.mxu3 %vm1503_vm1, %v8546_v30  ;;  %6564 = vmatmul.msk.bf16.vlgmr.msrb.gmra.mxu0 %vm1503_vm1, %v8546_v30 }
 0x24c   : > { %v1583_v33 = vmul.f32 %v7718_v12, %v1577_v32 }
 0x24e   : > { %v1589_v34 = vadd.f32 %v7719_v20, %v1583_v33 }
 0x250   : > { %v8557_v35 = vpack.c.bf16 %v1589_v34, %v1589_v34 }
 0x25a   : > { %6511 = vmatmul.msk.bf16.gmra.mxu1 %vm1503_vm1, %v8557_v35  ;;  %6521 = vmatmul.msk.bf16.gmra.mxu2 %vm1503_vm1, %v8557_v35 }
 0x25b   : > { %6531 = vmatmul.msk.bf16.gmra.mxu3 %vm1503_vm1, %v8557_v35  ;;  %6565 = vmatmul.msk.bf16.gmra.mxu0 %vm1503_vm1, %v8557_v35 }
 0x26b   : > { %6549 = vmatmul.msk.bf16.vlgmr.msrb.gmra.mxu3 %vm1503_vm1, %v8546_v30 }
 0x27b   : > { %6550 = vmatmul.msk.bf16.gmra.mxu3 %vm1503_vm1, %v8557_v35 }
 0x2c7   : > { %v1627_v36 = vpop.f32.mrf.mxu1 }
 0x2c8   : > { %v1890_v37 = vpop.f32.mrf.mxu0  ;;  %v1628_v19 = vadd.f32 %v7720_v11, %v1627_v36 }
 0x2c9   : > { %v1891_v13 = vadd.f32 %v7721_v51, %v1890_v37 }
 0x2cd   : > { %v1665_v38 = vpop.f32.mrf.mxu2 }
 0x2ce   : > { %v1703_v39 = vpop.f32.mrf.mxu3  ;;  %v1666_v0 = vadd.f32 %v7722_v46, %v1665_v38 }
 0x2cf   : > { %v1629_v40 = vpop.f32.mrf.mxu1  ;;  %v1704_v1 = vadd.f32 %v7723_v47, %v1703_v39 }
 0x2d0   : > { %v1892_v41 = vpop.f32.mrf.mxu0  ;;  %v1630_v15 = vadd.f32 %v7720_v11, %v1629_v40  ;;  %v7725_v40 = vld [vmem:[%s9686_s8 + $0x1] ss:$0 sm:$0xff] }
 0x2d1   : > { %v1893_v8 = vadd.f32 %v7721_v51, %v1892_v41 }
 0x2d2   : > { %v1712_v21 = vpack.c.bf16 %v1630_v15, %v1628_v19  ;;  %v7490_v15 = vld [vmem:[%s9682_s17 + $0x20] sm:$0xff] }
 0x2d3   : > { %v1941_v17 = vpack.c.bf16 %v1893_v8, %v1891_v13  ;;  %v7491_v13 = vld [vmem:[%s9682_s17 + $0x28] sm:$0xff] }
 0x2d5   : > { %v1667_v42 = vpop.f32.mrf.mxu2  ;;  %v1950_v22 = vsel %vm1716_vm14, %v1941_v17, 0 }
 0x2d6   : > { %v1705_v43 = vpop.f32.mrf.mxu3  ;;  %v1668_v60 = vadd.f32 %v7722_v46, %v1667_v42 }
 0x2d7   : > { %v1632_v44 = vpop.f32.mrf.mxu1  ;;  %v1706_v62 = vadd.f32 %v7723_v47, %v1705_v43 }
 0x2d8   : > { %v1895_v45 = vpop.f32.mrf.mxu0  ;;  %v1714_v5 = vpack.c.bf16 %v1668_v60, %v1666_v0  ;;  %v1633_v24 = vadd.f32 %v7720_v11, %v1632_v44 }
 0x2d9   : > { %v1896_v58 = vadd.f32 %v7721_v51, %v1895_v45  ;;  %v1784_v6 = vpack.c.bf16 %v1706_v62, %v1704_v1 }
 0x2da   : > { %v1724_v12 = vsel %vm1716_vm14, %v1714_v5, 0  ;;  %v1713_v26 = vpack.c.bf16 %v1633_v24, %v1633_v24 }
 0x2db   : > { %v1942_v2 = vpack.c.bf16 %v1896_v58, %v1896_v58 }
 0x2dd   : > { %v1670_v48 = vpop.f32.mrf.mxu2  ;;  %v1953_v9 = vsel %vm1716_vm14, %v1942_v2, 0 }
 0x2de   : > { %v1671_v49 = vadd.f32 %v7722_v46, %v1670_v48  ;;  %v1708_v50 = vpop.f32.mrf.mxu3 }
 0x2df   : > { %v1709_v52 = vadd.f32 %v7723_v47, %v1708_v50  ;;  %v1634_v53 = vpop.f32.mrf.mxu1 }
 0x2e0   : > { %v1715_v54 = vpack.c.bf16 %v1671_v49, %v1671_v49  ;;  %v1897_v55 = vpop.f32.mrf.mxu0 }
 0x2e1   : > { %v1785_v59 = vpack.c.bf16 %v1709_v52, %v1709_v52 }
 0x2e2   : > { %v1727_v61 = vsel %vm1716_vm14, %v1715_v54, 0 }
 0x2e3   : > { %1735 = vmatpush.bf16.xpose.msrb.mxu1 %v1727_v61  ;;  %v1796_v63 = vand.u32 %v8574_v57, %v1785_v59 }
 0x2e5   : > { %1804 = vmatpush.bf16.msrb.mxu2 %v1796_v63  ;;  %v1672_v3 = vpop.f32.mrf.mxu2 }
 0x2e6   : > { %v1710_v4 = vpop.f32.mrf.mxu3 }
 0x2e9   : > { %1805 = vmatpush.bf16.msrb.mxu2 %v1784_v6 }
 0x2eb   : > { %1736 = vmatpush.bf16.xpose.msrb.mxu1 %v1724_v12 }
 0x2ed   : > { %1961 = vmatpush.bf16.xpose.msra.mxu2 %v1953_v9 }
 0x2ee   : > { %v8583_v20 = vpop.f32.mrf.mxu3 }
 0x2f2   : > { %6532 = vmatmul.msk.bf16.vlgmr.msrb.gmra.mxu1 %vm1716_vm14, %v1712_v21 }
 0x2f3   : > { %1927 = vmatpush.bf16.msra.mxu1 %v7489_v7 }
 0x2f5   : > { %1962 = vmatpush.bf16.xpose.msra.mxu2 %v1950_v22 }
 0x2f6   : > { %v8587_v23 = vpop.f32.mrf.mxu3 }
 0x2f7   : > { %1928 = vmatpush.bf16.msra.mxu1 %v7488_v16  ;;  %v7724_v16 = vld [vmem:[%s9679_s21 + $0x1] ss:$0 sm:$0xff] }
 0x2f8   : > { %v1853_v17 = vadd.f32 %v7724_v16, %v8587_v23  ;;  %v1851_v19 = vadd.f32 %v7724_v16, %v8583_v20 }
 0x2fa   : > { %v1939_v21 = vpack.c.bf16 %v1853_v17, %v1851_v19 }
 0x2fe   : > { %v8589_v25 = vpop.f32.mrf.mxu3 }
 0x2ff   : > { %v1856_v22 = vadd.f32 %v7724_v16, %v8589_v25  ;;  %v6585_v16 = vld [vmem:[%s9683_s14 + $0x4] sm:$0xf] }
 0x300   : > { %v2049_v17 = vsel %vm2047_vm3, %v6585_v16, 0 }
 0x301   : > { %v1940_v24 = vpack.c.bf16 %v1856_v22, %v1856_v22  ;;  %2058 = vmatpush.bf16.msra.mxu0 %v2049_v17  ;;  %v7494_v22 = vld [vmem:[%s9688_s3 + $0x20] sm:$0xff]  ;;  %v6639_v17 = vld [vmem:[%s9683_s14 + $0x8] sm:$0xf] }
 0x302   : > { %6533 = vmatmul.msk.bf16.gmra.mxu1 %vm1716_vm14, %v1713_v26  ;;  %v1818_v26 = vld [vmem:[%s9683_s14] sm:$0xf] }
 0x303   : > { %v2076_v23 = vsel %vm2047_vm3, %v1818_v26, 0 }
 0x304   : > { %2085 = vmatpush.bf16.msrb.mxu1 %v2076_v23 }
 0x306   : > { %v1857_v28 = vpop.f32.mrf.mxu3 }
 0x312   : > { %6579 = vmatmul.msk.bf16.vlgmr.msra.gmra.mxu1 %vm1503_vm1, %v8546_v30 }
 0x322   : > { %6580 = vmatmul.msk.bf16.gmra.mxu1 %vm1503_vm1, %v8557_v35 }
 0x36f   : > { %v1738_v29 = vpop.f32.mrf.mxu1 }
 0x370   : > { %v1748_v31 = vsel %vm1747_vm15, %v1738_v29, -inf }
 0x371   : > { %1749 = vmax.xlane.f32.xlu0 %v1748_v31 }
 0x377   : > { %v1740_v32 = vpop.f32.mrf.mxu1 }
 0x378   : > { %v1751_v33 = vsel %vm1747_vm15, %v1740_v32, -inf }
 0x379   : > { %1752 = vmax.xlane.f32.xlu1 %v1751_v33 }
 0x37f   : > { %v1743_v34 = vpop.f32.mrf.mxu1 }
 0x380   : > { %v1755_v36 = vsel %vm1754_vm0, %v1743_v34, -inf }
 0x381   : > { %1756 = vmax.xlane.f32.xlu2 %v1755_v36 }
 0x387   : > { %v1745_v37 = vpop.f32.mrf.mxu1 }
 0x38f   : > { %v1930_v38 = vpop.f32.mrf.mxu1 }
 0x390   : > { %v1931_v46 = vadd.f32 %v7725_v40, %v1930_v38 }
 0x397   : > { %v1932_v39 = vpop.f32.mrf.mxu1 }
 0x398   : > { %v1933_v44 = vadd.f32 %v7725_v40, %v1932_v39 }
 0x39a   : > { %v2008_v48 = vpack.c.bf16 %v1933_v44, %v1931_v46 }
 0x39f   : > { %v1935_v41 = vpop.f32.mrf.mxu1 }
 0x3a0   : > { %v1936_v42 = vadd.f32 %v7725_v40, %v1935_v41 }
 0x3a2   : > { %v2009_v43 = vpack.c.bf16 %v1936_v42, %v1936_v42 }
 0x3a4   : > { %v2017_v45 = vand.u32 %v2009_v43, %v8574_v57 }
 0x3a6   : > { %2025 = vmatpush.bf16.msra.mxu3 %v2017_v45 }
 0x3a7   : > { %v1937_v47 = vpop.f32.mrf.mxu1 }
 0x3aa   : > { %2026 = vmatpush.bf16.msra.mxu3 %v2008_v48 }
 0x3e4   : > { %v1750_v49 = vpop.xlane.xlu0 %1749 }
 0x3e5   : > { %v1758_v50 = vsub.f32 %v1738_v29, %v1750_v49 }
 0x3e7   : > { %v1761_v51 = vmul.f32 1.442695, %v1758_v50 }
 0x3e9   : > { %7782 = vpow2.f32 %v1761_v51 }
 0x3ec   : > { %v1753_v52 = vpop.xlane.xlu1 %1752 }
 0x3ed   : > { %v1759_v53 = vsub.f32 %v1740_v32, %v1753_v52 }
 0x3ef   : > { %v7783_v54 = vpop.eup %7782  ;;  %v1763_v55 = vmul.f32 1.442695, %v1759_v53 }
 0x3f0   : > { %v1767_v56 = vsel %vm1747_vm15, %v7783_v54, 0.0 }
 0x3f1   : > { %7784 = vpow2.f32 %v1763_v55  ;;  %1768 = vadd.xlane.f32.xlu0 %v1767_v56 }
 0x3f4   : > { %v1757_v58 = vpop.xlane.xlu2 %1756 }
 0x3f5   : > { %v1760_v59 = vsub.f32 %v1743_v34, %v1757_v58 }
 0x3f7   : > { %v7785_v60 = vpop.eup %7784  ;;  %v1765_v61 = vmul.f32 1.442695, %v1760_v59 }
 0x3f8   : > { %v1770_v62 = vsel %vm1747_vm15, %v7785_v60, 0.0 }
 0x3f9   : > { %7786 = vpow2.f32 %v1765_v61  ;;  %1771 = vadd.xlane.f32.xlu1 %v1770_v62 }
 0x3ff   : > { %v7787_v63 = vpop.eup %7786 }
 0x400   : > { %v1773_v0 = vsel %vm1754_vm0, %v7787_v63, 0.0 }
 0x401   : > { %1774 = vadd.xlane.f32.xlu2 %v1773_v0 }
 0x464   : > { %v1769_v1 = vpop.xlane.xlu0 %1768 }
 0x465   : > { %7788 = vrcp.f32 %v1769_v1 }
 0x46b   : > { %v7789_v3 = vpop.eup %7788 }
 0x46c   : > { %v1772_v2 = vpop.xlane.xlu1 %1771  ;;  %v1779_v5 = vmul.f32 %v7789_v3, %v7783_v54  ;;  %v7492_v3 = vld [vmem:[%s9677_s25 + $0x20] sm:$0xff] }
 0x46d   : > { %7790 = vrcp.f32 %v1772_v2  ;;  %v7493_v2 = vld [vmem:[%s9677_s25 + $0x28] sm:$0xff] }
 0x46e   : > { %2164 = vmatpush.bf16.msrb.mxu3 %v7493_v2 }
 0x472   : > { %2165 = vmatpush.bf16.msrb.mxu3 %v7492_v3 }
 0x473   : > { %v7791_v4 = vpop.eup %7790 }
 0x474   : > { %v1780_v6 = vmul.f32 %v7791_v4, %v7785_v60  ;;  %v1775_v7 = vpop.xlane.xlu2 %1774 }
 0x475   : > { %7792 = vrcp.f32 %v1775_v7 }
 0x476   : > { %v1782_v8 = vpack.c.bf16 %v1780_v6, %v1779_v5 }
 0x478   : > { %6534 = vmatmul.msk.bf16.vlgmr.msrb.gmra.mxu2 %vm1747_vm15, %v1782_v8 }
 0x479   : > { %2124 = vmatpush.bf16.msrb.mxu2 %v7491_v13 }
 0x47b   : > { %v7793_v9 = vpop.eup %7792 }
 0x47c   : > { %v1781_v11 = vmul.f32 %v7793_v9, %v7787_v63 }
 0x47d   : > { %2125 = vmatpush.bf16.msrb.mxu2 %v7490_v15 }
 0x47e   : > { %v1783_v12 = vpack.c.bf16 %v1781_v11, %v1781_v11 }
 0x488   : > { %6535 = vmatmul.msk.bf16.gmra.mxu2 %vm1747_vm15, %v1783_v12 }
 0x498   : > { %6581 = vmatmul.msk.bf16.vlgmr.msra.gmra.mxu2 %vm1716_vm14, %v1939_v21  ;;  %v7495_v21 = vld [vmem:[%s9688_s3 + $0x28] sm:$0xff] }
 0x499   : > { %2204 = vmatpush.bf16.msrb.mxu0 %v7495_v21 }
 0x49d   : > { %2205 = vmatpush.bf16.msrb.mxu0 %v7494_v22 }
 0x4a8   : > { %6582 = vmatmul.msk.bf16.gmra.mxu2 %vm1716_vm14, %v1940_v24 }
 0x4b8   : > { %6603 = vmatmul.msk.bf16.vlgmr.msrb.gmra.mxu2 %vm1503_vm1, %v8546_v30 }
 0x4c8   : > { %6604 = vmatmul.msk.bf16.gmra.mxu2 %vm1503_vm1, %v8557_v35 }
 0x4fb   : > { %v1807_v20 = vpop.f32.mrf.mxu2 }
 0x503   : > { %v1809_v28 = vpop.f32.mrf.mxu2 }
 0x504   : > { %v1816_v29 = vpack.c.bf16 %v1809_v28, %v1807_v20 }
 0x506   : > { %6588 = vmatmul.msk.bf16.vlgmr.msrb.gmra.mxu1 %vm1716_vm14, %v1816_v29  ;;  %v7497_v29 = vld [vmem:[%s9682_s17 + $0x38] sm:$0xff] }
 0x50b   : > { %v1812_v25 = vpop.f32.mrf.mxu2 }
 0x50c   : > { %v1817_v32 = vpack.c.bf16 %v1812_v25, %v1812_v25 }
 0x513   : > { %v1814_v31 = vpop.f32.mrf.mxu2 }
 0x514   : > { %v7496_v31 = vld [vmem:[%s9682_s17 + $0x30] sm:$0xff] }
 0x516   : > { %6589 = vmatmul.msk.bf16.gmra.mxu1 %vm1716_vm14, %v1817_v32 }
 0x51b   : > { %v1964_v33 = vpop.f32.mrf.mxu2 }
 0x51c   : > { %v1973_v34 = vsel %vm1747_vm15, %v1964_v33, -inf }
 0x51d   : > { %1974 = vmax.xlane.f32.xlu0 %v1973_v34 }
 0x523   : > { %v1966_v36 = vpop.f32.mrf.mxu2 }
 0x524   : > { %v1976_v37 = vsel %vm1747_vm15, %v1966_v36, -inf }
 0x525   : > { %1977 = vmax.xlane.f32.xlu1 %v1976_v37 }
 0x52b   : > { %v1969_v38 = vpop.f32.mrf.mxu2 }
 0x52c   : > { %v1979_v39 = vsel %vm1754_vm0, %v1969_v38, -inf }
 0x52d   : > { %1980 = vmax.xlane.f32.xlu2 %v1979_v39 }
 0x533   : > { %v1971_v40 = vpop.f32.mrf.mxu2 }
 0x53b   : > { %v8625_v41 = vpop.f32.mrf.mxu2 }
 0x543   : > { %v8627_v42 = vpop.f32.mrf.mxu2 }
 0x54b   : > { %v8629_v43 = vpop.f32.mrf.mxu2 }
 0x553   : > { %v2134_v44 = vpop.f32.mrf.mxu2 }
 0x583   : > { %v8631_v45 = vpop.f32.mrf.mxu1 }
 0x58b   : > { %v8633_v46 = vpop.f32.mrf.mxu1 }
 0x590   : > { %v1975_v47 = vpop.xlane.xlu0 %1974 }
 0x591   : > { %v1982_v48 = vsub.f32 %v1964_v33, %v1975_v47  ;;  %v7727_v33 = vld [vmem:[%s8179_s29 + $0x2] ss:$0 sm:$0xff] }
 0x593   : > { %v1985_v49 = vmul.f32 1.442695, %v1982_v48  ;;  %v8635_v50 = vpop.f32.mrf.mxu1  ;;  %v7499_v48 = vld [vmem:[%s9677_s25 + $0x38] sm:$0xff] }
 0x595   : > { %7794 = vpow2.f32 %v1985_v49  ;;  %v7726_v49 = vld [vmem:[%s9679_s21 + $0x2] ss:$0 sm:$0xff] }
 0x598   : > { %v1978_v51 = vpop.xlane.xlu1 %1977 }
 0x599   : > { %v1983_v52 = vsub.f32 %v1966_v36, %v1978_v51 }
 0x59b   : > { %v7795_v53 = vpop.eup %7794  ;;  %v1987_v54 = vmul.f32 1.442695, %v1983_v52  ;;  %v2094_v55 = vpop.f32.mrf.mxu1  ;;  %v2130_v52 = vadd.f32 %v7726_v49, %v8627_v42 }
 0x59c   : > { %v1991_v56 = vsel %vm1747_vm15, %v7795_v53, 0.0 }
 0x59d   : > { %7796 = vpow2.f32 %v1987_v54  ;;  %1992 = vadd.xlane.f32.xlu0 %v1991_v56  ;;  %v2128_v54 = vadd.f32 %v7726_v49, %v8625_v41  ;;  %v2133_v56 = vadd.f32 %v7726_v49, %v8629_v43 }
 0x59f   : > { %v2216_v55 = vpack.c.bf16 %v2130_v52, %v2128_v54 }
 0x5a0   : > { %v1981_v58 = vpop.xlane.xlu2 %1980 }
 0x5a1   : > { %v1984_v59 = vsub.f32 %v1969_v38, %v1981_v58  ;;  %v2217_v58 = vpack.c.bf16 %v2133_v56, %v2133_v56 }
 0x5a3   : > { %v7797_v60 = vpop.eup %7796  ;;  %v1989_v61 = vmul.f32 1.442695, %v1984_v59 }
 0x5a4   : > { %v1994_v62 = vsel %vm1747_vm15, %v7797_v60, 0.0 }
 0x5a5   : > { %7798 = vpow2.f32 %v1989_v61  ;;  %1995 = vadd.xlane.f32.xlu1 %v1994_v62  ;;  %v7728_v62 = vld [vmem:[%s9686_s8 + $0x2] ss:$0 sm:$0xff] }
 0x5ab   : > { %v7799_v63 = vpop.eup %7798 }
 0x5ac   : > { %v1997_v0 = vsel %vm1754_vm0, %v7799_v63, 0.0 }
 0x5ad   : > { %1998 = vadd.xlane.f32.xlu2 %v1997_v0 }
 0x610   : > { %v1993_v1 = vpop.xlane.xlu0 %1992 }
 0x611   : > { %7800 = vrcp.f32 %v1993_v1 }
 0x617   : > { %v7801_v5 = vpop.eup %7800 }
 0x618   : > { %v1996_v4 = vpop.xlane.xlu1 %1995  ;;  %v2003_v7 = vmul.f32 %v7801_v5, %v7795_v53  ;;  %v7498_v53 = vld [vmem:[%s9677_s25 + $0x30] sm:$0xff] }
 0x619   : > { %7802 = vrcp.f32 %v1996_v4 }
 0x61f   : > { %v7803_v6 = vpop.eup %7802 }
 0x620   : > { %v2004_v8 = vmul.f32 %v7803_v6, %v7797_v60  ;;  %v1999_v11 = vpop.xlane.xlu2 %1998 }
 0x621   : > { %7804 = vrcp.f32 %v1999_v11 }
 0x622   : > { %v2006_v9 = vpack.c.bf16 %v2004_v8, %v2003_v7 }
 0x624   : > { %6583 = vmatmul.msk.bf16.vlgmr.msra.gmra.mxu3 %vm1747_vm15, %v2006_v9 }
 0x627   : > { %v7805_v12 = vpop.eup %7804 }
 0x628   : > { %v2005_v13 = vmul.f32 %v7805_v12, %v7799_v63 }
 0x62a   : > { %v2007_v15 = vpack.c.bf16 %v2005_v13, %v2005_v13 }
 0x634   : > { %6584 = vmatmul.msk.bf16.gmra.mxu3 %vm1747_vm15, %v2007_v15 }
 0x644   : > { %6618 = vmatmul.msk.bf16.vlgmr.msrb.gmra.mxu3 %vm1503_vm1, %v8546_v30 }
 0x654   : > { %6619 = vmatmul.msk.bf16.gmra.mxu3 %vm1503_vm1, %v8557_v35 }
 0x6a7   : > { %v2028_v19 = vpop.f32.mrf.mxu3 }
 0x6af   : > { %v2030_v24 = vpop.f32.mrf.mxu3 }
 0x6b0   : > { %v2037_v26 = vpack.c.bf16 %v2030_v24, %v2028_v19  ;;  %v2325_v19 = vsel %vm2047_vm3, %v6639_v17, 0 }
 0x6b1   : > { %2334 = vmatpush.bf16.msra.mxu3 %v2325_v19 }
 0x6b2   : > { %6586 = vmatmul.msk.bf16.vlgmr.msra.gmra.mxu0 %vm1716_vm14, %v2037_v26 }
 0x6b3   : > { %2376 = vmatpush.bf16.msra.mxu0 %v7497_v29 }
 0x6b7   : > { %v2033_v23 = vpop.f32.mrf.mxu3  ;;  %2377 = vmatpush.bf16.msra.mxu0 %v7496_v31 }
 0x6b8   : > { %v2038_v28 = vpack.c.bf16 %v2033_v23, %v2033_v23 }
 0x6bf   : > { %v2035_v20 = vpop.f32.mrf.mxu3 }
 0x6c0   : > { %v7730_v20 = vld [vmem:[%s8179_s29 + $0x3] ss:$0 sm:$0xff] }
 0x6c2   : > { %6587 = vmatmul.msk.bf16.gmra.mxu0 %vm1716_vm14, %v2038_v28 }
 0x6c7   : > { %v2167_v25 = vpop.f32.mrf.mxu3 }
 0x6c8   : > { %v2168_v40 = vadd.f32 %v7727_v33, %v2167_v25 }
 0x6cf   : > { %v2169_v32 = vpop.f32.mrf.mxu3 }
 0x6d0   : > { %v2170_v38 = vadd.f32 %v7727_v33, %v2169_v32 }
 0x6d2   : > { %6633 = vmatmul.msk.bf16.vlgmr.msrb.gmra.mxu0 %vm1503_vm1, %v8546_v30  ;;  %v2218_v47 = vpack.c.bf16 %v2170_v38, %v2168_v40 }
 0x6d4   : > { %v2227_v51 = vsel %vm1716_vm14, %v2218_v47, 0 }
 0x6d7   : > { %v2172_v34 = vpop.f32.mrf.mxu3 }
 0x6d8   : > { %v2173_v36 = vadd.f32 %v7727_v33, %v2172_v34 }
 0x6da   : > { %v2219_v37 = vpack.c.bf16 %v2173_v36, %v2173_v36 }
 0x6dc   : > { %v2230_v39 = vsel %vm1716_vm14, %v2219_v37, 0 }
 0x6dd   : > { %2238 = vmatpush.bf16.xpose.msra.mxu1 %v2230_v39 }
 0x6df   : > { %v2174_v44 = vpop.f32.mrf.mxu3 }
 0x6e2   : > { %6634 = vmatmul.msk.bf16.gmra.mxu0 %vm1503_vm1, %v8557_v35 }
 0x6e5   : > { %2239 = vmatpush.bf16.xpose.msra.mxu1 %v2227_v51 }
 0x6ec   : > { %6635 = vmatmul.msk.bf16.vlgmr.msra.gmra.mxu1 %vm1716_vm14, %v2216_v55 }
 0x6ed   : > { %2416 = vmatpush.bf16.msrb.mxu1 %v7499_v48 }
 0x6f1   : > { %2417 = vmatpush.bf16.msrb.mxu1 %v7498_v53 }
 0x6f2   : > { %6655 = vmatmul.msk.bf16.vlgmr.msra.gmra.mxu0 %vm1503_vm1, %v8546_v30 }
 0x6fc   : > { %6636 = vmatmul.msk.bf16.gmra.mxu1 %vm1716_vm14, %v2217_v58 }
 0x702   : > { %6656 = vmatmul.msk.bf16.gmra.mxu0 %vm1503_vm1, %v8557_v35 }
 0x70c   : > { %6670 = vmatmul.msk.bf16.vlgmr.msrb.gmra.mxu1 %vm1503_vm1, %v8546_v30 }
 0x71c   : > { %6671 = vmatmul.msk.bf16.gmra.mxu1 %vm1503_vm1, %v8557_v35 }
 0x72f   : > { %v8679_v41 = vpop.f32.mrf.mxu0 }
 0x737   : > { %v8681_v42 = vpop.f32.mrf.mxu0 }
 0x73f   : > { %v8683_v59 = vpop.f32.mrf.mxu0 }
 0x747   : > { %v2067_v60 = vpop.f32.mrf.mxu0 }
 0x74f   : > { %v2207_v43 = vpop.f32.mrf.mxu0 }
 0x750   : > { %v2208_v4 = vadd.f32 %v7728_v62, %v2207_v43 }
 0x757   : > { %v2209_v61 = vpop.f32.mrf.mxu0 }
 0x758   : > { %v2210_v2 = vadd.f32 %v7728_v62, %v2209_v61  ;;  %v7501_v61 = vld [vmem:[%s9688_s3 + $0x38] sm:$0xff] }
 0x75a   : > { %v2285_v6 = vpack.c.bf16 %v2210_v2, %v2208_v4 }
 0x75f   : > { %v2212_v63 = vpop.f32.mrf.mxu0 }
 0x760   : > { %v2213_v0 = vadd.f32 %v7728_v62, %v2212_v63  ;;  %v7500_v62 = vld [vmem:[%s9688_s3 + $0x30] sm:$0xff] }
 0x762   : > { %v2286_v1 = vpack.c.bf16 %v2213_v0, %v2213_v0 }
 0x764   : > { %v2294_v3 = vand.u32 %v2286_v1, %v8574_v57 }
 0x766   : > { %2302 = vmatpush.bf16.msra.mxu2 %v2294_v3 }
 0x767   : > { %v2214_v5 = vpop.f32.mrf.mxu0 }
 0x769   : > { %v2241_v7 = vpop.f32.mrf.mxu1 }
 0x76a   : > { %2303 = vmatpush.bf16.msra.mxu2 %v2285_v6  ;;  %v2250_v8 = vsel %vm1747_vm15, %v2241_v7, -inf }
 0x76b   : > { %2251 = vmax.xlane.f32.xlu0 %v2250_v8 }
 0x76e   : > { %2456 = vmatpush.bf16.msrb.mxu2 %v7501_v61 }
 0x76f   : > { %v8688_v9 = vpop.f32.mrf.mxu0 }
 0x771   : > { %v2243_v11 = vpop.f32.mrf.mxu1 }
 0x772   : > { %v2253_v12 = vsel %vm1747_vm15, %v2243_v11, -inf  ;;  %2457 = vmatpush.bf16.msrb.mxu2 %v7500_v62 }
 0x773   : > { %2254 = vmax.xlane.f32.xlu1 %v2253_v12 }
 0x777   : > { %v8691_v13 = vpop.f32.mrf.mxu0 }
 0x779   : > { %v2246_v15 = vpop.f32.mrf.mxu1 }
 0x77a   : > { %v2256_v16 = vsel %vm1754_vm0, %v2246_v15, -inf }
 0x77b   : > { %2257 = vmax.xlane.f32.xlu2 %v2256_v16 }
 0x77f   : > { %v8696_v21 = vpop.f32.mrf.mxu0 }
 0x781   : > { %v2248_v22 = vpop.f32.mrf.mxu1 }
 0x787   : > { %v2386_v24 = vpop.f32.mrf.mxu0 }
 0x788   : > { %v7729_v24 = vld [vmem:[%s9679_s21 + $0x3] ss:$0 sm:$0xff] }
 0x789   : > { %v2419_v26 = vpop.f32.mrf.mxu1 }
 0x78a   : > { %v2420_v33 = vadd.f32 %v7730_v20, %v2419_v26  ;;  %v2382_v26 = vadd.f32 %v7729_v24, %v8691_v13 }
 0x791   : > { %v2421_v23 = vpop.f32.mrf.mxu1 }
 0x792   : > { %v2422_v31 = vadd.f32 %v7730_v20, %v2421_v23 }
 0x794   : > { %v2470_v36 = vpack.c.bf16 %v2422_v31, %v2420_v33  ;;  %v2385_v31 = vadd.f32 %v7729_v24, %v8696_v21  ;;  %v2093_v21 = vadd.f32 %v8635_v50, %v8683_v59 }
 0x796   : > { %v2479_v37 = vsel %vm1716_vm14, %v2470_v36, 0 }
 0x799   : > { %v2424_v28 = vpop.f32.mrf.mxu1 }
 0x79a   : > { %v2425_v29 = vadd.f32 %v7730_v20, %v2424_v28 }
 0x79c   : > { %v2471_v25 = vpack.c.bf16 %v2425_v29, %v2425_v29 }
 0x79e   : > { %v2482_v32 = vsel %vm1716_vm14, %v2471_v25, 0 }
 0x79f   : > { %2490 = vmatpush.bf16.xpose.msrb.mxu3 %v2482_v32 }
 0x7a1   : > { %v2426_v34 = vpop.f32.mrf.mxu1 }
 0x7a7   : > { %2491 = vmatpush.bf16.xpose.msrb.mxu3 %v2479_v37  ;;  %v2469_v37 = vpack.c.bf16 %v2385_v31, %v2385_v31 }
 0x7de   : > { %v2252_v38 = vpop.xlane.xlu0 %2251 }
 0x7df   : > { %v2259_v39 = vsub.f32 %v2241_v7, %v2252_v38 }
 0x7e1   : > { %v2262_v40 = vmul.f32 1.442695, %v2259_v39 }
 0x7e3   : > { %7806 = vpow2.f32 %v2262_v40 }
 0x7e6   : > { %v2255_v44 = vpop.xlane.xlu1 %2254 }
 0x7e7   : > { %v2260_v47 = vsub.f32 %v2243_v11, %v2255_v44 }
 0x7e9   : > { %v7807_v48 = vpop.eup %7806  ;;  %v2264_v49 = vmul.f32 1.442695, %v2260_v47 }
 0x7ea   : > { %v2268_v51 = vsel %vm1747_vm15, %v7807_v48, 0.0 }
 0x7eb   : > { %7808 = vpow2.f32 %v2264_v49  ;;  %2269 = vadd.xlane.f32.xlu0 %v2268_v51 }
 0x7ee   : > { %v2258_v52 = vpop.xlane.xlu2 %2257 }
 0x7ef   : > { %v2261_v53 = vsub.f32 %v2246_v15, %v2258_v52 }
 0x7f1   : > { %v7809_v54 = vpop.eup %7808  ;;  %v2266_v55 = vmul.f32 1.442695, %v2261_v53 }
 0x7f2   : > { %v2271_v56 = vsel %vm1747_vm15, %v7809_v54, 0.0 }
 0x7f3   : > { %7810 = vpow2.f32 %v2266_v55  ;;  %2272 = vadd.xlane.f32.xlu1 %v2271_v56 }
 0x7f9   : > { %v7811_v58 = vpop.eup %7810 }
 0x7fa   : > { %v2274_v60 = vsel %vm1754_vm0, %v7811_v58, 0.0 }
 0x7fb   : > { %2275 = vadd.xlane.f32.xlu2 %v2274_v60 }
 0x85e   : > { %v2270_v43 = vpop.xlane.xlu0 %2269 }
 0x85f   : > { %7812 = vrcp.f32 %v2270_v43 }
 0x865   : > { %v7813_v0 = vpop.eup %7812 }
 0x866   : > { %v2273_v63 = vpop.xlane.xlu1 %2272  ;;  %v2280_v2 = vmul.f32 %v7813_v0, %v7807_v48 }
 0x867   : > { %7814 = vrcp.f32 %v2273_v63 }
 0x86d   : > { %v7815_v1 = vpop.eup %7814 }
 0x86e   : > { %v2281_v3 = vmul.f32 %v7815_v1, %v7809_v54  ;;  %v2276_v5 = vpop.xlane.xlu2 %2275 }
 0x86f   : > { %7816 = vrcp.f32 %v2276_v5 }
 0x870   : > { %v2283_v4 = vpack.c.bf16 %v2281_v3, %v2280_v2 }
 0x872   : > { %6637 = vmatmul.msk.bf16.vlgmr.msra.gmra.mxu2 %vm1747_vm15, %v2283_v4 }
 0x875   : > { %v7817_v6 = vpop.eup %7816 }
 0x876   : > { %v2282_v7 = vmul.f32 %v7817_v6, %v7811_v58  ;;  %v6691_v6 = vld [vmem:[%s9683_s14 + $0xc] sm:$0xf] }
 0x878   : > { %v2284_v8 = vpack.c.bf16 %v2282_v7, %v2282_v7  ;;  %v2577_v7 = vsel %vm2047_vm3, %v6691_v6, 0 }
 0x879   : > { %2586 = vmatpush.bf16.msra.mxu1 %v2577_v7 }
 0x882   : > { %6638 = vmatmul.msk.bf16.gmra.mxu2 %vm1747_vm15, %v2284_v8 }
 0x892   : > { %6685 = vmatmul.msk.bf16.vlgmr.msrb.gmra.mxu2 %vm1503_vm1, %v8546_v30  ;;  %v2380_v30 = vadd.f32 %v7729_v24, %v8688_v9  ;;  %v2088_v9 = vadd.f32 %v8631_v45, %v8679_v41 }
 0x894   : > { %v2468_v20 = vpack.c.bf16 %v2382_v26, %v2380_v30 }
 0x8a2   : > { %6686 = vmatmul.msk.bf16.gmra.mxu2 %vm1503_vm1, %v8557_v35  ;;  %v7731_v35 = vld [vmem:[%s9686_s8 + $0x3] ss:$0 sm:$0xff] }
 0x8f5   : > { %v2305_v11 = vpop.f32.mrf.mxu2 }
 0x8fd   : > { %v2307_v12 = vpop.f32.mrf.mxu2 }
 0x8fe   : > { %v2314_v15 = vpack.c.bf16 %v2307_v12, %v2305_v11 }
 0x900   : > { %6640 = vmatmul.msk.bf16.vlgmr.msra.gmra.mxu3 %vm1716_vm14, %v2314_v15 }
 0x905   : > { %v2310_v16 = vpop.f32.mrf.mxu2 }
 0x906   : > { %v2315_v19 = vpack.c.bf16 %v2310_v16, %v2310_v16 }
 0x90d   : > { %v2312_v17 = vpop.f32.mrf.mxu2 }
 0x910   : > { %6641 = vmatmul.msk.bf16.gmra.mxu3 %vm1716_vm14, %v2315_v19 }
 0x915   : > { %v2459_v22 = vpop.f32.mrf.mxu2 }
 0x916   : > { %v2460_v34 = vadd.f32 %v7731_v35, %v2459_v22 }
 0x91d   : > { %v2461_v23 = vpop.f32.mrf.mxu2 }
 0x91e   : > { %v2462_v32 = vadd.f32 %v7731_v35, %v2461_v23 }
 0x920   : > { %6687 = vmatmul.msk.bf16.vlgmr.msrb.gmra.mxu3 %vm1716_vm14, %v2468_v20  ;;  %v2537_v13 = vpack.c.bf16 %v2462_v32, %v2460_v34  ;;  %v2090_v34 = vadd.f32 %v8633_v46, %v8681_v42 }
 0x925   : > { %v2464_v28 = vpop.f32.mrf.mxu2 }
 0x926   : > { %v2465_v29 = vadd.f32 %v7731_v35, %v2464_v28 }
 0x928   : > { %v2538_v25 = vpack.c.bf16 %v2465_v29, %v2465_v29 }
 0x92a   : > { %v2546_v33 = vand.u32 %v2538_v25, %v8574_v57  ;;  %v7732_v25 = vld [vmem:[%s9681_s19] ss:$0 sm:$0xff] }
 0x92c   : > { %2554 = vmatpush.bf16.msrb.mxu0 %v2546_v33 }
 0x92d   : > { %v2466_v36 = vpop.f32.mrf.mxu2 }
 0x930   : > { %6688 = vmatmul.msk.bf16.gmra.mxu3 %vm1716_vm14, %v2469_v37  ;;  %2555 = vmatpush.bf16.msrb.mxu0 %v2537_v13 }
 0x983   : > { %v2336_v38 = vpop.f32.mrf.mxu3 }
 0x984   : > { %v8724_v39 = vadd.f32 %v2336_v38, %v2088_v9 }
 0x98b   : > { %v8726_v40 = vpop.f32.mrf.mxu3 }
 0x98c   : > { %v2346_v37 = vadd.f32 %v8726_v40, %v2090_v34 }
 0x993   : > { %v2341_v44 = vpop.f32.mrf.mxu3 }
 0x994   : > { %v8730_v47 = vadd.f32 %v2341_v44, %v2093_v21 }
 0x99b   : > { %v2343_v48 = vpop.f32.mrf.mxu3 }
 0x9a3   : > { %v2493_v49 = vpop.f32.mrf.mxu3 }
 0x9a4   : > { %v2502_v51 = vsel %vm1747_vm15, %v2493_v49, -inf }
 0x9a5   : > { %2503 = vmax.xlane.f32.xlu0 %v2502_v51 }
 0x9ab   : > { %v2495_v52 = vpop.f32.mrf.mxu3 }
 0x9ac   : > { %v2505_v53 = vsel %vm1747_vm15, %v2495_v52, -inf }
 0x9ad   : > { %2506 = vmax.xlane.f32.xlu1 %v2505_v53 }
 0x9b3   : > { %v2498_v45 = vpop.f32.mrf.mxu3 }
 0x9b4   : > { %v2508_v41 = vsel %vm1754_vm0, %v2498_v45, -inf }
 0x9b5   : > { %2509 = vmax.xlane.f32.xlu2 %v2508_v41 }
 0x9bb   : > { %v2500_v54 = vpop.f32.mrf.mxu3 }
 0xa18   : > { %v2504_v55 = vpop.xlane.xlu0 %2503 }
 0xa19   : > { %v2511_v56 = vsub.f32 %v2493_v49, %v2504_v55 }
 0xa1b   : > { %v2514_v50 = vmul.f32 1.442695, %v2511_v56 }
 0xa1d   : > { %7818 = vpow2.f32 %v2514_v50 }
 0xa20   : > { %v2507_v59 = vpop.xlane.xlu1 %2506 }
 0xa21   : > { %v2512_v58 = vsub.f32 %v2495_v52, %v2507_v59 }
 0xa23   : > { %v7819_v60 = vpop.eup %7818  ;;  %v2516_v43 = vmul.f32 1.442695, %v2512_v58 }
 0xa24   : > { %v2520_v61 = vsel %vm1747_vm15, %v7819_v60, 0.0 }
 0xa25   : > { %7820 = vpow2.f32 %v2516_v43  ;;  %2521 = vadd.xlane.f32.xlu0 %v2520_v61  ;;  %v7503_v43 = vld [vmem:[%s9701_s11 + $0x8] sm:$0xff] }
 0xa26   : > { %2724 = vmatpush.bf16.msra.mxu2 %v7503_v43 }
 0xa28   : > { %v2510_v62 = vpop.xlane.xlu2 %2509 }
 0xa29   : > { %v2513_v63 = vsub.f32 %v2498_v45, %v2510_v62 }
 0xa2b   : > { %v7821_v0 = vpop.eup %7820  ;;  %v2518_v1 = vmul.f32 1.442695, %v2513_v63 }
 0xa2c   : > { %v2523_v2 = vsel %vm1747_vm15, %v7821_v0, 0.0 }
 0xa2d   : > { %7822 = vpow2.f32 %v2518_v1  ;;  %2524 = vadd.xlane.f32.xlu1 %v2523_v2 }
 0xa33   : > { %v7823_v3 = vpop.eup %7822 }
 0xa34   : > { %v2526_v4 = vsel %vm1754_vm0, %v7823_v3, 0.0 }
 0xa35   : > { %2527 = vadd.xlane.f32.xlu2 %v2526_v4 }
 0xa98   : > { %v2522_v5 = vpop.xlane.xlu0 %2521 }
 0xa99   : > { %7824 = vrcp.f32 %v2522_v5 }
 0xa9f   : > { %v7825_v11 = vpop.eup %7824 }
 0xaa0   : > { %v2525_v8 = vpop.xlane.xlu1 %2524  ;;  %v2532_v15 = vmul.f32 %v7825_v11, %v7819_v60 }
 0xaa1   : > { %7826 = vrcp.f32 %v2525_v8 }
 0xaa7   : > { %v7827_v12 = vpop.eup %7826 }
 0xaa8   : > { %v2533_v16 = vmul.f32 %v7827_v12, %v7821_v0  ;;  %v2528_v19 = vpop.xlane.xlu2 %2527  ;;  %v7502_v0 = vld [vmem:[%s9701_s11] sm:$0xff] }
 0xaa9   : > { %7828 = vrcp.f32 %v2528_v19  ;;  %2725 = vmatpush.bf16.msra.mxu2 %v7502_v0 }
 0xaaa   : > { %v2535_v17 = vpack.c.bf16 %v2533_v16, %v2532_v15 }
 0xaac   : > { %6689 = vmatmul.msk.bf16.vlgmr.msrb.gmra.mxu0 %vm1747_vm15, %v2535_v17 }
 0xaaf   : > { %v7829_v22 = vpop.eup %7828 }
 0xab0   : > { %v2534_v24 = vmul.f32 %v7829_v22, %v7823_v3 }
 0xab2   : > { %v2536_v26 = vpack.c.bf16 %v2534_v24, %v2534_v24 }
 0xabc   : > { %6690 = vmatmul.msk.bf16.gmra.mxu0 %vm1747_vm15, %v2536_v26 }
 0xb29   : > { %v2557_v30 = vpop.f32.mrf.mxu0 }
 0xb31   : > { %v2559_v23 = vpop.f32.mrf.mxu0 }
 0xb32   : > { %v2566_v20 = vpack.c.bf16 %v2559_v23, %v2557_v30 }
 0xb34   : > { %6692 = vmatmul.msk.bf16.vlgmr.msra.gmra.mxu1 %vm1716_vm14, %v2566_v20  ;;  %v7733_v20 = vld [vmem:[%s9702_s16] ss:$0 sm:$0xff] }
 0xb39   : > { %v2562_v35 = vpop.f32.mrf.mxu0 }
 0xb3a   : > { %v2567_v29 = vpack.c.bf16 %v2562_v35, %v2562_v35 }
 0xb41   : > { %v2564_v28 = vpop.f32.mrf.mxu0 }
 0xb44   : > { %6693 = vmatmul.msk.bf16.gmra.mxu1 %vm1716_vm14, %v2567_v29 }
 0xbb1   : > { %v2588_v31 = vpop.f32.mrf.mxu1 }
 0xbb2   : > { %v2597_v32 = vadd.f32 %v2588_v31, %v8724_v39 }
 0xbb4   : > { %v2604_v33 = vadd.f32 %v7732_v25, %v2597_v32  ;;  %v7734_v32 = vld [vmem:[%s9703_s18] ss:$0 sm:$0xff] }
 0xbb6   : > { %v8749_v36 = vadd.f32 %v2604_v33, %v8492_v10 }
 0xbb8   : > { %v2612_v13 = vsel %vm1503_vm1, %v8749_v36, 0.0 }
 0xbb9   : > { %2613 = vadd.xlane.f32.xlu0 %v2612_v13  ;;  %v2590_v9 = vpop.f32.mrf.mxu1 }
 0xbba   : > { %v2598_v38 = vadd.f32 %v2590_v9, %v2346_v37 }
 0xbbc   : > { %v2605_v21 = vadd.f32 %v7732_v25, %v2598_v38 }
 0xbbe   : > { %v8755_v44 = vadd.f32 %v2605_v21, %v8497_v14 }
 0xbc0   : > { %v2615_v39 = vsel %vm1503_vm1, %v8755_v44, 0.0 }
 0xbc1   : > { %2616 = vadd.xlane.f32.xlu1 %v2615_v39  ;;  %v2593_v46 = vpop.f32.mrf.mxu1 }
 0xbc2   : > { %v2599_v10 = vadd.f32 %v2593_v46, %v8730_v47 }
 0xbc4   : > { %v2606_v42 = vadd.f32 %v7732_v25, %v2599_v10 }
 0xbc6   : > { %v8761_v40 = vadd.f32 %v2606_v42, %v8502_v18 }
 0xbc8   : > { %v2618_v48 = vsel %vm1510_vm2, %v8761_v40, 0.0 }
 0xbc9   : > { %2619 = vadd.xlane.f32.xlu2 %v2618_v48  ;;  %v2595_v49 = vpop.f32.mrf.mxu1 }
 0xc2c   : > { %v2614_v51 = vpop.xlane.xlu0 %2613 }
 0xc2d   : > { %v2621_v14 = vmul.f32 %v2614_v51, %v8506_v27 }
 0xc2f   : > { %v2624_v52 = vsub.f32 %v8749_v36, %v2621_v14  ;;  %v7507_v14 = vld [vmem:[%s9704_s10 + $0x18] sm:$0xff] }
 0xc30   : > { %2808 = vmatpush.bf16.msra.mxu3 %v7507_v14 }
 0xc31   : > { %v2627_v53 = vmul.f32 %v2624_v52, %v2624_v52 }
 0xc33   : > { %v2630_v45 = vsel %vm1503_vm1, %v2627_v53, 0.0  ;;  %v7505_v53 = vld [vmem:[%s9704_s10 + $0x8] sm:$0xff] }
 0xc34   : > { %2631 = vadd.xlane.f32.xlu0 %v2630_v45  ;;  %v2617_v47 = vpop.xlane.xlu1 %2616  ;;  %v7735_v45 = vld [vmem:[%s9705_s7] ss:$0 sm:$0xff] }
 0xc35   : > { %v2622_v41 = vmul.f32 %v2617_v47, %v8506_v27  ;;  %v7504_v47 = vld [vmem:[%s9704_s10] sm:$0xff] }
 0xc37   : > { %v2625_v18 = vsub.f32 %v8755_v44, %v2622_v41 }
 0xc39   : > { %v2628_v54 = vmul.f32 %v2625_v18, %v2625_v18 }
 0xc3b   : > { %v2633_v55 = vsel %vm1503_vm1, %v2628_v54, 0.0 }
 0xc3c   : > { %2634 = vadd.xlane.f32.xlu1 %v2633_v55  ;;  %v2620_v56 = vpop.xlane.xlu2 %2619 }
 0xc3d   : > { %v2623_v50 = vmul.f32 %v2620_v56, %v8506_v27 }
 0xc3f   : > { %v2626_v59 = vsub.f32 %v8761_v40, %v2623_v50 }
 0xc41   : > { %v2629_v58 = vmul.f32 %v2626_v59, %v2626_v59 }
 0xc43   : > { %v2636_v60 = vsel %vm1510_vm2, %v2629_v58, 0.0 }
 0xc44   : > { %2637 = vadd.xlane.f32.xlu2 %v2636_v60 }
 0xca7   : > { %v2632_v61 = vpop.xlane.xlu0 %2631 }
 0xca8   : > { %v2639_v62 = vmul.f32 %v2632_v61, %v8506_v27 }
 0xcaa   : > { %v2642_v63 = vadd.f32 1e-12, %v2639_v62 }
 0xcac   : > { %7830 = vrsqrt.f32 %v2642_v63  ;;  %vm2651_vm5 = vweird.f32 %v2642_v63 }
 0xcaf   : > { %v2635_v1 = vpop.xlane.xlu1 %2634 }
 0xcb0   : > { %v2640_v2 = vmul.f32 %v2635_v1, %v8506_v27 }
 0xcb2   : > { %v7831_v3 = vpop.eup %7830  ;;  %v2643_v4 = vadd.f32 1e-12, %v2640_v2 }
 0xcb3   : > { %v2646_v5 = vmul.f32 %v7831_v3, %v2642_v63  ;;  %vm2652_vm4 = vweird.f32 %v7831_v3 }
 0xcb4   : > { %7832 = vrsqrt.f32 %v2643_v4  ;;  %vm2653_vm6 = vmor %vm2651_vm5, %vm2652_vm4  ;;  %vm2661_vm8 = vweird.f32 %v2643_v4 }
 0xcb5   : > { %v2647_v6 = vmul.f32 %v7831_v3, %v2646_v5 }
 0xcb7   : > { %v2648_v7 = vmul.f32 0.5, %v2647_v6  ;;  %v2638_v8 = vpop.xlane.xlu2 %2637 }
 0xcb8   : > { %v2641_v11 = vmul.f32 %v2638_v8, %v8506_v27 }
 0xcb9   : > { %v2649_v12 = vsub.f32 1.5, %v2648_v7 }
 0xcba   : > { %v7833_v15 = vpop.eup %7832  ;;  %v2644_v16 = vadd.f32 1e-12, %v2641_v11 }
 0xcbb   : > { %v2650_v17 = vmul.f32 %v7831_v3, %v2649_v12  ;;  %v2656_v19 = vmul.f32 %v7833_v15, %v2643_v4  ;;  %vm2662_vm7 = vweird.f32 %v7833_v15 }
 0xcbc   : > { %7834 = vrsqrt.f32 %v2644_v16  ;;  %vm2663_vm9 = vmor %vm2661_vm8, %vm2662_vm7  ;;  %vm2671_vm11 = vweird.f32 %v2644_v16 }
 0xcbd   : > { %v2657_v22 = vmul.f32 %v7833_v15, %v2656_v19  ;;  %v2654_v24 = vsel %vm2653_vm6, %v7831_v3, %v2650_v17 }
 0xcbe   : > { %v2675_v35 = vmul.f32 %v2654_v24, %v2624_v52  ;;  %v7506_v52 = vld [vmem:[%s9704_s10 + $0x10] sm:$0xff] }
 0xcbf   : > { %v2658_v26 = vmul.f32 0.5, %v2657_v22  ;;  %2809 = vmatpush.bf16.msra.mxu3 %v7506_v52 }
 0xcc0   : > { %v2681_v33 = vmul.f32 %v7733_v20, %v2675_v35 }
 0xcc1   : > { %v2659_v30 = vsub.f32 1.5, %v2658_v26 }
 0xcc2   : > { %v7835_v23 = vpop.eup %7834  ;;  %v2687_v38 = vadd.f32 %v7734_v32, %v2681_v33 }
 0xcc3   : > { %v2660_v28 = vmul.f32 %v7833_v15, %v2659_v30  ;;  %v2666_v29 = vmul.f32 %v7835_v23, %v2644_v16  ;;  %vm2672_vm10 = vweird.f32 %v7835_v23  ;;  %2810 = vmatpush.bf16.msra.mxu3 %v7505_v53 }
 0xcc4   : > { %vm2673_vm12 = vmor %vm2671_vm11, %vm2672_vm10 }
 0xcc5   : > { %v2664_v25 = vsel %vm2663_vm9, %v7833_v15, %v2660_v28  ;;  %v2667_v31 = vmul.f32 %v7835_v23, %v2666_v29  ;;  %v7736_v29 = vld [vmem:[%s9706_s1] ss:$0 sm:$0xff] }
 0xcc6   : > { %v2676_v34 = vmul.f32 %v2664_v25, %v2625_v18 }
 0xcc7   : > { %v2668_v37 = vmul.f32 0.5, %v2667_v31  ;;  %2811 = vmatpush.bf16.msra.mxu3 %v7504_v47 }
 0xcc8   : > { %v2682_v13 = vmul.f32 %v7733_v20, %v2676_v34 }
 0xcc9   : > { %v2669_v9 = vsub.f32 1.5, %v2668_v37 }
 0xcca   : > { %v2688_v21 = vadd.f32 %v7734_v32, %v2682_v13 }
 0xccb   : > { %v2670_v39 = vmul.f32 %v7835_v23, %v2669_v9 }
 0xccc   : > { %v2694_v46 = vpack.c.bf16 %v2688_v21, %v2687_v38 }
 0xccd   : > { %v2674_v10 = vsel %vm2673_vm12, %v7835_v23, %v2670_v39 }
 0xcce   : > { %6702 = vmatmul.msk.bf16.vlgmr.msra.gmra.mxu2 %vm1503_vm1, %v2694_v46  ;;  %v2677_v42 = vmul.f32 %v2674_v10, %v2626_v59 }
 0xcd0   : > { %v2683_v48 = vmul.f32 %v7733_v20, %v2677_v42 }
 0xcd2   : > { %v2689_v49 = vadd.f32 %v7734_v32, %v2683_v48 }
 0xcd4   : > { %v2695_v51 = vpack.c.bf16 %v2689_v49, %v2689_v49 }
 0xcde   : > { %6703 = vmatmul.msk.bf16.gmra.mxu2 %vm1503_vm1, %v2695_v51 }
 0xd51   : > { %v2727_v41 = vpop.f32.mrf.mxu2 }
 0xd52   : > { %v2728_v18 = vadd.f32 %v7735_v45, %v2727_v41 }
 0xd54   : > { %v2739_v54 = vmul.f32 0.044715, %v2728_v18  ;;  %v2736_v16 = vmul.f32 0.5, %v2728_v18 }
 0xd56   : > { %v2742_v55 = vmul.f32 %v2739_v54, %v2728_v18 }
 0xd58   : > { %v2745_v56 = vmul.f32 %v2742_v55, %v2728_v18  ;;  %v7511_v55 = vld [vmem:[%s9677_s25 + $0x48] sm:$0xff] }
 0xd59   : > { %v2729_v50 = vpop.f32.mrf.mxu2  ;;  %2990 = vmatpush.bf16.msrb.mxu1 %v7511_v55 }
 0xd5a   : > { %v2748_v59 = vadd.f32 %v2745_v56, %v2728_v18  ;;  %v2730_v58 = vadd.f32 %v7735_v45, %v2729_v50  ;;  %v7509_v56 = vld [vmem:[%s9682_s17 + $0x48] sm:$0xff] }
 0xd5b   : > { %v7513_v50 = vld [vmem:[%s9688_s3 + $0x48] sm:$0xff]  ;;  %2950 = vmatpush.bf16.msra.mxu0 %v7509_v56 }
 0xd5c   : > { %v2740_v60 = vmul.f32 0.044715, %v2730_v58  ;;  %v2751_v43 = vmul.f32 0.7978846, %v2748_v59  ;;  %v2737_v17 = vmul.f32 0.5, %v2730_v58  ;;  %3030 = vmatpush.bf16.msrb.mxu2 %v7513_v50 }
 0xd5e   : > { %v2743_v61 = vmul.f32 %v2740_v60, %v2730_v58  ;;  %7836 = vtanh.f32 %v2751_v43  ;;  %v7508_v43 = vld [vmem:[%s9682_s17 + $0x40] sm:$0xff] }
 0xd5f   : > { %2951 = vmatpush.bf16.msra.mxu0 %v7508_v43 }
 0xd60   : > { %v2746_v62 = vmul.f32 %v2743_v61, %v2730_v58  ;;  %v7510_v61 = vld [vmem:[%s9677_s25 + $0x40] sm:$0xff] }
 0xd61   : > { %v2732_v63 = vpop.f32.mrf.mxu2  ;;  %2991 = vmatpush.bf16.msrb.mxu1 %v7510_v61  ;;  %v7741_v61 = vld [vmem:[%s9686_s8 + $0x4] ss:$0 sm:$0xff] }
 0xd62   : > { %v2749_v0 = vadd.f32 %v2746_v62, %v2730_v58  ;;  %v2733_v1 = vadd.f32 %v7735_v45, %v2732_v63  ;;  %v7512_v62 = vld [vmem:[%s9688_s3 + $0x40] sm:$0xff] }
 0xd63   : > { %3031 = vmatpush.bf16.msrb.mxu2 %v7512_v62 }
 0xd64   : > { %v2752_v2 = vmul.f32 0.7978846, %v2749_v0  ;;  %v2741_v3 = vmul.f32 0.044715, %v2733_v1  ;;  %v7837_v5 = vpop.eup %7836  ;;  %v2738_v20 = vmul.f32 0.5, %v2733_v1 }
 0xd65   : > { %v2757_v11 = vadd.f32 1.0, %v7837_v5 }
 0xd66   : > { %7838 = vtanh.f32 %v2752_v2  ;;  %v2744_v4 = vmul.f32 %v2741_v3, %v2733_v1 }
 0xd67   : > { %v2760_v22 = vmul.f32 %v2757_v11, %v2736_v16 }
 0xd68   : > { %v2747_v6 = vmul.f32 %v2744_v4, %v2733_v1 }
 0xd69   : > { %v2734_v7 = vpop.f32.mrf.mxu2 }
 0xd6a   : > { %v2750_v8 = vadd.f32 %v2747_v6, %v2733_v1 }
 0xd6c   : > { %v7839_v12 = vpop.eup %7838  ;;  %v2753_v15 = vmul.f32 0.7978846, %v2750_v8 }
 0xd6d   : > { %v2758_v19 = vadd.f32 1.0, %v7839_v12 }
 0xd6e   : > { %7840 = vtanh.f32 %v2753_v15 }
 0xd6f   : > { %v2761_v24 = vmul.f32 %v2758_v19, %v2737_v17 }
 0xd71   : > { %v2771_v26 = vpack.c.bf16 %v2761_v24, %v2760_v22  ;;  %v7515_v24 = vld [vmem:[%s9682_s17 + $0x58] sm:$0xff] }
 0xd72   : > { %3172 = vmatpush.bf16.msra.mxu1 %v7515_v24 }
 0xd73   : > { %6720 = vmatmul.msk.bf16.vlgmr.msra.gmra.mxu3 %vm2797_vm13, %v2771_v26  ;;  %v7517_v26 = vld [vmem:[%s9677_s25 + $0x58] sm:$0xff] }
 0xd74   : > { %v7841_v30 = vpop.eup %7840  ;;  %3212 = vmatpush.bf16.msra.mxu2 %v7517_v26 }
 0xd75   : > { %v2759_v23 = vadd.f32 1.0, %v7841_v30 }
 0xd77   : > { %v2762_v35 = vmul.f32 %v2759_v23, %v2738_v20  ;;  %v7514_v23 = vld [vmem:[%s9682_s17 + $0x50] sm:$0xff] }
 0xd78   : > { %v7516_v20 = vld [vmem:[%s9677_s25 + $0x50] sm:$0xff]  ;;  %3173 = vmatpush.bf16.msra.mxu1 %v7514_v23 }
 0xd79   : > { %v2772_v28 = vpack.c.bf16 %v2762_v35, %v2762_v35  ;;  %3213 = vmatpush.bf16.msra.mxu2 %v7516_v20 }
 0xd83   : > { %6721 = vmatmul.msk.bf16.gmra.mxu3 %vm2797_vm13, %v2772_v28  ;;  %v7737_v28 = vld [vmem:[%s9678_s24 + $0x1] ss:$0 sm:$0xff] }
 0xdf6   : > { %v2813_v25 = vpop.f32.mrf.mxu3 }
 0xdf7   : > { %v2822_v31 = vadd.f32 %v2813_v25, %v8749_v36 }
 0xdf9   : > { %v8792_v32 = vadd.f32 %v7736_v29, %v2822_v31 }
 0xdfb   : > { %v2836_v33 = vsel %vm1503_vm1, %v8792_v32, 0.0 }
 0xdfc   : > { %2837 = vadd.xlane.f32.xlu0 %v2836_v33 }
 0xdfe   : > { %v2815_v34 = vpop.f32.mrf.mxu3 }
 0xdff   : > { %v2823_v37 = vadd.f32 %v2815_v34, %v8755_v44 }
 0xe01   : > { %v8797_v13 = vadd.f32 %v7736_v29, %v2823_v37  ;;  %v7738_v37 = vld [vmem:[%s8209_s30 + $0x1] ss:$0 sm:$0xff] }
 0xe03   : > { %v2839_v9 = vsel %vm1503_vm1, %v8797_v13, 0.0 }
 0xe04   : > { %2840 = vadd.xlane.f32.xlu1 %v2839_v9 }
 0xe06   : > { %v2818_v38 = vpop.f32.mrf.mxu3 }
 0xe07   : > { %v2824_v21 = vadd.f32 %v2818_v38, %v8761_v40 }
 0xe09   : > { %v8802_v39 = vadd.f32 %v7736_v29, %v2824_v21 }
 0xe0b   : > { %v2842_v36 = vsel %vm1510_vm2, %v8802_v39, 0.0 }
 0xe0c   : > { %2843 = vadd.xlane.f32.xlu2 %v2842_v36 }
 0xe0e   : > { %v2820_v46 = vpop.f32.mrf.mxu3 }
 0xe6f   : > { %v2838_v10 = vpop.xlane.xlu0 %2837 }
 0xe70   : > { %v2845_v42 = vmul.f32 %v2838_v10, %v8506_v27 }
 0xe72   : > { %v8808_v44 = vsub.f32 %v8792_v32, %v2845_v42 }
 0xe74   : > { %v2851_v48 = vmul.f32 %v8808_v44, %v8808_v44 }
 0xe76   : > { %v2854_v40 = vsel %vm1503_vm1, %v2851_v48, 0.0 }
 0xe77   : > { %2855 = vadd.xlane.f32.xlu0 %v2854_v40  ;;  %v2841_v49 = vpop.xlane.xlu1 %2840 }
 0xe78   : > { %v2846_v51 = vmul.f32 %v2841_v49, %v8506_v27 }
 0xe7a   : > { %v8815_v14 = vsub.f32 %v8797_v13, %v2846_v51 }
 0xe7c   : > { %v2852_v52 = vmul.f32 %v8815_v14, %v8815_v14 }
 0xe7e   : > { %v2857_v53 = vsel %vm1503_vm1, %v2852_v52, 0.0 }
 0xe7f   : > { %2858 = vadd.xlane.f32.xlu1 %v2857_v53  ;;  %v2844_v45 = vpop.xlane.xlu2 %2843 }
 0xe80   : > { %v2847_v47 = vmul.f32 %v2844_v45, %v8506_v27 }
 0xe82   : > { %v8822_v41 = vsub.f32 %v8802_v39, %v2847_v47 }
 0xe84   : > { %v2853_v18 = vmul.f32 %v8822_v41, %v8822_v41 }
 0xe86   : > { %v2860_v54 = vsel %vm1510_vm2, %v2853_v18, 0.0 }
 0xe87   : > { %2861 = vadd.xlane.f32.xlu2 %v2860_v54  ;;  %v7740_v54 = vld [vmem:[%s8179_s29 + $0x4] ss:$0 sm:$0xff] }
 0xeea   : > { %v2856_v59 = vpop.xlane.xlu0 %2855 }
 0xeeb   : > { %v2863_v58 = vmul.f32 %v2856_v59, %v8506_v27 }
 0xeed   : > { %v2866_v60 = vadd.f32 1e-12, %v2863_v58 }
 0xeef   : > { %7842 = vrsqrt.f32 %v2866_v60  ;;  %vm2875_vm5 = vweird.f32 %v2866_v60 }
 0xef2   : > { %v2859_v63 = vpop.xlane.xlu1 %2858 }
 0xef3   : > { %v2864_v0 = vmul.f32 %v2859_v63, %v8506_v27 }
 0xef5   : > { %v7843_v1 = vpop.eup %7842  ;;  %v2867_v2 = vadd.f32 1e-12, %v2864_v0 }
 0xef6   : > { %v2870_v3 = vmul.f32 %v7843_v1, %v2866_v60  ;;  %vm2876_vm4 = vweird.f32 %v7843_v1 }
 0xef7   : > { %7844 = vrsqrt.f32 %v2867_v2  ;;  %vm2877_vm6 = vmor %vm2875_vm5, %vm2876_vm4  ;;  %vm2885_vm8 = vweird.f32 %v2867_v2 }
 0xef8   : > { %v2871_v4 = vmul.f32 %v7843_v1, %v2870_v3 }
 0xefa   : > { %v2872_v5 = vmul.f32 0.5, %v2871_v4  ;;  %v2862_v6 = vpop.xlane.xlu2 %2861 }
 0xefb   : > { %v2865_v7 = vmul.f32 %v2862_v6, %v8506_v27 }
 0xefc   : > { %v2873_v8 = vsub.f32 1.5, %v2872_v5 }
 0xefd   : > { %v7845_v11 = vpop.eup %7844  ;;  %v2868_v12 = vadd.f32 1e-12, %v2865_v7  ;;  %v7739_v7 = vld [vmem:[%s9679_s21 + $0x4] ss:$0 sm:$0xff] }
 0xefe   : > { %v2874_v15 = vmul.f32 %v7843_v1, %v2873_v8  ;;  %v2880_v16 = vmul.f32 %v7845_v11, %v2867_v2  ;;  %vm2886_vm7 = vweird.f32 %v7845_v11 }
 0xeff   : > { %7846 = vrsqrt.f32 %v2868_v12  ;;  %vm2887_vm9 = vmor %vm2885_vm8, %vm2886_vm7  ;;  %vm2895_vm11 = vweird.f32 %v2868_v12 }
 0xf00   : > { %v2881_v17 = vmul.f32 %v7845_v11, %v2880_v16  ;;  %v2878_v19 = vsel %vm2877_vm6, %v7843_v1, %v2874_v15 }
 0xf01   : > { %v2899_v29 = vmul.f32 %v2878_v19, %v8808_v44 }
 0xf02   : > { %v2882_v22 = vmul.f32 0.5, %v2881_v17  ;;  %v7518_v17 = vld [vmem:[%s9688_s3 + $0x50] sm:$0xff] }
 0xf03   : > { %v2905_v9 = vmul.f32 %v7737_v28, %v2899_v29 }
 0xf04   : > { %v2883_v30 = vsub.f32 1.5, %v2882_v22 }
 0xf05   : > { %v7847_v35 = vpop.eup %7846  ;;  %v2911_v10 = vadd.f32 %v7738_v37, %v2905_v9 }
 0xf06   : > { %v2884_v25 = vmul.f32 %v7845_v11, %v2883_v30  ;;  %v2890_v31 = vmul.f32 %v7847_v35, %v2868_v12  ;;  %vm2896_vm10 = vweird.f32 %v7847_v35 }
 0xf07   : > { %vm2897_vm12 = vmor %vm2895_vm11, %vm2896_vm10 }
 0xf08   : > { %v2888_v33 = vsel %vm2887_vm9, %v7845_v11, %v2884_v25  ;;  %v2891_v34 = vmul.f32 %v7847_v35, %v2890_v31  ;;  %v7519_v11 = vld [vmem:[%s9688_s3 + $0x58] sm:$0xff]  ;;  %v7743_v25 = vld [vmem:[%s8179_s29 + $0x5] ss:$0 sm:$0xff] }
 0xf09   : > { %v2900_v38 = vmul.f32 %v2888_v33, %v8815_v14 }
 0xf0a   : > { %v2892_v21 = vmul.f32 0.5, %v2891_v34 }
 0xf0b   : > { %v2906_v36 = vmul.f32 %v7737_v28, %v2900_v38 }
 0xf0c   : > { %v2893_v46 = vsub.f32 1.5, %v2892_v21 }
 0xf0d   : > { %v2912_v42 = vadd.f32 %v7738_v37, %v2906_v36 }
 0xf0e   : > { %v2894_v48 = vmul.f32 %v7847_v35, %v2893_v46 }
 0xf0f   : > { %v8844_v44 = vpack.c.bf16 %v2912_v42, %v2911_v10 }
 0xf10   : > { %v2898_v40 = vsel %vm2897_vm12, %v7847_v35, %v2894_v48 }
 0xf11   : > { %6737 = vmatmul.msk.bf16.vlgmr.msra.gmra.mxu0 %vm1503_vm1, %v8844_v44  ;;  %6752 = vmatmul.msk.bf16.vlgmr.msrb.gmra.mxu1 %vm1503_vm1, %v8844_v44  ;;  %v2901_v49 = vmul.f32 %v2898_v40, %v8822_v41 }
 0xf12   : > { %6767 = vmatmul.msk.bf16.vlgmr.msrb.gmra.mxu2 %vm1503_vm1, %v8844_v44 }
 0xf13   : > { %v2907_v51 = vmul.f32 %v7737_v28, %v2901_v49 }
 0xf15   : > { %v2913_v14 = vadd.f32 %v7738_v37, %v2907_v51 }
 0xf17   : > { %v8853_v52 = vpack.c.bf16 %v2913_v14, %v2913_v14 }
 0xf21   : > { %6738 = vmatmul.msk.bf16.gmra.mxu0 %vm1503_vm1, %v8853_v52  ;;  %6753 = vmatmul.msk.bf16.gmra.mxu1 %vm1503_vm1, %v8853_v52 }
 0xf22   : > { %6768 = vmatmul.msk.bf16.gmra.mxu2 %vm1503_vm1, %v8853_v52 }
 0xf31   : > { %6787 = vmatmul.msk.bf16.vlgmr.msra.gmra.mxu1 %vm1503_vm1, %v8844_v44 }
 0xf32   : > { %6802 = vmatmul.msk.bf16.vlgmr.msra.gmra.mxu2 %vm1503_vm1, %v8844_v44 }
 0xf41   : > { %6788 = vmatmul.msk.bf16.gmra.mxu1 %vm1503_vm1, %v8853_v52 }
 0xf42   : > { %6803 = vmatmul.msk.bf16.gmra.mxu2 %vm1503_vm1, %v8853_v52 }
 0xf8e   : > { %v2953_v53 = vpop.f32.mrf.mxu0  ;;  %v2993_v45 = vpop.f32.mrf.mxu1 }
 0xf8f   : > { %v2994_v62 = vadd.f32 %v7740_v54, %v2993_v45  ;;  %v2954_v24 = vadd.f32 %v7739_v7, %v2953_v53 }
 0xf95   : > { %v3033_v47 = vpop.f32.mrf.mxu2 }
 0xf96   : > { %v2955_v41 = vpop.f32.mrf.mxu0  ;;  %v2995_v18 = vpop.f32.mrf.mxu1  ;;  %v3034_v12 = vadd.f32 %v7741_v61, %v3033_v47 }
 0xf97   : > { %v2996_v60 = vadd.f32 %v7740_v54, %v2995_v18  ;;  %v2956_v15 = vadd.f32 %v7739_v7, %v2955_v41  ;;  %v7744_v41 = vld [vmem:[%s9686_s8 + $0x5] ss:$0 sm:$0xff] }
 0xf99   : > { %v3044_v3 = vpack.c.bf16 %v2996_v60, %v2994_v62  ;;  %v3042_v26 = vpack.c.bf16 %v2956_v15, %v2954_v24 }
 0xf9b   : > { %v3053_v8 = vsel %vm1716_vm14, %v3044_v3, 0 }
 0xf9d   : > { %v3035_v55 = vpop.f32.mrf.mxu2 }
 0xf9e   : > { %v2958_v56 = vpop.f32.mrf.mxu0  ;;  %v2998_v50 = vpop.f32.mrf.mxu1  ;;  %v3036_v5 = vadd.f32 %v7741_v61, %v3035_v55 }
 0xf9f   : > { %v2999_v59 = vadd.f32 %v7740_v54, %v2998_v50  ;;  %v2959_v20 = vadd.f32 %v7739_v7, %v2958_v56 }
 0xfa0   : > { %v3111_v19 = vpack.c.bf16 %v3036_v5, %v3034_v12 }
 0xfa1   : > { %v3045_v58 = vpack.c.bf16 %v2999_v59, %v2999_v59  ;;  %v3043_v29 = vpack.c.bf16 %v2959_v20, %v2959_v20 }
 0xfa3   : > { %v3056_v43 = vsel %vm1716_vm14, %v3045_v58, 0 }
 0xfa4   : > { %3064 = vmatpush.bf16.xpose.msrb.mxu3 %v3056_v43 }
 0xfa5   : > { %v3038_v63 = vpop.f32.mrf.mxu2 }
 0xfa6   : > { %v3039_v0 = vadd.f32 %v7741_v61, %v3038_v63  ;;  %v2960_v1 = vpop.f32.mrf.mxu0  ;;  %v3000_v2 = vpop.f32.mrf.mxu1 }
 0xfa8   : > { %v3112_v4 = vpack.c.bf16 %v3039_v0, %v3039_v0 }
 0xfaa   : > { %v3120_v6 = vand.u32 %v3112_v4, %v8574_v57 }
 0xfac   : > { %3128 = vmatpush.bf16.msrb.mxu0 %v3120_v6  ;;  %3065 = vmatpush.bf16.xpose.msrb.mxu3 %v3053_v8 }
 0xfad   : > { %v3040_v16 = vpop.f32.mrf.mxu2 }
 0xfae   : > { %v8877_v22 = vpop.f32.mrf.mxu1 }
 0xfb0   : > { %3129 = vmatpush.bf16.msrb.mxu0 %v3111_v19 }
 0xfb3   : > { %6769 = vmatmul.msk.bf16.vlgmr.msrb.gmra.mxu3 %vm1716_vm14, %v3042_v26 }
 0xfb4   : > { %3252 = vmatpush.bf16.msra.mxu3 %v7519_v11 }
 0xfb5   : > { %v3215_v30 = vpop.f32.mrf.mxu2 }
 0xfb6   : > { %v8880_v23 = vpop.f32.mrf.mxu1  ;;  %v3216_v21 = vadd.f32 %v7743_v25, %v3215_v30 }
 0xfb8   : > { %3253 = vmatpush.bf16.msra.mxu3 %v7518_v17 }
 0xfbd   : > { %v3217_v35 = vpop.f32.mrf.mxu2 }
 0xfbe   : > { %v8882_v28 = vpop.f32.mrf.mxu1  ;;  %v3218_v9 = vadd.f32 %v7743_v25, %v3217_v35 }
 0xfc0   : > { %v3266_v46 = vpack.c.bf16 %v3218_v9, %v3216_v21 }
 0xfc2   : > { %v3275_v10 = vsel %vm1716_vm14, %v3266_v46, 0  ;;  %v6773_v46 = vld [vmem:[%s9683_s14 + $0x10] sm:$0xf] }
 0xfc3   : > { %6770 = vmatmul.msk.bf16.gmra.mxu3 %vm1716_vm14, %v3043_v29 }
 0xfc5   : > { %v3220_v31 = vpop.f32.mrf.mxu2 }
 0xfc6   : > { %v3221_v33 = vadd.f32 %v7743_v25, %v3220_v31  ;;  %v3182_v34 = vpop.f32.mrf.mxu1  ;;  %v7521_v31 = vld [vmem:[%s9682_s17 + $0x68] sm:$0xff] }
 0xfc7   : > { %v7742_v34 = vld [vmem:[%s9679_s21 + $0x5] ss:$0 sm:$0xff] }
 0xfc8   : > { %v3267_v37 = vpack.c.bf16 %v3221_v33, %v3221_v33  ;;  %v7520_v33 = vld [vmem:[%s9682_s17 + $0x60] sm:$0xff]  ;;  %v3176_v9 = vadd.f32 %v7742_v34, %v8877_v22  ;;  %v3181_v21 = vadd.f32 %v7742_v34, %v8882_v28 }
 0xfca   : > { %v3278_v38 = vsel %vm1716_vm14, %v3267_v37, 0  ;;  %v3178_v37 = vadd.f32 %v7742_v34, %v8880_v23  ;;  %v6823_v34 = vld [vmem:[%s9683_s14 + $0x14] sm:$0xf] }
 0xfcb   : > { %3286 = vmatpush.bf16.xpose.msra.mxu0 %v3278_v38 }
 0xfcc   : > { %v3264_v38 = vpack.c.bf16 %v3178_v37, %v3176_v9  ;;  %v3373_v37 = vsel %vm2047_vm3, %v6823_v34, 0 }
 0xfcd   : > { %v3222_v36 = vpop.f32.mrf.mxu2  ;;  %3382 = vmatpush.bf16.msrb.mxu2 %v3373_v37  ;;  %v6877_v37 = vld [vmem:[%s9683_s14 + $0x18] sm:$0xf] }
 0xfce   : > { %v3265_v36 = vpack.c.bf16 %v3181_v21, %v3181_v21  ;;  %v7524_v21 = vld [vmem:[%s9688_s3 + $0x60] sm:$0xff] }
 0xfd3   : > { %3287 = vmatpush.bf16.xpose.msra.mxu0 %v3275_v10  ;;  %6817 = vmatmul.msk.bf16.vlgmr.msra.gmra.mxu3 %vm1503_vm1, %v8844_v44  ;;  %v3400_v10 = vsel %vm2047_vm3, %v6773_v46, 0 }
 0xfd4   : > { %3409 = vmatpush.bf16.msrb.mxu3 %v3400_v10 }
 0xfe3   : > { %6818 = vmatmul.msk.bf16.gmra.mxu3 %vm1503_vm1, %v8853_v52 }
0x1036   : > { %v3067_v42 = vpop.f32.mrf.mxu3 }
0x1037   : > { %v3076_v48 = vsel %vm1747_vm15, %v3067_v42, -inf }
0x1038   : > { %3077 = vmax.xlane.f32.xlu0 %v3076_v48 }
0x103e   : > { %v3069_v40 = vpop.f32.mrf.mxu3 }
0x103f   : > { %v3079_v49 = vsel %vm1747_vm15, %v3069_v40, -inf }
0x1040   : > { %3080 = vmax.xlane.f32.xlu1 %v3079_v49 }
0x1046   : > { %v3072_v51 = vpop.f32.mrf.mxu3 }
0x1047   : > { %v3082_v14 = vsel %vm1754_vm0, %v3072_v51, -inf }
0x1048   : > { %3083 = vmax.xlane.f32.xlu2 %v3082_v14 }
0x104e   : > { %v3074_v53 = vpop.f32.mrf.mxu3 }
0x1056   : > { %v3255_v45 = vpop.f32.mrf.mxu3 }
0x1057   : > { %v3256_v59 = vadd.f32 %v7744_v41, %v3255_v45 }
0x105e   : > { %v3257_v47 = vpop.f32.mrf.mxu3 }
0x105f   : > { %v3258_v56 = vadd.f32 %v7744_v41, %v3257_v47 }
0x1061   : > { %v3333_v60 = vpack.c.bf16 %v3258_v56, %v3256_v59 }
0x1066   : > { %v3260_v18 = vpop.f32.mrf.mxu3 }
0x1067   : > { %v3261_v54 = vadd.f32 %v7744_v41, %v3260_v18 }
0x1069   : > { %v3334_v55 = vpack.c.bf16 %v3261_v54, %v3261_v54 }
0x106b   : > { %v3342_v50 = vand.u32 %v3334_v55, %v8574_v57 }
0x106d   : > { %3350 = vmatpush.bf16.msrb.mxu1 %v3342_v50 }
0x106e   : > { %v3262_v58 = vpop.f32.mrf.mxu3 }
0x1071   : > { %3351 = vmatpush.bf16.msrb.mxu1 %v3333_v60 }
0x10ab   : > { %v3078_v43 = vpop.xlane.xlu0 %3077 }
0x10ac   : > { %v3085_v61 = vsub.f32 %v3067_v42, %v3078_v43 }
0x10ae   : > { %v3088_v62 = vmul.f32 1.442695, %v3085_v61 }
0x10b0   : > { %7848 = vpow2.f32 %v3088_v62 }
0x10b3   : > { %v3081_v63 = vpop.xlane.xlu1 %3080 }
0x10b4   : > { %v3086_v0 = vsub.f32 %v3069_v40, %v3081_v63 }
0x10b6   : > { %v7849_v1 = vpop.eup %7848  ;;  %v3090_v2 = vmul.f32 1.442695, %v3086_v0 }
0x10b7   : > { %v3094_v3 = vsel %vm1747_vm15, %v7849_v1, 0.0 }
0x10b8   : > { %7850 = vpow2.f32 %v3090_v2  ;;  %3095 = vadd.xlane.f32.xlu0 %v3094_v3 }
0x10bb   : > { %v3084_v4 = vpop.xlane.xlu2 %3083 }
0x10bc   : > { %v3087_v5 = vsub.f32 %v3072_v51, %v3084_v4 }
0x10be   : > { %v7851_v6 = vpop.eup %7850  ;;  %v3092_v7 = vmul.f32 1.442695, %v3087_v5 }
0x10bf   : > { %v3097_v8 = vsel %vm1747_vm15, %v7851_v6, 0.0 }
0x10c0   : > { %7852 = vpow2.f32 %v3092_v7  ;;  %3098 = vadd.xlane.f32.xlu1 %v3097_v8 }
0x10c6   : > { %v7853_v11 = vpop.eup %7852 }
0x10c7   : > { %v3100_v12 = vsel %vm1754_vm0, %v7853_v11, 0.0 }
0x10c8   : > { %3101 = vadd.xlane.f32.xlu2 %v3100_v12 }
0x112b   : > { %v3096_v15 = vpop.xlane.xlu0 %3095 }
0x112c   : > { %7854 = vrcp.f32 %v3096_v15 }
0x1132   : > { %v7855_v17 = vpop.eup %7854 }
0x1133   : > { %v3099_v16 = vpop.xlane.xlu1 %3098  ;;  %v3106_v24 = vmul.f32 %v7855_v17, %v7849_v1  ;;  %v7522_v17 = vld [vmem:[%s9677_s25 + $0x60] sm:$0xff] }
0x1134   : > { %7856 = vrcp.f32 %v3099_v16  ;;  %v7523_v16 = vld [vmem:[%s9677_s25 + $0x68] sm:$0xff] }
0x1135   : > { %3488 = vmatpush.bf16.msra.mxu1 %v7523_v16 }
0x1139   : > { %3489 = vmatpush.bf16.msra.mxu1 %v7522_v17 }
0x113a   : > { %v7857_v19 = vpop.eup %7856 }
0x113b   : > { %v3107_v26 = vmul.f32 %v7857_v19, %v7851_v6  ;;  %v3102_v20 = vpop.xlane.xlu2 %3101 }
0x113c   : > { %7858 = vrcp.f32 %v3102_v20 }
0x113d   : > { %v3109_v30 = vpack.c.bf16 %v3107_v26, %v3106_v24 }
0x113f   : > { %6771 = vmatmul.msk.bf16.vlgmr.msrb.gmra.mxu0 %vm1747_vm15, %v3109_v30 }
0x1140   : > { %3448 = vmatpush.bf16.msrb.mxu0 %v7521_v31 }
0x1142   : > { %v7859_v35 = vpop.eup %7858 }
0x1143   : > { %v3108_v29 = vmul.f32 %v7859_v35, %v7853_v11 }
0x1144   : > { %3449 = vmatpush.bf16.msrb.mxu0 %v7520_v33 }
0x1145   : > { %v3110_v25 = vpack.c.bf16 %v3108_v29, %v3108_v29 }
0x114f   : > { %6772 = vmatmul.msk.bf16.gmra.mxu0 %vm1747_vm15, %v3110_v25 }
0x115f   : > { %6819 = vmatmul.msk.bf16.vlgmr.msra.gmra.mxu0 %vm1716_vm14, %v3264_v38  ;;  %v7525_v38 = vld [vmem:[%s9688_s3 + $0x68] sm:$0xff] }
0x1160   : > { %3528 = vmatpush.bf16.msra.mxu2 %v7525_v38 }
0x1164   : > { %3529 = vmatpush.bf16.msra.mxu2 %v7524_v21 }
0x116f   : > { %6820 = vmatmul.msk.bf16.gmra.mxu0 %vm1716_vm14, %v3265_v36 }
0x117f   : > { %6841 = vmatmul.msk.bf16.vlgmr.msrb.gmra.mxu0 %vm1503_vm1, %v8844_v44 }
0x118f   : > { %6842 = vmatmul.msk.bf16.gmra.mxu0 %vm1503_vm1, %v8853_v52 }
0x11bc   : > { %v3131_v23 = vpop.f32.mrf.mxu0 }
0x11c4   : > { %v3133_v22 = vpop.f32.mrf.mxu0 }
0x11c5   : > { %v3140_v42 = vpack.c.bf16 %v3133_v22, %v3131_v23 }
0x11c7   : > { %6826 = vmatmul.msk.bf16.vlgmr.msrb.gmra.mxu3 %vm1716_vm14, %v3140_v42  ;;  %v7527_v42 = vld [vmem:[%s9682_s17 + $0x78] sm:$0xff] }
0x11cc   : > { %v3136_v48 = vpop.f32.mrf.mxu0 }
0x11cd   : > { %v3141_v40 = vpack.c.bf16 %v3136_v48, %v3136_v48 }
0x11d4   : > { %v3138_v28 = vpop.f32.mrf.mxu0 }
0x11d5   : > { %v7526_v28 = vld [vmem:[%s9682_s17 + $0x70] sm:$0xff]  ;;  %s9729_s17 = sld [smem:[#allocation49_spill]] }
0x11d7   : > { %6827 = vmatmul.msk.bf16.gmra.mxu3 %vm1716_vm14, %v3141_v40 }
0x11dc   : > { %v3289_v49 = vpop.f32.mrf.mxu0 }
0x11dd   : > { %v3298_v51 = vsel %vm1747_vm15, %v3289_v49, -inf }
0x11de   : > { %3299 = vmax.xlane.f32.xlu0 %v3298_v51 }
0x11e4   : > { %v3291_v14 = vpop.f32.mrf.mxu0 }
0x11e5   : > { %v3301_v53 = vsel %vm1747_vm15, %v3291_v14, -inf }
0x11e6   : > { %3302 = vmax.xlane.f32.xlu1 %v3301_v53 }
0x11ec   : > { %v3294_v45 = vpop.f32.mrf.mxu0 }
0x11ed   : > { %v3304_v47 = vsel %vm1754_vm0, %v3294_v45, -inf }
0x11ee   : > { %3305 = vmax.xlane.f32.xlu2 %v3304_v47 }
0x11f4   : > { %v3296_v41 = vpop.f32.mrf.mxu0 }
0x11fc   : > { %v8921_v18 = vpop.f32.mrf.mxu0 }
0x1204   : > { %v8923_v54 = vpop.f32.mrf.mxu0 }
0x120c   : > { %v8925_v55 = vpop.f32.mrf.mxu0 }
0x1214   : > { %v3458_v56 = vpop.f32.mrf.mxu0 }
0x124a   : > { %v8927_v50 = vpop.f32.mrf.mxu3 }
0x1251   : > { %v3300_v59 = vpop.xlane.xlu0 %3299 }
0x1252   : > { %v3307_v58 = vsub.f32 %v3289_v49, %v3300_v59  ;;  %v8929_v60 = vpop.f32.mrf.mxu3  ;;  %v7746_v49 = vld [vmem:[%s8179_s29 + $0x6] ss:$0 sm:$0xff] }
0x1254   : > { %v3310_v43 = vmul.f32 1.442695, %v3307_v58  ;;  %v7529_v58 = vld [vmem:[%s9677_s25 + $0x78] sm:$0xff] }
0x1256   : > { %7860 = vpow2.f32 %v3310_v43  ;;  %v7745_v43 = vld [vmem:[%s9679_s21 + $0x6] ss:$0 sm:$0xff] }
0x1259   : > { %v3303_v61 = vpop.xlane.xlu1 %3302 }
0x125a   : > { %v3308_v62 = vsub.f32 %v3291_v14, %v3303_v61  ;;  %v8931_v63 = vpop.f32.mrf.mxu3 }
0x125c   : > { %v7861_v0 = vpop.eup %7860  ;;  %v3312_v1 = vmul.f32 1.442695, %v3308_v62  ;;  %v3454_v62 = vadd.f32 %v7745_v43, %v8923_v54 }
0x125d   : > { %v3316_v2 = vsel %vm1747_vm15, %v7861_v0, 0.0 }
0x125e   : > { %7862 = vpow2.f32 %v3312_v1  ;;  %3317 = vadd.xlane.f32.xlu0 %v3316_v2  ;;  %v3452_v1 = vadd.f32 %v7745_v43, %v8921_v18 }
0x1260   : > { %v3540_v2 = vpack.c.bf16 %v3454_v62, %v3452_v1 }
0x1261   : > { %v3306_v3 = vpop.xlane.xlu2 %3305 }
0x1262   : > { %v3309_v4 = vsub.f32 %v3294_v45, %v3306_v3  ;;  %v3418_v5 = vpop.f32.mrf.mxu3  ;;  %v3457_v3 = vadd.f32 %v7745_v43, %v8925_v55 }
0x1264   : > { %v7863_v6 = vpop.eup %7862  ;;  %v3314_v7 = vmul.f32 1.442695, %v3309_v4  ;;  %v3541_v4 = vpack.c.bf16 %v3457_v3, %v3457_v3 }
0x1265   : > { %v3319_v8 = vsel %vm1747_vm15, %v7863_v6, 0.0 }
0x1266   : > { %7864 = vpow2.f32 %v3314_v7  ;;  %3320 = vadd.xlane.f32.xlu1 %v3319_v8  ;;  %v7747_v8 = vld [vmem:[%s9686_s8 + $0x6] ss:$0 sm:$0xff] }
0x126c   : > { %v7865_v11 = vpop.eup %7864 }
0x126d   : > { %v3322_v12 = vsel %vm1754_vm0, %v7865_v11, 0.0 }
0x126e   : > { %3323 = vadd.xlane.f32.xlu2 %v3322_v12 }
0x12d1   : > { %v3318_v15 = vpop.xlane.xlu0 %3317 }
0x12d2   : > { %7866 = vrcp.f32 %v3318_v15 }
0x12d8   : > { %v7867_v24 = vpop.eup %7866 }
0x12d9   : > { %v3321_v19 = vpop.xlane.xlu1 %3320  ;;  %v3328_v30 = vmul.f32 %v7867_v24, %v7861_v0  ;;  %v7528_v0 = vld [vmem:[%s9677_s25 + $0x70] sm:$0xff]  ;;  %s9739_s25 = sld [smem:[#allocation48_spill]] }
0x12da   : > { %7868 = vrcp.f32 %v3321_v19 }
0x12e0   : > { %v7869_v26 = vpop.eup %7868 }
0x12e1   : > { %v3329_v20 = vmul.f32 %v7869_v26, %v7863_v6  ;;  %v3324_v29 = vpop.xlane.xlu2 %3323 }
0x12e2   : > { %7870 = vrcp.f32 %v3324_v29 }
0x12e3   : > { %v3331_v35 = vpack.c.bf16 %v3329_v20, %v3328_v30 }
0x12e5   : > { %6821 = vmatmul.msk.bf16.vlgmr.msrb.gmra.mxu1 %vm1747_vm15, %v3331_v35 }
0x12e8   : > { %v7871_v25 = vpop.eup %7870 }
0x12e9   : > { %v3330_v31 = vmul.f32 %v7871_v25, %v7865_v11 }
0x12eb   : > { %v3332_v33 = vpack.c.bf16 %v3330_v31, %v3330_v31 }
0x12f5   : > { %6822 = vmatmul.msk.bf16.gmra.mxu1 %vm1747_vm15, %v3332_v33 }
0x1305   : > { %6856 = vmatmul.msk.bf16.vlgmr.msra.gmra.mxu1 %vm1503_vm1, %v8844_v44 }
0x1315   : > { %6857 = vmatmul.msk.bf16.gmra.mxu1 %vm1503_vm1, %v8853_v52 }
0x1362   : > { %v3353_v9 = vpop.f32.mrf.mxu1 }
0x136a   : > { %v3355_v36 = vpop.f32.mrf.mxu1 }
0x136b   : > { %v3362_v46 = vpack.c.bf16 %v3355_v36, %v3353_v9  ;;  %v3649_v9 = vsel %vm2047_vm3, %v6877_v37, 0 }
0x136c   : > { %3658 = vmatpush.bf16.msrb.mxu1 %v3649_v9 }
0x136d   : > { %6824 = vmatmul.msk.bf16.vlgmr.msrb.gmra.mxu2 %vm1716_vm14, %v3362_v46 }
0x136e   : > { %3700 = vmatpush.bf16.msrb.mxu2 %v7527_v42 }
0x1372   : > { %v3358_v10 = vpop.f32.mrf.mxu1  ;;  %3701 = vmatpush.bf16.msrb.mxu2 %v7526_v28 }
0x1373   : > { %v3363_v22 = vpack.c.bf16 %v3358_v10, %v3358_v10 }
0x137a   : > { %v3360_v23 = vpop.f32.mrf.mxu1 }
0x137b   : > { %v7749_v23 = vld [vmem:[%s8179_s29 + $0x7] ss:$0 sm:$0xff] }
0x137d   : > { %6825 = vmatmul.msk.bf16.gmra.mxu2 %vm1716_vm14, %v3363_v22 }
0x1382   : > { %v3491_v48 = vpop.f32.mrf.mxu1 }
0x1383   : > { %v3492_v41 = vadd.f32 %v7746_v49, %v3491_v48 }
0x138a   : > { %v3493_v40 = vpop.f32.mrf.mxu1 }
0x138b   : > { %v3494_v45 = vadd.f32 %v7746_v49, %v3493_v40 }
0x138d   : > { %6871 = vmatmul.msk.bf16.vlgmr.msra.gmra.mxu2 %vm1503_vm1, %v8844_v44  ;;  %v3542_v59 = vpack.c.bf16 %v3494_v45, %v3492_v41 }
0x138f   : > { %v3551_v61 = vsel %vm1716_vm14, %v3542_v59, 0 }
0x1392   : > { %v3496_v51 = vpop.f32.mrf.mxu1 }
0x1393   : > { %v3497_v14 = vadd.f32 %v7746_v49, %v3496_v51 }
0x1395   : > { %v3543_v53 = vpack.c.bf16 %v3497_v14, %v3497_v14 }
0x1397   : > { %v3554_v47 = vsel %vm1716_vm14, %v3543_v53, 0 }
0x1398   : > { %3562 = vmatpush.bf16.xpose.msra.mxu3 %v3554_v47 }
0x139a   : > { %v3498_v56 = vpop.f32.mrf.mxu1 }
0x139d   : > { %6872 = vmatmul.msk.bf16.gmra.mxu2 %vm1503_vm1, %v8853_v52 }
0x13a0   : > { %3563 = vmatpush.bf16.xpose.msra.mxu3 %v3551_v61 }
0x13a7   : > { %6873 = vmatmul.msk.bf16.vlgmr.msra.gmra.mxu3 %vm1716_vm14, %v3540_v2 }
0x13a8   : > { %3740 = vmatpush.bf16.msrb.mxu3 %v7529_v58 }
0x13ac   : > { %3741 = vmatpush.bf16.msrb.mxu3 %v7528_v0 }
0x13ad   : > { %6893 = vmatmul.msk.bf16.vlgmr.msrb.gmra.mxu2 %vm1503_vm1, %v8844_v44 }
0x13b7   : > { %6874 = vmatmul.msk.bf16.gmra.mxu3 %vm1716_vm14, %v3541_v4 }
0x13bd   : > { %6894 = vmatmul.msk.bf16.gmra.mxu2 %vm1503_vm1, %v8853_v52 }
0x13c7   : > { %6908 = vmatmul.msk.bf16.vlgmr.msrb.gmra.mxu3 %vm1503_vm1, %v8844_v44 }
0x13d7   : > { %6909 = vmatmul.msk.bf16.gmra.mxu3 %vm1503_vm1, %v8853_v52 }
0x13f0   : > { %v8975_v18 = vpop.f32.mrf.mxu2 }
0x13f8   : > { %v8977_v54 = vpop.f32.mrf.mxu2 }
0x1400   : > { %v8979_v5 = vpop.f32.mrf.mxu2 }
0x1408   : > { %v3391_v6 = vpop.f32.mrf.mxu2 }
0x1410   : > { %v3531_v55 = vpop.f32.mrf.mxu2 }
0x1411   : > { %v3532_v19 = vadd.f32 %v7747_v8, %v3531_v55 }
0x1418   : > { %v3533_v7 = vpop.f32.mrf.mxu2 }
0x1419   : > { %v3534_v16 = vadd.f32 %v7747_v8, %v3533_v7  ;;  %v7531_v7 = vld [vmem:[%s9688_s3 + $0x78] sm:$0xff] }
0x141b   : > { %v3609_v26 = vpack.c.bf16 %v3534_v16, %v3532_v19 }
0x1420   : > { %v3536_v11 = vpop.f32.mrf.mxu2 }
0x1421   : > { %v3537_v12 = vadd.f32 %v7747_v8, %v3536_v11  ;;  %v7530_v8 = vld [vmem:[%s9688_s3 + $0x70] sm:$0xff]  ;;  %s9712_s3 = sld [smem:[#allocation33_spill]] }
0x1423   : > { %v3610_v15 = vpack.c.bf16 %v3537_v12, %v3537_v12 }
0x1425   : > { %v3618_v17 = vand.u32 %v3610_v15, %v8574_v57 }
0x1427   : > { %3626 = vmatpush.bf16.msra.mxu0 %v3618_v17 }
0x1428   : > { %v3538_v24 = vpop.f32.mrf.mxu2 }
0x142a   : > { %v3565_v30 = vpop.f32.mrf.mxu3 }
0x142b   : > { %3627 = vmatpush.bf16.msra.mxu0 %v3609_v26  ;;  %v3574_v20 = vsel %vm1747_vm15, %v3565_v30, -inf }
0x142c   : > { %3575 = vmax.xlane.f32.xlu0 %v3574_v20 }
0x142f   : > { %3780 = vmatpush.bf16.msrb.mxu0 %v7531_v7 }
0x1430   : > { %v8984_v35 = vpop.f32.mrf.mxu2 }
0x1432   : > { %v3567_v29 = vpop.f32.mrf.mxu3 }
0x1433   : > { %v3577_v25 = vsel %vm1747_vm15, %v3567_v29, -inf  ;;  %3781 = vmatpush.bf16.msrb.mxu0 %v7530_v8 }
0x1434   : > { %3578 = vmax.xlane.f32.xlu1 %v3577_v25 }
0x1438   : > { %v8987_v31 = vpop.f32.mrf.mxu2 }
0x143a   : > { %v3570_v33 = vpop.f32.mrf.mxu3 }
0x143b   : > { %v3580_v34 = vsel %vm1754_vm0, %v3570_v33, -inf }
0x143c   : > { %3581 = vmax.xlane.f32.xlu2 %v3580_v34 }
0x1440   : > { %v8992_v38 = vpop.f32.mrf.mxu2 }
0x1442   : > { %v3572_v21 = vpop.f32.mrf.mxu3 }
0x1448   : > { %v3710_v36 = vpop.f32.mrf.mxu2 }
0x1449   : > { %v7748_v36 = vld [vmem:[%s9679_s21 + $0x7] ss:$0 sm:$0xff]  ;;  %s9734_s21 = sld [smem:[#allocation50_spill]] }
0x144a   : > { %v3743_v46 = vpop.f32.mrf.mxu3 }
0x144b   : > { %v3744_v49 = vadd.f32 %v7749_v23, %v3743_v46  ;;  %v3706_v46 = vadd.f32 %v7748_v36, %v8987_v31 }
0x1452   : > { %v3745_v10 = vpop.f32.mrf.mxu3 }
0x1453   : > { %v3746_v28 = vadd.f32 %v7749_v23, %v3745_v10 }
0x1455   : > { %v3794_v14 = vpack.c.bf16 %v3746_v28, %v3744_v49  ;;  %v3709_v28 = vadd.f32 %v7748_v36, %v8992_v38  ;;  %v3417_v38 = vadd.f32 %v8931_v63, %v8979_v5 }
0x1457   : > { %v3803_v53 = vsel %vm1716_vm14, %v3794_v14, 0 }
0x145a   : > { %v3748_v22 = vpop.f32.mrf.mxu3 }
0x145b   : > { %v3749_v42 = vadd.f32 %v7749_v23, %v3748_v22 }
0x145d   : > { %v3795_v48 = vpack.c.bf16 %v3749_v42, %v3749_v42 }
0x145f   : > { %v3806_v40 = vsel %vm1716_vm14, %v3795_v48, 0 }
0x1460   : > { %3814 = vmatpush.bf16.xpose.msra.mxu1 %v3806_v40 }
0x1462   : > { %v3750_v51 = vpop.f32.mrf.mxu3 }
0x1468   : > { %3815 = vmatpush.bf16.xpose.msra.mxu1 %v3803_v53  ;;  %v3793_v53 = vpack.c.bf16 %v3709_v28, %v3709_v28 }
0x149f   : > { %v3576_v45 = vpop.xlane.xlu0 %3575 }
0x14a0   : > { %v3583_v47 = vsub.f32 %v3565_v30, %v3576_v45 }
0x14a2   : > { %v3586_v41 = vmul.f32 1.442695, %v3583_v47 }
0x14a4   : > { %7872 = vpow2.f32 %v3586_v41 }
0x14a7   : > { %v3579_v56 = vpop.xlane.xlu1 %3578 }
0x14a8   : > { %v3584_v59 = vsub.f32 %v3567_v29, %v3579_v56 }
0x14aa   : > { %v7873_v58 = vpop.eup %7872  ;;  %v3588_v43 = vmul.f32 1.442695, %v3584_v59 }
0x14ab   : > { %v3592_v61 = vsel %vm1747_vm15, %v7873_v58, 0.0 }
0x14ac   : > { %7874 = vpow2.f32 %v3588_v43  ;;  %3593 = vadd.xlane.f32.xlu0 %v3592_v61 }
0x14af   : > { %v3582_v62 = vpop.xlane.xlu2 %3581 }
0x14b0   : > { %v3585_v0 = vsub.f32 %v3570_v33, %v3582_v62 }
0x14b2   : > { %v7875_v1 = vpop.eup %7874  ;;  %v3590_v2 = vmul.f32 1.442695, %v3585_v0 }
0x14b3   : > { %v3595_v3 = vsel %vm1747_vm15, %v7875_v1, 0.0 }
0x14b4   : > { %7876 = vpow2.f32 %v3590_v2  ;;  %3596 = vadd.xlane.f32.xlu1 %v3595_v3 }
0x14ba   : > { %v7877_v4 = vpop.eup %7876 }
0x14bb   : > { %v3598_v6 = vsel %vm1754_vm0, %v7877_v4, 0.0 }
0x14bc   : > { %3599 = vadd.xlane.f32.xlu2 %v3598_v6 }
0x151f   : > { %v3594_v55 = vpop.xlane.xlu0 %3593 }
0x1520   : > { %7878 = vrcp.f32 %v3594_v55 }
0x1526   : > { %v7879_v12 = vpop.eup %7878 }
0x1527   : > { %v3597_v11 = vpop.xlane.xlu1 %3596  ;;  %v3604_v16 = vmul.f32 %v7879_v12, %v7873_v58 }
0x1528   : > { %7880 = vrcp.f32 %v3597_v11 }
0x152e   : > { %v7881_v15 = vpop.eup %7880 }
0x152f   : > { %v3605_v17 = vmul.f32 %v7881_v15, %v7875_v1  ;;  %v3600_v24 = vpop.xlane.xlu2 %3599 }
0x1530   : > { %7882 = vrcp.f32 %v3600_v24 }
0x1531   : > { %v3607_v19 = vpack.c.bf16 %v3605_v17, %v3604_v16 }
0x1533   : > { %6875 = vmatmul.msk.bf16.vlgmr.msra.gmra.mxu0 %vm1747_vm15, %v3607_v19 }
0x1536   : > { %v7883_v26 = vpop.eup %7882 }
0x1537   : > { %v3606_v30 = vmul.f32 %v7883_v26, %v7877_v4 }
0x1539   : > { %v3608_v20 = vpack.c.bf16 %v3606_v30, %v3606_v30 }
0x1543   : > { %6876 = vmatmul.msk.bf16.gmra.mxu0 %vm1747_vm15, %v3608_v20 }
0x1553   : > { %6923 = vmatmul.msk.bf16.vlgmr.msrb.gmra.mxu0 %vm1503_vm1, %v8844_v44  ;;  %v3704_v44 = vadd.f32 %v7748_v36, %v8984_v35  ;;  %v3412_v35 = vadd.f32 %v8927_v50, %v8975_v18 }
0x1555   : > { %v3792_v23 = vpack.c.bf16 %v3706_v46, %v3704_v44 }
0x1563   : > { %6924 = vmatmul.msk.bf16.gmra.mxu0 %vm1503_vm1, %v8853_v52  ;;  %v7750_v52 = vld [vmem:[%s9686_s8 + $0x7] ss:$0 sm:$0xff] }
0x15b0   : > { %v3629_v29 = vpop.f32.mrf.mxu0 }
0x15b8   : > { %v3631_v25 = vpop.f32.mrf.mxu0 }
0x15b9   : > { %v3638_v33 = vpack.c.bf16 %v3631_v25, %v3629_v29 }
0x15bb   : > { %6878 = vmatmul.msk.bf16.vlgmr.msrb.gmra.mxu1 %vm1716_vm14, %v3638_v33 }
0x15c0   : > { %v3634_v34 = vpop.f32.mrf.mxu0 }
0x15c1   : > { %v3639_v9 = vpack.c.bf16 %v3634_v34, %v3634_v34  ;;  %v6929_v34 = vld [vmem:[%s9683_s14 + $0x1c] sm:$0xf] }
0x15c8   : > { %v3636_v37 = vpop.f32.mrf.mxu0 }
0x15c9   : > { %v3901_v37 = vsel %vm2047_vm3, %v6929_v34, 0 }
0x15ca   : > { %3910 = vmatpush.bf16.msra.mxu3 %v3901_v37 }
0x15cb   : > { %6879 = vmatmul.msk.bf16.gmra.mxu1 %vm1716_vm14, %v3639_v9 }
0x15d0   : > { %v3783_v21 = vpop.f32.mrf.mxu0 }
0x15d1   : > { %v3784_v51 = vadd.f32 %v7750_v52, %v3783_v21 }
0x15d8   : > { %v3785_v10 = vpop.f32.mrf.mxu0 }
0x15d9   : > { %v3786_v40 = vadd.f32 %v7750_v52, %v3785_v10 }
0x15db   : > { %6925 = vmatmul.msk.bf16.vlgmr.msra.gmra.mxu1 %vm1716_vm14, %v3792_v23  ;;  %v3861_v31 = vpack.c.bf16 %v3786_v40, %v3784_v51  ;;  %v3414_v51 = vadd.f32 %v8929_v60, %v8977_v54 }
0x15e0   : > { %v3788_v22 = vpop.f32.mrf.mxu0 }
0x15e1   : > { %v3789_v42 = vadd.f32 %v7750_v52, %v3788_v22 }
0x15e3   : > { %v3862_v48 = vpack.c.bf16 %v3789_v42, %v3789_v42  ;;  %v7751_v42 = vld [vmem:[%s9681_s19 + $0x1] ss:$0 sm:$0xff] }
0x15e5   : > { %v3870_v49 = vand.u32 %v3862_v48, %v8574_v57 }
0x15e7   : > { %3878 = vmatpush.bf16.msra.mxu2 %v3870_v49 }
0x15e8   : > { %v3790_v14 = vpop.f32.mrf.mxu0 }
0x15eb   : > { %6926 = vmatmul.msk.bf16.gmra.mxu1 %vm1716_vm14, %v3793_v53  ;;  %3879 = vmatpush.bf16.msra.mxu2 %v3861_v31 }
0x1638   : > { %v3660_v45 = vpop.f32.mrf.mxu1 }
0x1639   : > { %v9020_v47 = vadd.f32 %v3660_v45, %v3412_v35 }
0x1640   : > { %v9022_v41 = vpop.f32.mrf.mxu1 }
0x1641   : > { %v3670_v53 = vadd.f32 %v9022_v41, %v3414_v51 }
0x1648   : > { %v3665_v56 = vpop.f32.mrf.mxu1 }
0x1649   : > { %v9026_v59 = vadd.f32 %v3665_v56, %v3417_v38 }
0x1650   : > { %v3667_v58 = vpop.f32.mrf.mxu1 }
0x1658   : > { %v3817_v43 = vpop.f32.mrf.mxu1 }
0x1659   : > { %v3826_v61 = vsel %vm1747_vm15, %v3817_v43, -inf }
0x165a   : > { %3827 = vmax.xlane.f32.xlu0 %v3826_v61 }
0x1660   : > { %v3819_v62 = vpop.f32.mrf.mxu1 }
0x1661   : > { %v3829_v0 = vsel %vm1747_vm15, %v3819_v62, -inf }
0x1662   : > { %3830 = vmax.xlane.f32.xlu1 %v3829_v0 }
0x1668   : > { %v3822_v50 = vpop.f32.mrf.mxu1 }
0x1669   : > { %v3832_v11 = vsel %vm1754_vm0, %v3822_v50, -inf }
0x1670   : > { %v3824_v18 = vpop.f32.mrf.mxu1 }
0x16cd   : > { %v3828_v1 = vpop.xlane.xlu0 %3827 }
0x16ce   : > { %v3835_v2 = vsub.f32 %v3817_v43, %v3828_v1 }
0x16d0   : > { %v3838_v3 = vmul.f32 1.442695, %v3835_v2 }
0x16d2   : > { %7884 = vpow2.f32 %v3838_v3 }
0x16d5   : > { %v3831_v4 = vpop.xlane.xlu1 %3830 }
0x16d6   : > { %v3836_v63 = vsub.f32 %v3819_v62, %v3831_v4  ;;  %v7533_v4 = vld [vmem:[%s9701_s11 + $0x18] sm:$0xff] }
0x16d7   : > { %4053 = vmatpush.bf16.msra.mxu0 %v7533_v4 }
0x16d8   : > { %v7885_v5 = vpop.eup %7884  ;;  %v3840_v6 = vmul.f32 1.442695, %v3836_v63 }
0x16d9   : > { %v3844_v55 = vsel %vm1747_vm15, %v7885_v5, 0.0 }
0x16da   : > { %7886 = vpow2.f32 %v3840_v6  ;;  %3845 = vadd.xlane.f32.xlu2 %v3844_v55  ;;  %v7532_v55 = vld [vmem:[%s9701_s11 + $0x10] sm:$0xff]  ;;  %s9723_s11 = sld [smem:[#allocation44_spill]] }
0x16db   : > { %4054 = vmatpush.bf16.msra.mxu0 %v7532_v55 }
0x16e0   : > { %v7887_v7 = vpop.eup %7886 }
0x16e1   : > { %v3847_v8 = vsel %vm1747_vm15, %v7887_v7, 0.0 }
0x16e2   : > { %3848 = vadd.xlane.f32.xlu0 %v3847_v8 }
0x16ea   : > { %3833 = vmax.xlane.f32.xlu0 %v3832_v11 }
0x174d   : > { %v3846_v12 = vpop.xlane.xlu2 %3845 }
0x174e   : > { %7888 = vrcp.f32 %v3846_v12 }
0x1754   : > { %v7889_v16 = vpop.eup %7888 }
0x1755   : > { %v3849_v15 = vpop.xlane.xlu0 %3848  ;;  %v3856_v19 = vmul.f32 %v7889_v16, %v7885_v5 }
0x1756   : > { %7890 = vrcp.f32 %v3849_v15 }
0x175c   : > { %v7891_v17 = vpop.eup %7890 }
0x175d   : > { %v3857_v24 = vmul.f32 %v7891_v17, %v7887_v7  ;;  %v3834_v26 = vpop.xlane.xlu0 %3833 }
0x175e   : > { %v3837_v30 = vsub.f32 %v3822_v50, %v3834_v26 }
0x175f   : > { %v3859_v20 = vpack.c.bf16 %v3857_v24, %v3856_v19 }
0x1760   : > { %v3842_v29 = vmul.f32 1.442695, %v3837_v30 }
0x1761   : > { %6927 = vmatmul.msk.bf16.vlgmr.msra.gmra.mxu2 %vm1747_vm15, %v3859_v20 }
0x1762   : > { %7892 = vpow2.f32 %v3842_v29 }
0x1768   : > { %v7893_v25 = vpop.eup %7892 }
0x1769   : > { %v3850_v33 = vsel %vm1754_vm0, %v7893_v25, 0.0 }
0x176a   : > { %3851 = vadd.xlane.f32.xlu0 %v3850_v33 }
0x17dd   : > { %v3852_v9 = vpop.xlane.xlu0 %3851 }
0x17de   : > { %7894 = vrcp.f32 %v3852_v9 }
0x17e4   : > { %v7895_v21 = vpop.eup %7894  ;;  %v3881_v36 = vpop.f32.mrf.mxu2 }
0x17e5   : > { %v3858_v46 = vmul.f32 %v7895_v21, %v7893_v25 }
0x17e7   : > { %v3860_v44 = vpack.c.bf16 %v3858_v46, %v3858_v46 }
0x17e9   : > { %6928 = vmatmul.msk.bf16.gmra.mxu2 %vm1747_vm15, %v3860_v44 }
0x17ec   : > { %v3883_v10 = vpop.f32.mrf.mxu2 }
0x17ed   : > { %v3890_v23 = vpack.c.bf16 %v3883_v10, %v3881_v36  ;;  %v7752_v36 = vld [vmem:[%s9702_s16 + $0x1] ss:$0 sm:$0xff] }
0x17ef   : > { %6930 = vmatmul.msk.bf16.vlgmr.msra.gmra.mxu3 %vm1716_vm14, %v3890_v23  ;;  %v7753_v23 = vld [vmem:[%s9703_s18 + $0x1] ss:$0 sm:$0xff]  ;;  %s9730_s18 = sld [smem:[#allocation51_spill]] }
0x186c   : > { %v3886_v52 = vpop.f32.mrf.mxu2 }
0x186d   : > { %v3891_v22 = vpack.c.bf16 %v3886_v52, %v3886_v52 }
0x186f   : > { %6931 = vmatmul.msk.bf16.gmra.mxu3 %vm1716_vm14, %v3891_v22 }
0x1872   : > { %v3912_v48 = vpop.f32.mrf.mxu3 }
0x1873   : > { %v3921_v28 = vadd.f32 %v3912_v48, %v9020_v47 }
0x1874   : > { %v3888_v40 = vpop.f32.mrf.mxu2 }
0x1875   : > { %v3929_v49 = vadd.f32 %v7751_v42, %v3921_v28 }
0x1877   : > { %v9045_v14 = vadd.f32 %v3929_v49, %v8792_v32 }
0x1879   : > { %v3939_v31 = vsel %vm1503_vm1, %v9045_v14, 0.0 }
0x187a   : > { %3940 = vadd.xlane.f32.xlu1 %v3939_v31  ;;  %v3914_v35 = vpop.f32.mrf.mxu3 }
0x187b   : > { %v3922_v45 = vadd.f32 %v3914_v35, %v3670_v53 }
0x187d   : > { %v3930_v38 = vadd.f32 %v7751_v42, %v3922_v45 }
0x187f   : > { %v9051_v56 = vadd.f32 %v3930_v38, %v8797_v13 }
0x1881   : > { %v3942_v47 = vsel %vm1503_vm1, %v9051_v56, 0.0 }
0x1882   : > { %3943 = vadd.xlane.f32.xlu2 %v3942_v47 }
0x18ed   : > { %v3941_v60 = vpop.xlane.xlu1 %3940 }
0x18ee   : > { %v3948_v32 = vmul.f32 %v3941_v60, %v8506_v27  ;;  %v7537_v60 = vld [vmem:[%s9704_s10 + $0x38] sm:$0xff] }
0x18ef   : > { %4137 = vmatpush.bf16.msrb.mxu1 %v7537_v60 }
0x18f0   : > { %v3951_v54 = vsub.f32 %v9045_v14, %v3948_v32 }
0x18f2   : > { %v3917_v41 = vpop.f32.mrf.mxu3  ;;  %v3954_v58 = vmul.f32 %v3951_v54, %v3951_v54 }
0x18f3   : > { %v3923_v43 = vadd.f32 %v3917_v41, %v9026_v59 }
0x18f4   : > { %v3957_v61 = vsel %vm1503_vm1, %v3954_v58, 0.0  ;;  %v7536_v58 = vld [vmem:[%s9704_s10 + $0x30] sm:$0xff] }
0x18f5   : > { %v3931_v62 = vadd.f32 %v7751_v42, %v3923_v43  ;;  %3958 = vadd.xlane.f32.xlu1 %v3957_v61  ;;  %v3944_v13 = vpop.xlane.xlu2 %3943  ;;  %4138 = vmatpush.bf16.msrb.mxu1 %v7536_v58 }
0x18f6   : > { %v3949_v0 = vmul.f32 %v3944_v13, %v8506_v27 }
0x18f7   : > { %v9061_v50 = vadd.f32 %v3931_v62, %v8802_v39  ;;  %v7535_v62 = vld [vmem:[%s9704_s10 + $0x28] sm:$0xff] }
0x18f8   : > { %v3952_v18 = vsub.f32 %v9051_v56, %v3949_v0  ;;  %v7754_v0 = vld [vmem:[%s9705_s7 + $0x1] ss:$0 sm:$0xff]  ;;  %s9717_s7 = sld [smem:[#allocation38_spill]] }
0x18f9   : > { %v3945_v59 = vsel %vm1510_vm2, %v9061_v50, 0.0  ;;  %4139 = vmatpush.bf16.msrb.mxu1 %v7535_v62 }
0x18fa   : > { %v3919_v1 = vpop.f32.mrf.mxu3  ;;  %v3955_v2 = vmul.f32 %v3952_v18, %v3952_v18 }
0x18fc   : > { %v3960_v3 = vsel %vm1503_vm1, %v3955_v2, 0.0 }
0x18fd   : > { %3961 = vadd.xlane.f32.xlu2 %v3960_v3  ;;  %3946 = vadd.xlane.f32.xlu1 %v3945_v59 }
0x1968   : > { %v3959_v63 = vpop.xlane.xlu1 %3958 }
0x1969   : > { %v3966_v5 = vmul.f32 %v3959_v63, %v8506_v27 }
0x196b   : > { %v3969_v6 = vadd.f32 1e-12, %v3966_v5 }
0x196d   : > { %7896 = vrsqrt.f32 %v3969_v6  ;;  %vm3978_vm5 = vweird.f32 %v3969_v6 }
0x1970   : > { %v3962_v39 = vpop.xlane.xlu2 %3961  ;;  %v3947_v7 = vpop.xlane.xlu1 %3946 }
0x1971   : > { %v3967_v8 = vmul.f32 %v3962_v39, %v8506_v27  ;;  %v3950_v11 = vmul.f32 %v3947_v7, %v8506_v27 }
0x1973   : > { %v7897_v12 = vpop.eup %7896  ;;  %v3970_v15 = vadd.f32 1e-12, %v3967_v8  ;;  %v3953_v16 = vsub.f32 %v9061_v50, %v3950_v11 }
0x1974   : > { %v3973_v17 = vmul.f32 %v7897_v12, %v3969_v6  ;;  %vm3979_vm4 = vweird.f32 %v7897_v12 }
0x1975   : > { %7898 = vrsqrt.f32 %v3970_v15  ;;  %v3956_v19 = vmul.f32 %v3953_v16, %v3953_v16  ;;  %vm3980_vm6 = vmor %vm3978_vm5, %vm3979_vm4  ;;  %vm3988_vm8 = vweird.f32 %v3970_v15 }
0x1976   : > { %v3974_v24 = vmul.f32 %v7897_v12, %v3973_v17 }
0x1977   : > { %v3963_v26 = vsel %vm1510_vm2, %v3956_v19, 0.0 }
0x1978   : > { %v3975_v30 = vmul.f32 0.5, %v3974_v24  ;;  %3964 = vadd.xlane.f32.xlu0 %v3963_v26 }
0x197a   : > { %v3976_v20 = vsub.f32 1.5, %v3975_v30 }
0x197b   : > { %v7899_v29 = vpop.eup %7898 }
0x197c   : > { %v3977_v25 = vmul.f32 %v7897_v12, %v3976_v20  ;;  %v3983_v33 = vmul.f32 %v7899_v29, %v3970_v15  ;;  %vm3989_vm7 = vweird.f32 %v7899_v29 }
0x197d   : > { %vm3990_vm9 = vmor %vm3988_vm8, %vm3989_vm7 }
0x197e   : > { %v3984_v34 = vmul.f32 %v7899_v29, %v3983_v33  ;;  %v3981_v37 = vsel %vm3980_vm6, %v7897_v12, %v3977_v25 }
0x197f   : > { %v4002_v46 = vmul.f32 %v3981_v37, %v3951_v54 }
0x1980   : > { %v3985_v9 = vmul.f32 0.5, %v3984_v34 }
0x1981   : > { %v4008_v52 = vmul.f32 %v7752_v36, %v4002_v46 }
0x1982   : > { %v3986_v21 = vsub.f32 1.5, %v3985_v9 }
0x1983   : > { %v4014_v48 = vadd.f32 %v7753_v23, %v4008_v52 }
0x1984   : > { %v3987_v44 = vmul.f32 %v7899_v29, %v3986_v21 }
0x1986   : > { %v3991_v10 = vsel %vm3990_vm9, %v7899_v29, %v3987_v44 }
0x1987   : > { %v4003_v22 = vmul.f32 %v3991_v10, %v3952_v18  ;;  %v7534_v18 = vld [vmem:[%s9704_s10 + $0x20] sm:$0xff] }
0x1988   : > { %4140 = vmatpush.bf16.msrb.mxu1 %v7534_v18 }
0x1989   : > { %v4009_v42 = vmul.f32 %v7752_v36, %v4003_v22 }
0x198b   : > { %v4015_v28 = vadd.f32 %v7753_v23, %v4009_v42  ;;  %v7755_v42 = vld [vmem:[%s9706_s1 + $0x1] ss:$0 sm:$0xff]  ;;  %s9709_s1 = smov %s9708_s22 }
0x198d   : > { %v4022_v40 = vpack.c.bf16 %v4015_v28, %v4014_v48 }
0x198f   : > { %6948 = vmatmul.msk.bf16.vlgmr.msra.gmra.mxu0 %vm1503_vm1, %v4022_v40 }
0x19eb   : > { %v3965_v49 = vpop.xlane.xlu0 %3964 }
0x19ec   : > { %v3968_v51 = vmul.f32 %v3965_v49, %v8506_v27 }
0x19ee   : > { %v3971_v53 = vadd.f32 1e-12, %v3968_v51 }
0x19f0   : > { %7900 = vrsqrt.f32 %v3971_v53  ;;  %vm3998_vm11 = vweird.f32 %v3971_v53 }
0x19f6   : > { %v7901_v31 = vpop.eup %7900 }
0x19f7   : > { %v3993_v35 = vmul.f32 %v7901_v31, %v3971_v53  ;;  %vm3999_vm10 = vweird.f32 %v7901_v31 }
0x19f8   : > { %vm4000_vm12 = vmor %vm3998_vm11, %vm3999_vm10 }
0x19f9   : > { %v3994_v45 = vmul.f32 %v7901_v31, %v3993_v35 }
0x19fb   : > { %v3995_v38 = vmul.f32 0.5, %v3994_v45 }
0x19fd   : > { %v3996_v47 = vsub.f32 1.5, %v3995_v38 }
0x19ff   : > { %v3997_v32 = vmul.f32 %v7901_v31, %v3996_v47 }
0x1a01   : > { %v4001_v54 = vsel %vm4000_vm12, %v7901_v31, %v3997_v32 }
0x1a02   : > { %v4004_v41 = vmul.f32 %v4001_v54, %v3953_v16 }
0x1a04   : > { %v4010_v43 = vmul.f32 %v7752_v36, %v4004_v41 }
0x1a06   : > { %v4016_v61 = vadd.f32 %v7753_v23, %v4010_v43 }
0x1a08   : > { %v4023_v13 = vpack.c.bf16 %v4016_v61, %v4016_v61 }
0x1a0a   : > { %6949 = vmatmul.msk.bf16.gmra.mxu0 %vm1503_vm1, %v4023_v13 }
0x1a0c   : > { %v4056_v1 = vpop.f32.mrf.mxu0 }
0x1a0d   : > { %v4057_v2 = vadd.f32 %v7754_v0, %v4056_v1  ;;  %v7539_v1 = vld [vmem:[%s9707_s2 + $0x8] sm:$0xff] }
0x1a0e   : > { %4275 = vmatpush.bf16.msrb.mxu2 %v7539_v1 }
0x1a0f   : > { %v4068_v3 = vmul.f32 0.044715, %v4057_v2  ;;  %v4065_v19 = vmul.f32 0.5, %v4057_v2 }
0x1a11   : > { %v4071_v59 = vmul.f32 %v4068_v3, %v4057_v2 }
0x1a13   : > { %v4074_v4 = vmul.f32 %v4071_v59, %v4057_v2  ;;  %v7538_v59 = vld [vmem:[%s9707_s2] sm:$0xff] }
0x1a14   : > { %v4058_v63 = vpop.f32.mrf.mxu0  ;;  %4276 = vmatpush.bf16.msrb.mxu2 %v7538_v59 }
0x1a15   : > { %v4077_v5 = vadd.f32 %v4074_v4, %v4057_v2  ;;  %v4059_v6 = vadd.f32 %v7754_v0, %v4058_v63 }
0x1a17   : > { %v4069_v55 = vmul.f32 0.044715, %v4059_v6  ;;  %v4080_v39 = vmul.f32 0.7978846, %v4077_v5  ;;  %v4066_v24 = vmul.f32 0.5, %v4059_v6 }
0x1a19   : > { %v4072_v7 = vmul.f32 %v4069_v55, %v4059_v6  ;;  %7902 = vtanh.f32 %v4080_v39  ;;  %v7545_v55 = vld [vmem:[%s9708_s22 + $0x8] sm:$0xff]  ;;  %v7544_v39 = vld [vmem:[%s9709_s1] sm:$0xff]  ;;  %s9606_s22 = sand.u32 1, %s8080_s23  }
0x1a1a   : > { %4409 = vmatpush.bf16.msra.mxu2 %v7545_v55  ;;  %v7542_v55 = vld [vmem:[%s9716_s5] sm:$0xff] }
0x1a1b   : > { %v4075_v8 = vmul.f32 %v4072_v7, %v4059_v6 }
0x1a1d   : > { %v4078_v11 = vadd.f32 %v4075_v8, %v4059_v6 }
0x1a1e   : > { %4410 = vmatpush.bf16.msra.mxu2 %v7544_v39 }
0x1a1f   : > { %v4081_v12 = vmul.f32 0.7978846, %v4078_v11  ;;  %v7903_v15 = vpop.eup %7902 }
0x1a20   : > { %v4086_v16 = vadd.f32 1.0, %v7903_v15 }
0x1a21   : > { %7904 = vtanh.f32 %v4081_v12 }
0x1a22   : > { %v4089_v30 = vmul.f32 %v4086_v16, %v4065_v19 }
0x1a27   : > { %v7905_v17 = vpop.eup %7904 }
0x1a28   : > { %v4087_v26 = vadd.f32 1.0, %v7905_v17 }
0x1a2a   : > { %v4090_v20 = vmul.f32 %v4087_v26, %v4066_v24 }
0x1a2c   : > { %v4101_v29 = vpack.c.bf16 %v4090_v20, %v4089_v30  ;;  %v7756_v20 = vld [vmem:[%s9710_s26] ss:$0 sm:$0xff]  ;;  %s9120_s26 = scalar_lea.vmem [#allocation7], %s9606_s22 }
0x1a2e   : > { %6974 = vmatmul.msk.bf16.vlgmr.msrb.gmra.mxu1 %vm2797_vm13, %v4101_v29 }
0x1a87   : > { %v4061_v25 = vpop.f32.mrf.mxu0 }
0x1a88   : > { %v4062_v33 = vadd.f32 %v7754_v0, %v4061_v25 }
0x1a8a   : > { %v4070_v34 = vmul.f32 0.044715, %v4062_v33  ;;  %v4067_v10 = vmul.f32 0.5, %v4062_v33 }
0x1a8c   : > { %v4073_v37 = vmul.f32 %v4070_v34, %v4062_v33 }
0x1a8e   : > { %v4076_v9 = vmul.f32 %v4073_v37, %v4062_v33 }
0x1a8f   : > { %v4063_v21 = vpop.f32.mrf.mxu0 }
0x1a90   : > { %v4079_v36 = vadd.f32 %v4076_v9, %v4062_v33  ;;  %v7757_v33 = vld [vmem:[%s9711_s28] ss:$0 sm:$0xff]  ;;  %s9714_s28 = sld [smem:[#allocation32_spill]] }
0x1a91   : > { %v4242_v21 = vld [vmem:[#allocation2] sm:$0x1] }
0x1a92   : > { %v4082_v46 = vmul.f32 0.7978846, %v4079_v36 }
0x1a94   : > { %7906 = vtanh.f32 %v4082_v46 }
0x1a96   : > { %s9715_s22 = smov %s9714_s28  ;;  %v4253_v1 = vld [vmem:[%s9714_s28] sm:$0x1]  ;;  %s9718_s28 = sld [smem:[#allocation34_spill]] }
0x1a9a   : > { %v7907_v44 = vpop.eup %7906 }
0x1a9b   : > { %v4088_v23 = vadd.f32 1.0, %v7907_v44 }
0x1a9c   : > { %s9719_s8 = smov %s9718_s28 }
0x1a9d   : > { %v4091_v52 = vmul.f32 %v4088_v23, %v4067_v10 }
0x1a9f   : > { %v4102_v22 = vpack.c.bf16 %v4091_v52, %v4091_v52 }
0x1aa1   : > { %6975 = vmatmul.msk.bf16.gmra.mxu1 %vm2797_vm13, %v4102_v22 }
0x1aab   : > { %v4142_v48 = vpop.f32.mrf.mxu1 }
0x1aac   : > { %v4151_v28 = vadd.f32 %v4142_v48, %v9045_v14 }
0x1aae   : > { %v4159_v40 = vadd.f32 %v7755_v42, %v4151_v28 }
0x1ab0   : > { %v4164_v49 = vsel %vm1503_vm1, %v4159_v40, 0.0 }
0x1ab1   : > { %4165 = vadd.xlane.f32.xlu2 %v4164_v49  ;;  %v7541_v49 = vld [vmem:[%s9712_s3 + $0x8] sm:$0xff] }
0x1ab2   : > { %4309 = vmatpush.bf16.msrb.mxu3 %v7541_v49 }
0x1ab3   : > { %v4144_v51 = vpop.f32.mrf.mxu1 }
0x1ab4   : > { %v4152_v53 = vadd.f32 %v4144_v51, %v9051_v56  ;;  %v7553_v51 = vld [vmem:[%s9713_s4 + $0x18] sm:$0xff] }
0x1ab6   : > { %v4160_v31 = vadd.f32 %v7755_v42, %v4152_v53 }
0x1ab8   : > { %v4167_v35 = vsel %vm1503_vm1, %v4160_v31, 0.0 }
0x1ab9   : > { %4168 = vadd.xlane.f32.xlu2 %v4167_v35  ;;  %v7552_v35 = vld [vmem:[%s9713_s4 + $0x10] sm:$0xff] }
0x1b1e   : > { %v4147_v45 = vpop.f32.mrf.mxu1 }
0x1b1f   : > { %v4153_v38 = vadd.f32 %v4147_v45, %v9061_v50 }
0x1b21   : > { %v4161_v47 = vadd.f32 %v7755_v42, %v4153_v38 }
0x1b23   : > { %v4170_v60 = vsel %vm1510_vm2, %v4161_v47, 0.0 }
0x1b24   : > { %v4166_v32 = vpop.xlane.xlu2 %4165  ;;  %4171 = vadd.xlane.f32.xlu0 %v4170_v60 }
0x1b25   : > { %v4173_v14 = vmul.f32 %v4166_v32, %v8506_v27 }
0x1b26   : > { %v4149_v54 = vpop.f32.mrf.mxu1 }
0x1b27   : > { %v4176_v41 = vsub.f32 %v4159_v40, %v4173_v14  ;;  %v7540_v54 = vld [vmem:[%s9712_s3] sm:$0xff] }
0x1b28   : > { %4310 = vmatpush.bf16.msrb.mxu3 %v7540_v54 }
0x1b29   : > { %v4179_v58 = vmul.f32 %v4176_v41, %v4176_v41 }
0x1b2b   : > { %v4182_v56 = vsel %vm1503_vm1, %v4179_v58, 0.0 }
0x1b2c   : > { %4183 = vadd.xlane.f32.xlu1 %v4182_v56  ;;  %v4169_v43 = vpop.xlane.xlu2 %4168 }
0x1b2d   : > { %v4174_v61 = vmul.f32 %v4169_v43, %v8506_v27 }
0x1b2f   : > { %v4177_v62 = vsub.f32 %v4160_v31, %v4174_v61  ;;  %v7547_v61 = vld [vmem:[%s9713_s4 + $0x8] sm:$0xff] }
0x1b30   : > { %4447 = vmatpush.bf16.msra.mxu3 %v7547_v61 }
0x1b31   : > { %v4180_v50 = vmul.f32 %v4177_v62, %v4177_v62 }
0x1b33   : > { %v4185_v13 = vsel %vm1503_vm1, %v4180_v50, 0.0 }
0x1b34   : > { %4186 = vadd.xlane.f32.xlu2 %v4185_v13  ;;  %v7546_v13 = vld [vmem:[%s9713_s4] sm:$0xff] }
0x1b35   : > { %4448 = vmatpush.bf16.msra.mxu3 %v7546_v13 }
0x1b97   : > { %v4172_v0 = vpop.xlane.xlu0 %4171 }
0x1b98   : > { %v4175_v18 = vmul.f32 %v4172_v0, %v8506_v27  ;;  %v7557_v0 = vld [vmem:[%s9709_s1 + $0x28] sm:$0xff] }
0x1b9a   : > { %v9099_v2 = vsub.f32 %v4161_v47, %v4175_v18  ;;  %v7556_v18 = vld [vmem:[%s9709_s1 + $0x20] sm:$0xff] }
0x1b9c   : > { %v4181_v3 = vmul.f32 %v9099_v2, %v9099_v2 }
0x1b9e   : > { %v4188_v4 = vsel %vm1510_vm2, %v4181_v3, 0.0 }
0x1b9f   : > { %v4184_v63 = vpop.xlane.xlu1 %4183  ;;  %4189 = vadd.xlane.f32.xlu0 %v4188_v4 }
0x1ba0   : > { %v4191_v5 = vmul.f32 %v4184_v63, %v8506_v27  ;;  %v7563_v63 = vld [vmem:[%s9709_s1 + $0x38] sm:$0xff] }
0x1ba2   : > { %v4194_v6 = vadd.f32 1e-12, %v4191_v5  ;;  %v7562_v5 = vld [vmem:[%s9709_s1 + $0x30] sm:$0xff] }
0x1ba4   : > { %7908 = vrsqrt.f32 %v4194_v6  ;;  %vm4203_vm5 = vweird.f32 %v4194_v6 }
0x1ba7   : > { %v4187_v7 = vpop.xlane.xlu2 %4186 }
0x1ba8   : > { %v4192_v8 = vmul.f32 %v4187_v7, %v8506_v27 }
0x1baa   : > { %v7909_v11 = vpop.eup %7908  ;;  %v4195_v12 = vadd.f32 1e-12, %v4192_v8  ;;  %v7758_v8 = vld [vmem:[%s9717_s7] ss:$0 sm:$0xff] }
0x1bab   : > { %v4198_v15 = vmul.f32 %v7909_v11, %v4194_v6  ;;  %vm4204_vm4 = vweird.f32 %v7909_v11  ;;  %v7543_v6 = vld [vmem:[%s9716_s5 + $0x8] sm:$0xff] }
0x1bac   : > { %7910 = vrsqrt.f32 %v4195_v12  ;;  %vm4205_vm6 = vmor %vm4203_vm5, %vm4204_vm4  ;;  %vm4213_vm8 = vweird.f32 %v4195_v12  ;;  %4370 = vmatpush.bf16.msrb.mxu0 %v7543_v6 }
0x1bad   : > { %v4199_v16 = vmul.f32 %v7909_v11, %v4198_v15 }
0x1baf   : > { %v4200_v17 = vmul.f32 0.5, %v4199_v16 }
0x1bb0   : > { %4371 = vmatpush.bf16.msrb.mxu0 %v7542_v55 }
0x1bb1   : > { %v4201_v19 = vsub.f32 1.5, %v4200_v17 }
0x1bb2   : > { %v7911_v24 = vpop.eup %7910 }
0x1bb3   : > { %v4202_v26 = vmul.f32 %v7909_v11, %v4201_v19  ;;  %v4208_v30 = vmul.f32 %v7911_v24, %v4195_v12  ;;  %vm4214_vm7 = vweird.f32 %v7911_v24 }
0x1bb4   : > { %vm4215_vm9 = vmor %vm4213_vm8, %vm4214_vm7 }
0x1bb5   : > { %v4206_v29 = vsel %vm4205_vm6, %v7909_v11, %v4202_v26  ;;  %v4209_v25 = vmul.f32 %v7911_v24, %v4208_v30 }
0x1bb6   : > { %v4227_v34 = vmul.f32 %v4206_v29, %v4176_v41  ;;  %v4287_v29 = vld [vmem:[%s9718_s28] sm:$0x1]  ;;  %s9721_s28 = sld [smem:[#allocation43_spill]] }
0x1bb7   : > { %v4210_v37 = vmul.f32 0.5, %v4209_v25 }
0x1bb8   : > { %v4233_v9 = vmul.f32 %v7756_v20, %v4227_v34 }
0x1bb9   : > { %v4211_v36 = vsub.f32 1.5, %v4210_v37 }
0x1bba   : > { %v4239_v46 = vadd.f32 %v7757_v33, %v4233_v9 }
0x1bbb   : > { %v4212_v44 = vmul.f32 %v7911_v24, %v4211_v36 }
0x1bbc   : > { %v9112_v10 = vadd.f32 %v4242_v21, %v4239_v46  ;;  %s9722_s10 = smov %s9721_s28  ;;  %v4317_v55 = vld [vmem:[%s9721_s28] sm:$0x1]  ;;  %s9725_s28 = sld [smem:[#allocation41_spill]] }
0x1bbd   : > { %v4216_v22 = vsel %vm4215_vm9, %v7911_v24, %v4212_v44 }
0x1bbe   : > { %v4252_v23 = vpack.c.bf16 %v9112_v10, %v9112_v10  ;;  %v4244_v52 = vsel %vm1503_vm1, %v9112_v10, 0.0  ;;  %v4228_v42 = vmul.f32 %v4216_v22, %v4177_v62  ;;  %v7760_v22 = vld [vmem:[%s9720_s9] ss:$0 sm:$0xff] }
0x1bbf   : > { %4245 = vst [vmem:[%s9120_s26] sm:$0x1] %v4244_v52 }
0x1bc0   : > { %6985 = vmatmul.msk.bf16.vlgmr.msrb.gmra.mxu2 %vm1503_vm1, %v4252_v23  ;;  %v4234_v48 = vmul.f32 %v7756_v20, %v4228_v42 }
0x1bc1   : > { %4619 = vmatpush.bf16.msrb.mxu2 %v7553_v51 }
0x1bc2   : > { %v4240_v28 = vadd.f32 %v7757_v33, %v4234_v48  ;;  %s9726_s14 = smov %s9725_s28 }
0x1bc4   : > { %v9124_v40 = vpack.c.bf16 %v4240_v28, %v4239_v46 }
0x1bc5   : > { %4620 = vmatpush.bf16.msrb.mxu2 %v7552_v35 }
0x1bd0   : > { %7012 = vmatmul.msk.bf16.vlgmr.msra.gmra.mxu2 %vm1503_vm1, %v9124_v40 }
0x1bd1   : > { %4790 = vmatpush.bf16.msra.mxu2 %v7557_v0 }
0x1bd5   : > { %4791 = vmatpush.bf16.msra.mxu2 %v7556_v18 }
0x1c12   : > { %v4190_v53 = vpop.xlane.xlu0 %4189 }
0x1c13   : > { %v4193_v31 = vmul.f32 %v4190_v53, %v8506_v27 }
0x1c15   : > { %v4196_v45 = vadd.f32 1e-12, %v4193_v31 }
0x1c17   : > { %7912 = vrsqrt.f32 %v4196_v45  ;;  %vm4223_vm11 = vweird.f32 %v4196_v45 }
0x1c1d   : > { %v7913_v38 = vpop.eup %7912 }
0x1c1e   : > { %v4218_v47 = vmul.f32 %v7913_v38, %v4196_v45  ;;  %vm4224_vm10 = vweird.f32 %v7913_v38 }
0x1c1f   : > { %vm4225_vm12 = vmor %vm4223_vm11, %vm4224_vm10 }
0x1c20   : > { %v4219_v60 = vmul.f32 %v7913_v38, %v4218_v47 }
0x1c22   : > { %v4220_v32 = vmul.f32 0.5, %v4219_v60  ;;  %v9183_v60 = vld [vmem:[%s9717_s7 + $0x3] ss:$0 sm:$0xff] }
0x1c24   : > { %v4221_v14 = vsub.f32 1.5, %v4220_v32 }
0x1c26   : > { %v4222_v41 = vmul.f32 %v7913_v38, %v4221_v14 }
0x1c28   : > { %v4226_v58 = vsel %vm4225_vm12, %v7913_v38, %v4222_v41 }
0x1c29   : > { %v4229_v56 = vmul.f32 %v4226_v58, %v9099_v2 }
0x1c2b   : > { %v4235_v43 = vmul.f32 %v7756_v20, %v4229_v56 }
0x1c2d   : > { %v4241_v62 = vadd.f32 %v7757_v33, %v4235_v43 }
0x1c2f   : > { %v9135_v50 = vpack.c.bf16 %v4241_v62, %v4241_v62 }
0x1c31   : > { %7013 = vmatmul.msk.bf16.gmra.mxu2 %vm1503_vm1, %v9135_v50 }
0x1c41   : > { %7068 = vmatmul.msk.bf16.vlgmr.msrb.gmra.mxu2 %vm1503_vm1, %v9124_v40 }
0x1c42   : > { %4983 = vmatpush.bf16.msrb.mxu2 %v7563_v63 }
0x1c43   : > { %v4278_v2 = vpop.f32.mrf.mxu2 }
0x1c44   : > { %v4279_v3 = vadd.f32 %v4278_v2, %v4253_v1 }
0x1c46   : > { %v4286_v59 = vpack.c.bf16 %v4279_v3, %v4279_v3  ;;  %4984 = vmatpush.bf16.msrb.mxu2 %v7562_v5 }
0x1c48   : > { %6994 = vmatmul.msk.bf16.vlgmr.msrb.gmra.mxu3 %vm1503_vm1, %v4286_v59 }
0x1c4b   : > { %v4280_v4 = vpop.f32.mrf.mxu2 }
0x1c51   : > { %7069 = vmatmul.msk.bf16.gmra.mxu2 %vm1503_vm1, %v9135_v50 }
0x1c53   : > { %v4412_v39 = vpop.f32.mrf.mxu2 }
0x1c54   : > { %v4413_v19 = vadd.f32 %v7758_v8, %v4412_v39 }
0x1c58   : > { %7022 = vmatmul.msk.bf16.vlgmr.msra.gmra.mxu3 %vm1503_vm1, %v9124_v40 }
0x1c5b   : > { %v4414_v7 = vpop.f32.mrf.mxu2 }
0x1c5c   : > { %v4415_v16 = vadd.f32 %v7758_v8, %v4414_v7 }
0x1c5e   : > { %v4460_v26 = vpack.c.bf16 %v4415_v16, %v4413_v19  ;;  %v7549_v16 = vld [vmem:[%s9716_s5 + $0x18] sm:$0xff]  ;;  %v7759_v19 = vld [vmem:[%s9720_s9 + $0x1] ss:$0 sm:$0xff] }
0x1c60   : > { %v4466_v30 = vsel %vm1716_vm14, %v4460_v26, 0  ;;  %v4348_v26 = vld [vmem:[%s9724_s13] sm:$0x1] }
0x1c61   : > { %7102 = vmatmul.msk.bf16.vlgmr.msra.gmra.mxu2 %vm1503_vm1, %v9124_v40 }
0x1c68   : > { %7023 = vmatmul.msk.bf16.gmra.mxu3 %vm1503_vm1, %v9135_v50 }
0x1c71   : > { %7103 = vmatmul.msk.bf16.gmra.mxu2 %vm1503_vm1, %v9135_v50 }
0x1c81   : > { %7150 = vmatmul.msk.bf16.vlgmr.msrb.gmra.mxu2 %vm1503_vm1, %v9124_v40 }
0x1c91   : > { %7151 = vmatmul.msk.bf16.gmra.mxu2 %vm1503_vm1, %v9135_v50 }
0x1cb4   : > { %v4417_v11 = vpop.f32.mrf.mxu2 }
0x1cb5   : > { %v4418_v12 = vadd.f32 %v7758_v8, %v4417_v11  ;;  %v4318_v8 = vld [vmem:[%s9723_s11] sm:$0x1] }
0x1cb7   : > { %v4461_v15 = vpack.c.bf16 %v4418_v12, %v4418_v12 }
0x1cb9   : > { %v4469_v17 = vsel %vm1716_vm14, %v4461_v15, 0 }
0x1cba   : > { %4477 = vmatpush.bf16.xpose.msra.mxu0 %v4469_v17  ;;  %v7548_v17 = vld [vmem:[%s9716_s5 + $0x10] sm:$0xff] }
0x1cbc   : > { %v4419_v24 = vpop.f32.mrf.mxu2 }
0x1cc2   : > { %4478 = vmatpush.bf16.xpose.msra.mxu0 %v4466_v30 }
0x1cc4   : > { %v9167_v20 = vpop.f32.mrf.mxu2 }
0x1ccb   : > { %v4312_v25 = vpop.f32.mrf.mxu3 }
0x1ccc   : > { %v4313_v33 = vadd.f32 %v4312_v25, %v4287_v29  ;;  %v9170_v34 = vpop.f32.mrf.mxu2 }
0x1cce   : > { %v4316_v37 = vadd.f32 %v4313_v33, %v9112_v10 }
0x1cd0   : > { %v4319_v9 = vsel %vm1510_vm2, %v4316_v37, 0.0 }
0x1cd1   : > { %4320 = vadd.xlane.f32.xlu1 %v4319_v9 }
0x1cd3   : > { %v4314_v21 = vpop.f32.mrf.mxu3 }
0x1cd4   : > { %v4627_v36 = vpop.f32.mrf.mxu2  ;;  %v4623_v21 = vadd.f32 %v7759_v19, %v9167_v20 }
0x1cd5   : > { %v4628_v24 = vadd.f32 %v7759_v19, %v4627_v36 }
0x1cd7   : > { %v4669_v30 = vpack.c.bf16 %v4628_v24, %v4628_v24 }
0x1cd9   : > { %v4674_v9 = vand.u32 %v4669_v30, %v8574_v57 }
0x1cdb   : > { %v4450_v46 = vpop.f32.mrf.mxu3 }
0x1cdc   : > { %v4629_v44 = vpop.f32.mrf.mxu2  ;;  %v4451_v53 = vadd.f32 %v7760_v22, %v4450_v46 }
0x1ce3   : > { %v4452_v23 = vpop.f32.mrf.mxu3 }
0x1ce4   : > { %v9174_v52 = vpop.f32.mrf.mxu2  ;;  %v4453_v51 = vadd.f32 %v7760_v22, %v4452_v23 }
0x1ce6   : > { %v4496_v35 = vpack.c.bf16 %v4453_v51, %v4451_v53  ;;  %v7551_v53 = vld [vmem:[%s9709_s1 + $0x18] sm:$0xff] }
0x1ceb   : > { %v4455_v42 = vpop.f32.mrf.mxu3 }
0x1cec   : > { %v4456_v48 = vadd.f32 %v7760_v22, %v4455_v42  ;;  %v9177_v28 = vpop.f32.mrf.mxu2 }
0x1cee   : > { %v4497_v49 = vpack.c.bf16 %v4456_v48, %v4456_v48 }
0x1cf0   : > { %v4502_v10 = vand.u32 %v4497_v49, %v8574_v57 }
0x1cf2   : > { %4510 = vmatpush.bf16.msra.mxu1 %v4502_v10 }
0x1cf3   : > { %v4457_v31 = vpop.f32.mrf.mxu3 }
0x1cf4   : > { %v9180_v45 = vpop.f32.mrf.mxu2  ;;  %v7550_v31 = vld [vmem:[%s9709_s1 + $0x10] sm:$0xff] }
0x1cf6   : > { %4511 = vmatpush.bf16.msra.mxu1 %v4496_v35 }
0x1cfa   : > { %4579 = vmatpush.bf16.msrb.mxu1 %v7551_v53 }
0x1cfc   : > { %v4800_v38 = vpop.f32.mrf.mxu2 }
0x1cfe   : > { %4580 = vmatpush.bf16.msrb.mxu1 %v7550_v31 }
0x1d04   : > { %v4986_v47 = vpop.f32.mrf.mxu2 }
0x1d05   : > { %v9186_v14 = vadd.f32 %v9183_v60, %v4986_v47 }
0x1d0c   : > { %v4988_v32 = vpop.f32.mrf.mxu2 }
0x1d0d   : > { %v9189_v54 = vadd.f32 %v9183_v60, %v4988_v32 }
0x1d0f   : > { %v5036_v41 = vpack.c.bf16 %v9189_v54, %v9186_v14  ;;  %v7564_v14 = vld [vmem:[%s9713_s4 + $0x30] sm:$0xff] }
0x1d14   : > { %v9193_v58 = vpop.f32.mrf.mxu2 }
0x1d15   : > { %v4992_v31 = vadd.f32 %v9183_v60, %v9193_v58  ;;  %v7559_v60 = vld [vmem:[%s9713_s4 + $0x28] sm:$0xff]  ;;  %v7558_v58 = vld [vmem:[%s9713_s4 + $0x20] sm:$0xff] }
0x1d1c   : > { %v4993_v56 = vpop.f32.mrf.mxu2 }
0x1d1d   : > { %v7555_v56 = vld [vmem:[%s9716_s5 + $0x28] sm:$0xff] }
0x1d44   : > { %v4321_v43 = vpop.xlane.xlu1 %4320 }
0x1d45   : > { %v4322_v61 = vmul.f32 %v4321_v43, %v8506_v27  ;;  %v7554_v43 = vld [vmem:[%s9716_s5 + $0x20] sm:$0xff] }
0x1d47   : > { %v4323_v62 = vsub.f32 %v4316_v37, %v4322_v61  ;;  %v4625_v37 = vadd.f32 %v7759_v19, %v9170_v34 }
0x1d49   : > { %v4324_v13 = vmul.f32 %v4323_v62, %v4323_v62  ;;  %v4668_v46 = vpack.c.bf16 %v4625_v37, %v4623_v21  ;;  %v4518_v37 = vld [vmem:[%s9725_s28] sm:$0xf]  ;;  %s9727_s28 = sld [smem:[#allocation42_spill]] }
0x1d4b   : > { %v4325_v0 = vsel %vm1510_vm2, %v4324_v13, 0.0 }
0x1d4c   : > { %4326 = vadd.xlane.f32.xlu1 %v4325_v0 }
0x1d4f   : > { %s9728_s16 = smov %s9727_s28 }
0x1dbf   : > { %v4327_v18 = vpop.xlane.xlu1 %4326 }
0x1dc0   : > { %v4328_v1 = vmul.f32 %v4327_v18, %v8506_v27  ;;  %v7763_v18 = vld [vmem:[%s9717_s7 + $0x1] ss:$0 sm:$0xff] }
0x1dc2   : > { %v4329_v2 = vadd.f32 1e-05, %v4328_v1 }
0x1dc4   : > { %7914 = vrsqrt.f32 %v4329_v2  ;;  %vm4336_vm5 = vweird.f32 %v4329_v2 }
0x1dca   : > { %v7915_v3 = vpop.eup %7914 }
0x1dcb   : > { %v4331_v59 = vmul.f32 %v7915_v3, %v4329_v2  ;;  %vm4337_vm4 = vweird.f32 %v7915_v3 }
0x1dcc   : > { %vm4338_vm6 = vmor %vm4336_vm5, %vm4337_vm4 }
0x1dcd   : > { %v4332_v4 = vmul.f32 %v7915_v3, %v4331_v59 }
0x1dcf   : > { %v4333_v63 = vmul.f32 0.5, %v4332_v4 }
0x1dd1   : > { %v4334_v5 = vsub.f32 1.5, %v4333_v63 }
0x1dd3   : > { %v4335_v6 = vmul.f32 %v7915_v3, %v4334_v5 }
0x1dd5   : > { %v4339_v39 = vsel %vm4338_vm6, %v7915_v3, %v4335_v6 }
0x1dd6   : > { %v4340_v7 = vmul.f32 %v4339_v39, %v4323_v62 }
0x1dd8   : > { %v4341_v11 = vmul.f32 %v4340_v7, %v4317_v55  ;;  %v7030_v55 = vld [vmem:[%s9724_s13 + $0x1] sm:$0x1] }
0x1dda   : > { %v9200_v12 = vadd.f32 %v4341_v11, %v4318_v8 }
0x1ddc   : > { %v9204_v15 = vpack.c.bf16 %v9200_v12, %v9200_v12 }
0x1dde   : > { %7003 = vmatmul.msk.bf16.vlgmr.msrb.gmra.mxu0 %vm1503_vm1, %v9204_v15 }
0x1ddf   : > { %4544 = vmatpush.bf16.msrb.mxu0 %v7549_v16 }
0x1de3   : > { %4545 = vmatpush.bf16.msrb.mxu0 %v7548_v17 }
0x1e5b   : > { %v4373_v29 = vpop.f32.mrf.mxu0 }
0x1e5c   : > { %v4374_v25 = vadd.f32 %v4373_v29, %v4348_v26 }
0x1e5e   : > { %v4459_v33 = vpack.c.bf16 %v4374_v25, %v4374_v25 }
0x1e60   : > { %7024 = vmatmul.msk.bf16.vlgmr.msra.gmra.mxu0 %vm1716_vm14, %v4459_v33 }
0x1e61   : > { %4682 = vmatpush.bf16.msra.mxu0 %v4674_v9  ;;  %v4715_v9 = vsel %vm2047_vm3, %v4518_v37, 0 }
0x1e63   : > { %v4375_v44 = vpop.f32.mrf.mxu0 }
0x1e65   : > { %4683 = vmatpush.bf16.msra.mxu0 %v4668_v46  ;;  %v7761_v46 = vld [vmem:[%s9717_s7 + $0x2] ss:$0 sm:$0xff] }
0x1e66   : > { %v4799_v44 = vadd.f32 %v7761_v46, %v9180_v45  ;;  %v7121_v45 = vld [vmem:[%s9726_s14 + $0x8] sm:$0xf] }
0x1e67   : > { %v4907_v53 = vsel %vm2047_vm3, %v7121_v45, 0 }
0x1e70   : > { %7039 = vmatmul.msk.bf16.vlgmr.msrb.gmra.mxu0 %vm1503_vm1, %v9204_v15 }
0x1e71   : > { %4724 = vmatpush.bf16.msrb.mxu0 %v4715_v9 }
0x1edd   : > { %v4480_v36 = vpop.f32.mrf.mxu0 }
0x1ede   : > { %v4484_v23 = vsel %vm1754_vm0, %v4480_v36, -inf }
0x1edf   : > { %4485 = vmax.xlane.f32.xlu2 %v4484_v23  ;;  %v4844_v23 = vpack.c.bf16 %v4799_v44, %v4799_v44 }
0x1ee5   : > { %v4482_v34 = vpop.f32.mrf.mxu0 }
0x1eed   : > { %v4547_v22 = vpop.f32.mrf.mxu0 }
0x1eee   : > { %v4548_v7 = vadd.f32 %v7030_v55, %v4547_v22 }
0x1ef0   : > { %v4631_v11 = vpack.c.bf16 %v4548_v7, %v4548_v7 }
0x1ef5   : > { %v4549_v42 = vpop.f32.mrf.mxu0 }
0x1ef6   : > { %v4796_v42 = vadd.f32 %v7761_v46, %v9177_v28  ;;  %v7079_v28 = vld [vmem:[%s9724_s13 + $0x2] sm:$0x1] }
0x1f52   : > { %v4486_v48 = vpop.xlane.xlu2 %4485 }
0x1f53   : > { %v4487_v49 = vsub.f32 %v4480_v36, %v4486_v48  ;;  %v4852_v48 = vsel %vm1716_vm14, %v4844_v23, 0  ;;  %v7561_v23 = vld [vmem:[%s9716_s5 + $0x38] sm:$0xff] }
0x1f55   : > { %v4488_v20 = vmul.f32 1.442695, %v4487_v49  ;;  %v4794_v49 = vadd.f32 %v7761_v46, %v9174_v52  ;;  %v5037_v52 = vpack.c.bf16 %v4992_v31, %v4992_v31  ;;  %v7127_v31 = vld [vmem:[%s9724_s13 + $0x3] sm:$0x1] }
0x1f57   : > { %7916 = vpow2.f32 %v4488_v20  ;;  %v4843_v20 = vpack.c.bf16 %v4796_v42, %v4794_v49 }
0x1f5d   : > { %v7917_v51 = vpop.eup %7916 }
0x1f5e   : > { %v4490_v10 = vsel %vm1754_vm0, %v7917_v51, 0.0 }
0x1f5f   : > { %4491 = vadd.xlane.f32.xlu0 %v4490_v10 }
0x1fd2   : > { %v4492_v35 = vpop.xlane.xlu0 %4491 }
0x1fd3   : > { %7918 = vrcp.f32 %v4492_v35 }
0x1fd9   : > { %v7919_v38 = vpop.eup %7918 }
0x1fda   : > { %v4494_v47 = vmul.f32 %v7919_v38, %v7917_v51  ;;  %v4849_v51 = vsel %vm1716_vm14, %v4843_v20, 0 }
0x1fdc   : > { %v4495_v32 = vpack.c.bf16 %v4494_v47, %v4494_v47  ;;  %v5045_v47 = vsel %vm1716_vm14, %v5037_v52, 0 }
0x1fde   : > { %7025 = vmatmul.msk.bf16.vlgmr.msra.gmra.mxu1 %vm1747_vm15, %v4495_v32  ;;  %v5042_v32 = vsel %vm1716_vm14, %v5036_v41, 0 }
0x1fdf   : > { %4755 = vmatpush.bf16.msra.mxu1 %v7555_v56  ;;  %v7072_v56 = vld [vmem:[%s9726_s14 + $0x4] sm:$0xf] }
0x1fe3   : > { %4756 = vmatpush.bf16.msra.mxu1 %v7554_v43  ;;  %v4696_v43 = vsel %vm2047_vm3, %v7072_v56, 0 }
0x1fee   : > { %7053 = vmatmul.msk.bf16.vlgmr.msrb.gmra.mxu1 %vm1503_vm1, %v9124_v40 }
0x1ffe   : > { %7054 = vmatmul.msk.bf16.gmra.mxu1 %vm1503_vm1, %v9135_v50 }
0x200e   : > { %7088 = vmatmul.msk.bf16.vlgmr.msra.gmra.mxu1 %vm1503_vm1, %v9204_v15 }
0x205b   : > { %v4513_v61 = vpop.f32.mrf.mxu1 }
0x205c   : > { %v4517_v10 = vpack.c.bf16 %v4513_v61, %v4513_v61 }
0x2063   : > { %v4515_v62 = vpop.f32.mrf.mxu1 }
0x206b   : > { %v4582_v13 = vpop.f32.mrf.mxu1 }
0x206c   : > { %v4583_v63 = vadd.f32 %v7763_v18, %v4582_v13 }
0x2073   : > { %v4584_v0 = vpop.f32.mrf.mxu1 }
0x2074   : > { %v4585_v59 = vadd.f32 %v7763_v18, %v4584_v0  ;;  %v7565_v0 = vld [vmem:[%s9713_s4 + $0x38] sm:$0xff] }
0x2076   : > { %v4632_v6 = vpack.c.bf16 %v4585_v59, %v4583_v63 }
0x2078   : > { %v4638_v39 = vsel %vm1716_vm14, %v4632_v6, 0 }
0x207b   : > { %v4587_v1 = vpop.f32.mrf.mxu1 }
0x207c   : > { %v4588_v2 = vadd.f32 %v7763_v18, %v4587_v1 }
0x207e   : > { %v4633_v3 = vpack.c.bf16 %v4588_v2, %v4588_v2 }
0x2080   : > { %v4641_v4 = vsel %vm1716_vm14, %v4633_v3, 0 }
0x2081   : > { %4649 = vmatpush.bf16.xpose.msrb.mxu3 %v4641_v4 }
0x2083   : > { %v4589_v5 = vpop.f32.mrf.mxu1 }
0x2089   : > { %4650 = vmatpush.bf16.xpose.msrb.mxu3 %v4638_v39 }
0x208b   : > { %v4758_v8 = vpop.f32.mrf.mxu1 }
0x208c   : > { %v4759_v35 = vadd.f32 %v7079_v28, %v4758_v8  ;;  %v7764_v8 = vld [vmem:[%s9720_s9 + $0x2] ss:$0 sm:$0xff] }
0x208e   : > { %v4842_v38 = vpack.c.bf16 %v4759_v35, %v4759_v35 }
0x2090   : > { %7070 = vmatmul.msk.bf16.vlgmr.msrb.gmra.mxu3 %vm1716_vm14, %v4631_v11 }
0x2091   : > { %4705 = vmatpush.bf16.msra.mxu3 %v4696_v43 }
0x2093   : > { %v4760_v16 = vpop.f32.mrf.mxu1 }
0x2095   : > { %4830 = vmatpush.bf16.msrb.mxu3 %v7559_v60 }
0x2099   : > { %4831 = vmatpush.bf16.msrb.mxu3 %v7558_v58 }
0x2113   : > { %v4652_v17 = vpop.f32.mrf.mxu3 }
0x2114   : > { %v4656_v19 = vsel %vm1754_vm0, %v4652_v17, -inf }
0x2115   : > { %4657 = vmax.xlane.f32.xlu1 %v4656_v19 }
0x211b   : > { %v4654_v24 = vpop.f32.mrf.mxu3 }
0x2188   : > { %v4658_v26 = vpop.xlane.xlu1 %4657 }
0x2189   : > { %v4659_v30 = vsub.f32 %v4652_v17, %v4658_v26 }
0x218b   : > { %v4660_v29 = vmul.f32 1.442695, %v4659_v30 }
0x218d   : > { %7920 = vpow2.f32 %v4660_v29 }
0x2193   : > { %v7921_v25 = vpop.eup %7920 }
0x2194   : > { %v4662_v33 = vsel %vm1754_vm0, %v7921_v25, 0.0 }
0x2195   : > { %4663 = vadd.xlane.f32.xlu2 %v4662_v33  ;;  %v7765_v33 = vld [vmem:[%s9720_s9 + $0x3] ss:$0 sm:$0xff] }
0x2208   : > { %v4664_v21 = vpop.xlane.xlu2 %4663 }
0x2209   : > { %7922 = vrcp.f32 %v4664_v21 }
0x220f   : > { %v7923_v36 = vpop.eup %7922 }
0x2210   : > { %v4666_v34 = vmul.f32 %v7923_v36, %v7921_v25 }
0x2212   : > { %v4667_v22 = vpack.c.bf16 %v4666_v34, %v4666_v34  ;;  %v7560_v34 = vld [vmem:[%s9716_s5 + $0x30] sm:$0xff] }
0x2214   : > { %7071 = vmatmul.msk.bf16.vlgmr.msra.gmra.mxu0 %vm1747_vm15, %v4667_v22 }
0x2215   : > { %4860 = vmatpush.bf16.xpose.msra.mxu0 %v4852_v48 }
0x221d   : > { %4861 = vmatpush.bf16.xpose.msra.mxu0 %v4849_v51 }
0x2224   : > { %7074 = vmatmul.msk.bf16.vlgmr.msrb.gmra.mxu0 %vm1716_vm14, %v4517_v10 }
0x2225   : > { %4916 = vmatpush.bf16.msrb.mxu0 %v4907_v53 }
0x2234   : > { %7119 = vmatmul.msk.bf16.vlgmr.msra.gmra.mxu0 %vm1716_vm14, %v4842_v38 }
0x2235   : > { %5053 = vmatpush.bf16.xpose.msra.mxu0 %v5045_v47 }
0x223d   : > { %5054 = vmatpush.bf16.xpose.msra.mxu0 %v5042_v32 }
0x2291   : > { %v4685_v61 = vpop.f32.mrf.mxu0 }
0x2292   : > { %v4689_v62 = vpack.c.bf16 %v4685_v61, %v4685_v61 }
0x2294   : > { %7073 = vmatmul.msk.bf16.vlgmr.msra.gmra.mxu3 %vm1716_vm14, %v4689_v62 }
0x2295   : > { %5023 = vmatpush.bf16.msra.mxu3 %v7565_v0 }
0x2299   : > { %v4687_v13 = vpop.f32.mrf.mxu0  ;;  %5024 = vmatpush.bf16.msra.mxu3 %v7564_v14 }
0x22a1   : > { %v9266_v54 = vpop.f32.mrf.mxu0 }
0x22a4   : > { %7117 = vmatmul.msk.bf16.vlgmr.msrb.gmra.mxu3 %vm1503_vm1, %v9124_v40 }
0x22a9   : > { %v4728_v41 = vpop.f32.mrf.mxu0 }
0x22b1   : > { %v4863_v18 = vpop.f32.mrf.mxu0 }
0x22b2   : > { %v4867_v1 = vsel %vm1754_vm0, %v4863_v18, -inf }
0x22b3   : > { %4868 = vmax.xlane.f32.xlu0 %v4867_v1 }
0x22b4   : > { %7118 = vmatmul.msk.bf16.gmra.mxu3 %vm1503_vm1, %v9135_v50 }
0x22b9   : > { %v4865_v2 = vpop.f32.mrf.mxu0 }
0x22c4   : > { %7165 = vmatmul.msk.bf16.vlgmr.msra.gmra.mxu3 %vm1503_vm1, %v9124_v40 }
0x22d4   : > { %7166 = vmatmul.msk.bf16.gmra.mxu3 %vm1503_vm1, %v9135_v50 }
0x2317   : > { %v4707_v3 = vpop.f32.mrf.mxu3 }
0x2318   : > { %v4727_v32 = vadd.f32 %v9266_v54, %v4707_v3  ;;  %v7169_v3 = vld [vmem:[%s9726_s14 + $0xc] sm:$0xf] }
0x231f   : > { %v4709_v59 = vpop.f32.mrf.mxu3 }
0x2320   : > { %v5100_v59 = vsel %vm2047_vm3, %v7169_v3, 0 }
0x2326   : > { %v4869_v4 = vpop.xlane.xlu0 %4868 }
0x2327   : > { %v4870_v63 = vsub.f32 %v4863_v18, %v4869_v4  ;;  %v4833_v5 = vpop.f32.mrf.mxu3 }
0x2328   : > { %v4834_v26 = vadd.f32 %v7764_v8, %v4833_v5 }
0x2329   : > { %v4871_v6 = vmul.f32 1.442695, %v4870_v63 }
0x232b   : > { %7924 = vpow2.f32 %v4871_v6 }
0x232f   : > { %v4835_v55 = vpop.f32.mrf.mxu3 }
0x2330   : > { %v4836_v19 = vadd.f32 %v7764_v8, %v4835_v55  ;;  %v5116_v55 = vld [vmem:[%s9727_s28] sm:$0x1]  ;;  %s9731_s28 = sld [smem:[#allocation45_spill]] }
0x2331   : > { %v7925_v39 = vpop.eup %7924 }
0x2332   : > { %v4873_v7 = vsel %vm1754_vm0, %v7925_v39, 0.0  ;;  %v4879_v29 = vpack.c.bf16 %v4836_v19, %v4834_v26 }
0x2333   : > { %4874 = vadd.xlane.f32.xlu1 %v4873_v7 }
0x2336   : > { %s9732_s19 = smov %s9731_s28 }
0x2337   : > { %v4838_v11 = vpop.f32.mrf.mxu3 }
0x2338   : > { %v4839_v16 = vadd.f32 %v7764_v8, %v4838_v11 }
0x233a   : > { %v4880_v17 = vpack.c.bf16 %v4839_v16, %v4839_v16 }
0x233c   : > { %v4885_v24 = vand.u32 %v4880_v17, %v8574_v57 }
0x233e   : > { %4893 = vmatpush.bf16.msrb.mxu1 %v4885_v24 }
0x233f   : > { %v4840_v30 = vpop.f32.mrf.mxu3 }
0x2342   : > { %4894 = vmatpush.bf16.msrb.mxu1 %v4879_v29  ;;  %v7567_v29 = vld [vmem:[%s9729_s17 + $0x8] sm:$0xff] }
0x2346   : > { %4948 = vmatpush.bf16.msra.mxu1 %v7561_v23 }
0x2347   : > { %v5026_v25 = vpop.f32.mrf.mxu3 }
0x2348   : > { %v5027_v9 = vadd.f32 %v7765_v33, %v5026_v25  ;;  %v7566_v25 = vld [vmem:[%s9729_s17] sm:$0xff] }
0x234a   : > { %4949 = vmatpush.bf16.msra.mxu1 %v7560_v34 }
0x234f   : > { %v5028_v37 = vpop.f32.mrf.mxu3 }
0x2350   : > { %v5029_v21 = vadd.f32 %v7765_v33, %v5028_v37 }
0x2352   : > { %v5072_v46 = vpack.c.bf16 %v5029_v21, %v5027_v9  ;;  %v7570_v9 = vld [vmem:[%s9730_s18 + $0x10] sm:$0xff] }
0x2357   : > { %v5031_v44 = vpop.f32.mrf.mxu3 }
0x2358   : > { %v5032_v42 = vadd.f32 %v7765_v33, %v5031_v44  ;;  %v7571_v33 = vld [vmem:[%s9730_s18 + $0x18] sm:$0xff] }
0x2359   : > { %5221 = vmatpush.bf16.msra.mxu2 %v7571_v33 }
0x235a   : > { %v5073_v49 = vpack.c.bf16 %v5032_v42, %v5032_v42  ;;  %v5119_v42 = vld [vmem:[%s9731_s28] sm:$0x1]  ;;  %s9735_s28 = sld [smem:[#allocation52_spill]] }
0x235c   : > { %v5078_v45 = vand.u32 %v5073_v49, %v8574_v57 }
0x235d   : > { %5222 = vmatpush.bf16.msra.mxu2 %v7570_v9  ;;  %v9359_v9 = vld [vmem:[%s9717_s7 + $0x6] ss:$0 sm:$0xff] }
0x235f   : > { %v5033_v36 = vpop.f32.mrf.mxu3 }
0x2360   : > { %s9736_s24 = smov %s9735_s28 }
0x23a6   : > { %v4875_v22 = vpop.xlane.xlu1 %4874 }
0x23a7   : > { %7926 = vrcp.f32 %v4875_v22 }
0x23ad   : > { %v7927_v48 = vpop.eup %7926 }
0x23ae   : > { %v4877_v20 = vmul.f32 %v7927_v48, %v7925_v39 }
0x23b0   : > { %v4878_v51 = vpack.c.bf16 %v4877_v20, %v4877_v20  ;;  %v5120_v20 = vld [vmem:[%s9733_s20] sm:$0x1] }
0x23b2   : > { %7120 = vmatmul.msk.bf16.vlgmr.msrb.gmra.mxu1 %vm1747_vm15, %v4878_v51 }
0x23b3   : > { %5086 = vmatpush.bf16.msrb.mxu1 %v5078_v45 }
0x23b7   : > { %5087 = vmatpush.bf16.msrb.mxu1 %v5072_v46 }
0x23c2   : > { %7136 = vmatmul.msk.bf16.vlgmr.msra.gmra.mxu1 %vm1503_vm1, %v9204_v15 }
0x23c3   : > { %5172 = vmatpush.bf16.msra.mxu1 %v7567_v29 }
0x23c7   : > { %5173 = vmatpush.bf16.msra.mxu1 %v7566_v25 }
0x242f   : > { %v4896_v10 = vpop.f32.mrf.mxu1 }
0x2430   : > { %v4900_v53 = vpack.c.bf16 %v4896_v10, %v4896_v10 }
0x2432   : > { %7122 = vmatmul.msk.bf16.vlgmr.msrb.gmra.mxu0 %vm1716_vm14, %v4900_v53  ;;  %v7569_v53 = vld [vmem:[%s9730_s18 + $0x8] sm:$0xff] }
0x2433   : > { %5109 = vmatpush.bf16.msrb.mxu0 %v5100_v59  ;;  %5223 = vmatpush.bf16.msra.mxu2 %v7569_v53 }
0x2437   : > { %v4898_v28 = vpop.f32.mrf.mxu1 }
0x2438   : > { %v7568_v28 = vld [vmem:[%s9730_s18] sm:$0xff] }
0x2439   : > { %5224 = vmatpush.bf16.msra.mxu2 %v7568_v28 }
0x243f   : > { %v4951_v35 = vpop.f32.mrf.mxu1 }
0x2440   : > { %v4952_v52 = vadd.f32 %v7127_v31, %v4951_v35  ;;  %v7579_v31 = vld [vmem:[%s9709_s1 + $0x48] sm:$0xff]  ;;  %v7578_v35 = vld [vmem:[%s9709_s1 + $0x40] sm:$0xff] }
0x2441   : > { %5422 = vmatpush.bf16.msrb.mxu2 %v7579_v31 }
0x2442   : > { %v5035_v38 = vpack.c.bf16 %v4952_v52, %v4952_v52  ;;  %v5150_v52 = vld [vmem:[%s9734_s21] sm:$0x1] }
0x2444   : > { %7167 = vmatmul.msk.bf16.vlgmr.msra.gmra.mxu0 %vm1716_vm14, %v5035_v38 }
0x2445   : > { %5423 = vmatpush.bf16.msrb.mxu2 %v7578_v35 }
0x2447   : > { %v4953_v47 = vpop.f32.mrf.mxu1 }
0x24af   : > { %v4918_v56 = vpop.f32.mrf.mxu0 }
0x24b0   : > { %v4922_v43 = vadd.f32 %v4918_v56, %v4727_v32 }
0x24b7   : > { %v4920_v60 = vpop.f32.mrf.mxu0 }
0x24c1   : > { %v5056_v58 = vpop.f32.mrf.mxu0 }
0x24c2   : > { %v5060_v15 = vsel %vm1754_vm0, %v5056_v58, -inf }
0x24c3   : > { %5061 = vmax.xlane.f32.xlu2 %v5060_v15  ;;  %v7591_v15 = vld [vmem:[%s9709_s1 + $0x68] sm:$0xff] }
0x24c9   : > { %v5058_v61 = vpop.f32.mrf.mxu0 }
0x24ca   : > { %v7590_v61 = vld [vmem:[%s9709_s1 + $0x60] sm:$0xff] }
0x2536   : > { %v5062_v62 = vpop.xlane.xlu2 %5061 }
0x2537   : > { %v5063_v13 = vsub.f32 %v5056_v58, %v5062_v62  ;;  %v7586_v58 = vld [vmem:[%s9713_s4 + $0x50] sm:$0xff]  ;;  %v7597_v62 = vld [vmem:[%s9709_s1 + $0x78] sm:$0xff] }
0x2539   : > { %v5064_v0 = vmul.f32 1.442695, %v5063_v13  ;;  %v7596_v13 = vld [vmem:[%s9709_s1 + $0x70] sm:$0xff] }
0x253b   : > { %7928 = vpow2.f32 %v5064_v0  ;;  %v5189_v0 = vld [vmem:[%s9735_s28] sm:$0x1]  ;;  %s9737_s28 = sld [smem:[#allocation47_spill]] }
0x2541   : > { %v7929_v14 = vpop.eup %7928 }
0x2542   : > { %v5066_v41 = vsel %vm1754_vm0, %v7929_v14, 0.0 }
0x2543   : > { %5067 = vadd.xlane.f32.xlu0 %v5066_v41  ;;  %v7575_v41 = vld [vmem:[%s9712_s3 + $0x18] sm:$0xff] }
0x2544   : > { %5322 = vmatpush.bf16.msra.mxu0 %v7575_v41  ;;  %v5231_v41 = vld [vmem:[%s9737_s28] sm:$0x1] }
0x25b6   : > { %v5068_v18 = vpop.xlane.xlu0 %5067 }
0x25b7   : > { %7930 = vrcp.f32 %v5068_v18 }
0x25bd   : > { %v7931_v54 = vpop.eup %7930 }
0x25be   : > { %v5070_v1 = vmul.f32 %v7931_v54, %v7929_v14 }
0x25c0   : > { %v5071_v2 = vpack.c.bf16 %v5070_v1, %v5070_v1  ;;  %v7574_v1 = vld [vmem:[%s9712_s3 + $0x10] sm:$0xff]  ;;  %s9738_s3 = smov %s9737_s28  ;;  %s6329_s28 = scalar_lea.hbm %s8379_s12, %s8407_s0 }
0x25c1   : > { %5323 = vmatpush.bf16.msra.mxu0 %v7574_v1  ;;  %v5232_v1 = vld [vmem:[%s9739_s25] sm:$0x1] }
0x25c2   : > { %7168 = vmatmul.msk.bf16.vlgmr.msrb.gmra.mxu1 %vm1747_vm15, %v5071_v2 }
0x263f   : > { %v5089_v4 = vpop.f32.mrf.mxu1 }
0x2640   : > { %v5093_v63 = vpack.c.bf16 %v5089_v4, %v5089_v4 }
0x2642   : > { %7170 = vmatmul.msk.bf16.vlgmr.msrb.gmra.mxu0 %vm1716_vm14, %v5093_v63  ;;  %v7766_v63 = vld [vmem:[%s9717_s7 + $0x4] ss:$0 sm:$0xff] }
0x2647   : > { %v5091_v5 = vpop.f32.mrf.mxu1 }
0x26bf   : > { %v5111_v6 = vpop.f32.mrf.mxu0 }
0x26c0   : > { %v5115_v39 = vadd.f32 %v5111_v6, %v4922_v43  ;;  %v7587_v43 = vld [vmem:[%s9713_s4 + $0x58] sm:$0xff] }
0x26c2   : > { %v5117_v7 = vadd.f32 %v5116_v55, %v5115_v39 }
0x26c4   : > { %v5118_v8 = vadd.f32 %v5117_v7, %v9200_v12 }
0x26c6   : > { %v5121_v11 = vsel %vm1510_vm2, %v5118_v8, 0.0 }
0x26c7   : > { %5122 = vadd.xlane.f32.xlu1 %v5121_v11  ;;  %v5113_v16 = vpop.f32.mrf.mxu0 }
0x273a   : > { %v5123_v17 = vpop.xlane.xlu1 %5122 }
0x273b   : > { %v5124_v19 = vmul.f32 %v5123_v17, %v8506_v27 }
0x273d   : > { %v5125_v24 = vsub.f32 %v5118_v8, %v5124_v19 }
0x273f   : > { %v5126_v26 = vmul.f32 %v5125_v24, %v5125_v24 }
0x2741   : > { %v5127_v30 = vsel %vm1510_vm2, %v5126_v26, 0.0 }
0x2742   : > { %5128 = vadd.xlane.f32.xlu2 %v5127_v30 }
0x27b5   : > { %v5129_v37 = vpop.xlane.xlu2 %5128 }
0x27b6   : > { %v5130_v12 = vmul.f32 %v5129_v37, %v8506_v27 }
0x27b8   : > { %v5131_v21 = vadd.f32 1e-05, %v5130_v12 }
0x27ba   : > { %7932 = vrsqrt.f32 %v5131_v21  ;;  %vm5138_vm8 = vweird.f32 %v5131_v21 }
0x27c0   : > { %v7933_v46 = vpop.eup %7932 }
0x27c1   : > { %v5133_v44 = vmul.f32 %v7933_v46, %v5131_v21  ;;  %vm5139_vm7 = vweird.f32 %v7933_v46 }
0x27c2   : > { %vm5140_vm9 = vmor %vm5138_vm8, %vm5139_vm7 }
0x27c3   : > { %v5134_v36 = vmul.f32 %v7933_v46, %v5133_v44 }
0x27c5   : > { %v5135_v23 = vmul.f32 0.5, %v5134_v36 }
0x27c7   : > { %v5136_v34 = vsub.f32 1.5, %v5135_v23 }
0x27c9   : > { %v5137_v22 = vmul.f32 %v7933_v46, %v5136_v34 }
0x27cb   : > { %v5141_v48 = vsel %vm5140_vm9, %v7933_v46, %v5137_v22 }
0x27cc   : > { %v5142_v49 = vmul.f32 %v5141_v48, %v5125_v24  ;;  %v9346_v24 = vld [vmem:[%s9720_s9 + $0x5] ss:$0 sm:$0xff] }
0x27ce   : > { %v5143_v51 = vmul.f32 %v5142_v49, %v5119_v42  ;;  %v9372_v42 = vld [vmem:[%s9717_s7 + $0x7] ss:$0 sm:$0xff] }
0x27d0   : > { %v5144_v45 = vadd.f32 %v5143_v51, %v5120_v20 }
0x27d2   : > { %v5149_v10 = vpack.c.bf16 %v5144_v45, %v5144_v45 }
0x27d4   : > { %7179 = vmatmul.msk.bf16.vlgmr.msra.gmra.mxu1 %vm1503_vm1, %v5149_v10 }
0x2851   : > { %v5175_v38 = vpop.f32.mrf.mxu1 }
0x2852   : > { %v5176_v47 = vadd.f32 %v5175_v38, %v5150_v52  ;;  %v7573_v38 = vld [vmem:[%s9707_s2 + $0x18] sm:$0xff] }
0x2853   : > { %5286 = vmatpush.bf16.msrb.mxu3 %v7573_v38 }
0x2854   : > { %v5179_v32 = vmax.f32 %v5176_v47, 0.0  ;;  %v7572_v47 = vld [vmem:[%s9707_s2 + $0x10] sm:$0xff]  ;;  %s6333_s2 = sshll.u32 %s6329_s28, 4  ;;  %s6334_s2 = int_to_ptr.hbm [resolvable:$true] %s6333_s2 }
0x2856   : > { %v5188_v56 = vpack.c.bf16 %v5179_v32, %v5179_v32  ;;  %v7581_v32 = vld [vmem:[%s9713_s4 + $0x48] sm:$0xff] }
0x2857   : > { %5287 = vmatpush.bf16.msrb.mxu3 %v7572_v47 }
0x2858   : > { %7196 = vmatmul.msk.bf16.vlgmr.msra.gmra.mxu2 %vm2797_vm13, %v5188_v56 }
0x2859   : > { %v5177_v60 = vpop.f32.mrf.mxu1  ;;  %5635 = vmatpush.bf16.msra.mxu2 %v7587_v43 }
0x285a   : > { %v7580_v60 = vld [vmem:[%s9713_s4 + $0x40] sm:$0xff] }
0x285b   : > { %5462 = vmatpush.bf16.msra.mxu3 %v7581_v32 }
0x285d   : > { %5636 = vmatpush.bf16.msra.mxu2 %v7586_v58 }
0x285f   : > { %5463 = vmatpush.bf16.msra.mxu3 %v7580_v60 }
0x2868   : > { %7254 = vmatmul.msk.bf16.vlgmr.msrb.gmra.mxu2 %vm1503_vm1, %v9124_v40 }
0x2869   : > { %5806 = vmatpush.bf16.msrb.mxu2 %v7591_v15 }
0x286d   : > { %5807 = vmatpush.bf16.msrb.mxu2 %v7590_v61 }
0x2878   : > { %7255 = vmatmul.msk.bf16.gmra.mxu2 %vm1503_vm1, %v9135_v50 }
0x2888   : > { %7316 = vmatmul.msk.bf16.vlgmr.msra.gmra.mxu2 %vm1503_vm1, %v9124_v40 }
0x2889   : > { %5999 = vmatpush.bf16.msra.mxu2 %v7597_v62 }
0x288d   : > { %6000 = vmatpush.bf16.msra.mxu2 %v7596_v13 }
0x2898   : > { %7317 = vmatmul.msk.bf16.gmra.mxu2 %vm1503_vm1, %v9135_v50 }
0x28a8   : > { %7350 = vmatmul.msk.bf16.vlgmr.msrb.gmra.mxu2 %vm1503_vm1, %v9124_v40 }
0x28b8   : > { %7351 = vmatmul.msk.bf16.gmra.mxu2 %vm1503_vm1, %v9135_v50 }
0x28c8   : > { %7398 = vmatmul.msk.bf16.vlgmr.msra.gmra.mxu2 %vm1503_vm1, %v9124_v40 }
0x28d8   : > { %7399 = vmatmul.msk.bf16.gmra.mxu2 %vm1503_vm1, %v9135_v50 }
0x28db   : > { %v5226_v14 = vpop.f32.mrf.mxu2 }
0x28dc   : > { %v5227_v18 = vadd.f32 %v5226_v14, %v5189_v0 }
0x28de   : > { %v5230_v54 = vadd.f32 %v5227_v18, %v5144_v45 }
0x28e0   : > { %v5233_v2 = vsel %vm1510_vm2, %v5230_v54, 0.0 }
0x28e1   : > { %5234 = vadd.xlane.f32.xlu0 %v5233_v2 }
0x28e3   : > { %v5228_v3 = vpop.f32.mrf.mxu2 }
0x28eb   : > { %v5425_v59 = vpop.f32.mrf.mxu2 }
0x28ec   : > { %v5426_v8 = vadd.f32 %v7766_v63, %v5425_v59 }
0x28f3   : > { %v5427_v4 = vpop.f32.mrf.mxu2 }
0x28f4   : > { %v5428_v39 = vadd.f32 %v7766_v63, %v5427_v4  ;;  %v7201_v4 = vld [vmem:[%s9715_s22 + $0x1] sm:$0x1] }
0x28f6   : > { %v5475_v16 = vpack.c.bf16 %v5428_v39, %v5426_v8  ;;  %v7576_v39 = vld [vmem:[%s9716_s5 + $0x40] sm:$0xff] }
0x28f8   : > { %v5481_v17 = vsel %vm1716_vm14, %v5475_v16, 0  ;;  %v7770_v16 = vld [vmem:[%s9720_s9 + $0x4] ss:$0 sm:$0xff] }
0x28fb   : > { %v5430_v5 = vpop.f32.mrf.mxu2 }
0x28fc   : > { %v5431_v6 = vadd.f32 %v7766_v63, %v5430_v5 }
0x28fe   : > { %v5476_v55 = vpack.c.bf16 %v5431_v6, %v5431_v6  ;;  %v7577_v6 = vld [vmem:[%s9716_s5 + $0x48] sm:$0xff] }
0x28ff   : > { %5387 = vmatpush.bf16.msrb.mxu1 %v7577_v6  ;;  %v7231_v6 = vld [vmem:[%s9724_s13 + $0x4] sm:$0x1] }
0x2900   : > { %v5484_v7 = vsel %vm1716_vm14, %v5476_v55, 0 }
0x2901   : > { %5492 = vmatpush.bf16.xpose.msrb.mxu0 %v5484_v7 }
0x2903   : > { %v5432_v11 = vpop.f32.mrf.mxu2  ;;  %5388 = vmatpush.bf16.msrb.mxu1 %v7576_v39 }
0x2909   : > { %5493 = vmatpush.bf16.xpose.msrb.mxu0 %v5481_v17 }
0x290b   : > { %v5638_v19 = vpop.f32.mrf.mxu2 }
0x290c   : > { %v9349_v30 = vadd.f32 %v9346_v24, %v5638_v19 }
0x2913   : > { %v5640_v26 = vpop.f32.mrf.mxu2 }
0x2914   : > { %v9352_v29 = vadd.f32 %v9346_v24, %v5640_v26 }
0x2916   : > { %v5684_v25 = vpack.c.bf16 %v9352_v29, %v9349_v30 }
0x291b   : > { %v9356_v33 = vpop.f32.mrf.mxu2 }
0x2923   : > { %v5645_v37 = vpop.f32.mrf.mxu2 }
0x292b   : > { %v5809_v12 = vpop.f32.mrf.mxu2 }
0x292c   : > { %v9362_v46 = vadd.f32 %v9359_v9, %v5809_v12 }
0x2933   : > { %v5811_v21 = vpop.f32.mrf.mxu2 }
0x2934   : > { %v9365_v44 = vadd.f32 %v9359_v9, %v5811_v21 }
0x2936   : > { %v5859_v36 = vpack.c.bf16 %v9365_v44, %v9362_v46 }
0x293b   : > { %v9369_v23 = vpop.f32.mrf.mxu2 }
0x2943   : > { %v5816_v34 = vpop.f32.mrf.mxu2 }
0x294b   : > { %v6002_v22 = vpop.f32.mrf.mxu2 }
0x294c   : > { %v9375_v49 = vadd.f32 %v9372_v42, %v6002_v22 }
0x2953   : > { %v6004_v48 = vpop.f32.mrf.mxu2 }
0x2954   : > { %v9378_v20 = vadd.f32 %v9372_v42, %v6004_v48  ;;  %v5235_v51 = vpop.xlane.xlu0 %5234  ;;  %v7215_v48 = vld [vmem:[%s9719_s8 + $0x1] sm:$0x1]  ;;  %s8038_s8 = scalar_lea.hbm %s8379_s12, 2 }
0x2955   : > { %v5236_v45 = vmul.f32 %v5235_v51, %v8506_v27 }
0x2956   : > { %v6052_v10 = vpack.c.bf16 %v9378_v20, %v9375_v49  ;;  %v7598_v49 = vld [vmem:[%s9713_s4 + $0x70] sm:$0xff] }
0x2957   : > { %v5237_v53 = vsub.f32 %v5230_v54, %v5236_v45 }
0x2959   : > { %v5238_v28 = vmul.f32 %v5237_v53, %v5237_v53 }
0x295b   : > { %v9383_v31 = vpop.f32.mrf.mxu2  ;;  %v5239_v35 = vsel %vm1510_vm2, %v5238_v28, 0.0 }
0x295c   : > { %5240 = vadd.xlane.f32.xlu1 %v5239_v35 }
0x2963   : > { %v6009_v52 = vpop.f32.mrf.mxu2 }
0x29cf   : > { %v5241_v56 = vpop.xlane.xlu1 %5240 }
0x29d0   : > { %v5242_v43 = vmul.f32 %v5241_v56, %v8506_v27 }
0x29d2   : > { %v5243_v58 = vadd.f32 1e-05, %v5242_v43 }
0x29d4   : > { %7934 = vrsqrt.f32 %v5243_v58  ;;  %vm5250_vm11 = vweird.f32 %v5243_v58 }
0x29da   : > { %v7935_v15 = vpop.eup %7934 }
0x29db   : > { %v5245_v61 = vmul.f32 %v7935_v15, %v5243_v58  ;;  %vm5251_vm10 = vweird.f32 %v7935_v15 }
0x29dc   : > { %vm5252_vm12 = vmor %vm5250_vm11, %vm5251_vm10 }
0x29dd   : > { %v5246_v62 = vmul.f32 %v7935_v15, %v5245_v61 }
0x29df   : > { %v5247_v13 = vmul.f32 0.5, %v5246_v62 }
0x29e1   : > { %v5248_v0 = vsub.f32 1.5, %v5247_v13 }
0x29e3   : > { %v5249_v14 = vmul.f32 %v7935_v15, %v5248_v0 }
0x29e5   : > { %v5253_v18 = vsel %vm5252_vm12, %v7935_v15, %v5249_v14 }
0x29e6   : > { %v5254_v54 = vmul.f32 %v5253_v18, %v5237_v53 }
0x29e8   : > { %v5255_v2 = vmul.f32 %v5254_v54, %v5231_v41  ;;  %v7225_v41 = vld [vmem:[%s9722_s10 + $0x1] sm:$0x1] }
0x29ea   : > { %v5256_v3 = vadd.f32 %v5255_v2, %v5232_v1  ;;  %v7226_v1 = vld [vmem:[%s9723_s11 + $0x1] sm:$0x1] }
0x29ec   : > { %v5262_v59 = vpack.c.bf16 %v5256_v3, %v5256_v3 }
0x29ee   : > { %7210 = vmatmul.msk.bf16.vlgmr.msrb.gmra.mxu3 %vm1503_vm1, %v5262_v59 }
0x29fe   : > { %7269 = vmatmul.msk.bf16.vlgmr.msra.gmra.mxu3 %vm1503_vm1, %v9124_v40 }
0x2a0e   : > { %7270 = vmatmul.msk.bf16.gmra.mxu3 %vm1503_vm1, %v9135_v50 }
0x2a71   : > { %v5289_v63 = vpop.f32.mrf.mxu3 }
0x2a72   : > { %v5290_v5 = vadd.f32 %v7201_v4, %v5289_v63  ;;  %v7583_v4 = vld [vmem:[%s9716_s5 + $0x58] sm:$0xff]  ;;  %v7582_v63 = vld [vmem:[%s9716_s5 + $0x50] sm:$0xff] }
0x2a74   : > { %v5298_v55 = vpack.c.bf16 %v5290_v5, %v5290_v5  ;;  %v5644_v5 = vadd.f32 %v9346_v24, %v9356_v33 }
0x2a76   : > { %7224 = vmatmul.msk.bf16.vlgmr.msra.gmra.mxu0 %vm1503_vm1, %v5298_v55  ;;  %v5685_v55 = vpack.c.bf16 %v5644_v5, %v5644_v5 }
0x2a77   : > { %5560 = vmatpush.bf16.msra.mxu0 %v7583_v4 }
0x2a79   : > { %v5291_v7 = vpop.f32.mrf.mxu3 }
0x2a7b   : > { %5561 = vmatpush.bf16.msra.mxu0 %v7582_v63 }
0x2a81   : > { %v5465_v8 = vpop.f32.mrf.mxu3 }
0x2a82   : > { %v5466_v21 = vadd.f32 %v7770_v16, %v5465_v8 }
0x2a89   : > { %v5467_v11 = vpop.f32.mrf.mxu3 }
0x2a8a   : > { %v5468_v37 = vadd.f32 %v7770_v16, %v5467_v11  ;;  %v5690_v11 = vand.u32 %v5685_v55, %v8574_v57 }
0x2a8c   : > { %v5511_v22 = vpack.c.bf16 %v5468_v37, %v5466_v21 }
0x2a91   : > { %v5470_v17 = vpop.f32.mrf.mxu3 }
0x2a92   : > { %v5471_v19 = vadd.f32 %v7770_v16, %v5470_v17 }
0x2a94   : > { %v5512_v26 = vpack.c.bf16 %v5471_v19, %v5471_v19 }
0x2a96   : > { %v5517_v12 = vand.u32 %v5512_v26, %v8574_v57 }
0x2a98   : > { %5525 = vmatpush.bf16.msra.mxu1 %v5517_v12 }
0x2a99   : > { %v5472_v34 = vpop.f32.mrf.mxu3 }
0x2a9a   : > { %v7584_v34 = vld [vmem:[%s9709_s1 + $0x50] sm:$0xff] }
0x2a9c   : > { %5526 = vmatpush.bf16.msra.mxu1 %v5511_v22 }
0x2af3   : > { %v5325_v51 = vpop.f32.mrf.mxu0 }
0x2af4   : > { %v5326_v45 = vadd.f32 %v7215_v48, %v5325_v51 }
0x2af6   : > { %v5329_v53 = vadd.f32 %v5326_v45, %v5256_v3 }
0x2af8   : > { %v5334_v28 = vsel %vm1510_vm2, %v5329_v53, 0.0 }
0x2af9   : > { %5335 = vadd.xlane.f32.xlu2 %v5334_v28  ;;  %v7588_v28 = vld [vmem:[%s9716_s5 + $0x60] sm:$0xff] }
0x2afb   : > { %v5327_v35 = vpop.f32.mrf.mxu0 }
0x2b6c   : > { %v5336_v52 = vpop.xlane.xlu2 %5335 }
0x2b6d   : > { %v5337_v38 = vmul.f32 %v5336_v52, %v8506_v27 }
0x2b6f   : > { %v5338_v47 = vsub.f32 %v5329_v53, %v5337_v38  ;;  %v7589_v53 = vld [vmem:[%s9716_s5 + $0x68] sm:$0xff] }
0x2b71   : > { %v5339_v32 = vmul.f32 %v5338_v47, %v5338_v47 }
0x2b73   : > { %v5340_v56 = vsel %vm1510_vm2, %v5339_v32, 0.0  ;;  %v7771_v32 = vld [vmem:[%s9717_s7 + $0x5] ss:$0 sm:$0xff]  ;;  %s8032_s7 = sshra.s32 %s6334_s2, 4  ;;  %s8033_s7 = int_to_ptr.hbm [resolvable:$true] %s8032_s7 }
0x2b74   : > { %5341 = vadd.xlane.f32.xlu0 %v5340_v56  ;;  %p8039_p8 = scmp.lt.s32.totalorder %s8033_s7, %s8379_s12 }
0x2be7   : > { %v5342_v43 = vpop.xlane.xlu0 %5341 }
0x2be8   : > { %v5343_v60 = vmul.f32 %v5342_v43, %v8506_v27 }
0x2bea   : > { %v5344_v58 = vadd.f32 1e-05, %v5343_v60 }
0x2bec   : > { %7936 = vrsqrt.f32 %v5344_v58  ;;  %vm5351_vm5 = vweird.f32 %v5344_v58 }
0x2bf2   : > { %v7937_v15 = vpop.eup %7936 }
0x2bf3   : > { %v5346_v61 = vmul.f32 %v7937_v15, %v5344_v58  ;;  %vm5352_vm4 = vweird.f32 %v7937_v15 }
0x2bf4   : > { %vm5353_vm6 = vmor %vm5351_vm5, %vm5352_vm4 }
0x2bf5   : > { %v5347_v62 = vmul.f32 %v7937_v15, %v5346_v61 }
0x2bf7   : > { %v5348_v13 = vmul.f32 0.5, %v5347_v62 }
0x2bf9   : > { %v5349_v0 = vsub.f32 1.5, %v5348_v13 }
0x2bfb   : > { %v5350_v14 = vmul.f32 %v7937_v15, %v5349_v0  ;;  %v7278_v0 = vld [vmem:[%s9724_s13 + $0x5] sm:$0x1] }
0x2bfd   : > { %v5354_v18 = vsel %vm5353_vm6, %v7937_v15, %v5350_v14 }
0x2bfe   : > { %v5355_v54 = vmul.f32 %v5354_v18, %v5338_v47 }
0x2c00   : > { %v5356_v2 = vmul.f32 %v7225_v41, %v5355_v54 }
0x2c02   : > { %v9411_v3 = vadd.f32 %v7226_v1, %v5356_v2 }
0x2c04   : > { %v9415_v59 = vpack.c.bf16 %v9411_v3, %v9411_v3 }
0x2c06   : > { %7240 = vmatmul.msk.bf16.vlgmr.msrb.gmra.mxu1 %vm1503_vm1, %v9415_v59 }
0x2c83   : > { %v5390_v39 = vpop.f32.mrf.mxu1 }
0x2c84   : > { %v5391_v7 = vadd.f32 %v7231_v6, %v5390_v39 }
0x2c86   : > { %v5474_v8 = vpack.c.bf16 %v5391_v7, %v5391_v7 }
0x2c88   : > { %7271 = vmatmul.msk.bf16.vlgmr.msrb.gmra.mxu0 %vm1716_vm14, %v5474_v8  ;;  %v7273_v8 = vld [vmem:[%s9726_s14 + $0x10] sm:$0xf] }
0x2c89   : > { %5698 = vmatpush.bf16.msrb.mxu0 %v5690_v11  ;;  %v5731_v11 = vsel %vm2047_vm3, %v7273_v8, 0  ;;  %v7595_v8 = vld [vmem:[%s9716_s5 + $0x78] sm:$0xff] }
0x2c8b   : > { %v5392_v16 = vpop.f32.mrf.mxu1 }
0x2c8d   : > { %5699 = vmatpush.bf16.msrb.mxu0 %v5684_v25  ;;  %v7585_v25 = vld [vmem:[%s9709_s1 + $0x58] sm:$0xff]  ;;  %s6331_s1 = sshll.u32 %s9120_s26, 4  ;;  %s6332_s1 = int_to_ptr.vmem [resolvable:$true] %s6331_s1 }
0x2c8e   : > { %5595 = vmatpush.bf16.msrb.mxu1 %v7585_v25 }
0x2c92   : > { %5596 = vmatpush.bf16.msrb.mxu1 %v7584_v34 }
0x2c98   : > { %7287 = vmatmul.msk.bf16.vlgmr.msra.gmra.mxu0 %vm1503_vm1, %v9415_v59 }
0x2c99   : > { %5740 = vmatpush.bf16.msra.mxu0 %v5731_v11  ;;  %v7594_v11 = vld [vmem:[%s9716_s5 + $0x70] sm:$0xff] }
0x2d05   : > { %v5495_v24 = vpop.f32.mrf.mxu0 }
0x2d06   : > { %v5499_v33 = vsel %vm1754_vm0, %v5495_v24, -inf }
0x2d07   : > { %5500 = vmax.xlane.f32.xlu1 %v5499_v33 }
0x2d0d   : > { %v5497_v17 = vpop.f32.mrf.mxu0 }
0x2d15   : > { %v5563_v19 = vpop.f32.mrf.mxu0 }
0x2d16   : > { %v5564_v41 = vadd.f32 %v7278_v0, %v5563_v19 }
0x2d18   : > { %v5647_v54 = vpack.c.bf16 %v5564_v41, %v5564_v41 }
0x2d1d   : > { %v5565_v26 = vpop.f32.mrf.mxu0 }
0x2d7a   : > { %v5501_v37 = vpop.xlane.xlu1 %5500 }
0x2d7b   : > { %v5502_v12 = vsub.f32 %v5495_v24, %v5501_v37  ;;  %v5815_v24 = vadd.f32 %v9359_v9, %v9369_v23  ;;  %v7327_v23 = vld [vmem:[%s9724_s13 + $0x6] sm:$0x1] }
0x2d7d   : > { %v5503_v21 = vmul.f32 1.442695, %v5502_v12  ;;  %v5860_v17 = vpack.c.bf16 %v5815_v24, %v5815_v24  ;;  %v5865_v12 = vsel %vm1716_vm14, %v5859_v36, 0  ;;  %v6058_v36 = vsel %vm1716_vm14, %v6052_v10, 0 }
0x2d7f   : > { %7938 = vpow2.f32 %v5503_v21  ;;  %v5868_v37 = vsel %vm1716_vm14, %v5860_v17, 0  ;;  %v7369_v21 = vld [vmem:[%s9726_s14 + $0x18] sm:$0xf] }
0x2d80   : > { %v5923_v9 = vsel %vm2047_vm3, %v7369_v21, 0 }
0x2d85   : > { %v7939_v30 = vpop.eup %7938 }
0x2d86   : > { %v5505_v29 = vsel %vm1754_vm0, %v7939_v30, 0.0 }
0x2d87   : > { %5506 = vadd.xlane.f32.xlu2 %v5505_v29  ;;  %v6008_v29 = vadd.f32 %v9372_v42, %v9383_v31  ;;  %v7593_v42 = vld [vmem:[%s9713_s4 + $0x68] sm:$0xff]  ;;  %v7592_v31 = vld [vmem:[%s9713_s4 + $0x60] sm:$0xff] }
0x2d89   : > { %v6053_v34 = vpack.c.bf16 %v6008_v29, %v6008_v29 }
0x2d8b   : > { %v6061_v44 = vsel %vm1716_vm14, %v6053_v34, 0 }
0x2dfa   : > { %v5507_v22 = vpop.xlane.xlu2 %5506 }
0x2dfb   : > { %7940 = vrcp.f32 %v5507_v22  ;;  %v7320_v22 = vld [vmem:[%s9726_s14 + $0x14] sm:$0xf] }
0x2e01   : > { %v7941_v48 = vpop.eup %7940 }
0x2e02   : > { %v5509_v51 = vmul.f32 %v7941_v48, %v7939_v30  ;;  %v5712_v48 = vsel %vm2047_vm3, %v7320_v22, 0 }
0x2e04   : > { %v5510_v45 = vpack.c.bf16 %v5509_v51, %v5509_v51 }
0x2e06   : > { %7272 = vmatmul.msk.bf16.vlgmr.msra.gmra.mxu1 %vm1747_vm15, %v5510_v45 }
0x2e07   : > { %5771 = vmatpush.bf16.msra.mxu1 %v7589_v53 }
0x2e0b   : > { %5772 = vmatpush.bf16.msra.mxu1 %v7588_v28  ;;  %v7599_v28 = vld [vmem:[%s9713_s4 + $0x78] sm:$0xff]  ;;  %s9740_s4 = sand.u32 1, %s8080_s23  }
0x2e0c   : > { %s6318_s5 = scalar_lea.sflag [#allocation4], %s9740_s4 }
0x2e16   : > { %7301 = vmatmul.msk.bf16.vlgmr.msrb.gmra.mxu1 %vm1503_vm1, %v9124_v40 }
0x2e26   : > { %7302 = vmatmul.msk.bf16.gmra.mxu1 %vm1503_vm1, %v9135_v50 }
0x2e36   : > { %7336 = vmatmul.msk.bf16.vlgmr.msra.gmra.mxu1 %vm1503_vm1, %v9415_v59 }
0x2e83   : > { %v5528_v35 = vpop.f32.mrf.mxu1 }
0x2e84   : > { %v5532_v30 = vpack.c.bf16 %v5528_v35, %v5528_v35 }
0x2e8b   : > { %v5530_v52 = vpop.f32.mrf.mxu1 }
0x2e93   : > { %v5598_v38 = vpop.f32.mrf.mxu1 }
0x2e94   : > { %v5599_v61 = vadd.f32 %v7771_v32, %v5598_v38 }
0x2e9b   : > { %v5600_v47 = vpop.f32.mrf.mxu1 }
0x2e9c   : > { %v5601_v58 = vadd.f32 %v7771_v32, %v5600_v47 }
0x2e9e   : > { %v5648_v13 = vpack.c.bf16 %v5601_v58, %v5599_v61 }
0x2ea0   : > { %v5654_v14 = vsel %vm1716_vm14, %v5648_v13, 0  ;;  %v7772_v13 = vld [vmem:[%s9720_s9 + $0x6] ss:$0 sm:$0xff] }
0x2ea3   : > { %v5603_v56 = vpop.f32.mrf.mxu1 }
0x2ea4   : > { %v5604_v43 = vadd.f32 %v7771_v32, %v5603_v56 }
0x2ea6   : > { %v5649_v60 = vpack.c.bf16 %v5604_v43, %v5604_v43 }
0x2ea8   : > { %v5657_v15 = vsel %vm1716_vm14, %v5649_v60, 0 }
0x2ea9   : > { %5665 = vmatpush.bf16.xpose.msrb.mxu3 %v5657_v15 }
0x2eab   : > { %v5605_v62 = vpop.f32.mrf.mxu1 }
0x2eb1   : > { %5666 = vmatpush.bf16.xpose.msrb.mxu3 %v5654_v14 }
0x2eb3   : > { %v5774_v18 = vpop.f32.mrf.mxu1 }
0x2eb4   : > { %v5775_v25 = vadd.f32 %v7327_v23, %v5774_v18 }
0x2eb6   : > { %v5858_v46 = vpack.c.bf16 %v5775_v25, %v5775_v25 }
0x2eb8   : > { %7318 = vmatmul.msk.bf16.vlgmr.msrb.gmra.mxu3 %vm1716_vm14, %v5647_v54 }
0x2eb9   : > { %5721 = vmatpush.bf16.msra.mxu3 %v5712_v48 }
0x2ebb   : > { %v5776_v1 = vpop.f32.mrf.mxu1 }
0x2ebd   : > { %5846 = vmatpush.bf16.msrb.mxu3 %v7593_v42 }
0x2ec1   : > { %5847 = vmatpush.bf16.msrb.mxu3 %v7592_v31 }
0x2f3b   : > { %v5668_v2 = vpop.f32.mrf.mxu3 }
0x2f3c   : > { %v5672_v4 = vsel %vm1754_vm0, %v5668_v2, -inf }
0x2f3d   : > { %5673 = vmax.xlane.f32.xlu0 %v5672_v4  ;;  %v7773_v4 = vld [vmem:[%s9720_s9 + $0x7] ss:$0 sm:$0xff] }
0x2f43   : > { %v5670_v63 = vpop.f32.mrf.mxu3 }
0x2fb0   : > { %v5674_v5 = vpop.xlane.xlu0 %5673 }
0x2fb1   : > { %v5675_v6 = vsub.f32 %v5668_v2, %v5674_v5 }
0x2fb3   : > { %v5676_v55 = vmul.f32 1.442695, %v5675_v6 }
0x2fb5   : > { %7942 = vpow2.f32 %v5676_v55 }
0x2fbb   : > { %v7943_v39 = vpop.eup %7942 }
0x2fbc   : > { %v5678_v7 = vsel %vm1754_vm0, %v7943_v39, 0.0 }
0x2fbd   : > { %5679 = vadd.xlane.f32.xlu1 %v5678_v7 }
0x3030   : > { %v5680_v16 = vpop.xlane.xlu1 %5679 }
0x3031   : > { %7944 = vrcp.f32 %v5680_v16 }
0x3037   : > { %v7945_v33 = vpop.eup %7944 }
0x3038   : > { %v5682_v19 = vmul.f32 %v7945_v33, %v7943_v39 }
0x303a   : > { %v5683_v26 = vpack.c.bf16 %v5682_v19, %v5682_v19 }
0x303c   : > { %7319 = vmatmul.msk.bf16.vlgmr.msrb.gmra.mxu0 %vm1747_vm15, %v5683_v26 }
0x303d   : > { %5876 = vmatpush.bf16.xpose.msrb.mxu0 %v5868_v37 }
0x3045   : > { %5877 = vmatpush.bf16.xpose.msrb.mxu0 %v5865_v12 }
0x304c   : > { %7322 = vmatmul.msk.bf16.vlgmr.msra.gmra.mxu0 %vm1716_vm14, %v5532_v30 }
0x304d   : > { %5932 = vmatpush.bf16.msra.mxu0 %v5923_v9  ;;  %v7375_v9 = vld [vmem:[%s9724_s13 + $0x7] sm:$0x1] }
0x305c   : > { %7367 = vmatmul.msk.bf16.vlgmr.msrb.gmra.mxu0 %vm1716_vm14, %v5858_v46 }
0x305d   : > { %6069 = vmatpush.bf16.xpose.msrb.mxu0 %v6061_v44 }
0x3065   : > { %6070 = vmatpush.bf16.xpose.msrb.mxu0 %v6058_v36 }
0x30b9   : > { %v5701_v51 = vpop.f32.mrf.mxu0 }
0x30ba   : > { %v5705_v45 = vpack.c.bf16 %v5701_v51, %v5701_v51 }
0x30bc   : > { %7321 = vmatmul.msk.bf16.vlgmr.msra.gmra.mxu3 %vm1716_vm14, %v5705_v45 }
0x30bd   : > { %6039 = vmatpush.bf16.msra.mxu3 %v7599_v28 }
0x30c1   : > { %v5703_v53 = vpop.f32.mrf.mxu0  ;;  %6040 = vmatpush.bf16.msra.mxu3 %v7598_v49 }
0x30c9   : > { %v9480_v20 = vpop.f32.mrf.mxu0 }
0x30cc   : > { %7365 = vmatmul.msk.bf16.vlgmr.msrb.gmra.mxu3 %vm1503_vm1, %v9124_v40 }
0x30d1   : > { %v5744_v10 = vpop.f32.mrf.mxu0 }
0x30d9   : > { %v5879_v35 = vpop.f32.mrf.mxu0 }
0x30da   : > { %v5883_v52 = vsel %vm1754_vm0, %v5879_v35, -inf }
0x30db   : > { %5884 = vmax.xlane.f32.xlu2 %v5883_v52 }
0x30dc   : > { %7366 = vmatmul.msk.bf16.gmra.mxu3 %vm1503_vm1, %v9135_v50 }
0x30e1   : > { %v5881_v38 = vpop.f32.mrf.mxu0 }
0x30ec   : > { %7413 = vmatmul.msk.bf16.vlgmr.msra.gmra.mxu3 %vm1503_vm1, %v9124_v40 }
0x30fc   : > { %7414 = vmatmul.msk.bf16.gmra.mxu3 %vm1503_vm1, %v9135_v50 }
0x313f   : > { %v5723_v47 = vpop.f32.mrf.mxu3 }
0x3147   : > { %v5725_v32 = vpop.f32.mrf.mxu3 }
0x314e   : > { %v5885_v56 = vpop.xlane.xlu2 %5884 }
0x314f   : > { %v5886_v43 = vsub.f32 %v5879_v35, %v5885_v56  ;;  %v5849_v60 = vpop.f32.mrf.mxu3  ;;  %v7417_v35 = vld [vmem:[%s9726_s14 + $0x1c] sm:$0xf] }
0x3150   : > { %v5850_v18 = vadd.f32 %v7772_v13, %v5849_v60  ;;  %v6116_v52 = vsel %vm2047_vm3, %v7417_v35, 0 }
0x3151   : > { %v5887_v58 = vmul.f32 1.442695, %v5886_v43  ;;  %v7419_v43 = vld [vmem:[%s9728_s16 + $0x1] sm:$0x1] }
0x3153   : > { %7946 = vpow2.f32 %v5887_v58 }
0x3157   : > { %v5851_v15 = vpop.f32.mrf.mxu3 }
0x3158   : > { %v5852_v41 = vadd.f32 %v7772_v13, %v5851_v15 }
0x3159   : > { %v7947_v61 = vpop.eup %7946 }
0x315a   : > { %v5889_v62 = vsel %vm1754_vm0, %v7947_v61, 0.0  ;;  %v5895_v1 = vpack.c.bf16 %v5852_v41, %v5850_v18  ;;  %v7600_v18 = vld [vmem:[%s9729_s17 + $0x10] sm:$0xff] }
0x315b   : > { %5890 = vadd.xlane.f32.xlu0 %v5889_v62 }
0x315f   : > { %v5854_v0 = vpop.f32.mrf.mxu3 }
0x3160   : > { %v5855_v14 = vadd.f32 %v7772_v13, %v5854_v0 }
0x3162   : > { %v5896_v40 = vpack.c.bf16 %v5855_v14, %v5855_v14 }
0x3164   : > { %v5901_v50 = vand.u32 %v5896_v40, %v8574_v57 }
0x3166   : > { %5909 = vmatpush.bf16.msrb.mxu1 %v5901_v50  ;;  %v7601_v50 = vld [vmem:[%s9729_s17 + $0x18] sm:$0xff] }
0x3167   : > { %v5856_v54 = vpop.f32.mrf.mxu3 }
0x3168   : > { %v7605_v54 = vld [vmem:[%s9730_s18 + $0x38] sm:$0xff] }
0x3169   : > { %6244 = vmatpush.bf16.msrb.mxu2 %v7605_v54 }
0x316a   : > { %5910 = vmatpush.bf16.msrb.mxu1 %v5895_v1 }
0x316e   : > { %5964 = vmatpush.bf16.msra.mxu1 %v7595_v8  ;;  %v7420_v8 = vld [vmem:[%s9732_s19 + $0x1] sm:$0x1] }
0x316f   : > { %v6042_v2 = vpop.f32.mrf.mxu3 }
0x3170   : > { %v6043_v5 = vadd.f32 %v7773_v4, %v6042_v2  ;;  %v7604_v2 = vld [vmem:[%s9730_s18 + $0x30] sm:$0xff] }
0x3171   : > { %6245 = vmatpush.bf16.msrb.mxu2 %v7604_v2 }
0x3172   : > { %5965 = vmatpush.bf16.msra.mxu1 %v7594_v11 }
0x3177   : > { %v6044_v63 = vpop.f32.mrf.mxu3 }
0x3178   : > { %v6045_v6 = vadd.f32 %v7773_v4, %v6044_v63 }
0x317a   : > { %v6088_v55 = vpack.c.bf16 %v6045_v6, %v6043_v5 }
0x317f   : > { %v6047_v39 = vpop.f32.mrf.mxu3 }
0x3180   : > { %v6048_v24 = vadd.f32 %v7773_v4, %v6047_v39 }
0x3182   : > { %v6089_v17 = vpack.c.bf16 %v6048_v24, %v6048_v24  ;;  %v7421_v24 = vld [vmem:[%s9733_s20 + $0x1] sm:$0x1] }
0x3184   : > { %v6094_v37 = vand.u32 %v6089_v17, %v8574_v57  ;;  %v5743_v57 = vadd.f32 %v9480_v20, %v5723_v47 }
0x3187   : > { %v6049_v7 = vpop.f32.mrf.mxu3 }
0x31ce   : > { %v5891_v16 = vpop.xlane.xlu0 %5890 }
0x31cf   : > { %7948 = vrcp.f32 %v5891_v16 }
0x31d5   : > { %v7949_v33 = vpop.eup %7948 }
0x31d6   : > { %v5893_v19 = vmul.f32 %v7949_v33, %v7947_v61 }
0x31d8   : > { %v5894_v26 = vpack.c.bf16 %v5893_v19, %v5893_v19 }
0x31da   : > { %7368 = vmatmul.msk.bf16.vlgmr.msrb.gmra.mxu1 %vm1747_vm15, %v5894_v26  ;;  %v7603_v26 = vld [vmem:[%s9730_s18 + $0x28] sm:$0xff] }
0x31db   : > { %6102 = vmatpush.bf16.msrb.mxu1 %v6094_v37  ;;  %6246 = vmatpush.bf16.msrb.mxu2 %v7603_v26  ;;  %v7602_v37 = vld [vmem:[%s9730_s18 + $0x20] sm:$0xff] }
0x31df   : > { %6103 = vmatpush.bf16.msrb.mxu1 %v6088_v55  ;;  %6247 = vmatpush.bf16.msrb.mxu2 %v7602_v37 }
0x31ea   : > { %7384 = vmatmul.msk.bf16.vlgmr.msra.gmra.mxu1 %vm1503_vm1, %v9415_v59 }
0x31eb   : > { %6193 = vmatpush.bf16.msra.mxu1 %v7601_v50 }
0x31ef   : > { %6194 = vmatpush.bf16.msra.mxu1 %v7600_v18 }
0x3257   : > { %v5912_v12 = vpop.f32.mrf.mxu1 }
0x3258   : > { %v5916_v21 = vpack.c.bf16 %v5912_v12, %v5912_v12  ;;  %v7426_v12 = vld [vmem:[%s9734_s21 + $0x1] sm:$0x1] }
0x325a   : > { %7370 = vmatmul.msk.bf16.vlgmr.msra.gmra.mxu0 %vm1716_vm14, %v5916_v21 }
0x325b   : > { %6125 = vmatpush.bf16.msra.mxu0 %v6116_v52 }
0x325f   : > { %v5914_v30 = vpop.f32.mrf.mxu1 }
0x3267   : > { %v5967_v23 = vpop.f32.mrf.mxu1 }
0x3268   : > { %v5968_v29 = vadd.f32 %v7375_v9, %v5967_v23 }
0x326a   : > { %v6051_v25 = vpack.c.bf16 %v5968_v29, %v5968_v29 }
0x326c   : > { %7415 = vmatmul.msk.bf16.vlgmr.msrb.gmra.mxu0 %vm1716_vm14, %v6051_v25  ;;  %v7444_v25 = vld [vmem:[%s9736_s24 + $0x1] sm:$0x1] }
0x326f   : > { %v5969_v34 = vpop.f32.mrf.mxu1 }
0x32d7   : > { %v5934_v46 = vpop.f32.mrf.mxu0 }
0x32d8   : > { %v5938_v44 = vadd.f32 %v5934_v46, %v5743_v57 }
0x32df   : > { %v5936_v36 = vpop.f32.mrf.mxu0 }
0x32e9   : > { %v6072_v22 = vpop.f32.mrf.mxu0 }
0x32ea   : > { %v6076_v59 = vsel %vm1754_vm0, %v6072_v22, -inf }
0x32eb   : > { %6077 = vmax.xlane.f32.xlu1 %v6076_v59 }
0x32f1   : > { %v6074_v48 = vpop.f32.mrf.mxu0 }
0x335e   : > { %v6078_v42 = vpop.xlane.xlu1 %6077 }
0x335f   : > { %v6079_v31 = vsub.f32 %v6072_v22, %v6078_v42 }
0x3361   : > { %v6080_v51 = vmul.f32 1.442695, %v6079_v31 }
0x3363   : > { %7950 = vpow2.f32 %v6080_v51  ;;  %v7607_v51 = vld [vmem:[%s8369_s27 + $0x8] sm:$0xff] }
0x3364   : > { %6309 = vmatpush.bf16.msrb.mxu3 %v7607_v51 }
0x3369   : > { %v7951_v45 = vpop.eup %7950 }
0x336a   : > { %v6082_v53 = vsel %vm1754_vm0, %v7951_v45, 0.0 }
0x336b   : > { %6083 = vadd.xlane.f32.xlu2 %v6082_v53 }
0x33de   : > { %v6084_v28 = vpop.xlane.xlu2 %6083 }
0x33df   : > { %7952 = vrcp.f32 %v6084_v28 }
0x33e5   : > { %v7953_v49 = vpop.eup %7952 }
0x33e6   : > { %v6086_v20 = vmul.f32 %v7953_v49, %v7951_v45  ;;  %v7606_v45 = vld [vmem:[%s8369_s27] sm:$0xff] }
0x33e7   : > { %6310 = vmatpush.bf16.msrb.mxu3 %v7606_v45 }
0x33e8   : > { %v6087_v10 = vpack.c.bf16 %v6086_v20, %v6086_v20 }
0x33ea   : > { %7416 = vmatmul.msk.bf16.vlgmr.msrb.gmra.mxu1 %vm1747_vm15, %v6087_v10 }
0x3467   : > { %v6105_v38 = vpop.f32.mrf.mxu1 }
0x3468   : > { %v6109_v47 = vpack.c.bf16 %v6105_v38, %v6105_v38 }
0x346a   : > { %7418 = vmatmul.msk.bf16.vlgmr.msra.gmra.mxu0 %vm1716_vm14, %v6109_v47 }
0x346f   : > { %v6107_v32 = vpop.f32.mrf.mxu1 }
0x3470   : > { %v7462_v32 = vld [vmem:[%s9738_s3 + $0x1] sm:$0x1]  ;;  %s8034_s3 = scalar_lea.hbm %s8033_s7, 1 }
0x3471   : > { %p8035_p9 = scmp.ne.s32.totalorder %s8033_s7, %s8034_s3  ;;  %p8040_p11 = scmp.lt.s32.totalorder %s8038_s8, %s8034_s3 }
0x3473   : > { %p8036_p10 = pnand %p8035_p9, %p8424_p5  ;;  %p8041_p13 = por %p8040_p11, %p8039_p8 }
0x3475   : > { %p8037_p0 = pneg %p8036_p10 }
0x3477   : > { %p8042_p1 = pnand %p8041_p13, %p8037_p0 }
0x34e7   : > { %v6127_v56 = vpop.f32.mrf.mxu0 }
0x34e8   : > { %v6131_v60 = vadd.f32 %v6127_v56, %v5938_v44 }
0x34ea   : > { %v6134_v58 = vadd.f32 %v7419_v43, %v6131_v60 }
0x34ec   : > { %v6135_v15 = vadd.f32 %v6134_v58, %v9411_v3 }
0x34ee   : > { %v6140_v61 = vsel %vm1510_vm2, %v6135_v15, 0.0 }
0x34ef   : > { %6141 = vadd.xlane.f32.xlu0 %v6140_v61  ;;  %v6129_v62 = vpop.f32.mrf.mxu0 }
0x3562   : > { %v6142_v13 = vpop.xlane.xlu0 %6141 }
0x3563   : > { %v6143_v0 = vmul.f32 %v6142_v13, %v8506_v27 }
0x3565   : > { %v6144_v14 = vsub.f32 %v6135_v15, %v6143_v0 }
0x3567   : > { %v6145_v40 = vmul.f32 %v6144_v14, %v6144_v14 }
0x3569   : > { %v6146_v41 = vsel %vm1510_vm2, %v6145_v40, 0.0 }
0x356a   : > { %6147 = vadd.xlane.f32.xlu1 %v6146_v41 }
0x35dd   : > { %v6148_v1 = vpop.xlane.xlu1 %6147 }
0x35de   : > { %v6149_v3 = vmul.f32 %v6148_v1, %v8506_v27 }
0x35e0   : > { %v6150_v4 = vadd.f32 1e-05, %v6149_v3 }
0x35e2   : > { %7954 = vrsqrt.f32 %v6150_v4  ;;  %vm6157_vm15 = vweird.f32 %v6150_v4 }
0x35e8   : > { %v7955_v63 = vpop.eup %7954 }
0x35e9   : > { %v6152_v5 = vmul.f32 %v7955_v63, %v6150_v4  ;;  %vm6158_vm14 = vweird.f32 %v7955_v63 }
0x35ea   : > { %vm6159_vm0 = vmor %vm6157_vm15, %vm6158_vm14 }
0x35eb   : > { %v6153_v6 = vmul.f32 %v7955_v63, %v6152_v5 }
0x35ed   : > { %v6154_v55 = vmul.f32 0.5, %v6153_v6 }
0x35ef   : > { %v6155_v39 = vsub.f32 1.5, %v6154_v55 }
0x35f1   : > { %v6156_v7 = vmul.f32 %v7955_v63, %v6155_v39 }
0x35f3   : > { %v6160_v11 = vsel %vm6159_vm0, %v7955_v63, %v6156_v7 }
0x35f4   : > { %v6161_v16 = vmul.f32 %v6160_v11, %v6144_v14 }
0x35f6   : > { %v6162_v33 = vmul.f32 %v7420_v8, %v6161_v16 }
0x35f8   : > { %v6163_v17 = vadd.f32 %v7421_v24, %v6162_v33 }
0x35fa   : > { %v6169_v19 = vpack.c.bf16 %v6163_v17, %v6163_v17 }
0x35fc   : > { %7435 = vmatmul.msk.bf16.vlgmr.msra.gmra.mxu1 %vm1503_vm1, %v6169_v19 }
0x3679   : > { %v6196_v21 = vpop.f32.mrf.mxu1 }
0x367a   : > { %v6197_v30 = vadd.f32 %v7426_v12, %v6196_v21 }
0x367c   : > { %v6200_v9 = vmax.f32 %v6197_v30, 0.0 }
0x367e   : > { %v6210_v23 = vpack.c.bf16 %v6200_v9, %v6200_v9 }
0x3680   : > { %7461 = vmatmul.msk.bf16.vlgmr.msrb.gmra.mxu2 %vm2797_vm13, %v6210_v23 }
0x3681   : > { %v6198_v29 = vpop.f32.mrf.mxu1 }
0x3703   : > { %v6249_v34 = vpop.f32.mrf.mxu2 }
0x3704   : > { %v6250_v57 = vadd.f32 %v7444_v25, %v6249_v34 }
0x3706   : > { %v6253_v46 = vadd.f32 %v6250_v57, %v6163_v17 }
0x3708   : > { %v6258_v44 = vsel %vm1510_vm2, %v6253_v46, 0.0 }
0x3709   : > { %6259 = vadd.xlane.f32.xlu2 %v6258_v44 }
0x370b   : > { %v6251_v36 = vpop.f32.mrf.mxu2 }
0x377c   : > { %v6260_v22 = vpop.xlane.xlu2 %6259 }
0x377d   : > { %v6261_v59 = vmul.f32 %v6260_v22, %v8506_v27 }
0x377f   : > { %v6262_v48 = vsub.f32 %v6253_v46, %v6261_v59 }
0x3781   : > { %v6263_v42 = vmul.f32 %v6262_v48, %v6262_v48 }
0x3783   : > { %v6264_v31 = vsel %vm1510_vm2, %v6263_v42, 0.0 }
0x3784   : > { %6265 = vadd.xlane.f32.xlu0 %v6264_v31 }
0x37f7   : > { %v6266_v53 = vpop.xlane.xlu0 %6265 }
0x37f8   : > { %v6267_v28 = vmul.f32 %v6266_v53, %v8506_v27  ;;  %v7463_v27 = vld [vmem:[%s9739_s25 + $0x1] sm:$0x1] }
0x37fa   : > { %v6268_v49 = vadd.f32 1e-05, %v6267_v28 }
0x37fc   : > { %7956 = vrsqrt.f32 %v6268_v49  ;;  %vm6275_vm3 = vweird.f32 %v6268_v49 }
0x3802   : > { %v7957_v20 = vpop.eup %7956 }
0x3803   : > { %v6270_v10 = vmul.f32 %v7957_v20, %v6268_v49  ;;  %vm6276_vm2 = vweird.f32 %v7957_v20 }
0x3804   : > { %vm6277_vm13 = vmor %vm6275_vm3, %vm6276_vm2 }
0x3805   : > { %v6271_v35 = vmul.f32 %v7957_v20, %v6270_v10 }
0x3807   : > { %v6272_v52 = vmul.f32 0.5, %v6271_v35 }
0x3809   : > { %v6273_v38 = vsub.f32 1.5, %v6272_v52 }
0x380b   : > { %v6274_v47 = vmul.f32 %v7957_v20, %v6273_v38 }
0x380d   : > { %v6278_v56 = vsel %vm6277_vm13, %v7957_v20, %v6274_v47 }
0x380e   : > { %v6279_v43 = vmul.f32 %v6278_v56, %v6262_v48 }
0x3810   : > { %v6280_v60 = vmul.f32 %v7462_v32, %v6279_v43 }
0x3812   : > { %v6281_v58 = vadd.f32 %v7463_v27, %v6280_v60 }
0x3814   : > { %v6286_v15 = vpack.c.bf16 %v6281_v58, %v6281_v58 }
0x3816   : > { %7472 = vmatmul.msk.bf16.vlgmr.msrb.gmra.mxu3 %vm1503_vm1, %v6286_v15 }
0x3817   : > { %8045 = shalt.err (!%p8042_p1)
}
0x3818   : > { %s9741_s0 = sld [smem:[#allocation54_spill]]  ;;  %v6287_v61 = vld [vmem:[#allocation5] sm:$0x1] }
0x3819   : > { %7617 = dma.vmem_to_hbm [thread:$0]  (%p8424_p5), %s6332_s1, 16, %s6334_s2, %s6318_s5  }
0x381e   : > { %s1442_s4 = scalar_lea.vmem %s9741_s0, %s8484_s6 }
0x3899   : > { %v6312_v62 = vpop.f32.mrf.mxu3 }
0x389a   : > { %v6313_v13 = vadd.f32 %v6312_v62, %v6287_v61 }
0x389c   : > { %6316 = vst [vmem:[%s1442_s4] sm:$0x1] %v6313_v13 }
0x38a1   : > { %v6314_v0 = vpop.f32.mrf.mxu3 }
0x38a2 PF: > { %s9742_s26 = sld [smem:[#allocation57_spill]] }
0x38a3   : > { %s9743_s28 = sld [smem:[#allocation55_spill]] }
0x38a8   : > { %p7634_p2 = scmp.ge.s32.totalorder %s9742_s26, 2 }
0x38a9   : > { %s6348_s3 = sand.u32 1, %s9743_s28  }
0x38aa   : > { %p7627_p3 = pnand %p7634_p2, %p8428_p6  ;;  %s6349_s8 = scalar_lea.sflag [#allocation4], %s6348_s3 }
0x38ac   : > { %p7628_p4 = pneg %p7627_p3 }
0x38ae   : > { %8071 = dma.done.wait (%p7628_p4), %s6349_s8, 16  }
0x38af   : > { %8073 = vsyncadd (%p7628_p4), %s6349_s8, 4294967280  ;;  %s9745_s28 = sld [smem:[#allocation58_spill]] }
0x38b0   : > { %s9746_s5 = sld [smem:[#allocation56_spill]] }
0x38b1   : > { %s9747_s26 = sld [smem:[#allocation59_spill]] }
0x38b2   : > { %9748 = sst [smem:[#allocation55_spill]] %s8080_s23 }
0x38b5   : > { %p108_p5 = scmp.ge.s32.totalorder %s9745_s28, 4  }
0x38b6   : > { %s9749_s23 = smov %s9746_s5 }
0x38b7   :  { %110 = sbr.rel (!%p108_p5) target bundleno = 113 (0x71), region = 429 }
0x38bc   :  { %6360 = vsyncpa [#allocation3], 1 }
0x38bd   :  { %6362 = vsyncpa [#allocation3 + $0x1], 1 }
0x38be   :  { %6363 = vsyncpa [#allocation6], 1 }
0x38bf   :  { %6364 = vsyncpa [#allocation4], 1 }
0x38c0   :  { %6366 = vsyncpa [#allocation4 + $0x1], 1 }

</bundles_post_ra>
